<compile_context>
chip_gen: v7x
topology: tpu7x:2x2x1
jax: 0.10.0
libtpu: 0.0.40
codegen_flags: <defaults>
</compile_context>

<pallas_src>
import jax
import jax.numpy as jnp
from jax.experimental import pallas as pl
from jax.experimental.pallas import tpu as pltpu

K_NEIGHBORS = 9  # kernel_size of DyGraphConv2d / DenseDilatedKnnGraph (includes self)


def _grapher_kernel(x_ref, w1_ref, b1_ref, wed_ref, be_ref, w2_ref, b2_ref,
                    o_ref, sel_ref):
    # x_ref/o_ref: (1, C, N) f32, N on lanes.  sel_ref: (N, (K-1)*N) bf16 scratch.
    x = x_ref[0]                                   # (C, N) original input (residual)
    c, n = x.shape
    c2 = 2 * c
    km1 = K_NEIGHBORS - 1
    f32 = jnp.float32

    # --- fc1: 1x1 conv + BatchNorm (folded, eval mode); kept f32 (feeds the kNN) ---
    x1 = jnp.dot(w1_ref[...], x, preferred_element_type=f32) + b1_ref[...]   # (C, N)

    # --- F.normalize(x1, p=2, dim=channel); rsqrt -> EUP slot ---
    sq = jnp.sum(x1 * x1, axis=0, keepdims=True)                 # (1, N)
    xn = x1 * jax.lax.rsqrt(jnp.maximum(sq, 1e-24))              # (C, N)

    # --- pairwise squared distance: neighbours j on ROWS, queries i on COLUMNS ---
    gram = jnp.dot(xn.T, xn, preferred_element_type=f32)         # (N, N) = xn^T xn
    row = jax.lax.broadcasted_iota(jnp.int32, (n, n), 0)
    col = jax.lax.broadcasted_iota(jnp.int32, (n, n), 1)
    eye = row == col
    xsq = jnp.sum(xn * xn, axis=0, keepdims=True)                # (1, N)  |xn_i|^2
    # |xn_j|^2 as a column = diag(gram); avoids a lane->sublane relayout of xsq.
    xsq_col = jnp.sum(jnp.where(eye, gram, 0.0), axis=1, keepdims=True)   # (N, 1)
    dist = xsq_col - 2.0 * gram + xsq                            # (N, N)  dist[j, i]

    # --- EdgeConv 1x1 conv, fused weight: rows [0:2C]=(Wa-Wb), rows [2C:4C]=Wb ---
    ab = jnp.dot(wed_ref[...], x1.astype(jnp.bfloat16),
                 preferred_element_type=f32)                     # (4C, N)
    a = ab[:c2] + be_ref[...]                                    # (2C, N)  (Wa-Wb)x_i + b
    bm_bf = ab[c2:].astype(jnp.bfloat16)                         # (2C, N)  Wb x_j

    # --- kNN: single sortable key per entry = (distance bits | neighbour row idx) ---
    # dist+1.0 keeps the bit pattern in the normal-float range; stealing the low
    # log2(N) mantissa bits for the index gives exact one-hot selectors and
    # first-index tie-breaking (ordering resolution ~2^-(23-log2(N)), fp-level).
    nbits = max(1, (n - 1).bit_length())
    himask = jnp.int32(-(1 << nbits))
    dbits = pltpu.bitcast(jnp.maximum(dist, 0.0) + 1.0, jnp.int32)
    keyi = (dbits & himask) | row
    key = jnp.where(eye, jnp.inf, pltpu.bitcast(keyi, f32))      # self excluded here

    # K-1 picks (self handled exactly via the max_nbr init below); one reduction
    # per pick; selectors staged into the VMEM scratch for a single stacked gather.
    for k in range(km1):
        mn = jnp.min(key, axis=0, keepdims=True)                 # (1, N)
        sel = key == mn                                          # exactly one-hot / column
        sel_ref[:, k * n:(k + 1) * n] = jnp.where(sel, 1.0, 0.0).astype(jnp.bfloat16)
        key = jnp.where(sel, jnp.inf, key)

    # --- ONE stacked MXU gather, then running max over the k axis ---
    gathered = jnp.dot(bm_bf, sel_ref[...],
                       preferred_element_type=f32)               # (2C, (K-1)*N)
    max_nbr = bm_bf.astype(f32)                                  # self neighbour (exact)
    for k in range(km1):
        max_nbr = jnp.maximum(max_nbr, gathered[:, k * n:(k + 1) * n])

    # max_k relu(conv) == relu(a + max_k (Wb x_j))   (ReLU monotone, per channel)
    h = jnp.maximum(a + max_nbr, 0.0).astype(jnp.bfloat16)       # (2C, N)

    # --- fc2: 1x1 conv + BatchNorm (folded) + residual (drop_path = Identity) ---
    y = jnp.dot(w2_ref[...], h, preferred_element_type=f32) + b2_ref[...]   # (C, N)
    o_ref[0] = y + x


def init_params(key, c):
    """Random torch-like parameters, with BN (eval mode) folded into the 1x1 convs."""
    c2 = 2 * c
    ks = jax.random.split(key, 14)
    # fc1: Conv2d(C, C, 1) + BatchNorm2d(C)
    w_fc1 = jax.random.normal(ks[0], (c, c), jnp.float32) * 0.1
    b_fc1 = jax.random.normal(ks[1], (c,), jnp.float32) * 0.1
    g1 = 1.0 + 0.1 * jax.random.normal(ks[2], (c,), jnp.float32)
    be1 = 0.1 * jax.random.normal(ks[3], (c,), jnp.float32)
    m1 = 0.1 * jax.random.normal(ks[4], (c,), jnp.float32)
    v1 = jnp.abs(1.0 + 0.1 * jax.random.normal(ks[5], (c,), jnp.float32))
    # EdgeConv BasicConv([2C, 2C]): Conv2d(2C, 2C, 1, bias=True) + ReLU
    w_e = jax.random.normal(ks[6], (c2, c2), jnp.float32) * 0.1
    b_e = jax.random.normal(ks[7], (c2,), jnp.float32) * 0.1
    # fc2: Conv2d(2C, C, 1) + BatchNorm2d(C)
    w_fc2 = jax.random.normal(ks[8], (c, c2), jnp.float32) * 0.1
    b_fc2 = jax.random.normal(ks[9], (c,), jnp.float32) * 0.1
    g2 = 1.0 + 0.1 * jax.random.normal(ks[10], (c,), jnp.float32)
    be2 = 0.1 * jax.random.normal(ks[11], (c,), jnp.float32)
    m2 = 0.1 * jax.random.normal(ks[12], (c,), jnp.float32)
    v2 = jnp.abs(1.0 + 0.1 * jax.random.normal(ks[13], (c,), jnp.float32))

    # fold BN1 into fc1 (eval mode)
    s1 = g1 / jnp.sqrt(v1 + 1e-5)
    w1_eff = s1[:, None] * w_fc1                               # (C, C)  f32
    b1_eff = (s1 * b_fc1 + be1 - m1 * s1)[:, None]             # (C, 1)  f32

    # EdgeConv weight split & fuse: conv([x_i, x_j-x_i]) = (Wa-Wb)x_i + Wb x_j + b
    wa, wb = w_e[:, :c], w_e[:, c:]
    w_ed = jnp.concatenate([wa - wb, wb], axis=0).astype(jnp.bfloat16)   # (4C, C) bf16
    b_e_col = b_e[:, None]                                     # (2C, 1) f32

    # fold BN2 into fc2 (eval mode)
    s2 = g2 / jnp.sqrt(v2 + 1e-5)
    w2_eff = (s2[:, None] * w_fc2).astype(jnp.bfloat16)        # (C, 2C) bf16
    b2_eff = (s2 * b_fc2 + be2 - m2 * s2)[:, None]             # (C, 1)  f32

    return w1_eff, b1_eff, w_ed, b_e_col, w2_eff, b2_eff


def grapher_forward(x_nchw, params):
    B, C, H, W = x_nchw.shape
    N = H * W
    assert N % 128 == 0 and C % 8 == 0, "demo layout: N on lanes, C on sublanes"
    assert N >= K_NEIGHBORS
    w1, b1, wed, be, w2, b2 = params
    C2, C4 = 2 * C, 4 * C

    x = x_nchw.reshape(B, C, N).astype(jnp.float32)   # NCHW flattened; no transpose

    out = pl.pallas_call(
        _grapher_kernel,
        out_shape=jax.ShapeDtypeStruct((B, C, N), jnp.float32),
        grid_spec=pltpu.PrefetchScalarGridSpec(
            num_scalar_prefetch=0,
            grid=(B,),
            in_specs=[
                pl.BlockSpec((1, C, N), lambda b: (b, 0, 0)),   # x (NCHW flat)
                pl.BlockSpec((C, C), lambda b: (0, 0)),         # fc1 weight (BN folded)
                pl.BlockSpec((C, 1), lambda b: (0, 0)),         # fc1 bias
                pl.BlockSpec((C4, C), lambda b: (0, 0)),        # edge conv [(Wa-Wb); Wb] bf16
                pl.BlockSpec((C2, 1), lambda b: (0, 0)),        # edge conv bias
                pl.BlockSpec((C, C2), lambda b: (0, 0)),        # fc2 weight (BN folded) bf16
                pl.BlockSpec((C, 1), lambda b: (0, 0)),         # fc2 bias
            ],
            out_specs=pl.BlockSpec((1, C, N), lambda b: (b, 0, 0)),
            scratch_shapes=[pltpu.VMEM((N, (K_NEIGHBORS - 1) * N), jnp.bfloat16)],
        ),
        compiler_params=pltpu.CompilerParams(
            dimension_semantics=("parallel",)),
    )(x, w1, b1, wed, be, w2, b2)

    return out.reshape(B, C, H, W)


if __name__ == "__main__":
    key = jax.random.PRNGKey(0)
    k_x, k_p = jax.random.split(key)

    B, C, H, W = 2, 16, 16, 16          # in_channels=16, N = H*W = 256 (lane-dense), k=9
    x = jax.random.normal(k_x, (B, C, H, W), jnp.float32)
    params = init_params(k_p, C)

    y = grapher_forward(x, params)
    jax.block_until_ready(y)
    assert y.shape == (B, C, H, W) and y.dtype == jnp.float32
    assert bool(jnp.isfinite(y).all())
    print("KERNEL_OK")
</pallas_src>

<mosaic_0001>
module attributes {stable_mosaic.version = 11 : i64} {
  func.func @_grapher_kernel(%arg0: i32, %arg1: memref<1x16x256xf32, #tpu.memory_space<vmem>>, %arg2: memref<16x16xf32, #tpu.memory_space<vmem>>, %arg3: memref<16x1xf32, #tpu.memory_space<vmem>>, %arg4: memref<64x16xbf16, #tpu.memory_space<vmem>>, %arg5: memref<32x1xf32, #tpu.memory_space<vmem>>, %arg6: memref<16x32xbf16, #tpu.memory_space<vmem>>, %arg7: memref<16x1xf32, #tpu.memory_space<vmem>>, %arg8: memref<1x16x256xf32, #tpu.memory_space<vmem>>, %arg9: memref<256x2048xbf16, #tpu.memory_space<vmem>>) attributes {dimension_semantics = [#tpu.dimension_semantics<parallel>], iteration_bounds = array<i64: 2>, scalar_prefetch = 0 : i64, scratch_operands = 1 : i64, tpu.core_type = #tpu.core_type<tc>, window_params = [{transform_indices = @transform_0, window_bounds = array<i64: 1, 16, 256>}, {pipeline_mode = #tpu.pipeline_mode<synchronous>, transform_indices = @transform_1, window_bounds = array<i64: 16, 16>}, {pipeline_mode = #tpu.pipeline_mode<synchronous>, transform_indices = @transform_2, window_bounds = array<i64: 16, 1>}, {pipeline_mode = #tpu.pipeline_mode<synchronous>, transform_indices = @transform_3, window_bounds = array<i64: 64, 16>}, {pipeline_mode = #tpu.pipeline_mode<synchronous>, transform_indices = @transform_4, window_bounds = array<i64: 32, 1>}, {pipeline_mode = #tpu.pipeline_mode<synchronous>, transform_indices = @transform_5, window_bounds = array<i64: 16, 32>}, {pipeline_mode = #tpu.pipeline_mode<synchronous>, transform_indices = @transform_6, window_bounds = array<i64: 16, 1>}, {transform_indices = @transform_7, window_bounds = array<i64: 1, 16, 256>}]} {
    %c0 = arith.constant 0 : index
    %c0_0 = arith.constant 0 : index
    %c0_1 = arith.constant 0 : index
    %0 = vector.load %arg1[%c0, %c0_0, %c0_1] : memref<1x16x256xf32, #tpu.memory_space<vmem>>, vector<1x16x256xf32>
    %1 = vector.shape_cast %0 : vector<1x16x256xf32> to vector<16x256xf32>
    %c0_2 = arith.constant 0 : index
    %c0_3 = arith.constant 0 : index
    %2 = vector.load %arg2[%c0_2, %c0_3] : memref<16x16xf32, #tpu.memory_space<vmem>>, vector<16x16xf32>
    %cst = arith.constant dense<0.000000e+00> : vector<16x256xf32>
    %3 = tpu.matmul %2, %1, %cst {dimension_numbers = #tpu.dot_dimension_numbers<[1], [0], [0], [1], [0, 0, 1, 1], [], []>} : vector<16x16xf32>, vector<16x256xf32>, vector<16x256xf32> -> vector<16x256xf32>
    %c0_4 = arith.constant 0 : index
    %c0_5 = arith.constant 0 : index
    %4 = vector.load %arg3[%c0_4, %c0_5] : memref<16x1xf32, #tpu.memory_space<vmem>>, vector<16x1xf32>
    %5 = vector.broadcast %4 : vector<16x1xf32> to vector<16x256xf32>
    %6 = arith.addf %3, %5 : vector<16x256xf32>
    %7 = arith.mulf %6, %6 : vector<16x256xf32>
    %cst_6 = arith.constant dense<0.000000e+00> : vector<256xf32>
    %8 = vector.multi_reduction <add>, %7, %cst_6 [0] : vector<16x256xf32> to vector<256xf32>
    %9 = vector.shape_cast %8 : vector<256xf32> to vector<1x256xf32>
    %cst_7 = arith.constant 1.000000e-24 : f32
    %10 = vector.broadcast %cst_7 : f32 to vector<1x256xf32>
    %11 = arith.maximumf %9, %10 : vector<1x256xf32>
    %12 = math.rsqrt %11 : vector<1x256xf32>
    %13 = vector.broadcast %12 : vector<1x256xf32> to vector<16x256xf32>
    %14 = arith.mulf %6, %13 : vector<16x256xf32>
    %15 = tpu.transpose %14, [1, 0] : vector<16x256xf32> -> vector<256x16xf32>
    %cst_8 = arith.constant dense<0.000000e+00> : vector<256x256xf32>
    %16 = tpu.matmul %15, %14, %cst_8 {dimension_numbers = #tpu.dot_dimension_numbers<[1], [0], [0], [1], [0, 0, 1, 1], [], []>} : vector<256x16xf32>, vector<16x256xf32>, vector<256x256xf32> -> vector<256x256xf32>
    %17 = tpu.iota {dimensions = array<i32: 0>} : vector<256x256xi32>
    %18 = tpu.iota {dimensions = array<i32: 1>} : vector<256x256xi32>
    %19 = arith.cmpi eq, %17, %18 : vector<256x256xi32>
    %20 = arith.mulf %14, %14 : vector<16x256xf32>
    %cst_9 = arith.constant dense<0.000000e+00> : vector<256xf32>
    %21 = vector.multi_reduction <add>, %20, %cst_9 [0] : vector<16x256xf32> to vector<256xf32>
    %22 = vector.shape_cast %21 : vector<256xf32> to vector<1x256xf32>
    %cst_10 = arith.constant 0.000000e+00 : f32
    %23 = vector.broadcast %cst_10 : f32 to vector<256x256xf32>
    %24 = arith.select %19, %16, %23 : vector<256x256xi1>, vector<256x256xf32>
    %cst_11 = arith.constant dense<0.000000e+00> : vector<256xf32>
    %25 = vector.multi_reduction <add>, %24, %cst_11 [1] : vector<256x256xf32> to vector<256xf32>
    %26 = vector.shape_cast %25 : vector<256xf32> to vector<256x1xf32>
    %cst_12 = arith.constant 2.000000e+00 : f32
    %27 = vector.broadcast %cst_12 : f32 to vector<256x256xf32>
    %28 = arith.mulf %27, %16 : vector<256x256xf32>
    %29 = vector.broadcast %26 : vector<256x1xf32> to vector<256x256xf32>
    %30 = arith.subf %29, %28 : vector<256x256xf32>
    %31 = vector.broadcast %22 : vector<1x256xf32> to vector<256x256xf32>
    %32 = arith.addf %30, %31 : vector<256x256xf32>
    %c0_13 = arith.constant 0 : index
    %c0_14 = arith.constant 0 : index
    %33 = vector.load %arg4[%c0_13, %c0_14] : memref<64x16xbf16, #tpu.memory_space<vmem>>, vector<64x16xbf16>
    %34 = arith.truncf %6 : vector<16x256xf32> to vector<16x256xbf16>
    %cst_15 = arith.constant dense<0.000000e+00> : vector<64x256xf32>
    %35 = tpu.matmul %33, %34, %cst_15 {dimension_numbers = #tpu.dot_dimension_numbers<[1], [0], [0], [1], [0, 0, 1, 1], [], []>} : vector<64x16xbf16>, vector<16x256xbf16>, vector<64x256xf32> -> vector<64x256xf32>
    %36 = vector.extract_strided_slice %35 {offsets = [0, 0], sizes = [32, 256], strides = [1, 1]} : vector<64x256xf32> to vector<32x256xf32>
    %c0_16 = arith.constant 0 : index
    %c0_17 = arith.constant 0 : index
    %37 = vector.load %arg5[%c0_16, %c0_17] : memref<32x1xf32, #tpu.memory_space<vmem>>, vector<32x1xf32>
    %38 = vector.broadcast %37 : vector<32x1xf32> to vector<32x256xf32>
    %39 = arith.addf %36, %38 : vector<32x256xf32>
    %40 = vector.extract_strided_slice %35 {offsets = [32, 0], sizes = [32, 256], strides = [1, 1]} : vector<64x256xf32> to vector<32x256xf32>
    %41 = arith.truncf %40 : vector<32x256xf32> to vector<32x256xbf16>
    %cst_18 = arith.constant 0.000000e+00 : f32
    %42 = vector.broadcast %cst_18 : f32 to vector<256x256xf32>
    %43 = arith.maximumf %32, %42 : vector<256x256xf32>
    %cst_19 = arith.constant 1.000000e+00 : f32
    %44 = vector.broadcast %cst_19 : f32 to vector<256x256xf32>
    %45 = arith.addf %43, %44 : vector<256x256xf32>
    %46 = tpu.bitcast %45 : vector<256x256xf32> -> vector<256x256xi32>
    %c-256_i32 = arith.constant -256 : i32
    %47 = vector.broadcast %c-256_i32 : i32 to vector<256x256xi32>
    %48 = arith.andi %46, %47 : vector<256x256xi32>
    %49 = arith.ori %48, %17 : vector<256x256xi32>
    %50 = tpu.bitcast %49 : vector<256x256xi32> -> vector<256x256xf32>
    %cst_20 = arith.constant 0x7F800000 : f32
    %51 = vector.broadcast %cst_20 : f32 to vector<256x256xf32>
    %52 = arith.select %19, %51, %50 : vector<256x256xi1>, vector<256x256xf32>
    %cst_21 = arith.constant dense<0x7F800000> : vector<256xf32>
    %53 = vector.multi_reduction <minimumf>, %52, %cst_21 [0] : vector<256x256xf32> to vector<256xf32>
    %54 = vector.shape_cast %53 : vector<256xf32> to vector<1x256xf32>
    %55 = vector.broadcast %54 : vector<1x256xf32> to vector<256x256xf32>
    %56 = arith.cmpf oeq, %52, %55 : vector<256x256xf32>
    %cst_22 = arith.constant 1.000000e+00 : f32
    %cst_23 = arith.constant 0.000000e+00 : f32
    %57 = vector.broadcast %cst_22 : f32 to vector<256x256xf32>
    %58 = vector.broadcast %cst_23 : f32 to vector<256x256xf32>
    %59 = arith.select %56, %57, %58 : vector<256x256xi1>, vector<256x256xf32>
    %60 = arith.truncf %59 : vector<256x256xf32> to vector<256x256xbf16>
    %c0_24 = arith.constant 0 : index
    %c0_25 = arith.constant 0 : index
    %61 = vector.load %arg9[%c0_24, %c0_25] : memref<256x2048xbf16, #tpu.memory_space<vmem>>, vector<256x256xbf16>
    tpu.vector_store %arg9[%c0_24, %c0_25], %60 {strides = array<i32>} : memref<256x2048xbf16, #tpu.memory_space<vmem>>, vector<256x256xbf16>,
    %cst_26 = arith.constant 0x7F800000 : f32
    %62 = vector.broadcast %cst_26 : f32 to vector<256x256xf32>
    %63 = arith.select %56, %62, %52 : vector<256x256xi1>, vector<256x256xf32>
    %cst_27 = arith.constant dense<0x7F800000> : vector<256xf32>
    %64 = vector.multi_reduction <minimumf>, %63, %cst_27 [0] : vector<256x256xf32> to vector<256xf32>
    %65 = vector.shape_cast %64 : vector<256xf32> to vector<1x256xf32>
    %66 = vector.broadcast %65 : vector<1x256xf32> to vector<256x256xf32>
    %67 = arith.cmpf oeq, %63, %66 : vector<256x256xf32>
    %cst_28 = arith.constant 1.000000e+00 : f32
    %cst_29 = arith.constant 0.000000e+00 : f32
    %68 = vector.broadcast %cst_28 : f32 to vector<256x256xf32>
    %69 = vector.broadcast %cst_29 : f32 to vector<256x256xf32>
    %70 = arith.select %67, %68, %69 : vector<256x256xi1>, vector<256x256xf32>
    %71 = arith.truncf %70 : vector<256x256xf32> to vector<256x256xbf16>
    %c0_30 = arith.constant 0 : index
    %c256 = arith.constant 256 : index
    %72 = vector.load %arg9[%c0_30, %c256] : memref<256x2048xbf16, #tpu.memory_space<vmem>>, vector<256x256xbf16>
    tpu.vector_store %arg9[%c0_30, %c256], %71 {strides = array<i32>} : memref<256x2048xbf16, #tpu.memory_space<vmem>>, vector<256x256xbf16>,
    %cst_31 = arith.constant 0x7F800000 : f32
    %73 = vector.broadcast %cst_31 : f32 to vector<256x256xf32>
    %74 = arith.select %67, %73, %63 : vector<256x256xi1>, vector<256x256xf32>
    %cst_32 = arith.constant dense<0x7F800000> : vector<256xf32>
    %75 = vector.multi_reduction <minimumf>, %74, %cst_32 [0] : vector<256x256xf32> to vector<256xf32>
    %76 = vector.shape_cast %75 : vector<256xf32> to vector<1x256xf32>
    %77 = vector.broadcast %76 : vector<1x256xf32> to vector<256x256xf32>
    %78 = arith.cmpf oeq, %74, %77 : vector<256x256xf32>
    %cst_33 = arith.constant 1.000000e+00 : f32
    %cst_34 = arith.constant 0.000000e+00 : f32
    %79 = vector.broadcast %cst_33 : f32 to vector<256x256xf32>
    %80 = vector.broadcast %cst_34 : f32 to vector<256x256xf32>
    %81 = arith.select %78, %79, %80 : vector<256x256xi1>, vector<256x256xf32>
    %82 = arith.truncf %81 : vector<256x256xf32> to vector<256x256xbf16>
    %c0_35 = arith.constant 0 : index
    %c512 = arith.constant 512 : index
    %83 = vector.load %arg9[%c0_35, %c512] : memref<256x2048xbf16, #tpu.memory_space<vmem>>, vector<256x256xbf16>
    tpu.vector_store %arg9[%c0_35, %c512], %82 {strides = array<i32>} : memref<256x2048xbf16, #tpu.memory_space<vmem>>, vector<256x256xbf16>,
    %cst_36 = arith.constant 0x7F800000 : f32
    %84 = vector.broadcast %cst_36 : f32 to vector<256x256xf32>
    %85 = arith.select %78, %84, %74 : vector<256x256xi1>, vector<256x256xf32>
    %cst_37 = arith.constant dense<0x7F800000> : vector<256xf32>
    %86 = vector.multi_reduction <minimumf>, %85, %cst_37 [0] : vector<256x256xf32> to vector<256xf32>
    %87 = vector.shape_cast %86 : vector<256xf32> to vector<1x256xf32>
    %88 = vector.broadcast %87 : vector<1x256xf32> to vector<256x256xf32>
    %89 = arith.cmpf oeq, %85, %88 : vector<256x256xf32>
    %cst_38 = arith.constant 1.000000e+00 : f32
    %cst_39 = arith.constant 0.000000e+00 : f32
    %90 = vector.broadcast %cst_38 : f32 to vector<256x256xf32>
    %91 = vector.broadcast %cst_39 : f32 to vector<256x256xf32>
    %92 = arith.select %89, %90, %91 : vector<256x256xi1>, vector<256x256xf32>
    %93 = arith.truncf %92 : vector<256x256xf32> to vector<256x256xbf16>
    %c0_40 = arith.constant 0 : index
    %c768 = arith.constant 768 : index
    %94 = vector.load %arg9[%c0_40, %c768] : memref<256x2048xbf16, #tpu.memory_space<vmem>>, vector<256x256xbf16>
    tpu.vector_store %arg9[%c0_40, %c768], %93 {strides = array<i32>} : memref<256x2048xbf16, #tpu.memory_space<vmem>>, vector<256x256xbf16>,
    %cst_41 = arith.constant 0x7F800000 : f32
    %95 = vector.broadcast %cst_41 : f32 to vector<256x256xf32>
    %96 = arith.select %89, %95, %85 : vector<256x256xi1>, vector<256x256xf32>
    %cst_42 = arith.constant dense<0x7F800000> : vector<256xf32>
    %97 = vector.multi_reduction <minimumf>, %96, %cst_42 [0] : vector<256x256xf32> to vector<256xf32>
    %98 = vector.shape_cast %97 : vector<256xf32> to vector<1x256xf32>
    %99 = vector.broadcast %98 : vector<1x256xf32> to vector<256x256xf32>
    %100 = arith.cmpf oeq, %96, %99 : vector<256x256xf32>
    %cst_43 = arith.constant 1.000000e+00 : f32
    %cst_44 = arith.constant 0.000000e+00 : f32
    %101 = vector.broadcast %cst_43 : f32 to vector<256x256xf32>
    %102 = vector.broadcast %cst_44 : f32 to vector<256x256xf32>
    %103 = arith.select %100, %101, %102 : vector<256x256xi1>, vector<256x256xf32>
    %104 = arith.truncf %103 : vector<256x256xf32> to vector<256x256xbf16>
    %c0_45 = arith.constant 0 : index
    %c1024 = arith.constant 1024 : index
    %105 = vector.load %arg9[%c0_45, %c1024] : memref<256x2048xbf16, #tpu.memory_space<vmem>>, vector<256x256xbf16>
    tpu.vector_store %arg9[%c0_45, %c1024], %104 {strides = array<i32>} : memref<256x2048xbf16, #tpu.memory_space<vmem>>, vector<256x256xbf16>,
    %cst_46 = arith.constant 0x7F800000 : f32
    %106 = vector.broadcast %cst_46 : f32 to vector<256x256xf32>
    %107 = arith.select %100, %106, %96 : vector<256x256xi1>, vector<256x256xf32>
    %cst_47 = arith.constant dense<0x7F800000> : vector<256xf32>
    %108 = vector.multi_reduction <minimumf>, %107, %cst_47 [0] : vector<256x256xf32> to vector<256xf32>
    %109 = vector.shape_cast %108 : vector<256xf32> to vector<1x256xf32>
    %110 = vector.broadcast %109 : vector<1x256xf32> to vector<256x256xf32>
    %111 = arith.cmpf oeq, %107, %110 : vector<256x256xf32>
    %cst_48 = arith.constant 1.000000e+00 : f32
    %cst_49 = arith.constant 0.000000e+00 : f32
    %112 = vector.broadcast %cst_48 : f32 to vector<256x256xf32>
    %113 = vector.broadcast %cst_49 : f32 to vector<256x256xf32>
    %114 = arith.select %111, %112, %113 : vector<256x256xi1>, vector<256x256xf32>
    %115 = arith.truncf %114 : vector<256x256xf32> to vector<256x256xbf16>
    %c0_50 = arith.constant 0 : index
    %c1280 = arith.constant 1280 : index
    %116 = vector.load %arg9[%c0_50, %c1280] : memref<256x2048xbf16, #tpu.memory_space<vmem>>, vector<256x256xbf16>
    tpu.vector_store %arg9[%c0_50, %c1280], %115 {strides = array<i32>} : memref<256x2048xbf16, #tpu.memory_space<vmem>>, vector<256x256xbf16>,
    %cst_51 = arith.constant 0x7F800000 : f32
    %117 = vector.broadcast %cst_51 : f32 to vector<256x256xf32>
    %118 = arith.select %111, %117, %107 : vector<256x256xi1>, vector<256x256xf32>
    %cst_52 = arith.constant dense<0x7F800000> : vector<256xf32>
    %119 = vector.multi_reduction <minimumf>, %118, %cst_52 [0] : vector<256x256xf32> to vector<256xf32>
    %120 = vector.shape_cast %119 : vector<256xf32> to vector<1x256xf32>
    %121 = vector.broadcast %120 : vector<1x256xf32> to vector<256x256xf32>
    %122 = arith.cmpf oeq, %118, %121 : vector<256x256xf32>
    %cst_53 = arith.constant 1.000000e+00 : f32
    %cst_54 = arith.constant 0.000000e+00 : f32
    %123 = vector.broadcast %cst_53 : f32 to vector<256x256xf32>
    %124 = vector.broadcast %cst_54 : f32 to vector<256x256xf32>
    %125 = arith.select %122, %123, %124 : vector<256x256xi1>, vector<256x256xf32>
    %126 = arith.truncf %125 : vector<256x256xf32> to vector<256x256xbf16>
    %c0_55 = arith.constant 0 : index
    %c1536 = arith.constant 1536 : index
    %127 = vector.load %arg9[%c0_55, %c1536] : memref<256x2048xbf16, #tpu.memory_space<vmem>>, vector<256x256xbf16>
    tpu.vector_store %arg9[%c0_55, %c1536], %126 {strides = array<i32>} : memref<256x2048xbf16, #tpu.memory_space<vmem>>, vector<256x256xbf16>,
    %cst_56 = arith.constant 0x7F800000 : f32
    %128 = vector.broadcast %cst_56 : f32 to vector<256x256xf32>
    %129 = arith.select %122, %128, %118 : vector<256x256xi1>, vector<256x256xf32>
    %cst_57 = arith.constant dense<0x7F800000> : vector<256xf32>
    %130 = vector.multi_reduction <minimumf>, %129, %cst_57 [0] : vector<256x256xf32> to vector<256xf32>
    %131 = vector.shape_cast %130 : vector<256xf32> to vector<1x256xf32>
    %132 = vector.broadcast %131 : vector<1x256xf32> to vector<256x256xf32>
    %133 = arith.cmpf oeq, %129, %132 : vector<256x256xf32>
    %cst_58 = arith.constant 1.000000e+00 : f32
    %cst_59 = arith.constant 0.000000e+00 : f32
    %134 = vector.broadcast %cst_58 : f32 to vector<256x256xf32>
    %135 = vector.broadcast %cst_59 : f32 to vector<256x256xf32>
    %136 = arith.select %133, %134, %135 : vector<256x256xi1>, vector<256x256xf32>
    %137 = arith.truncf %136 : vector<256x256xf32> to vector<256x256xbf16>
    %c0_60 = arith.constant 0 : index
    %c1792 = arith.constant 1792 : index
    %138 = vector.load %arg9[%c0_60, %c1792] : memref<256x2048xbf16, #tpu.memory_space<vmem>>, vector<256x256xbf16>
    tpu.vector_store %arg9[%c0_60, %c1792], %137 {strides = array<i32>} : memref<256x2048xbf16, #tpu.memory_space<vmem>>, vector<256x256xbf16>,
    %c0_61 = arith.constant 0 : index
    %c0_62 = arith.constant 0 : index
    %139 = vector.load %arg9[%c0_61, %c0_62] : memref<256x2048xbf16, #tpu.memory_space<vmem>>, vector<256x2048xbf16>
    %cst_63 = arith.constant dense<0.000000e+00> : vector<32x2048xf32>
    %140 = tpu.matmul %41, %139, %cst_63 {dimension_numbers = #tpu.dot_dimension_numbers<[1], [0], [0], [1], [0, 0, 1, 1], [], []>} : vector<32x256xbf16>, vector<256x2048xbf16>, vector<32x2048xf32> -> vector<32x2048xf32>
    %141 = arith.extf %41 : vector<32x256xbf16> to vector<32x256xf32>
    %142 = vector.extract_strided_slice %140 {offsets = [0, 0], sizes = [32, 256], strides = [1, 1]} : vector<32x2048xf32> to vector<32x256xf32>
    %143 = arith.maximumf %141, %142 : vector<32x256xf32>
    %144 = vector.extract_strided_slice %140 {offsets = [0, 256], sizes = [32, 256], strides = [1, 1]} : vector<32x2048xf32> to vector<32x256xf32>
    %145 = arith.maximumf %143, %144 : vector<32x256xf32>
    %146 = vector.extract_strided_slice %140 {offsets = [0, 512], sizes = [32, 256], strides = [1, 1]} : vector<32x2048xf32> to vector<32x256xf32>
    %147 = arith.maximumf %145, %146 : vector<32x256xf32>
    %148 = vector.extract_strided_slice %140 {offsets = [0, 768], sizes = [32, 256], strides = [1, 1]} : vector<32x2048xf32> to vector<32x256xf32>
    %149 = arith.maximumf %147, %148 : vector<32x256xf32>
    %150 = vector.extract_strided_slice %140 {offsets = [0, 1024], sizes = [32, 256], strides = [1, 1]} : vector<32x2048xf32> to vector<32x256xf32>
    %151 = arith.maximumf %149, %150 : vector<32x256xf32>
    %152 = vector.extract_strided_slice %140 {offsets = [0, 1280], sizes = [32, 256], strides = [1, 1]} : vector<32x2048xf32> to vector<32x256xf32>
    %153 = arith.maximumf %151, %152 : vector<32x256xf32>
    %154 = vector.extract_strided_slice %140 {offsets = [0, 1536], sizes = [32, 256], strides = [1, 1]} : vector<32x2048xf32> to vector<32x256xf32>
    %155 = arith.maximumf %153, %154 : vector<32x256xf32>
    %156 = vector.extract_strided_slice %140 {offsets = [0, 1792], sizes = [32, 256], strides = [1, 1]} : vector<32x2048xf32> to vector<32x256xf32>
    %157 = arith.maximumf %155, %156 : vector<32x256xf32>
    %158 = arith.addf %39, %157 : vector<32x256xf32>
    %cst_64 = arith.constant 0.000000e+00 : f32
    %159 = vector.broadcast %cst_64 : f32 to vector<32x256xf32>
    %160 = arith.maximumf %158, %159 : vector<32x256xf32>
    %161 = arith.truncf %160 : vector<32x256xf32> to vector<32x256xbf16>
    %c0_65 = arith.constant 0 : index
    %c0_66 = arith.constant 0 : index
    %162 = vector.load %arg6[%c0_65, %c0_66] : memref<16x32xbf16, #tpu.memory_space<vmem>>, vector<16x32xbf16>
    %cst_67 = arith.constant dense<0.000000e+00> : vector<16x256xf32>
    %163 = tpu.matmul %162, %161, %cst_67 {dimension_numbers = #tpu.dot_dimension_numbers<[1], [0], [0], [1], [0, 0, 1, 1], [], []>} : vector<16x32xbf16>, vector<32x256xbf16>, vector<16x256xf32> -> vector<16x256xf32>
    %c0_68 = arith.constant 0 : index
    %c0_69 = arith.constant 0 : index
    %164 = vector.load %arg7[%c0_68, %c0_69] : memref<16x1xf32, #tpu.memory_space<vmem>>, vector<16x1xf32>
    %165 = vector.broadcast %164 : vector<16x1xf32> to vector<16x256xf32>
    %166 = arith.addf %163, %165 : vector<16x256xf32>
    %167 = arith.addf %166, %1 : vector<16x256xf32>
    %c0_70 = arith.constant 0 : index
    %c0_71 = arith.constant 0 : index
    %c0_72 = arith.constant 0 : index
    %168 = vector.load %arg8[%c0_70, %c0_71, %c0_72] : memref<1x16x256xf32, #tpu.memory_space<vmem>>, vector<1x16x256xf32>
    %169 = vector.shape_cast %168 : vector<1x16x256xf32> to vector<16x256xf32>
    %170 = vector.shape_cast %167 : vector<16x256xf32> to vector<1x16x256xf32>
    tpu.vector_store %arg8[%c0_70, %c0_71, %c0_72], %170 {strides = array<i32>} : memref<1x16x256xf32, #tpu.memory_space<vmem>>, vector<1x16x256xf32>,
    return
  }
  func.func @transform_0(%arg0: i32) -> (i32, i32, i32) {
    %c0_i32 = arith.constant 0 : i32
    %c0_i32_0 = arith.constant 0 : i32
    %c0_i32_1 = arith.constant 0 : i32
    return %arg0, %c0_i32, %c0_i32_0 : i32, i32, i32
  }
  func.func @transform_1(%arg0: i32) -> (i32, i32) {
    %c0_i32 = arith.constant 0 : i32
    %c0_i32_0 = arith.constant 0 : i32
    %c0_i32_1 = arith.constant 0 : i32
    return %c0_i32, %c0_i32_0 : i32, i32
  }
  func.func @transform_2(%arg0: i32) -> (i32, i32) {
    %c0_i32 = arith.constant 0 : i32
    %c0_i32_0 = arith.constant 0 : i32
    %c0_i32_1 = arith.constant 0 : i32
    return %c0_i32, %c0_i32_0 : i32, i32
  }
  func.func @transform_3(%arg0: i32) -> (i32, i32) {
    %c0_i32 = arith.constant 0 : i32
    %c0_i32_0 = arith.constant 0 : i32
    %c0_i32_1 = arith.constant 0 : i32
    return %c0_i32, %c0_i32_0 : i32, i32
  }
  func.func @transform_4(%arg0: i32) -> (i32, i32) {
    %c0_i32 = arith.constant 0 : i32
    %c0_i32_0 = arith.constant 0 : i32
    %c0_i32_1 = arith.constant 0 : i32
    return %c0_i32, %c0_i32_0 : i32, i32
  }
  func.func @transform_5(%arg0: i32) -> (i32, i32) {
    %c0_i32 = arith.constant 0 : i32
    %c0_i32_0 = arith.constant 0 : i32
    %c0_i32_1 = arith.constant 0 : i32
    return %c0_i32, %c0_i32_0 : i32, i32
  }
  func.func @transform_6(%arg0: i32) -> (i32, i32) {
    %c0_i32 = arith.constant 0 : i32
    %c0_i32_0 = arith.constant 0 : i32
    %c0_i32_1 = arith.constant 0 : i32
    return %c0_i32, %c0_i32_0 : i32, i32
  }
  func.func @transform_7(%arg0: i32) -> (i32, i32, i32) {
    %c0_i32 = arith.constant 0 : i32
    %c0_i32_0 = arith.constant 0 : i32
    %c0_i32_1 = arith.constant 0 : i32
    return %arg0, %c0_i32, %c0_i32_0 : i32, i32, i32
  }
}

</mosaic_0001>

<bundles_post_ra>
// kernel: tpu_custom_call.1
= control target key start
LH: loop header
LB: loop body
LE: loop exit
PB: predicated region body
PF: predicated region fallthrough
CT: control target
= control target key end

     0   :  { %12 = vsyncpa [#allocation4], 0  ;;  %s13641_s0 = inlined_call_operand.vmem [shape: f32[2,16,256], index: 0, kind: input, shape index: {}]   ;;  %s13642_s1 = inlined_call_operand.vmem [shape: f32[16,16], index: 1, kind: input, shape index: {}]   ;;  %s13643_s2 = inlined_call_operand.vmem [shape: f32[16,1], index: 2, kind: input, shape index: {}]   ;;  %s13644_s3 = inlined_call_operand.vmem [shape: bf16[64,16], index: 3, kind: input, shape index: {}]   ;;  %s13645_s4 = inlined_call_operand.vmem [shape: f32[32,1], index: 4, kind: input, shape index: {}]   ;;  %s13646_s5 = inlined_call_operand.vmem [shape: bf16[16,32], index: 5, kind: input, shape index: {}]   ;;  %s13647_s6 = inlined_call_operand.vmem [shape: f32[16,1], index: 6, kind: input, shape index: {}]   ;;  %s13648_s7 = inlined_call_operand.hbm [shape: f32[2,16,256], index: 7, kind: output, shape index: {}]  }
   0x1   :  { %14 = vsyncpa [#allocation4 + $0x1], 0  ;;  %s6139_s24 = smov 0   ;;  %s6141_s25 = smov 0  }
   0x2   :  { %s6143_s26 = smov 0   ;;  %s6145_s27 = smov 0  }
   0x3 LB: > { %s6160_s28 = sadd.s32 4294967295, %s6091_s27   ;;  %s5390_s29 = sadd.s32 4294967294, %s6091_s27   ;;  %s6091_s27 = sphi %s6145_s27, %s15845_s27   ;;  %s6087_s26 = sphi %s6143_s26, %s15844_s26   ;;  %s6083_s25 = sphi %s6141_s25, %s15843_s25   ;;  %s6079_s24 = sphi %s6139_s24, %s15842_s24  }
   0x4   : > { %s6164_s30 = sadd.s32 1, %s6091_s27   ;;  %s179_s8 = sadd.s32 1, %s6087_s26 }
   0x5   : > { %s176_s9 = ssub.s32 %s6091_s27, %s6164_s30  ;;  %p189_p0 = scmp.ne.s32.totalorder %s6087_s26, %s6083_s25 }
   0x6   : > { %p177_p1 = scmp.eq.s32.totalorder %s176_s9, 0  ;;  %p190_p2 = scmp.eq.s32.totalorder %s6160_s28, 1 }
   0x7   : > { %p195_p3 = scmp.ne.s32.totalorder %s6083_s25, %s6079_s24  ;;  %p196_p4 = scmp.eq.s32.totalorder %s5390_s29, 1 }
   0x8   : > { %s6175_s10 = scalar_select %p177_p1, %s6087_s26, %s179_s8  }
   0x9   : > { %p6177_p5 = por %p190_p2, %p189_p0  ;;  %p6181_p6 = por %p196_p4, %p195_p3 }
   0xa   : > { %p5393_p7 = scmp.ge.s32.totalorder %s6091_s27, 1  ;;  %p240_p8 = scmp.lt.s32.totalorder %s6091_s27, 3 }
   0xc   : > { %p241_p9 = pnand %p5393_p7, %p240_p8 }
   0xe   : > { %244 = sbr.rel (%p241_p9) target bundleno = 2034 (0x7f2), region = 48 }
  0x15   : > { %p272_p10 = scmp.lt.s32.totalorder %s6160_s28, 1  ;;  %v6093_v0 = vmov 0.0   ;;  %v13652_v1 = vmov 0   ;;  %v284_v2 = vld [vmem:[%s13643_s2] sm:$0xff]  ;;  %v285_v3 = vld [vmem:[%s13643_s2 + $0x8] sm:$0xff]  ;;  %vm296_vm0 = vcmask 130048  }
  0x16   : > { %367 = vmatprep.mubr.f32.mxu0 %v6093_v0  ;;  %6014 = vset.pattern.permute.xlu0 %v13652_v1  ;;  %v282_v10 = vld [vmem:[%s13642_s1] sm:$0xff]  ;;  %v283_v11 = vld [vmem:[%s13642_s1 + $0x8] sm:$0xff]  ;;  %s269_s22 = sand.u32 1, %s6083_s25   ;;  %s5447_s9 = sshll.u32 %s6160_s28, 9 }
  0x17   : > { %s273_s15 = scalar_select %p272_p10, %s6160_s28, 1  ;;  %288 = vperm.xlu0 %6014, %v284_v2   ;;  %666 = vmatprep.mubr.f32.mxu1 %v6093_v0 }
  0x18   : > { %s5394_s23 = sshll.u32 %s269_s22, 5  ;;  %s13600_s28 = scalar_lea.sflag [#allocation4], %s269_s22 }
  0x19   : > { %s5446_s18 = sshll.u32 %s273_s15, 5  ;;  %s271_s29 = scalar_lea.vmem [#allocation3], %s5394_s23 }
  0x1a   : > { %s6201_s21 = scalar_lea.vmem %s13641_s0, %s5446_s18  ;;  %s5328_s8 = sshll.u32 %s271_s29, 4  ;;  %s13591_s8 = int_to_ptr.vmem [resolvable:$true] %s5328_s8 }
  0x1b   : > { %v279_v4 = vld [vmem:[%s6201_s21 + $0x8] sm:$0xff]  ;;  %v281_v5 = vld [vmem:[%s6201_s21 + $0x18] sm:$0xff]  ;;  %v278_v6 = vld [vmem:[%s6201_s21] sm:$0xff]  ;;  %293 = vperm.xlu0 %6014, %v285_v3   ;;  %s13598_s15 = scalar_lea.hbm %s13648_s7, %s5447_s9  ;;  %s6029_s16 = scalar_lea.vmem %s13591_s8, 512 }
  0x1c   : > { %v5960_v7 = vpack.c.bf16 %v281_v5, %v279_v4  ;;  %v280_v8 = vld [vmem:[%s6201_s21 + $0x10] sm:$0xff]  ;;  %p6030_p11 = scmp.ne.s32.totalorder %s13591_s8, %s6029_s16  ;;  %s6096_s17 = smov [#allocation3]  }
  0x1d   : > { %v5962_v9 = vpack.c.bf16 %v280_v8, %v278_v6  ;;  %s6033_s18 = sshll.u32 %s6096_s17, 4  ;;  %s6034_s18 = int_to_ptr.vmem [resolvable:$false] %s6033_s18 }
  0x1e   : > { %5961 = vmatprep.subr.bf16.mxu0 %v5960_v7  ;;  %p6031_p12 = pnand %p6030_p11, %p6177_p5  ;;  %s6035_s19 = scalar_lea.vmem %s6034_s18, 1024 }
  0x1f   : > { %5963 = vmatpush1.bf16.msra.mxu0 %v5962_v9  ;;  %p6036_p0 = scmp.lt.s32.totalorder %s13591_s8, %s6034_s18  ;;  %p6037_p1 = scmp.lt.s32.totalorder %s6035_s19, %s6029_s16 }
  0x20   : > { %p6032_p13 = pneg %p6031_p12 }
  0x21   : > { %p6038_p2 = por %p6037_p1, %p6036_p0 }
  0x22   : > { %5397 = vmatmul.mubr.msk.f32.vlgmr.msra.gmra.mrb[0].mxu0 %vm296_vm0, %v282_v10 }
  0x23   : > { %373 = vmatprep.mubr.f32.mxu0 %v6093_v0  ;;  %p6039_p3 = pnand %p6038_p2, %p6032_p13 }
  0x26   : > { %5398 = vmatmul.mubr.msk.f32.gmra.mrb[2].mxu0 %vm296_vm0, %v283_v11 }
  0x27   : > { %630 = vmatprep.mubr.f32.mxu0 %v6093_v0 }
  0x96   : > { %v289_v12 = vpop.permute.xlu0 %288 }
  0x9a   : > { %v294_v16 = vpop.permute.xlu0 %293 }
  0xf5   : > { %v369_v13 = vpop.f32.mrb[0].mxu0 }
  0xf6   : > { %v371_v14 = vpop.f32.mrb[1].mxu0  ;;  %v370_v15 = vadd.f32 %v369_v13, %v289_v12 }
  0xf7   : > { %v372_v17 = vadd.f32 %v371_v14, %v289_v12 }
  0xf8   : > { %v380_v22 = vmul.f32 %v370_v15, %v370_v15 }
  0xf9   : > { %v375_v18 = vpop.f32.mrb[2].mxu0  ;;  %v381_v25 = vmul.f32 %v372_v17, %v372_v17 }
  0xfa   : > { %v376_v19 = vadd.f32 %v375_v18, %v294_v16  ;;  %v377_v20 = vpop.f32.mrb[3].mxu0 }
  0xfb   : > { %v378_v21 = vadd.f32 %v377_v20, %v294_v16 }
  0xfc   : > { %v382_v23 = vmul.f32 %v376_v19, %v376_v19  ;;  %v1301_v24 = vpack.c.bf16 %v376_v19, %v370_v15 }
  0xfd   : > { %v383_v26 = vmul.f32 %v378_v21, %v378_v21  ;;  %v1302_v27 = vpack.c.bf16 %v378_v21, %v372_v17 }
  0xfe   : > { %v384_v28 = vadd.f32 %v382_v23, %v380_v22 }
  0xff   : > { %v391_v29 = vadd.f32 %v383_v26, %v381_v25 }
 0x100   : > { %v385_v30 = vrot.slane %v384_v28, 4 }
 0x101   : > { %v392_v31 = vrot.slane %v391_v29, 4 }
 0x102   : > { %v386_v32 = vadd.f32 %v385_v30, %v384_v28  ;;  %v6016_v28 = vld [vmem:[%s13644_s3] sm:$0xff]  }
 0x103   : > { %v393_v33 = vadd.f32 %v392_v31, %v391_v29  ;;  %v823_v29 = vlaneseq }
 0x104   : > { %v387_v34 = vrot.slane %v386_v32, 2 }
 0x105   : > { %v394_v35 = vrot.slane %v393_v33, 2  ;;  %v6290_v30 = vshrl.u32 %v823_v29, 7  ;;  %v6292_v31 = vand.u32 127, %v823_v29 }
 0x106   : > { %v388_v36 = vadd.f32 %v387_v34, %v386_v32  ;;  %v6017_v32 = vld [vmem:[%s13644_s3 + $0x8] sm:$0xff]  }
 0x107   : > { %v395_v37 = vadd.f32 %v394_v35, %v393_v33  ;;  %14320 = vst [vmem:[#allocation6_spill] sm:$0xff] %v6290_v30  ;;  %14321 = vst [vmem:[#allocation7_spill] sm:$0xff] %v6292_v31  ;;  %vm13650_vm1 = vcmp.eq.s32.totalorder %v6290_v30, %v6292_v31 }
 0x108   : > { %v389_v38 = vrot.slane %v388_v36, 1 }
 0x109   : > { %v396_v39 = vrot.slane %v395_v37, 1 }
 0x10a   : > { %v390_v40 = vadd.f32 %v389_v38, %v388_v36  ;;  %v6314_v36 = vadd.s32 16, %v6290_v30 }
 0x10b   : > { %v397_v41 = vadd.f32 %v396_v39, %v395_v37 }
 0x10c   : > { %v398_v42 = vmax.f32 %v390_v40, 1e-24  ;;  %14323 = vst [vmem:[#allocation9_spill] sm:$0xff] %v6314_v36  ;;  %vm863_vm3 = vcmp.eq.s32.totalorder %v6314_v36, %v6292_v31  ;;  %v6328_v40 = vadd.s32 24, %v6290_v30 }
 0x10d   : > { %v399_v43 = vmax.f32 %v397_v41, 1e-24 }
 0x10e   : > { %6021 = vrsqrt.f32 %v398_v42  ;;  %14324 = vst [vmem:[#allocation10_spill] sm:$0xff] %v6328_v40  ;;  %vm865_vm4 = vcmp.eq.s32.totalorder %v6328_v40, %v6292_v31 }
 0x10f   : > { %6023 = vrsqrt.f32 %v399_v43 }
 0x118   : > { %v6022_v44 = vpop.eup %6021 }
 0x119   : > { %v6024_v45 = vpop.eup %6023  ;;  %v402_v46 = vmul.f32 %v6022_v44, %v370_v15  ;;  %v404_v47 = vmul.f32 %v6022_v44, %v376_v19  ;;  %v6341_v44 = vadd.s32 32, %v6290_v30 }
 0x11a   : > { %v405_v48 = vmul.f32 %v6024_v45, %v378_v21  ;;  %v403_v49 = vmul.f32 %v6024_v45, %v372_v17 }
 0x11b   : > { %406 = vxpose.xlu1.b32.start [1/2] (short) %v402_v46, 128  ;;  %v923_v50 = vmul.f32 %v402_v46, %v402_v46  ;;  %v925_v51 = vmul.f32 %v404_v47, %v404_v47  ;;  %v5966_v52 = vpack.c.bf16 %v404_v47, %v402_v46  ;;  %14325 = vst [vmem:[#allocation11_spill] sm:$0xff] %v6341_v44 }
 0x11c   : > { %v926_v53 = vmul.f32 %v405_v48, %v405_v48  ;;  %438 = vxpose.xlu0.b32.start [1/2] (short) %v403_v49, 128  ;;  %v924_v54 = vmul.f32 %v403_v49, %v403_v49  ;;  %v5964_v55 = vpack.c.bf16 %v405_v48, %v403_v49  ;;  %vm867_vm5 = vcmp.eq.s32.totalorder %v6341_v44, %v6292_v31 }
 0x11d   : > { %v6217_v56 = vadd.f32 %v925_v51, %v923_v50 }
 0x11e   : > { %v6219_v57 = vadd.f32 %v926_v53, %v924_v54  ;;  %5965 = vmatprep.subr.bf16.mxu0 %v5964_v55  ;;  %5968 = vmatprep.subr.bf16.mxu1 %v5964_v55  ;;  %v6370_v53 = vadd.s32 48, %v6290_v30 }
 0x11f   : > { %407 = vxpose.xlu1.b32.end [2/2] (short) %v404_v47, 128  ;;  %5967 = vmatpush1.bf16.msra.mxu0 %v5966_v52 }
 0x120   : > { %5969 = vmatpush1.bf16.msra.mxu1 %v5966_v52  ;;  %439 = vxpose.xlu0.b32.end [2/2] (short) %v405_v48, 128  ;;  %v6354_v48 = vadd.s32 40, %v6290_v30  ;;  %v6018_v52 = vld [vmem:[%s13644_s3 + $0x10] sm:$0xff]   ;;  %14327 = vst [vmem:[#allocation13_spill] sm:$0xff] %v6370_v53  ;;  %vm871_vm7 = vcmp.eq.s32.totalorder %v6370_v53, %v6292_v31 }
 0x121   : > { %1335 = vmatprep.subr.bf16.mxu0 %v1302_v27 }
 0x122   : > { %14326 = vst [vmem:[#allocation12_spill] sm:$0xff] %v6354_v48  ;;  %vm869_vm6 = vcmp.eq.s32.totalorder %v6354_v48, %v6292_v31 }
 0x13d   : > { %6015 = vset.pattern.permute.xlu1 %v13652_v1 }
 0x19b   : > { %v422_v58 = vpop.trf.xlu1 }
 0x19c   : > { %5399 = vmatmul.mubr.msk.f32.vlgmr.msra.gmra.mrb[4].mxu0 %vm296_vm0, %v422_v58  ;;  %v454_v5 = vpop.trf.xlu0 }
 0x19d   : > { %1336 = vmatpush1.bf16.msra.mxu0 %v1301_v24  ;;  %636 = vmatprep.mubr.f32.mxu0 %v6093_v0 }
 0x19f   : > { %v423_v59 = vpop.trf.xlu1 }
 0x1a0   : > { %5400 = vmatmul.mubr.msk.f32.gmra.mrb[6].mxu0 %vm296_vm0, %v423_v59  ;;  %v455_v7 = vpop.trf.xlu0  ;;  %v6385_v59 = vadd.s32 56, %v6290_v30 }
 0x1a1   : > { %642 = vmatprep.mubr.f32.mxu0 %v6093_v0 }
 0x1a2   : > { %14328 = vst [vmem:[#allocation14_spill] sm:$0xff] %v6385_v59  ;;  %vm873_vm8 = vcmp.eq.s32.totalorder %v6385_v59, %v6292_v31 }
 0x1a3   : > { %v424_v60 = vpop.trf.xlu1 }
 0x1a4   : > { %5401 = vmatmul.mubr.msk.f32.gmra.mrb[8].mxu0 %vm296_vm0, %v424_v60  ;;  %v456_v10 = vpop.trf.xlu0 }
 0x1a5   : > { %648 = vmatprep.mubr.f32.mxu0 %v6093_v0 }
 0x1a7   : > { %v425_v61 = vpop.trf.xlu1 }
 0x1a8   : > { %5402 = vmatmul.mubr.msk.f32.gmra.mrb[10].mxu0 %vm296_vm0, %v425_v61  ;;  %v457_v12 = vpop.trf.xlu0 }
 0x1a9   : > { %654 = vmatprep.mubr.f32.mxu0 %v6093_v0 }
 0x1ab   : > { %v426_v62 = vpop.trf.xlu1 }
 0x1ac   : > { %5403 = vmatmul.mubr.msk.f32.gmra.mrb[12].mxu0 %vm296_vm0, %v426_v62  ;;  %v458_v15 = vpop.trf.xlu0 }
 0x1ad   : > { %660 = vmatprep.mubr.f32.mxu0 %v6093_v0 }
 0x1af   : > { %v427_v63 = vpop.trf.xlu1 }
 0x1b0   : > { %5404 = vmatmul.mubr.msk.f32.gmra.mrb[14].mxu0 %vm296_vm0, %v427_v63  ;;  %v459_v17 = vpop.trf.xlu0  ;;  %v6398_v63 = vadd.s32 64, %v6290_v30 }
 0x1b1   : > { %1367 = vmatprep.mubr.bf16.mxu0 %v13652_v1 }
 0x1b2   : > { %14329 = vst [vmem:[#allocation15_spill] sm:$0xff] %v6398_v63  ;;  %vm875_vm9 = vcmp.eq.s32.totalorder %v6398_v63, %v6292_v31 }
 0x1b3   : > { %v428_v2 = vpop.trf.xlu1 }
 0x1b4   : > { %5405 = vmatmul.mubr.msk.f32.vlgmr.msra.gmra.mrb[0].mxu1 %vm296_vm0, %v428_v2  ;;  %v460_v18 = vpop.trf.xlu0  ;;  %5435 = vmatmul.mubr.msk.bf16.vlgmr.msra.gmra.mrb[16].mxu0 %vm296_vm0, %v6016_v28 }
 0x1b5   : > { %672 = vmatprep.mubr.f32.mxu1 %v6093_v0  ;;  %1377 = vmatprep.mubr.bf16.mxu0 %v13652_v1 }
 0x1b7   : > { %v429_v3 = vpop.trf.xlu1 }
 0x1b8   : > { %5406 = vmatmul.mubr.msk.f32.gmra.mrb[2].mxu1 %vm296_vm0, %v429_v3  ;;  %v461_v19 = vpop.trf.xlu0 }
 0x1b9   : > { %678 = vmatprep.mubr.f32.mxu1 %v6093_v0 }
 0x1bb   : > { %v430_v4 = vpop.trf.xlu1 }
 0x1bc   : > { %5407 = vmatmul.mubr.msk.f32.gmra.mrb[4].mxu1 %vm296_vm0, %v430_v4  ;;  %v462_v20 = vpop.trf.xlu0  ;;  %5436 = vmatmul.mubr.msk.bf16.gmra.mrb[20].mxu0 %vm296_vm0, %v6017_v32  ;;  %v6493_v32 = vadd.s32 120, %v6290_v30 }
 0x1bd   : > { %684 = vmatprep.mubr.f32.mxu1 %v6093_v0  ;;  %1387 = vmatprep.mubr.bf16.mxu0 %v13652_v1 }
 0x1be   : > { %14336 = vst [vmem:[#allocation22_spill] sm:$0xff] %v6493_v32 }
 0x1bf   : > { %v431_v6 = vpop.trf.xlu1 }
 0x1c0   : > { %5408 = vmatmul.mubr.msk.f32.gmra.mrb[6].mxu1 %vm296_vm0, %v431_v6  ;;  %v463_v21 = vpop.trf.xlu0 }
 0x1c1   : > { %690 = vmatprep.mubr.f32.mxu1 %v6093_v0 }
 0x1c3   : > { %v432_v8 = vpop.trf.xlu1 }
 0x1c4   : > { %5409 = vmatmul.mubr.msk.f32.gmra.mrb[8].mxu1 %vm296_vm0, %v432_v8  ;;  %v464_v22 = vpop.trf.xlu0  ;;  %5437 = vmatmul.mubr.msk.bf16.gmra.mrb[24].mxu0 %vm296_vm0, %v6018_v52 }
 0x1c5   : > { %696 = vmatprep.mubr.f32.mxu1 %v6093_v0  ;;  %1397 = vmatprep.mubr.bf16.mxu0 %v13652_v1 }
 0x1c7   : > { %v433_v9 = vpop.trf.xlu1 }
 0x1c8   : > { %5410 = vmatmul.mubr.msk.f32.gmra.mrb[10].mxu1 %vm296_vm0, %v433_v9  ;;  %v465_v23 = vpop.trf.xlu0  ;;  %v6424_v9 = vadd.s32 80, %v6290_v30 }
 0x1c9   : > { %702 = vmatprep.mubr.f32.mxu1 %v6093_v0 }
 0x1ca   : > { %14331 = vst [vmem:[#allocation17_spill] sm:$0xff] %v6424_v9  ;;  %vm879_vm11 = vcmp.eq.s32.totalorder %v6424_v9, %v6292_v31 }
 0x1cb   : > { %v434_v11 = vpop.trf.xlu1 }
 0x1cc   : > { %5411 = vmatmul.mubr.msk.f32.gmra.mrb[12].mxu1 %vm296_vm0, %v434_v11  ;;  %v466_v24 = vpop.trf.xlu0 }
 0x1cd   : > { %708 = vmatprep.mubr.f32.mxu1 %v6093_v0 }
 0x1cf   : > { %v435_v13 = vpop.trf.xlu1 }
 0x1d0   : > { %5412 = vmatmul.mubr.msk.f32.gmra.mrb[14].mxu1 %vm296_vm0, %v435_v13  ;;  %v467_v25 = vpop.trf.xlu0  ;;  %v6019_v13 = vld [vmem:[%s13644_s3 + $0x18] sm:$0xff]  }
 0x1d1   : > { %714 = vmatprep.mubr.f32.mxu1 %v6093_v0  ;;  %5438 = vmatmul.mubr.msk.bf16.gmra.mrb[28].mxu0 %vm296_vm0, %v6019_v13 }
 0x1d3   : > { %v436_v14 = vpop.trf.xlu1 }
 0x1d4   : > { %5413 = vmatmul.mubr.msk.f32.gmra.mrb[16].mxu1 %vm296_vm0, %v436_v14  ;;  %v468_v26 = vpop.trf.xlu0  ;;  %v6440_v14 = vadd.s32 88, %v6290_v30 }
 0x1d5   : > { %720 = vmatprep.mubr.f32.mxu1 %v6093_v0 }
 0x1d6   : > { %14332 = vst [vmem:[#allocation18_spill] sm:$0xff] %v6440_v14  ;;  %vm881_vm12 = vcmp.eq.s32.totalorder %v6440_v14, %v6292_v31 }
 0x1d7   : > { %v437_v16 = vpop.trf.xlu1 }
 0x1d8   : > { %5414 = vmatmul.mubr.msk.f32.gmra.mrb[18].mxu1 %vm296_vm0, %v437_v16  ;;  %v469_v27 = vpop.trf.xlu0 }
 0x1d9   : > { %726 = vmatprep.mubr.f32.mxu1 %v6093_v0 }
 0x1dc   : > { %5415 = vmatmul.mubr.msk.f32.gmra.mrb[20].mxu1 %vm296_vm0, %v454_v5  ;;  %v6411_v5 = vadd.s32 72, %v6290_v30 }
 0x1dd   : > { %732 = vmatprep.mubr.f32.mxu1 %v6093_v0 }
 0x1de   : > { %14330 = vst [vmem:[#allocation16_spill] sm:$0xff] %v6411_v5  ;;  %vm877_vm10 = vcmp.eq.s32.totalorder %v6411_v5, %v6292_v31 }
 0x1e0   : > { %5416 = vmatmul.mubr.msk.f32.gmra.mrb[22].mxu1 %vm296_vm0, %v455_v7 }
 0x1e1   : > { %738 = vmatprep.mubr.f32.mxu1 %v6093_v0 }
 0x1e4   : > { %5417 = vmatmul.mubr.msk.f32.gmra.mrb[24].mxu1 %vm296_vm0, %v456_v10 }
 0x1e5   : > { %744 = vmatprep.mubr.f32.mxu1 %v6093_v0 }
 0x1e8   : > { %5418 = vmatmul.mubr.msk.f32.gmra.mrb[26].mxu1 %vm296_vm0, %v457_v12 }
 0x1e9   : > { %750 = vmatprep.mubr.f32.mxu1 %v6093_v0 }
 0x1ec   : > { %5419 = vmatmul.mubr.msk.f32.gmra.mrb[28].mxu1 %vm296_vm0, %v458_v15 }
 0x1ed   : > { %756 = vmatprep.mubr.f32.mxu1 %v6093_v0 }
 0x1f0   : > { %5420 = vmatmul.mubr.msk.f32.gmra.mrb[30].mxu1 %vm296_vm0, %v459_v17 }
 0x1f1   : > { %762 = vmatprep.mubr.f32.mxu1 %v6093_v0 }
 0x1f4   : > { %5421 = vmatmul.mubr.msk.f32.gmra.mrb[32].mxu1 %vm296_vm0, %v460_v18  ;;  %v6454_v18 = vadd.s32 96, %v6290_v30 }
 0x1f5   : > { %768 = vmatprep.mubr.f32.mxu1 %v6093_v0 }
 0x1f6   : > { %14333 = vst [vmem:[#allocation19_spill] sm:$0xff] %v6454_v18  ;;  %vm883_vm13 = vcmp.eq.s32.totalorder %v6454_v18, %v6292_v31 }
 0x1f8   : > { %5422 = vmatmul.mubr.msk.f32.gmra.mrb[34].mxu1 %vm296_vm0, %v461_v19 }
 0x1f9   : > { %774 = vmatprep.mubr.f32.mxu1 %v6093_v0 }
 0x1fc   : > { %5423 = vmatmul.mubr.msk.f32.gmra.mrb[36].mxu1 %vm296_vm0, %v462_v20 }
 0x1fd   : > { %780 = vmatprep.mubr.f32.mxu1 %v6093_v0 }
 0x200   : > { %5424 = vmatmul.mubr.msk.f32.gmra.mrb[38].mxu1 %vm296_vm0, %v463_v21 }
 0x201   : > { %786 = vmatprep.mubr.f32.mxu1 %v6093_v0 }
 0x204   : > { %5425 = vmatmul.mubr.msk.f32.gmra.mrb[40].mxu1 %vm296_vm0, %v464_v22  ;;  %v6467_v22 = vadd.s32 104, %v6290_v30 }
 0x205   : > { %792 = vmatprep.mubr.f32.mxu1 %v6093_v0 }
 0x206   : > { %14334 = vst [vmem:[#allocation20_spill] sm:$0xff] %v6467_v22  ;;  %vm885_vm14 = vcmp.eq.s32.totalorder %v6467_v22, %v6292_v31 }
 0x208   : > { %5426 = vmatmul.mubr.msk.f32.gmra.mrb[42].mxu1 %vm296_vm0, %v465_v23 }
 0x209   : > { %798 = vmatprep.mubr.f32.mxu1 %v6093_v0 }
 0x20c   : > { %5427 = vmatmul.mubr.msk.f32.gmra.mrb[44].mxu1 %vm296_vm0, %v466_v24 }
 0x20d   : > { %804 = vmatprep.mubr.f32.mxu1 %v6093_v0 }
 0x210   : > { %5428 = vmatmul.mubr.msk.f32.gmra.mrb[46].mxu1 %vm296_vm0, %v467_v25 }
 0x211   : > { %810 = vmatprep.mubr.f32.mxu1 %v6093_v0 }
 0x214   : > { %5429 = vmatmul.mubr.msk.f32.gmra.mrb[48].mxu1 %vm296_vm0, %v468_v26  ;;  %v6480_v26 = vadd.s32 112, %v6290_v30 }
 0x215   : > { %816 = vmatprep.mubr.f32.mxu1 %v6093_v0  ;;  %v6297_v0 = vadd.s32 8, %v6290_v30 }
 0x216   : > { %14335 = vst [vmem:[#allocation21_spill] sm:$0xff] %v6480_v26  ;;  %vm887_vm15 = vcmp.eq.s32.totalorder %v6480_v26, %v6292_v31 }
 0x217   : > { %14322 = vst [vmem:[#allocation8_spill] sm:$0xff] %v6297_v0  ;;  %vm13649_vm2 = vcmp.eq.s32.totalorder %v6297_v0, %v6292_v31 }
 0x218   : > { %5430 = vmatmul.mubr.msk.f32.gmra.mrb[50].mxu1 %vm296_vm0, %v469_v27  ;;  %vm889_vm0 = vcmp.eq.s32.totalorder %v6493_v32, %v6292_v31 }
 0x26f   : > { %v6302_v33 = vpop.f32.mrb[4].mxu0 }
 0x270   : > { %v6304_v34 = vpop.f32.mrb[5].mxu0  ;;  %v941_v35 = vsel %vm13650_vm1, %v6302_v33, 0.0 }
 0x271   : > { %1006 = vadd.xlane.f32.xlu1 %v941_v35 }
 0x273   : > { %v6317_v37 = vpop.f32.mrb[6].mxu0 }
 0x274   : > { %v6319_v38 = vpop.f32.mrb[7].mxu0  ;;  %v943_v39 = vsel %vm13649_vm2, %v6317_v37, 0.0 }
 0x275   : > { %1009 = vadd.xlane.f32.xlu0 %v943_v39 }
 0x277   : > { %v6330_v41 = vpop.f32.mrb[8].mxu0 }
 0x278   : > { %v6332_v42 = vpop.f32.mrb[9].mxu0  ;;  %v945_v43 = vsel %vm863_vm3, %v6330_v41, 0.0 }
 0x279   : > { %1012 = vadd.xlane.f32.xlu1 %v945_v43 }
 0x27b   : > { %v6343_v45 = vpop.f32.mrb[10].mxu0 }
 0x27c   : > { %v6345_v46 = vpop.f32.mrb[11].mxu0  ;;  %v947_v47 = vsel %vm865_vm4, %v6343_v45, 0.0 }
 0x27d   : > { %1015 = vadd.xlane.f32.xlu1 %v947_v47  ;;  %v6506_v47 = vadd.s32 128, %v6290_v30 }
 0x27f   : > { %v6356_v49 = vpop.f32.mrb[12].mxu0  ;;  %14337 = vst [vmem:[#allocation23_spill] sm:$0xff] %v6506_v47 }
 0x280   : > { %v6358_v50 = vpop.f32.mrb[13].mxu0  ;;  %v949_v51 = vsel %vm867_vm5, %v6356_v49, 0.0 }
 0x281   : > { %1018 = vadd.xlane.f32.xlu1 %v949_v51  ;;  %v6509_v51 = vadd.s32 128, %v6292_v31 }
 0x283   : > { %v6373_v54 = vpop.f32.mrb[14].mxu0  ;;  %14338 = vst [vmem:[#allocation24_spill] sm:$0xff] %v6509_v51  ;;  %vm13651_vm2 = vcmp.eq.s32.totalorder %v6506_v47, %v6509_v51 }
 0x284   : > { %v6376_v55 = vpop.f32.mrb[15].mxu0  ;;  %v951_v58 = vsel %vm869_vm6, %v6373_v54, 0.0 }
 0x285   : > { %1021 = vadd.xlane.f32.xlu1 %v951_v58 }
 0x287   : > { %v6387_v60 = vpop.f32.mrb[0].mxu1 }
 0x288   : > { %v6389_v61 = vpop.f32.mrb[1].mxu1  ;;  %v953_v62 = vsel %vm871_vm7, %v6387_v60, 0.0 }
 0x289   : > { %1024 = vadd.xlane.f32.xlu1 %v953_v62 }
 0x28b   : > { %v6400_v2 = vpop.f32.mrb[2].mxu1 }
 0x28c   : > { %v6402_v3 = vpop.f32.mrb[3].mxu1  ;;  %v955_v4 = vsel %vm873_vm8, %v6400_v2, 0.0 }
 0x28d   : > { %1027 = vadd.xlane.f32.xlu1 %v955_v4  ;;  %v6522_v4 = vadd.s32 136, %v6290_v30 }
 0x28f   : > { %v6413_v6 = vpop.f32.mrb[4].mxu1  ;;  %14339 = vst [vmem:[#allocation25_spill] sm:$0xff] %v6522_v4  ;;  %vm13653_vm1 = vcmp.eq.s32.totalorder %v6522_v4, %v6509_v51 }
 0x290   : > { %v6415_v7 = vpop.f32.mrb[5].mxu1  ;;  %v957_v8 = vsel %vm875_vm9, %v6413_v6, 0.0 }
 0x291   : > { %1030 = vadd.xlane.f32.xlu1 %v957_v8 }
 0x293   : > { %v6426_v10 = vpop.f32.mrb[6].mxu1 }
 0x294   : > { %v6428_v11 = vpop.f32.mrb[7].mxu1  ;;  %v959_v12 = vsel %vm877_vm10, %v6426_v10, 0.0 }
 0x295   : > { %1033 = vadd.xlane.f32.xlu1 %v959_v12 }
 0x297   : > { %v6443_v15 = vpop.f32.mrb[8].mxu1 }
 0x298   : > { %v6445_v16 = vpop.f32.mrb[9].mxu1  ;;  %v961_v17 = vsel %vm879_vm11, %v6443_v15, 0.0 }
 0x299   : > { %1036 = vadd.xlane.f32.xlu1 %v961_v17  ;;  %v6535_v17 = vadd.s32 144, %v6290_v30 }
 0x29b   : > { %v6456_v19 = vpop.f32.mrb[10].mxu1  ;;  %14340 = vst [vmem:[#allocation26_spill] sm:$0xff] %v6535_v17 }
 0x29c   : > { %v6458_v20 = vpop.f32.mrb[11].mxu1  ;;  %v963_v21 = vsel %vm881_vm12, %v6456_v19, 0.0 }
 0x29d   : > { %1039 = vadd.xlane.f32.xlu1 %v963_v21 }
 0x29f   : > { %v6469_v23 = vpop.f32.mrb[12].mxu1 }
 0x2a0   : > { %v6471_v24 = vpop.f32.mrb[13].mxu1  ;;  %v965_v25 = vsel %vm883_vm13, %v6469_v23, 0.0 }
 0x2a1   : > { %1042 = vadd.xlane.f32.xlu0 %v965_v25 }
 0x2a3   : > { %v6482_v27 = vpop.f32.mrb[14].mxu1 }
 0x2a4   : > { %v6484_v28 = vpop.f32.mrb[15].mxu1  ;;  %v967_v29 = vsel %vm885_vm14, %v6482_v27, 0.0 }
 0x2a5   : > { %1045 = vadd.xlane.f32.xlu1 %v967_v29 }
 0x2a7   : > { %v6495_v35 = vpop.f32.mrb[16].mxu1 }
 0x2a8   : > { %v6497_v39 = vpop.f32.mrb[17].mxu1  ;;  %v969_v43 = vsel %vm887_vm15, %v6495_v35, 0.0 }
 0x2a9   : > { %1048 = vadd.xlane.f32.xlu0 %v969_v43  ;;  %v6548_v43 = vadd.s32 152, %v6290_v30 }
 0x2ab   : > { %v6511_v52 = vpop.f32.mrb[18].mxu1  ;;  %14341 = vst [vmem:[#allocation27_spill] sm:$0xff] %v6548_v43 }
 0x2ac   : > { %v6513_v58 = vpop.f32.mrb[19].mxu1  ;;  %v971_v62 = vsel %vm889_vm0, %v6511_v52, 0.0 }
 0x2ad   : > { %1051 = vadd.xlane.f32.xlu1 %v971_v62 }
 0x2af   : > { %v6524_v8 = vpop.f32.mrb[20].mxu1 }
 0x2b0   : > { %v6526_v12 = vpop.f32.mrb[21].mxu1 }
 0x2b1   : > { %v974_v13 = vsel %vm13651_vm2, %v6526_v12, 0.0  ;;  %vm13660_vm2 = vcmp.eq.s32.totalorder %v6535_v17, %v6509_v51 }
 0x2b2   : > { %1054 = vadd.xlane.f32.xlu0 %v974_v13 }
 0x2b3   : > { %v6537_v21 = vpop.f32.mrb[22].mxu1 }
 0x2b4   : > { %v6539_v25 = vpop.f32.mrb[23].mxu1 }
 0x2b5   : > { %v976_v29 = vsel %vm13653_vm1, %v6539_v25, 0.0  ;;  %vm13667_vm1 = vcmp.eq.s32.totalorder %v6548_v43, %v6509_v51 }
 0x2b6   : > { %1057 = vadd.xlane.f32.xlu1 %v976_v29  ;;  %v6561_v29 = vadd.s32 160, %v6290_v30 }
 0x2b7   : > { %v6550_v62 = vpop.f32.mrb[24].mxu1 }
 0x2b8   : > { %v6552_v13 = vpop.f32.mrb[25].mxu1  ;;  %14342 = vst [vmem:[#allocation28_spill] sm:$0xff] %v6561_v29 }
 0x2b9   : > { %v978_v1 = vsel %vm13660_vm2, %v6552_v13, 0.0  ;;  %vm13674_vm2 = vcmp.eq.s32.totalorder %v6561_v29, %v6509_v51 }
 0x2ba   : > { %1060 = vadd.xlane.f32.xlu0 %v978_v1  ;;  %v6574_v1 = vadd.s32 168, %v6290_v30 }
 0x2bb   : > { %v6563_v4 = vpop.f32.mrb[26].mxu1 }
 0x2bc   : > { %v6565_v47 = vpop.f32.mrb[27].mxu1  ;;  %14343 = vst [vmem:[#allocation29_spill] sm:$0xff] %v6574_v1 }
 0x2bd   : > { %v980_v32 = vsel %vm13667_vm1, %v6565_v47, 0.0  ;;  %vm13681_vm1 = vcmp.eq.s32.totalorder %v6574_v1, %v6509_v51 }
 0x2be   : > { %1063 = vadd.xlane.f32.xlu1 %v980_v32  ;;  %v6587_v32 = vadd.s32 176, %v6290_v30 }
 0x2bf   : > { %v6576_v17 = vpop.f32.mrb[28].mxu1 }
 0x2c0   : > { %v6578_v26 = vpop.f32.mrb[29].mxu1  ;;  %14344 = vst [vmem:[#allocation30_spill] sm:$0xff] %v6587_v32 }
 0x2c1   : > { %v982_v22 = vsel %vm13674_vm2, %v6578_v26, 0.0  ;;  %vm13688_vm2 = vcmp.eq.s32.totalorder %v6587_v32, %v6509_v51 }
 0x2c2   : > { %1066 = vadd.xlane.f32.xlu0 %v982_v22  ;;  %v6600_v22 = vadd.s32 184, %v6290_v30 }
 0x2c3   : > { %v6589_v43 = vpop.f32.mrb[30].mxu1 }
 0x2c4   : > { %v6591_v18 = vpop.f32.mrb[31].mxu1  ;;  %14345 = vst [vmem:[#allocation31_spill] sm:$0xff] %v6600_v22 }
 0x2c5   : > { %v984_v14 = vsel %vm13681_vm1, %v6591_v18, 0.0  ;;  %vm13695_vm1 = vcmp.eq.s32.totalorder %v6600_v22, %v6509_v51 }
 0x2c6   : > { %1069 = vadd.xlane.f32.xlu1 %v984_v14  ;;  %v6613_v14 = vadd.s32 192, %v6290_v30 }
 0x2c7   : > { %v6602_v29 = vpop.f32.mrb[32].mxu1 }
 0x2c8   : > { %v6604_v9 = vpop.f32.mrb[33].mxu1  ;;  %14346 = vst [vmem:[#allocation32_spill] sm:$0xff] %v6613_v14 }
 0x2c9   : > { %v986_v5 = vsel %vm13688_vm2, %v6604_v9, 0.0  ;;  %vm13702_vm2 = vcmp.eq.s32.totalorder %v6613_v14, %v6509_v51 }
 0x2ca   : > { %1072 = vadd.xlane.f32.xlu0 %v986_v5  ;;  %v6626_v5 = vadd.s32 200, %v6290_v30 }
 0x2cb   : > { %v6615_v1 = vpop.f32.mrb[34].mxu1 }
 0x2cc   : > { %14347 = vst [vmem:[#allocation33_spill] sm:$0xff] %v6615_v1  ;;  %v6617_v63 = vpop.f32.mrb[35].mxu1  ;;  %14349 = vst [vmem:[#allocation35_spill] sm:$0xff] %v6626_v5  ;;  %v1102_v1 = vmul.f32 2.0, %v6304_v34  ;;  %v1106_v34 = vmul.f32 2.0, %v6332_v42 }
 0x2cd   : > { %14348 = vst [vmem:[#allocation34_spill] sm:$0xff] %v6617_v63  ;;  %v988_v59 = vsel %vm13695_vm1, %v6617_v63, 0.0  ;;  %vm13709_vm1 = vcmp.eq.s32.totalorder %v6626_v5, %v6509_v51 }
 0x2ce   : > { %1075 = vadd.xlane.f32.xlu1 %v988_v59  ;;  %v6639_v59 = vadd.s32 208, %v6290_v30 }
 0x2cf   : > { %v6628_v32 = vpop.f32.mrb[36].mxu1 }
 0x2d0   : > { %14350 = vst [vmem:[#allocation36_spill] sm:$0xff] %v6628_v32  ;;  %v6630_v53 = vpop.f32.mrb[37].mxu1  ;;  %14352 = vst [vmem:[#allocation38_spill] sm:$0xff] %v6639_v59 }
 0x2d1   : > { %14351 = vst [vmem:[#allocation37_spill] sm:$0xff] %v6630_v53  ;;  %v990_v48 = vsel %vm13702_vm2, %v6630_v53, 0.0  ;;  %vm13714_vm2 = vcmp.eq.s32.totalorder %v6639_v59, %v6509_v51 }
 0x2d2   : > { %1078 = vadd.xlane.f32.xlu0 %v990_v48  ;;  %v6652_v48 = vadd.s32 216, %v6290_v30 }
 0x2d3   : > { %v6641_v22 = vpop.f32.mrb[38].mxu1 }
 0x2d4   : > { %14353 = vst [vmem:[#allocation39_spill] sm:$0xff] %v6641_v22  ;;  %v6643_v44 = vpop.f32.mrb[39].mxu1  ;;  %14355 = vst [vmem:[#allocation41_spill] sm:$0xff] %v6652_v48 }
 0x2d5   : > { %14354 = vst [vmem:[#allocation40_spill] sm:$0xff] %v6643_v44  ;;  %v992_v31 = vsel %vm13709_vm1, %v6643_v44, 0.0  ;;  %vm13718_vm1 = vcmp.eq.s32.totalorder %v6652_v48, %v6509_v51 }
 0x2d6   : > { %1081 = vadd.xlane.f32.xlu1 %v992_v31  ;;  %v6665_v31 = vadd.s32 224, %v6290_v30 }
 0x2d7   : > { %v6654_v14 = vpop.f32.mrb[40].mxu1 }
 0x2d8   : > { %14356 = vst [vmem:[#allocation42_spill] sm:$0xff] %v6654_v14  ;;  %v6656_v0 = vpop.f32.mrb[41].mxu1  ;;  %14358 = vst [vmem:[#allocation44_spill] sm:$0xff] %v6665_v31 }
 0x2d9   : > { %14357 = vst [vmem:[#allocation43_spill] sm:$0xff] %v6656_v0  ;;  %v994_v40 = vsel %vm13714_vm2, %v6656_v0, 0.0  ;;  %vm13722_vm2 = vcmp.eq.s32.totalorder %v6665_v31, %v6509_v51 }
 0x2da   : > { %1084 = vadd.xlane.f32.xlu0 %v994_v40  ;;  %v6678_v40 = vadd.s32 232, %v6290_v30 }
 0x2db   : > { %v6667_v5 = vpop.f32.mrb[42].mxu1 }
 0x2dc   : > { %14359 = vst [vmem:[#allocation45_spill] sm:$0xff] %v6667_v5  ;;  %v6669_v36 = vpop.f32.mrb[43].mxu1  ;;  %14361 = vst [vmem:[#allocation47_spill] sm:$0xff] %v6678_v40 }
 0x2dd   : > { %14360 = vst [vmem:[#allocation46_spill] sm:$0xff] %v6669_v36  ;;  %v996_v14 = vsel %vm13718_vm1, %v6669_v36, 0.0  ;;  %vm13726_vm1 = vcmp.eq.s32.totalorder %v6678_v40, %v6509_v51  ;;  %v928_v40 = vrot.slane %v6217_v56, 4 }
 0x2de   : > { %1087 = vadd.xlane.f32.xlu1 %v996_v14  ;;  %v6691_v14 = vadd.s32 240, %v6290_v30 }
 0x2df   : > { %v6680_v59 = vpop.f32.mrb[44].mxu1 }
 0x2e0   : > { %14362 = vst [vmem:[#allocation48_spill] sm:$0xff] %v6680_v59  ;;  %v6682_v0 = vpop.f32.mrb[45].mxu1  ;;  %14364 = vst [vmem:[#allocation50_spill] sm:$0xff] %v6691_v14 }
 0x2e1   : > { %14363 = vst [vmem:[#allocation49_spill] sm:$0xff] %v6682_v0  ;;  %v998_v5 = vsel %vm13722_vm2, %v6682_v0, 0.0  ;;  %vm920_vm2 = vcmp.eq.s32.totalorder %v6691_v14, %v6509_v51 }
 0x2e2   : > { %1090 = vadd.xlane.f32.xlu0 %v998_v5  ;;  %v6704_v5 = vadd.s32 248, %v6290_v30 }
 0x2e3   : > { %v6693_v48 = vpop.f32.mrb[46].mxu1 }
 0x2e4   : > { %14365 = vst [vmem:[#allocation51_spill] sm:$0xff] %v6693_v48  ;;  %v6695_v36 = vpop.f32.mrb[47].mxu1  ;;  %14367 = vst [vmem:[#allocation53_spill] sm:$0xff] %v6704_v5 }
 0x2e5   : > { %14366 = vst [vmem:[#allocation52_spill] sm:$0xff] %v6695_v36  ;;  %v1000_v59 = vsel %vm13726_vm1, %v6695_v36, 0.0  ;;  %vm922_vm1 = vcmp.eq.s32.totalorder %v6704_v5, %v6509_v51  ;;  %v1408_v5 = vld [vmem:[%s13645_s4] sm:$0xff] }
 0x2e6   : > { %1093 = vadd.xlane.f32.xlu1 %v1000_v59  ;;  %v935_v59 = vrot.slane %v6219_v57, 4 }
 0x2e7   : > { %v6706_v31 = vpop.f32.mrb[48].mxu1 }
 0x2e8   : > { %14368 = vst [vmem:[#allocation54_spill] sm:$0xff] %v6706_v31  ;;  %v6708_v0 = vpop.f32.mrb[49].mxu1  ;;  %v936_v14 = vadd.f32 %v935_v59, %v6219_v57 }
 0x2e9   : > { %14369 = vst [vmem:[#allocation55_spill] sm:$0xff] %v6708_v0  ;;  %v1002_v48 = vsel %vm920_vm2, %v6708_v0, 0.0 }
 0x2ea   : > { %1096 = vadd.xlane.f32.xlu0 %v1002_v48  ;;  %v929_v48 = vadd.f32 %v928_v40, %v6217_v56  ;;  %v937_v0 = vrot.slane %v936_v14, 2 }
 0x2eb   : > { %v6718_v36 = vpop.f32.mrb[50].mxu1 }
 0x2ec   : > { %14370 = vst [vmem:[#allocation56_spill] sm:$0xff] %v6718_v36  ;;  %v6720_v30 = vpop.f32.mrb[51].mxu1  ;;  %v930_v44 = vrot.slane %v929_v48, 2  ;;  %v938_v22 = vadd.f32 %v937_v0, %v936_v14  ;;  %v1101_v36 = vmul.f32 2.0, %v6302_v33  ;;  %v1103_v0 = vmul.f32 2.0, %v6317_v37 }
 0x2ed   : > { %v1004_v31 = vsel %vm922_vm1, %v6720_v30, 0.0  ;;  %v1105_v33 = vmul.f32 2.0, %v6330_v41  ;;  %v1108_v37 = vmul.f32 2.0, %v6345_v46  ;;  %v6756_v41 = vmul.f32 2.0, %v6358_v50 }
 0x2ee   : > { %1099 = vadd.xlane.f32.xlu1 %v1004_v31  ;;  %v931_v53 = vadd.f32 %v930_v44, %v929_v48  ;;  %v939_v32 = vrot.slane %v938_v22, 1  ;;  %v1104_v44 = vmul.f32 2.0, %v6319_v38  ;;  %v6753_v38 = vmul.f32 2.0, %v6356_v49 }
 0x2ef   : > { %v6771_v46 = vmul.f32 2.0, %v6400_v2  ;;  %v6774_v49 = vmul.f32 2.0, %v6402_v3  ;;  %v6777_v50 = vmul.f32 2.0, %v6413_v6  ;;  %v6792_v2 = vmul.f32 2.0, %v6428_v11 }
 0x2f0   : > { %v932_v63 = vrot.slane %v931_v53, 1  ;;  %v6733_v31 = vadd.f32 %v939_v32, %v938_v22  ;;  %v6765_v22 = vmul.f32 2.0, %v6387_v60  ;;  %v6795_v3 = vmul.f32 2.0, %v6443_v15 }
 0x2f1   : > { %v6798_v6 = vmul.f32 2.0, %v6445_v16  ;;  %v6804_v48 = vmul.f32 2.0, %v6458_v20  ;;  %v6813_v11 = vmul.f32 2.0, %v6482_v27  ;;  %v6816_v15 = vmul.f32 2.0, %v6484_v28 }
 0x2f2   : > { %v6735_v57 = vadd.f32 %v932_v63, %v931_v53  ;;  %v1107_v53 = vmul.f32 2.0, %v6343_v45  ;;  %v6759_v63 = vmul.f32 2.0, %v6373_v54  ;;  %v6768_v45 = vmul.f32 2.0, %v6389_v61 }
 0x2f3   : > { %v6780_v54 = vmul.f32 2.0, %v6415_v7  ;;  %v6789_v61 = vmul.f32 2.0, %v6426_v10  ;;  %v6810_v10 = vmul.f32 2.0, %v6471_v24  ;;  %v6822_v20 = vmul.f32 2.0, %v6497_v39 }
 0x2f4   : > { %v6828_v24 = vmul.f32 2.0, %v6513_v58  ;;  %v6831_v27 = vmul.f32 2.0, %v6524_v8  ;;  %v6834_v28 = vmul.f32 2.0, %v6526_v12  ;;  %v6839_v39 = vmul.f32 2.0, %v6537_v21 }
 0x2f5   : > { %v6848_v8 = vmul.f32 2.0, %v6552_v13  ;;  %v6851_v12 = vmul.f32 2.0, %v6563_v4  ;;  %v6857_v21 = vmul.f32 2.0, %v6576_v17  ;;  %v6865_v13 = vmul.f32 2.0, %v6589_v43  ;;  %v14374_v43 = vld [vmem:[#allocation33_spill] sm:$0xff] }
 0x2f6   : > { %v6868_v4 = vmul.f32 2.0, %v6591_v18 }
 0x2f8   : > { %14371 = vst [vmem:[#allocation57_spill] sm:$0xff] %v6868_v4 }
 0x2fe   : > { %v1007_v51 = vpop.xlane.xlu1 %1006 }
 0x2ff   : > { %v1165_v56 = vsub.f32 %v1007_v51, %v1101_v36  ;;  %v1166_v40 = vsub.f32 %v1007_v51, %v1102_v1  ;;  %v5242_v36 = vld [vmem:[%s13647_s6] sm:$0xff]  ;;  %v6762_v51 = vmul.f32 2.0, %v6376_v55 }
 0x300   : > { %1414 = vperm.xlu0 %6014, %v1408_v5   ;;  %v6801_v5 = vmul.f32 2.0, %v6456_v19  ;;  %v6819_v19 = vmul.f32 2.0, %v6495_v35 }
 0x301   : > { %v6742_v14 = vadd.f32 %v1165_v56, %v6735_v57  ;;  %v6745_v59 = vadd.f32 %v1166_v40, %v6733_v31  ;;  %v6807_v56 = vmul.f32 2.0, %v6469_v23  ;;  %v6825_v23 = vmul.f32 2.0, %v6511_v52 }
 0x302   : > { %v1010_v42 = vpop.xlane.xlu0 %1009  ;;  %v6842_v52 = vmul.f32 2.0, %v6539_v25 }
 0x303   : > { %v1167_v1 = vsub.f32 %v1010_v42, %v1103_v0  ;;  %v1168_v32 = vsub.f32 %v1010_v42, %v1104_v44 }
 0x304   : > { %5246 = vperm.xlu0 %6014, %v5242_v36   ;;  %v6854_v36 = vmul.f32 2.0, %v6565_v47  ;;  %v1445_v47 = vmax.f32 %v6745_v59, 0.0 }
 0x305   : > { %v6783_v55 = vadd.f32 %v1167_v1, %v6735_v57  ;;  %v6786_v60 = vadd.f32 %v1168_v32, %v6733_v31 }
 0x306   : > { %v1013_v7 = vpop.xlane.xlu1 %1012 }
 0x307   : > { %v1169_v16 = vsub.f32 %v1013_v7, %v1105_v33  ;;  %v1170_v40 = vsub.f32 %v1013_v7, %v1106_v34  ;;  %v6845_v34 = vmul.f32 2.0, %v6550_v62  ;;  %v6862_v62 = vmul.f32 2.0, %v6578_v26 }
 0x308   : > { %v6877_v26 = vmul.f32 2.0, %v6604_v9 }
 0x309   : > { %v1233_v0 = vadd.f32 %v1169_v16, %v6735_v57  ;;  %v1234_v35 = vadd.f32 %v1170_v40, %v6733_v31  ;;  %v6874_v16 = vmul.f32 2.0, %v6602_v29  ;;  %v6880_v40 = vmul.f32 2.0, %v14374_v43  ;;  %v14382_v43 = vld [vmem:[#allocation39_spill] sm:$0xff] }
 0x30a   : > { %v1016_v44 = vpop.xlane.xlu1 %1015  ;;  %14373 = vst [vmem:[#allocation59_spill] sm:$0xff] %v6877_v26 }
 0x30b   : > { %v1171_v33 = vsub.f32 %v1016_v44, %v1107_v53  ;;  %v1172_v58 = vsub.f32 %v1016_v44, %v1108_v37  ;;  %v1448_v42 = vmax.f32 %v1233_v0, 0.0  ;;  %v1449_v1 = vmax.f32 %v1234_v35, 0.0  ;;  %14372 = vst [vmem:[#allocation58_spill] sm:$0xff] %v6874_v16  ;;  %14375 = vst [vmem:[#allocation33_spill] sm:$0xff] %v6880_v40 }
 0x30c   : > { %v1447_v0 = vmax.f32 %v6786_v60, 0.0  ;;  %v1509_v60 = vadd.f32 1.0, %v1445_v47 }
 0x30d   : > { %v1235_v25 = vadd.f32 %v1171_v33, %v6735_v57  ;;  %v1236_v53 = vadd.f32 %v1172_v58, %v6733_v31  ;;  %v1512_v59 = vadd.f32 1.0, %v1448_v42  ;;  %v14380_v58 = vld [vmem:[#allocation37_spill] sm:$0xff]  ;;  %v1513_v42 = vadd.f32 1.0, %v1449_v1 }
 0x30e   : > { %v1019_v37 = vpop.xlane.xlu1 %1018  ;;  %v6892_v9 = vmul.f32 2.0, %v14380_v58 }
 0x30f   : > { %v1450_v17 = vmax.f32 %v1235_v25, 0.0  ;;  %v1173_v32 = vsub.f32 %v1019_v37, %v6753_v38  ;;  %v1174_v7 = vsub.f32 %v1019_v37, %v6756_v41  ;;  %v1451_v18 = vmax.f32 %v1236_v53, 0.0  ;;  %v14376_v38 = vld [vmem:[#allocation34_spill] sm:$0xff]  ;;  %v14378_v41 = vld [vmem:[#allocation36_spill] sm:$0xff] }
 0x310   : > { %v6886_v33 = vmul.f32 2.0, %v14376_v38  ;;  %v6889_v29 = vmul.f32 2.0, %v14378_v41  ;;  %14381 = vst [vmem:[#allocation37_spill] sm:$0xff] %v6892_v9  ;;  %v6895_v53 = vmul.f32 2.0, %v14382_v43  ;;  %v1640_v9 = vand.u32 4294967040, %v1512_v59  ;;  %v14391_v59 = vld [vmem:[#allocation46_spill] sm:$0xff] }
 0x311   : > { %v1237_v35 = vadd.f32 %v1173_v32, %v6735_v57  ;;  %v1238_v44 = vadd.f32 %v1174_v7, %v6733_v31  ;;  %v1514_v25 = vadd.f32 1.0, %v1450_v17  ;;  %v1515_v32 = vadd.f32 1.0, %v1451_v18 }
 0x312   : > { %14377 = vst [vmem:[#allocation34_spill] sm:$0xff] %v6886_v33  ;;  %14379 = vst [vmem:[#allocation36_spill] sm:$0xff] %v6889_v29  ;;  %v1022_v37 = vpop.xlane.xlu1 %1021  ;;  %v14384_v33 = vld [vmem:[#allocation40_spill] sm:$0xff]  ;;  %v14386_v29 = vld [vmem:[#allocation42_spill] sm:$0xff]  ;;  %v1511_v17 = vadd.f32 1.0, %v1447_v0 }
 0x313   : > { %14383 = vst [vmem:[#allocation39_spill] sm:$0xff] %v6895_v53  ;;  %v1453_v40 = vmax.f32 %v1238_v44, 0.0  ;;  %v1452_v26 = vmax.f32 %v1237_v35, 0.0  ;;  %v1175_v7 = vsub.f32 %v1022_v37, %v6759_v63  ;;  %v1176_v38 = vsub.f32 %v1022_v37, %v6762_v51  ;;  %v14388_v35 = vld [vmem:[#allocation43_spill] sm:$0xff]  ;;  %v14390_v63 = vld [vmem:[#allocation45_spill] sm:$0xff] }
 0x314   : > { %v6900_v41 = vmul.f32 2.0, %v14384_v33  ;;  %v6903_v58 = vmul.f32 2.0, %v14386_v29  ;;  %v1642_v16 = vand.u32 4294967040, %v1514_v25  ;;  %v6908_v44 = vmul.f32 2.0, %v14388_v35  ;;  %v14392_v53 = vld [vmem:[#allocation9_spill] sm:$0xff] }
 0x315   : > { %v1517_v43 = vadd.f32 1.0, %v1453_v40  ;;  %v1239_v47 = vadd.f32 %v1175_v7, %v6735_v57  ;;  %v1240_v1 = vadd.f32 %v1176_v38, %v6733_v31  ;;  %v6911_v51 = vmul.f32 2.0, %v14390_v63 }
 0x316   : > { %14385 = vst [vmem:[#allocation40_spill] sm:$0xff] %v6900_v41  ;;  %14387 = vst [vmem:[#allocation42_spill] sm:$0xff] %v6903_v58  ;;  %v1025_v18 = vpop.xlane.xlu1 %1024  ;;  %v1637_v33 = vand.u32 4294967040, %v1509_v60  ;;  %v1641_v37 = vand.u32 4294967040, %v1513_v42  ;;  %v1643_v41 = vand.u32 4294967040, %v1515_v32  ;;  %v1516_v29 = vadd.f32 1.0, %v1452_v26 }
 0x317   : > { %14389 = vst [vmem:[#allocation43_spill] sm:$0xff] %v6908_v44  ;;  %v1455_v58 = vmax.f32 %v1240_v1, 0.0  ;;  %v1177_v0 = vsub.f32 %v1025_v18, %v6765_v22  ;;  %v6915_v40 = vmul.f32 2.0, %v14391_v59  ;;  %v1639_v25 = vand.u32 4294967040, %v1511_v17  ;;  %v14393_v44 = vld [vmem:[#allocation10_spill] sm:$0xff]  ;;  %v14394_v32 = vld [vmem:[#allocation48_spill] sm:$0xff] }
 0x318   : > { %v1454_v7 = vmax.f32 %v1239_v47, 0.0  ;;  %v1178_v38 = vsub.f32 %v1025_v18, %v6768_v45  ;;  %v1704_v35 = vor.u32 %v1640_v9, %v14392_v53  ;;  %v1706_v4 = vor.u32 %v1642_v16, %v14393_v44  ;;  %v14395_v17 = vld [vmem:[#allocation6_spill] sm:$0xff] }
 0x319   : > { %v1645_v63 = vand.u32 4294967040, %v1517_v43  ;;  %v1241_v60 = vadd.f32 %v1177_v0, %v6735_v57  ;;  %v6922_v26 = vmul.f32 2.0, %v14394_v32  ;;  %v1519_v1 = vadd.f32 1.0, %v1455_v58  ;;  %v14399_v32 = vld [vmem:[#allocation8_spill] sm:$0xff] }
 0x31a   : > { %v1028_v42 = vpop.xlane.xlu1 %1027  ;;  %v1242_v22 = vadd.f32 %v1178_v38, %v6733_v31  ;;  %v6927_v47 = vor.u32 %v1637_v33, %v14395_v17  ;;  %v6930_v45 = vor.u32 %v1641_v37, %v14392_v53  ;;  %v6933_v16 = vor.u32 %v1643_v41, %v14393_v44  ;;  %v14403_v37 = vld [vmem:[#allocation11_spill] sm:$0xff] }
 0x31b   : > { %v1179_v59 = vsub.f32 %v1028_v42, %v6771_v46  ;;  %v1644_v9 = vand.u32 4294967040, %v1516_v29  ;;  %v1518_v43 = vadd.f32 1.0, %v1454_v7  ;;  %v1180_v0 = vsub.f32 %v1028_v42, %v6774_v49  ;;  %v14400_v46 = vld [vmem:[#allocation7_spill] sm:$0xff] }
 0x31c   : > { %14396 = vst [vmem:[#allocation45_spill] sm:$0xff] %v6927_v47  ;;  %14397 = vst [vmem:[#allocation46_spill] sm:$0xff] %v6930_v45  ;;  %v1457_v18 = vmax.f32 %v1242_v22, 0.0  ;;  %v6938_v38 = vor.u32 %v1639_v25, %v14399_v32  ;;  %v6943_v33 = vsel %vm863_vm3, inf, %v1704_v35  ;;  %v6948_v41 = vsel %vm865_vm4, inf, %v1706_v4 }
 0x31d   : > { %14398 = vst [vmem:[#allocation9_spill] sm:$0xff] %v6933_v16  ;;  %v1243_v58 = vadd.f32 %v1179_v59, %v6735_v57  ;;  %14401 = vst [vmem:[#allocation10_spill] sm:$0xff] %v6943_v33  ;;  %v6951_v29 = vor.u32 %v1645_v63, %v14403_v37  ;;  %v1647_v49 = vand.u32 4294967040, %v1519_v1  ;;  %v1244_v22 = vadd.f32 %v1180_v0, %v6733_v31 }
 0x31e   : > { %14402 = vst [vmem:[#allocation48_spill] sm:$0xff] %v6948_v41  ;;  %v1031_v7 = vpop.xlane.xlu1 %1030  ;;  %v1521_v42 = vadd.f32 1.0, %v1457_v18  ;;  %v1929_v53 = vmin.f32 %v6927_v47, %v6930_v45  ;;  %v1930_v35 = vmin.f32 %v6938_v38, %v6933_v16  ;;  %v1456_v59 = vmax.f32 %v1241_v60, 0.0  ;;  %v14405_v47 = vld [vmem:[#allocation12_spill] sm:$0xff]  ;;  %v14407_v60 = vld [vmem:[#allocation13_spill] sm:$0xff] }
 0x31f   : > { %14404 = vst [vmem:[#allocation7_spill] sm:$0xff] %v6951_v29  ;;  %v1181_v25 = vsub.f32 %v1031_v7, %v6777_v50  ;;  %v1182_v4 = vsub.f32 %v1031_v7, %v6780_v54  ;;  %v1708_v44 = vor.u32 %v1644_v9, %v14403_v37  ;;  %v1646_v63 = vand.u32 4294967040, %v1518_v43 }
 0x320   : > { %v1649_v32 = vand.u32 4294967040, %v1521_v42  ;;  %v1459_v17 = vmax.f32 %v1244_v22, 0.0  ;;  %v1892_v1 = vmin.f32 %v6948_v41, %v6943_v33  ;;  %v1931_v18 = vmin.f32 %v1929_v53, %v6951_v29 }
 0x321   : > { %v1245_v50 = vadd.f32 %v1181_v25, %v6735_v57  ;;  %v1246_v0 = vadd.f32 %v1182_v4, %v6733_v31  ;;  %v6967_v16 = vor.u32 %v1647_v49, %v14405_v47  ;;  %v1520_v7 = vadd.f32 1.0, %v1456_v59 }
 0x322   : > { %v1034_v45 = vpop.xlane.xlu1 %1033  ;;  %v6970_v54 = vor.u32 %v1649_v32, %v14407_v60  ;;  %v1523_v9 = vadd.f32 1.0, %v1459_v17  ;;  %v1458_v42 = vmax.f32 %v1243_v58, 0.0  ;;  %v6977_v25 = vsel %vm867_vm5, inf, %v1708_v44 }
 0x323   : > { %14406 = vst [vmem:[#allocation11_spill] sm:$0xff] %v6967_v16  ;;  %v1183_v43 = vsub.f32 %v1034_v45, %v6789_v61  ;;  %v1461_v22 = vmax.f32 %v1246_v0, 0.0  ;;  %v1184_v41 = vsub.f32 %v1034_v45, %v6792_v2  ;;  %14409 = vst [vmem:[#allocation13_spill] sm:$0xff] %v6977_v25  ;;  %v1710_v53 = vor.u32 %v1646_v63, %v14405_v47  ;;  %v14410_v2 = vld [vmem:[#allocation14_spill] sm:$0xff] }
 0x324   : > { %14408 = vst [vmem:[#allocation12_spill] sm:$0xff] %v6970_v54  ;;  %v1933_v49 = vmin.f32 %v1931_v18, %v6970_v54  ;;  %v1651_v4 = vand.u32 4294967040, %v1523_v9  ;;  %v1460_v32 = vmax.f32 %v1245_v50, 0.0  ;;  %v1932_v59 = vmin.f32 %v1930_v35, %v6967_v16  ;;  %v14411_v54 = vld [vmem:[#allocation49_spill] sm:$0xff] }
 0x325   : > { %v1525_v33 = vadd.f32 1.0, %v1461_v22  ;;  %v1247_v17 = vadd.f32 %v1183_v43, %v6735_v57  ;;  %v1248_v61 = vadd.f32 %v1184_v41, %v6733_v31  ;;  %v1648_v63 = vand.u32 4294967040, %v1520_v7 }
 0x326   : > { %v1037_v58 = vpop.xlane.xlu1 %1036  ;;  %v6985_v45 = vor.u32 %v1651_v4, %v14410_v2  ;;  %v1522_v0 = vadd.f32 1.0, %v1458_v42  ;;  %v6993_v35 = vmul.f32 2.0, %v14411_v54  ;;  %v1893_v4 = vmin.f32 %v6977_v25, %v1892_v1 }
 0x327   : > { %v1185_v37 = vsub.f32 %v1037_v58, %v6795_v3  ;;  %v1186_v44 = vsub.f32 %v1037_v58, %v6798_v6  ;;  %v1653_v18 = vand.u32 4294967040, %v1525_v33  ;;  %v1462_v9 = vmax.f32 %v1247_v17, 0.0  ;;  %v14412_v3 = vld [vmem:[#allocation15_spill] sm:$0xff] }
 0x328   : > { %v1934_v50 = vmin.f32 %v1932_v59, %v6985_v45  ;;  %v1463_v22 = vmax.f32 %v1248_v61, 0.0  ;;  %v1524_v16 = vadd.f32 1.0, %v1460_v32  ;;  %v7003_v61 = vsel %vm869_vm6, inf, %v1710_v53  ;;  %v14413_v53 = vld [vmem:[#allocation51_spill] sm:$0xff] }
 0x329   : > { %v1249_v43 = vadd.f32 %v1185_v37, %v6735_v57  ;;  %v1250_v41 = vadd.f32 %v1186_v44, %v6733_v31  ;;  %v6997_v29 = vor.u32 %v1653_v18, %v14412_v3  ;;  %v1650_v58 = vand.u32 4294967040, %v1522_v0  ;;  %v14414_v0 = vld [vmem:[#allocation16_spill] sm:$0xff] }
 0x32a   : > { %v1040_v6 = vpop.xlane.xlu1 %1039  ;;  %v1527_v7 = vadd.f32 1.0, %v1463_v22  ;;  %v1712_v32 = vor.u32 %v1648_v63, %v14407_v60  ;;  %v1526_v59 = vadd.f32 1.0, %v1462_v9  ;;  %v1652_v18 = vand.u32 4294967040, %v1524_v16 }
 0x32b   : > { %v1464_v33 = vmax.f32 %v1249_v43, 0.0  ;;  %v1465_v42 = vmax.f32 %v1250_v41, 0.0  ;;  %v1187_v17 = vsub.f32 %v1040_v6, %v6801_v5  ;;  %v7006_v54 = vmin.f32 %v1933_v49, %v6997_v29 }
 0x32c   : > { %v1188_v1 = vsub.f32 %v1040_v6, %v6804_v48  ;;  %v1655_v37 = vand.u32 4294967040, %v1527_v7  ;;  %v7013_v41 = vmul.f32 2.0, %v14413_v53  ;;  %v1894_v63 = vmin.f32 %v7003_v61, %v1893_v4 }
 0x32d   : > { %v1529_v44 = vadd.f32 1.0, %v1465_v42  ;;  %v1528_v22 = vadd.f32 1.0, %v1464_v33  ;;  %v1251_v5 = vadd.f32 %v1187_v17, %v6735_v57  ;;  %v1714_v9 = vor.u32 %v1650_v58, %v14410_v2  ;;  %v14416_v17 = vld [vmem:[#allocation17_spill] sm:$0xff] }
 0x32e   : > { %v1252_v43 = vadd.f32 %v1188_v1, %v6733_v31  ;;  %v1043_v47 = vpop.xlane.xlu0 %1042  ;;  %v7016_v49 = vor.u32 %v1655_v37, %v14414_v0  ;;  %v7025_v7 = vsel %vm871_vm7, inf, %v1712_v32  ;;  %v1654_v33 = vand.u32 4294967040, %v1526_v59 }
 0x32f   : > { %v1657_v25 = vand.u32 4294967040, %v1529_v44  ;;  %v1189_v48 = vsub.f32 %v1043_v47, %v6807_v56  ;;  %v1466_v16 = vmax.f32 %v1251_v5, 0.0  ;;  %v1190_v6 = vsub.f32 %v1043_v47, %v6810_v10  ;;  %14415 = vst [vmem:[#allocation14_spill] sm:$0xff] %v7025_v7  ;;  %v14417_v44 = vld [vmem:[#allocation52_spill] sm:$0xff] }
 0x330   : > { %v7028_v42 = vmin.f32 %v1934_v50, %v7016_v49  ;;  %v1716_v56 = vor.u32 %v1652_v18, %v14412_v3  ;;  %v1656_v4 = vand.u32 4294967040, %v1528_v22  ;;  %v7041_v5 = vmul.f32 2.0, %v14417_v44  ;;  %v14420_v3 = vld [vmem:[#allocation56_spill] sm:$0xff] }
 0x331   : > { %v7031_v1 = vor.u32 %v1657_v25, %v14416_v17  ;;  %v1253_v58 = vadd.f32 %v1189_v48, %v6735_v57  ;;  %v1254_v37 = vadd.f32 %v1190_v6, %v6733_v31  ;;  %v1530_v32 = vadd.f32 1.0, %v1466_v16 }
 0x332   : > { %v1046_v10 = vpop.xlane.xlu1 %1045  ;;  %v1444_v25 = vmax.f32 %v6742_v14, 0.0  ;;  %v7047_v18 = vsel %vm873_vm8, inf, %v1714_v9  ;;  %v1895_v47 = vmin.f32 %v7025_v7, %v1894_v63  ;;  %v1718_v53 = vor.u32 %v1654_v33, %v14414_v0 }
 0x333   : > { %v1191_v59 = vsub.f32 %v1046_v10, %v6813_v11  ;;  %v1192_v50 = vsub.f32 %v1046_v10, %v6816_v15  ;;  %v1468_v22 = vmax.f32 %v1253_v58, 0.0  ;;  %v14418_v15 = vld [vmem:[#allocation54_spill] sm:$0xff]  ;;  %v7059_v14 = vsel %vm875_vm9, inf, %v1716_v56 }
 0x334   : > { %v7054_v16 = vmul.f32 2.0, %v14418_v15  ;;  %v1720_v2 = vor.u32 %v1656_v4, %v14416_v17  ;;  %v1467_v9 = vmax.f32 %v1252_v43, 0.0  ;;  %v1896_v63 = vmin.f32 %v7047_v18, %v1895_v47 }
 0x335   : > { %v1255_v48 = vadd.f32 %v1191_v59, %v6735_v57  ;;  %v1256_v11 = vadd.f32 %v1192_v50, %v6733_v31  ;;  %v1658_v58 = vand.u32 4294967040, %v1530_v32  ;;  %v1469_v33 = vmax.f32 %v1254_v37, 0.0  ;;  %v14419_v59 = vld [vmem:[#allocation55_spill] sm:$0xff] }
 0x336   : > { %v1049_v6 = vpop.xlane.xlu0 %1048  ;;  %v7065_v50 = vmul.f32 2.0, %v14419_v59  ;;  %v1532_v44 = vadd.f32 1.0, %v1468_v22  ;;  %v7069_v56 = vmul.f32 2.0, %v14420_v3  ;;  %v7071_v7 = vadd.f32 1.0, %v1444_v25  ;;  %v14422_v25 = vld [vmem:[#allocation18_spill] sm:$0xff] }
 0x337   : > { %v1193_v10 = vsub.f32 %v1049_v6, %v6819_v19  ;;  %v1470_v15 = vmax.f32 %v1255_v48, 0.0  ;;  %v1194_v60 = vsub.f32 %v1049_v6, %v6822_v20  ;;  %v1897_v43 = vmin.f32 %v7059_v14, %v1896_v63 }
 0x338   : > { %v7077_v4 = vsel %vm877_vm10, inf, %v1718_v53  ;;  %v7082_v19 = vsel %vm879_vm11, inf, %v1720_v2  ;;  %v1531_v37 = vadd.f32 1.0, %v1467_v9  ;;  %v1722_v47 = vor.u32 %v1658_v58, %v14422_v25 }
 0x339   : > { %14421 = vst [vmem:[#allocation49_spill] sm:$0xff] %v7082_v19  ;;  %v1257_v20 = vadd.f32 %v1193_v10, %v6735_v57  ;;  %v1258_v32 = vadd.f32 %v1194_v60, %v6733_v31  ;;  %v1533_v48 = vadd.f32 1.0, %v1469_v33  ;;  %v1471_v6 = vmax.f32 %v1256_v11, 0.0 }
 0x33a   : > { %v1052_v22 = vpop.xlane.xlu1 %1051  ;;  %v1660_v0 = vand.u32 4294967040, %v1532_v44  ;;  %v1534_v53 = vadd.f32 1.0, %v1470_v15  ;;  %v7090_v17 = vmul.f32 2.0, %v6720_v30  ;;  %v1898_v9 = vmin.f32 %v7077_v4, %v1897_v43  ;;  %v14423_v43 = vld [vmem:[#allocation19_spill] sm:$0xff] }
 0x33b   : > { %v1195_v63 = vsub.f32 %v1052_v22, %v6825_v23  ;;  %v1472_v59 = vmax.f32 %v1257_v20, 0.0  ;;  %v1196_v3 = vsub.f32 %v1052_v22, %v6828_v24  ;;  %v1473_v60 = vmax.f32 %v1258_v32, 0.0 }
 0x33c   : > { %v1446_v10 = vmax.f32 %v6783_v55, 0.0  ;;  %v1659_v58 = vand.u32 4294967040, %v1531_v37  ;;  %v1899_v33 = vmin.f32 %v7082_v19, %v1898_v9  ;;  %v7101_v24 = vsel %vm881_vm12, inf, %v1722_v47 }
 0x33d   : > { %v1259_v11 = vadd.f32 %v1195_v63, %v6735_v57  ;;  %v1260_v23 = vadd.f32 %v1196_v3, %v6733_v31  ;;  %v1535_v30 = vadd.f32 1.0, %v1471_v6  ;;  %v1536_v44 = vadd.f32 1.0, %v1472_v59 }
 0x33e   : > { %v1661_v20 = vand.u32 4294967040, %v1533_v48  ;;  %v1724_v32 = vor.u32 %v1660_v0, %v14423_v43  ;;  %v1662_v22 = vand.u32 4294967040, %v1534_v53  ;;  %v1537_v37 = vadd.f32 1.0, %v1473_v60 }
 0x33f   : > { %v1055_v15 = vpop.xlane.xlu0 %1054  ;;  %v1474_v55 = vmax.f32 %v1259_v11, 0.0  ;;  %v1475_v2 = vmax.f32 %v1260_v23, 0.0  ;;  %v7106_v9 = vadd.f32 1.0, %v1446_v10  ;;  %v7109_v19 = vor.u32 %v1659_v58, %v14422_v25 }
 0x340   : > { %v1197_v63 = vsub.f32 %v1055_v15, %v6831_v27  ;;  %v1198_v3 = vsub.f32 %v1055_v15, %v6834_v28  ;;  %v1900_v47 = vmin.f32 %v7101_v24, %v1899_v33  ;;  %v1663_v59 = vand.u32 4294967040, %v1535_v30  ;;  %v14424_v28 = vld [vmem:[#allocation20_spill] sm:$0xff] }
 0x341   : > { %v1538_v6 = vadd.f32 1.0, %v1474_v55  ;;  %v1664_v48 = vand.u32 4294967040, %v1536_v44  ;;  %v7115_v11 = vor.u32 %v1661_v20, %v14423_v43  ;;  %v7120_v27 = vsel %vm883_vm13, inf, %v1724_v32 }
 0x342   : > { %v1261_v0 = vadd.f32 %v1197_v63, %v6735_v57  ;;  %v1262_v53 = vadd.f32 %v1198_v3, %v6733_v31  ;;  %v1726_v25 = vor.u32 %v1662_v22, %v14424_v28  ;;  %v1665_v58 = vand.u32 4294967040, %v1537_v37  ;;  %v14425_v22 = vld [vmem:[#allocation21_spill] sm:$0xff] }
 0x343   : > { %v1058_v60 = vpop.xlane.xlu1 %1057  ;;  %v1539_v23 = vadd.f32 1.0, %v1475_v2  ;;  %v1938_v44 = vmin.f32 %v7028_v42, %v7109_v19  ;;  %v1666_v15 = vand.u32 4294967040, %v1538_v6  ;;  %v1901_v43 = vmin.f32 %v7120_v27, %v1900_v47 }
 0x344   : > { %v1199_v10 = vsub.f32 %v1058_v60, %v6839_v39  ;;  %v1476_v33 = vmax.f32 %v1261_v0, 0.0  ;;  %v1477_v30 = vmax.f32 %v1262_v53, 0.0  ;;  %v1200_v20 = vsub.f32 %v1058_v60, %v6842_v52  ;;  %v14427_v53 = vld [vmem:[#allocation22_spill] sm:$0xff] }
 0x345   : > { %v7130_v32 = vor.u32 %v1663_v59, %v14424_v28  ;;  %v1728_v63 = vor.u32 %v1664_v48, %v14425_v22  ;;  %v14426_v52 = vmin.f32 %v7006_v54, %v7031_v1  ;;  %v7142_v47 = vsel %vm885_vm14, inf, %v1726_v25 }
 0x346   : > { %v1263_v55 = vadd.f32 %v1199_v10, %v6735_v57  ;;  %v1541_v39 = vadd.f32 1.0, %v1477_v30  ;;  %v1540_v2 = vadd.f32 1.0, %v1476_v33  ;;  %v1264_v3 = vadd.f32 %v1200_v20, %v6733_v31 }
 0x347   : > { %v1061_v37 = vpop.xlane.xlu0 %1060  ;;  %v1939_v6 = vmin.f32 %v14426_v52, %v7115_v11  ;;  %v7145_v59 = vor.u32 %v1665_v58, %v14425_v22  ;;  %v1667_v48 = vand.u32 4294967040, %v1539_v23  ;;  %v1730_v60 = vor.u32 %v1666_v15, %v14427_v53 }
 0x348   : > { %v1478_v0 = vmax.f32 %v1263_v55, 0.0  ;;  %v1201_v42 = vsub.f32 %v1061_v37, %v6845_v34  ;;  %v1479_v10 = vmax.f32 %v1264_v3, 0.0  ;;  %v1202_v33 = vsub.f32 %v1061_v37, %v6848_v8 }
 0x349   : > { %v7151_v30 = vmin.f32 %v1938_v44, %v7130_v32  ;;  %v7156_v54 = vsel %vm887_vm15, inf, %v1728_v63  ;;  %v1669_v28 = vand.u32 4294967040, %v1541_v39  ;;  %v1902_v23 = vmin.f32 %v7142_v47, %v1901_v43 }
 0x34a   : > { %v1265_v34 = vadd.f32 %v1201_v42, %v6735_v57  ;;  %14428 = vst [vmem:[#allocation15_spill] sm:$0xff] %v7156_v54  ;;  %v1542_v25 = vadd.f32 1.0, %v1478_v0  ;;  %v1668_v20 = vand.u32 4294967040, %v1540_v2  ;;  %v1266_v15 = vadd.f32 %v1202_v33, %v6733_v31  ;;  %v14431_v2 = vld [vmem:[#allocation23_spill] sm:$0xff] }
 0x34b   : > { %v1064_v58 = vpop.xlane.xlu1 %1063  ;;  %v1941_v8 = vmin.f32 %v1939_v6, %v7145_v59  ;;  %v1543_v37 = vadd.f32 1.0, %v1479_v10  ;;  %v1903_v22 = vmin.f32 %v7156_v54, %v1902_v23  ;;  %v7165_v63 = vor.u32 %v1667_v48, %v14427_v53 }
 0x34c   : > { %v1480_v55 = vmax.f32 %v1265_v34, 0.0  ;;  %v1203_v44 = vsub.f32 %v1064_v58, %v6851_v12  ;;  %v1204_v3 = vsub.f32 %v1064_v58, %v6854_v36  ;;  %v7170_v43 = vsel %vm889_vm0, inf, %v1730_v60 }
 0x34d   : > { %14429 = vst [vmem:[#allocation51_spill] sm:$0xff] %v7165_v63  ;;  %14430 = vst [vmem:[#allocation16_spill] sm:$0xff] %v7170_v43  ;;  %v1481_v39 = vmax.f32 %v1266_v15, 0.0  ;;  %v1733_v0 = vor.u32 %v1669_v28, %v14431_v2  ;;  %v1670_v42 = vand.u32 4294967040, %v1542_v25  ;;  %v7176_v36 = vor.u32 %v1668_v20, %v14431_v2  ;;  %v14433_v20 = vld [vmem:[#allocation24_spill] sm:$0xff] }
 0x34e   : > { %v1267_v52 = vadd.f32 %v1203_v44, %v6735_v57  ;;  %v1268_v12 = vadd.f32 %v1204_v3, %v6733_v31  ;;  %v1544_v10 = vadd.f32 1.0, %v1480_v55  ;;  %v1671_v34 = vand.u32 4294967040, %v1543_v37  ;;  %v14436_v44 = vld [vmem:[#allocation25_spill] sm:$0xff] }
 0x34f   : > { %v1067_v6 = vpop.xlane.xlu0 %1066  ;;  %14432 = vst [vmem:[#allocation17_spill] sm:$0xff] %v7176_v36  ;;  %v1545_v48 = vadd.f32 1.0, %v1481_v39  ;;  %v1904_v28 = vmin.f32 %v7170_v43, %v1903_v22  ;;  %v1942_v25 = vmin.f32 %v7151_v30, %v7165_v63  ;;  %vm14434_vm3 = vcmp.eq.s32.totalorder %v14431_v2, %v14433_v20 }
 0x350   : > { %v1205_v33 = vsub.f32 %v1067_v6, %v6857_v21  ;;  %v1482_v53 = vmax.f32 %v1267_v52, 0.0  ;;  %v1483_v60 = vmax.f32 %v1268_v12, 0.0  ;;  %v1206_v58 = vsub.f32 %v1067_v6, %v6862_v62 }
 0x351   : > { %v1673_v23 = vand.u32 4294967040, %v1545_v48  ;;  %v7187_v55 = vsel %vm14434_vm3, inf, %v1733_v0  ;;  %v7190_v21 = vor.u32 %v1670_v42, %v14436_v44  ;;  %v1672_v62 = vand.u32 4294967040, %v1544_v10  ;;  %v14438_v48 = vld [vmem:[#allocation26_spill] sm:$0xff]  ;;  %v14439_v0 = vld [vmem:[#allocation57_spill] sm:$0xff] }
 0x352   : > { %v1269_v15 = vadd.f32 %v1205_v33, %v6735_v57  ;;  %14435 = vst [vmem:[#allocation52_spill] sm:$0xff] %v7187_v55  ;;  %v1546_v37 = vadd.f32 1.0, %v1482_v53  ;;  %v1547_v3 = vadd.f32 1.0, %v1483_v60  ;;  %v1270_v22 = vadd.f32 %v1206_v58, %v6733_v31 }
 0x353   : > { %14437 = vst [vmem:[#allocation54_spill] sm:$0xff] %v7190_v21  ;;  %v1070_v39 = vpop.xlane.xlu1 %1069  ;;  %v1905_v12 = vmin.f32 %v7176_v36, %v1904_v28  ;;  %v1735_v6 = vor.u32 %v1671_v34, %v14436_v44  ;;  %v1737_v2 = vor.u32 %v1673_v23, %v14438_v48  ;;  %v7200_v10 = vmin.f32 %v1941_v8, %v7187_v55 }
 0x354   : > { %v1484_v52 = vmax.f32 %v1269_v15, 0.0  ;;  %v1207_v30 = vsub.f32 %v1070_v39, %v6865_v13  ;;  %v1208_v33 = vsub.f32 %v1070_v39, %v14439_v0  ;;  %v1674_v43 = vand.u32 4294967040, %v1546_v37  ;;  %v14441_v39 = vld [vmem:[#allocation58_spill] sm:$0xff] }
 0x355   : > { %v1675_v42 = vand.u32 4294967040, %v1547_v3  ;;  %v1485_v54 = vmax.f32 %v1270_v22, 0.0  ;;  %v1906_v60 = vmin.f32 %v7190_v21, %v1905_v12  ;;  %v7205_v34 = vor.u32 %v1672_v62, %v14438_v48  ;;  %v14447_v12 = vld [vmem:[#allocation27_spill] sm:$0xff] }
 0x356   : > { %v1271_v53 = vadd.f32 %v1207_v30, %v6735_v57  ;;  %v1548_v58 = vadd.f32 1.0, %v1484_v52  ;;  %v1272_v13 = vadd.f32 %v1208_v33, %v6733_v31  ;;  %vm14442_vm4 = vcmp.eq.s32.totalorder %v14436_v44, %v14433_v20  ;;  %v14446_v52 = vld [vmem:[#allocation59_spill] sm:$0xff] }
 0x357   : > { %v1073_v28 = vpop.xlane.xlu0 %1072  ;;  %14440 = vst [vmem:[#allocation55_spill] sm:$0xff] %v7205_v34  ;;  %v1549_v23 = vadd.f32 1.0, %v1485_v54  ;;  %v7211_v3 = vsel %vm14442_vm4, inf, %v1735_v6  ;;  %vm14444_vm5 = vcmp.eq.s32.totalorder %v14438_v48, %v14433_v20  ;;  %v7220_v62 = vor.u32 %v1674_v43, %v14447_v12 }
 0x358   : > { %v1486_v15 = vmax.f32 %v1271_v53, 0.0  ;;  %v1209_v37 = vsub.f32 %v1073_v28, %v14441_v39  ;;  %14443 = vst [vmem:[#allocation56_spill] sm:$0xff] %v7211_v3  ;;  %v7216_v8 = vsel %vm14444_vm5, inf, %v1737_v2  ;;  %v1487_v22 = vmax.f32 %v1272_v13, 0.0  ;;  %v14449_v2 = vld [vmem:[#allocation28_spill] sm:$0xff] }
 0x359   : > { %14445 = vst [vmem:[#allocation18_spill] sm:$0xff] %v7216_v8  ;;  %v1210_v30 = vsub.f32 %v1073_v28, %v14446_v52  ;;  %14448 = vst [vmem:[#allocation19_spill] sm:$0xff] %v7220_v62  ;;  %v1739_v54 = vor.u32 %v1675_v42, %v14447_v12  ;;  %v1677_v0 = vand.u32 4294967040, %v1549_v23  ;;  %v1676_v53 = vand.u32 4294967040, %v1548_v58  ;;  %v14450_v28 = vld [vmem:[#allocation33_spill] sm:$0xff]  ;;  %v14451_v42 = vld [vmem:[#allocation34_spill] sm:$0xff] }
 0x35a   : > { %v1550_v33 = vadd.f32 1.0, %v1486_v15  ;;  %v1551_v39 = vadd.f32 1.0, %v1487_v22  ;;  %v1273_v44 = vadd.f32 %v1209_v37, %v6735_v57  ;;  %v1907_v48 = vmin.f32 %v7205_v34, %v1906_v60  ;;  %v7229_v15 = vpop.f32.mrb[16].mxu0 }
 0x35b   : > { %v1274_v6 = vadd.f32 %v1210_v30, %v6733_v31  ;;  %v1076_v21 = vpop.xlane.xlu1 %1075  ;;  %v1741_v13 = vor.u32 %v1677_v0, %v14449_v2  ;;  %14452 = vst [vmem:[#allocation20_spill] sm:$0xff] %v7229_v15  ;;  %v1944_v58 = vmin.f32 %v1942_v25, %v7211_v3  ;;  %v1945_v37 = vmin.f32 %v7200_v10, %v7216_v8  ;;  %v7236_v30 = vpop.f32.mrb[17].mxu0 }
 0x35c   : > { %v1678_v55 = vand.u32 4294967040, %v1550_v33  ;;  %v1211_v52 = vsub.f32 %v1076_v21, %v14450_v28  ;;  %v1679_v43 = vand.u32 4294967040, %v1551_v39  ;;  %v1488_v36 = vmax.f32 %v1273_v44, 0.0  ;;  %14453 = vst [vmem:[#allocation21_spill] sm:$0xff] %v7236_v30 }
 0x35d   : > { %v1489_v63 = vmax.f32 %v1274_v6, 0.0  ;;  %v1212_v23 = vsub.f32 %v1076_v21, %v14451_v42  ;;  %v1908_v22 = vmin.f32 %v7220_v62, %v1907_v48  ;;  %vm14454_vm6 = vcmp.eq.s32.totalorder %v14447_v12, %v14433_v20  ;;  %v14456_v48 = vld [vmem:[#allocation36_spill] sm:$0xff]  ;;  %v14459_v42 = vld [vmem:[#allocation37_spill] sm:$0xff] }
 0x35e   : > { %v1275_v60 = vadd.f32 %v1211_v52, %v6735_v57  ;;  %v7241_v0 = vsel %vm14454_vm6, inf, %v1739_v54  ;;  %v7244_v21 = vor.u32 %v1676_v53, %v14449_v2  ;;  %v1552_v33 = vadd.f32 1.0, %v1488_v36  ;;  %v14457_v52 = vld [vmem:[#allocation29_spill] sm:$0xff] }
 0x35f   : > { %v1553_v39 = vadd.f32 1.0, %v1489_v63  ;;  %v1079_v25 = vpop.xlane.xlu0 %1078  ;;  %vm14455_vm7 = vcmp.eq.s32.totalorder %v14449_v2, %v14433_v20  ;;  %v1276_v44 = vadd.f32 %v1212_v23, %v6733_v31  ;;  %v7254_v12 = vor.u32 %v1678_v55, %v14457_v52 }
 0x360   : > { %v7249_v10 = vsel %vm14455_vm7, inf, %v1741_v13  ;;  %v1490_v6 = vmax.f32 %v1275_v60, 0.0  ;;  %v1213_v28 = vsub.f32 %v1079_v25, %v14456_v48  ;;  %v1743_v54 = vor.u32 %v1679_v43, %v14457_v52  ;;  %v14460_v60 = vld [vmem:[#allocation30_spill] sm:$0xff] }
 0x361   : > { %14458 = vst [vmem:[#allocation22_spill] sm:$0xff] %v7254_v12  ;;  %v1681_v53 = vand.u32 4294967040, %v1553_v39  ;;  %v1214_v36 = vsub.f32 %v1079_v25, %v14459_v42  ;;  %v1680_v63 = vand.u32 4294967040, %v1552_v33  ;;  %v1491_v30 = vmax.f32 %v1276_v44, 0.0  ;;  %v14461_v39 = vld [vmem:[#allocation39_spill] sm:$0xff] }
 0x362   : > { %v1554_v15 = vadd.f32 1.0, %v1490_v6  ;;  %v1277_v2 = vadd.f32 %v1213_v28, %v6735_v57  ;;  %v1946_v13 = vmin.f32 %v1944_v58, %v7241_v0  ;;  %v1909_v23 = vmin.f32 %v7244_v21, %v1908_v22  ;;  %v14462_v6 = vld [vmem:[#allocation40_spill] sm:$0xff] }
 0x363   : > { %v1745_v62 = vor.u32 %v1681_v53, %v14460_v60  ;;  %v1278_v48 = vadd.f32 %v1214_v36, %v6733_v31  ;;  %v1082_v55 = vpop.xlane.xlu1 %1081  ;;  %v1555_v34 = vadd.f32 1.0, %v1491_v30  ;;  %v1947_v33 = vmin.f32 %v1945_v37, %v7249_v10 }
 0x364   : > { %v1682_v8 = vand.u32 4294967040, %v1554_v15  ;;  %v1492_v43 = vmax.f32 %v1277_v2, 0.0  ;;  %v1215_v3 = vsub.f32 %v1082_v55, %v14461_v39  ;;  %v1910_v25 = vmin.f32 %v7254_v12, %v1909_v23  ;;  %v14465_v23 = vld [vmem:[#allocation31_spill] sm:$0xff] }
 0x365   : > { %v1493_v44 = vmax.f32 %v1278_v48, 0.0  ;;  %v1216_v28 = vsub.f32 %v1082_v55, %v14462_v6  ;;  %vm14463_vm8 = vcmp.eq.s32.totalorder %v14457_v52, %v14433_v20  ;;  %v7273_v22 = vor.u32 %v1680_v63, %v14460_v60  ;;  %v14466_v48 = vld [vmem:[#allocation42_spill] sm:$0xff]  ;;  %v14468_v6 = vld [vmem:[#allocation32_spill] sm:$0xff] }
 0x366   : > { %v7270_v58 = vsel %vm14463_vm8, inf, %v1743_v54  ;;  %v1683_v30 = vand.u32 4294967040, %v1555_v34  ;;  %v1556_v15 = vadd.f32 1.0, %v1492_v43  ;;  %vm14464_vm9 = vcmp.eq.s32.totalorder %v14460_v60, %v14433_v20  ;;  %v14467_v60 = vld [vmem:[#allocation43_spill] sm:$0xff] }
 0x367   : > { %v7278_v53 = vsel %vm14464_vm9, inf, %v1745_v62  ;;  %v1557_v37 = vadd.f32 1.0, %v1493_v44  ;;  %v1279_v42 = vadd.f32 %v1215_v3, %v6735_v57  ;;  %v1280_v36 = vadd.f32 %v1216_v28, %v6733_v31  ;;  %v1085_v2 = vpop.xlane.xlu0 %1084 }
 0x368   : > { %v7283_v52 = vor.u32 %v1682_v8, %v14465_v23  ;;  %v1747_v54 = vor.u32 %v1683_v30, %v14465_v23  ;;  %v1684_v63 = vand.u32 4294967040, %v1556_v15  ;;  %v1217_v34 = vsub.f32 %v1085_v2, %v14466_v48 }
 0x369   : > { %v1685_v55 = vand.u32 4294967040, %v1557_v37  ;;  %v1494_v43 = vmax.f32 %v1279_v42, 0.0  ;;  %v1495_v39 = vmax.f32 %v1280_v36, 0.0  ;;  %v1218_v62 = vsub.f32 %v1085_v2, %v14467_v60 }
 0x36a   : > { %v1948_v44 = vmin.f32 %v1946_v13, %v7270_v58  ;;  %v1911_v3 = vmin.f32 %v7273_v22, %v1910_v25  ;;  %v7291_v28 = vor.u32 %v1684_v63, %v14468_v6  ;;  %v1281_v8 = vadd.f32 %v1217_v34, %v6735_v57 }
 0x36b   : > { %v1949_v12 = vmin.f32 %v1947_v33, %v7278_v53  ;;  %v1749_v30 = vor.u32 %v1685_v55, %v14468_v6  ;;  %v1558_v15 = vadd.f32 1.0, %v1494_v43  ;;  %v1559_v48 = vadd.f32 1.0, %v1495_v39  ;;  %v1088_v37 = vpop.xlane.xlu1 %1087 }
 0x36c   : > { %14469 = vst [vmem:[#allocation23_spill] sm:$0xff] %v7291_v28  ;;  %v1912_v42 = vmin.f32 %v7283_v52, %v1911_v3  ;;  %v1282_v36 = vadd.f32 %v1218_v62, %v6733_v31  ;;  %v1496_v2 = vmax.f32 %v1281_v8, 0.0  ;;  %v1219_v13 = vsub.f32 %v1088_v37, %v6911_v51  ;;  %v14473_v51 = vld [vmem:[#allocation35_spill] sm:$0xff] }
 0x36d   : > { %vm14470_vm10 = vcmp.eq.s32.totalorder %v14465_v23, %v14433_v20  ;;  %v1686_v63 = vand.u32 4294967040, %v1558_v15  ;;  %v1687_v34 = vand.u32 4294967040, %v1559_v48  ;;  %v1220_v33 = vsub.f32 %v1088_v37, %v6915_v40 }
 0x36e   : > { %v7302_v25 = vsel %vm14470_vm10, inf, %v1747_v54  ;;  %v1913_v55 = vmin.f32 %v7291_v28, %v1912_v42  ;;  %v1497_v43 = vmax.f32 %v1282_v36, 0.0  ;;  %v1560_v39 = vadd.f32 1.0, %v1496_v2 }
 0x36f   : > { %v1283_v60 = vadd.f32 %v1219_v13, %v6735_v57  ;;  %vm14471_vm11 = vcmp.eq.s32.totalorder %v14468_v6, %v14433_v20  ;;  %v7313_v3 = vor.u32 %v1686_v63, %v14473_v51  ;;  %v1751_v23 = vor.u32 %v1687_v34, %v14473_v51  ;;  %v1091_v8 = vpop.xlane.xlu0 %1090 }
 0x370   : > { %v7310_v62 = vsel %vm14471_vm11, inf, %v1749_v30  ;;  %v1284_v54 = vadd.f32 %v1220_v33, %v6733_v31  ;;  %v1561_v40 = vadd.f32 1.0, %v1497_v43  ;;  %v1688_v15 = vand.u32 4294967040, %v1560_v39 }
 0x371   : > { %14472 = vst [vmem:[#allocation24_spill] sm:$0xff] %v7310_v62  ;;  %14474 = vst [vmem:[#allocation25_spill] sm:$0xff] %v7313_v3  ;;  %v1498_v48 = vmax.f32 %v1283_v60, 0.0  ;;  %v1221_v37 = vsub.f32 %v1091_v8, %v6922_v26  ;;  %v1950_v36 = vmin.f32 %v1948_v44, %v7302_v25  ;;  %v1222_v30 = vsub.f32 %v1091_v8, %v6993_v35  ;;  %v14477_v60 = vld [vmem:[#allocation38_spill] sm:$0xff] }
 0x372   : > { %v1499_v6 = vmax.f32 %v1284_v54, 0.0  ;;  %v1951_v2 = vmin.f32 %v1949_v12, %v7310_v62  ;;  %v1914_v13 = vmin.f32 %v7313_v3, %v1913_v55  ;;  %v1689_v63 = vand.u32 4294967040, %v1561_v40  ;;  %v14544_v3 = vld [vmem:[#allocation56_spill] sm:$0xff]  ;;  %v14559_v62 = vld [vmem:[#allocation19_spill] sm:$0xff] }
 0x373   : > { %v1562_v34 = vadd.f32 1.0, %v1498_v48  ;;  %vm14475_vm12 = vcmp.eq.s32.totalorder %v14473_v51, %v14433_v20  ;;  %v1285_v26 = vadd.f32 %v1221_v37, %v6735_v57  ;;  %v1286_v39 = vadd.f32 %v1222_v30, %v6733_v31  ;;  %v1094_v44 = vpop.xlane.xlu1 %1093 }
 0x374   : > { %v7326_v33 = vsel %vm14475_vm12, inf, %v1751_v23  ;;  %v1563_v43 = vadd.f32 1.0, %v1499_v6  ;;  %v7331_v54 = vor.u32 %v1688_v15, %v14477_v60  ;;  %v1753_v35 = vor.u32 %v1689_v63, %v14477_v60  ;;  %v14479_v6 = vld [vmem:[#allocation41_spill] sm:$0xff] }
 0x375   : > { %14476 = vst [vmem:[#allocation26_spill] sm:$0xff] %v7326_v33  ;;  %v1690_v12 = vand.u32 4294967040, %v1562_v34  ;;  %v1223_v55 = vsub.f32 %v1094_v44, %v7013_v41  ;;  %v1500_v40 = vmax.f32 %v1285_v26, 0.0  ;;  %v1501_v48 = vmax.f32 %v1286_v39, 0.0 }
 0x376   : > { %v1691_v8 = vand.u32 4294967040, %v1563_v43  ;;  %v1224_v51 = vsub.f32 %v1094_v44, %v7041_v5  ;;  %v1952_v23 = vmin.f32 %v1950_v36, %v7326_v33  ;;  %vm14478_vm13 = vcmp.eq.s32.totalorder %v14477_v60, %v14433_v20 }
 0x377   : > { %v7340_v37 = vsel %vm14478_vm13, inf, %v1753_v35  ;;  %v7343_v15 = vor.u32 %v1690_v12, %v14479_v6  ;;  %v1287_v30 = vadd.f32 %v1223_v55, %v6735_v57  ;;  %v1564_v34 = vadd.f32 1.0, %v1500_v40  ;;  %v1097_v26 = vpop.xlane.xlu0 %1096 }
 0x378   : > { %v1953_v63 = vmin.f32 %v1951_v2, %v7340_v37  ;;  %v1755_v41 = vor.u32 %v1691_v8, %v14479_v6  ;;  %v1565_v43 = vadd.f32 1.0, %v1501_v48  ;;  %v1915_v5 = vmin.f32 %v7331_v54, %v1914_v13 }
 0x379   : > { %v1288_v36 = vadd.f32 %v1224_v51, %v6733_v31  ;;  %v1502_v39 = vmax.f32 %v1287_v30, 0.0  ;;  %v1225_v44 = vsub.f32 %v1097_v26, %v7054_v16  ;;  %vm14480_vm14 = vcmp.eq.s32.totalorder %v14479_v6, %v14433_v20  ;;  %v14481_v51 = vld [vmem:[#allocation44_spill] sm:$0xff] }
 0x37a   : > { %v7354_v60 = vsel %vm14480_vm14, inf, %v1755_v41  ;;  %v1692_v35 = vand.u32 4294967040, %v1564_v34  ;;  %v1693_v12 = vand.u32 4294967040, %v1565_v43  ;;  %v1226_v2 = vsub.f32 %v1097_v26, %v7065_v50 }
 0x37b   : > { %v1954_v55 = vmin.f32 %v1952_v23, %v7354_v60  ;;  %v1503_v8 = vmax.f32 %v1288_v36, 0.0  ;;  %v1566_v40 = vadd.f32 1.0, %v1502_v39  ;;  %v1289_v13 = vadd.f32 %v1225_v44, %v6735_v57  ;;  %v1100_v41 = vpop.xlane.xlu1 %1099 }
 0x37c   : > { %v1916_v48 = vmin.f32 %v7343_v15, %v1915_v5  ;;  %v7361_v30 = vor.u32 %v1692_v35, %v14481_v51  ;;  %v1757_v16 = vor.u32 %v1693_v12, %v14481_v51  ;;  %v1290_v6 = vadd.f32 %v1226_v2, %v6733_v31  ;;  %v14483_v35 = vld [vmem:[#allocation47_spill] sm:$0xff] }
 0x37d   : > { %v1567_v34 = vadd.f32 1.0, %v1503_v8  ;;  %v1694_v43 = vand.u32 4294967040, %v1566_v40  ;;  %v1504_v42 = vmax.f32 %v1289_v13, 0.0  ;;  %v1227_v50 = vsub.f32 %v1100_v41, %v7069_v56 }
 0x37e   : > { %v1917_v23 = vmin.f32 %v7361_v30, %v1916_v48  ;;  %vm14482_vm15 = vcmp.eq.s32.totalorder %v14481_v51, %v14433_v20  ;;  %v1505_v5 = vmax.f32 %v1290_v6, 0.0  ;;  %v1228_v36 = vsub.f32 %v1100_v41, %v7090_v17 }
 0x37f   : > { %v7370_v26 = vsel %vm14482_vm15, inf, %v1757_v16  ;;  %v1695_v44 = vand.u32 4294967040, %v1567_v34  ;;  %v7375_v12 = vor.u32 %v1694_v43, %v14483_v35  ;;  %v1568_v2 = vadd.f32 1.0, %v1504_v42  ;;  %v14484_v16 = vld [vmem:[#allocation6_spill] sm:$0xff]  ;;  %v14486_v43 = vld [vmem:[#allocation8_spill] sm:$0xff] }
 0x380   : > { %v1955_v39 = vmin.f32 %v1953_v63, %v7370_v26  ;;  %v1569_v8 = vadd.f32 1.0, %v1505_v5  ;;  %v1291_v56 = vadd.f32 %v1227_v50, %v6735_v57  ;;  %v1292_v40 = vadd.f32 %v1228_v36, %v6733_v31  ;;  %v14489_v57 = vld [vmem:[#allocation50_spill] sm:$0xff] }
 0x381   : > { %v1918_v13 = vmin.f32 %v7375_v12, %v1917_v23  ;;  %v1759_v48 = vor.u32 %v1695_v44, %v14483_v35  ;;  %v1696_v51 = vand.u32 4294967040, %v1568_v2  ;;  %v14485_v17 = vand.u32 4294967040, %v7071_v7 }
 0x382   : > { %v1697_v63 = vand.u32 4294967040, %v1569_v8  ;;  %v1506_v41 = vmax.f32 %v1291_v56, 0.0  ;;  %v1507_v34 = vmax.f32 %v1292_v40, 0.0  ;;  %v14487_v42 = vand.u32 4294967040, %v7106_v9 }
 0x383   : > { %v1700_v6 = vor.u32 %v14485_v17, %v14484_v16  ;;  %vm14488_vm0 = vcmp.eq.s32.totalorder %v14483_v35, %v14433_v20  ;;  %v7393_v50 = vor.u32 %v1696_v51, %v14489_v57  ;;  %vm14490_vm3 = vcmp.eq.s32.totalorder %v14484_v16, %v14400_v46 }
 0x384   : > { %v1702_v5 = vor.u32 %v14487_v42, %v14486_v43  ;;  %v7390_v31 = vsel %vm14488_vm0, inf, %v1759_v48  ;;  %v1761_v7 = vor.u32 %v1697_v63, %v14489_v57  ;;  %v1570_v36 = vadd.f32 1.0, %v1506_v41  ;;  %v14492_v48 = vld [vmem:[#allocation53_spill] sm:$0xff] }
 0x385   : > { %v1956_v23 = vmin.f32 %v1954_v55, %v7390_v31  ;;  %v1571_v44 = vadd.f32 1.0, %v1507_v34  ;;  %v1919_v2 = vmin.f32 %v7393_v50, %v1918_v13  ;;  %v7406_v35 = vsel %vm14490_vm3, inf, %v1700_v6 }
 0x386   : > { %v7401_v9 = vsel %vm920_vm2, inf, %v1761_v7  ;;  %v1698_v8 = vand.u32 4294967040, %v1570_v36  ;;  %vm14491_vm4 = vcmp.eq.s32.totalorder %v14486_v43, %v14400_v46 }
 0x387   : > { %v1699_v56 = vand.u32 4294967040, %v1571_v44  ;;  %v1957_v55 = vmin.f32 %v1955_v39, %v7401_v9  ;;  %v1920_v40 = vmin.f32 %v7406_v35, %v1919_v2  ;;  %v7413_v13 = vsel %vm14491_vm4, inf, %v1702_v5 }
 0x388   : > { %v7418_v63 = vor.u32 %v1698_v8, %v14492_v48 }
 0x389   : > { %v1763_v51 = vor.u32 %v1699_v56, %v14492_v48  ;;  %v1921_v17 = vmin.f32 %v7413_v13, %v1920_v40  ;;  %v14495_v56 = vld [vmem:[#allocation45_spill] sm:$0xff]  ;;  %v14498_v48 = vld [vmem:[#allocation7_spill] sm:$0xff] }
 0x38a   : > { %v14497_v40 = vld [vmem:[#allocation9_spill] sm:$0xff] }
 0x38b   : > { %v7423_v16 = vsel %vm922_vm1, inf, %v1763_v51  ;;  %v1922_v39 = vmin.f32 %v7418_v63, %v1921_v17  ;;  %v14499_v51 = vld [vmem:[#allocation11_spill] sm:$0xff]  ;;  %v14500_v17 = vld [vmem:[#allocation12_spill] sm:$0xff] }
 0x38c   : > { %v1958_v6 = vmin.f32 %v1956_v23, %v7423_v16 }
 0x38d   : > { %v1923_v41 = vrot.slane %v1922_v39, 4 }
 0x38e   : > { %v1959_v46 = vmin.f32 %v1957_v55, %v1958_v6  ;;  %v14496_v55 = vld [vmem:[#allocation46_spill] sm:$0xff] }
 0x38f   : > { %v1924_v34 = vmin.f32 %v1922_v39, %v1923_v41  ;;  %v13805_v39 = vmov 1.0|1.0   ;;  %v14501_v6 = vld [vmem:[#allocation10_spill] sm:$0xff]  ;;  %v14502_v41 = vld [vmem:[#allocation48_spill] sm:$0xff] }
 0x390   : > { %v1960_v43 = vrot.slane %v1959_v46, 4 }
 0x391   : > { %v1925_v42 = vrot.slane %v1924_v34, 2 }
 0x392   : > { %v1961_v5 = vmin.f32 %v1959_v46, %v1960_v43  ;;  %v14529_v43 = vld [vmem:[#allocation16_spill] sm:$0xff] }
 0x393   : > { %v1926_v57 = vmin.f32 %v1924_v34, %v1925_v42  ;;  %v14505_v34 = vld [vmem:[#allocation13_spill] sm:$0xff] }
 0x394   : > { %v1962_v7 = vrot.slane %v1961_v5, 2 }
 0x395   : > { %v1927_v36 = vrot.slane %v1926_v57, 1 }
 0x396   : > { %v1963_v44 = vmin.f32 %v1961_v5, %v1962_v7  ;;  %v14510_v5 = vld [vmem:[#allocation14_spill] sm:$0xff] }
 0x397   : > { %v7427_v2 = vmin.f32 %v1926_v57, %v1927_v36 }
 0x398   : > { %v1964_v8 = vrot.slane %v1963_v44, 1 }
 0x399   : > { %vm1966_vm1 = vcmp.eq.f32.partialorder %v7406_v35, %v7427_v2  ;;  %vm1968_vm2 = vcmp.eq.f32.partialorder %v7413_v13, %v7427_v2  ;;  %vm13793_vm3 = vcmp.eq.f32.partialorder %v14501_v6, %v7427_v2  ;;  %vm13792_vm4 = vcmp.eq.f32.partialorder %v14502_v41, %v7427_v2 }
 0x39a   : > { %v7429_v20 = vmin.f32 %v1963_v44, %v1964_v8  ;;  %vm7441_vm5 = vmpackc.low %vm1968_vm2, %vm1966_vm1  ;;  %v7578_v57 = vsel %vm1966_vm1, inf, %v7406_v35  ;;  %v7584_v7 = vsel %vm1968_vm2, inf, %v7413_v13  ;;  %vm13802_vm1 = vcmp.eq.f32.partialorder %v7077_v4, %v7427_v2  ;;  %v14512_v35 = vld [vmem:[#allocation49_spill] sm:$0xff] }
 0x39b   : > { %14511 = vst [vmem:[#allocation57_spill] sm:$0xff] %v7584_v7  ;;  %vm13804_vm2 = vcmp.eq.f32.partialorder %v7101_v24, %v7427_v2 }
 0x39c   : > { %vm13787_vm6 = vcmp.eq.f32.partialorder %v14495_v56, %v7429_v20  ;;  %vm13786_vm7 = vcmp.eq.f32.partialorder %v6938_v38, %v7429_v20  ;;  %vm13789_vm8 = vcmp.eq.f32.partialorder %v14496_v55, %v7429_v20  ;;  %vm13788_vm9 = vcmp.eq.f32.partialorder %v14497_v40, %v7429_v20 }
 0x39d   : > { %vm1975_vm10 = vcmp.eq.f32.partialorder %v14498_v48, %v7429_v20  ;;  %vm13790_vm11 = vcmp.eq.f32.partialorder %v14499_v51, %v7429_v20  ;;  %vm1979_vm12 = vcmp.eq.f32.partialorder %v14500_v17, %v7429_v20  ;;  %vm5448_vm13 = vmpackc.low %vm13786_vm7, %vm13787_vm6  ;;  %vm13791_vm14 = vcmp.eq.f32.partialorder %v6985_v45, %v7429_v20 }
 0x39e   : > { %vm13799_vm15 = vcmp.eq.f32.partialorder %v6997_v29, %v7429_v20  ;;  %5449 = vmatprep.subr.msk.bf16.mxu0 %vm5448_vm13, %v13805_v39  ;;  %vm5452_vm0 = vmpackc.low %vm13788_vm9, %vm13789_vm8  ;;  %vm13794_vm7 = vcmp.eq.f32.partialorder %v7016_v49, %v7429_v20  ;;  %vm13796_vm6 = vcmp.eq.f32.partialorder %v7031_v1, %v7429_v20  ;;  %vm13798_vm8 = vcmp.eq.f32.partialorder %v14505_v34, %v7427_v2 }
 0x39f   : > { %5451 = vmatpush1.bf16.msk.msra.mxu0 %vm7441_vm5, %v13805_v39  ;;  %vm5456_vm13 = vmpackc.low %vm13790_vm11, %vm1975_vm10  ;;  %vm13795_vm5 = vcmp.eq.f32.partialorder %v7109_v19, %v7429_v20  ;;  %vm13797_vm11 = vcmp.eq.f32.partialorder %v7003_v61, %v7427_v2  ;;  %v7603_v13 = vsel %vm1975_vm10, inf, %v14498_v48  ;;  %v7622_v44 = vsel %vm1979_vm12, inf, %v14500_v17  ;;  %v14526_v17 = vld [vmem:[#allocation51_spill] sm:$0xff] }
 0x3a0   : > { %5453 = vmatprep.subr.msk.bf16.mxu0 %vm5452_vm0, %v13805_v39  ;;  %vm7500_vm9 = vmpackc.low %vm13791_vm14, %vm1979_vm12  ;;  %14513 = vst [vmem:[#allocation58_spill] sm:$0xff] %v7603_v13  ;;  %vm13808_vm10 = vcmp.eq.f32.partialorder %v7130_v32, %v7429_v20 }
 0x3a1   : > { %vm5454_vm0 = vmpackc.low %vm13792_vm4, %vm13793_vm3  ;;  %vm13800_vm3 = vcmp.eq.f32.partialorder %v7047_v18, %v7427_v2  ;;  %14516 = vst [vmem:[#allocation27_spill] sm:$0xff] %v7622_v44 }
 0x3a2   : > { %vm7523_vm14 = vmpackc.low %vm13794_vm7, %vm13799_vm15  ;;  %vm2019_vm7 = vcmp.eq.f32.partialorder %v7340_v37, %v7429_v20  ;;  %vm2024_vm15 = vcmp.eq.f32.partialorder %v7375_v12, %v7427_v2 }
 0x3a3   : > { %5455 = vmatpush1.bf16.msk.msra.mxu0 %vm5454_vm0, %v13805_v39  ;;  %vm7534_vm4 = vmpackc.low %vm13795_vm5, %vm13796_vm6  ;;  %vm2025_vm5 = vcmp.eq.f32.partialorder %v7390_v31, %v7429_v20  ;;  %vm2027_vm6 = vcmp.eq.f32.partialorder %v7401_v9, %v7429_v20 }
 0x3a4   : > { %5457 = vmatprep.subr.msk.bf16.mxu0 %vm5456_vm13, %v13805_v39  ;;  %vm5458_vm0 = vmpackc.low %vm13797_vm11, %vm13798_vm8  ;;  %vm13801_vm13 = vcmp.eq.f32.partialorder %v14510_v5, %v7427_v2  ;;  %vm13803_vm11 = vcmp.eq.f32.partialorder %v7059_v14, %v7427_v2  ;;  %vm14521_vm8 = vcmp.eq.f32.partialorder %v7016_v49, %v7429_v20 }
 0x3a5   : > { %vm5466_vm12 = vmpackc.low %vm13802_vm1, %vm13803_vm11  ;;  %vm13822_vm1 = vcmp.eq.f32.partialorder %v7145_v59, %v7429_v20  ;;  %vm13819_vm11 = vcmp.eq.f32.partialorder %v14526_v17, %v7429_v20 }
 0x3a7   : > { %5459 = vmatpush1.bf16.msk.msra.mxu0 %vm5458_vm0, %v13805_v39  ;;  %vm13807_vm0 = vcmp.eq.f32.partialorder %v14512_v35, %v7427_v2 }
 0x3a8   : > { %5461 = vmatprep.subr.msk.bf16.mxu0 %vm7500_vm9, %v13805_v39  ;;  %vm5462_vm9 = vmpackc.low %vm13800_vm3, %vm13801_vm13  ;;  %vm1991_vm3 = vcmp.eq.f32.partialorder %v7115_v11, %v7429_v20  ;;  %vm13812_vm13 = vcmp.eq.f32.partialorder %v7120_v27, %v7427_v2 }
 0x3ab   : > { %5463 = vmatpush1.bf16.msk.msra.mxu0 %vm5462_vm9, %v13805_v39  ;;  %vm14514_vm9 = vcmp.eq.f32.partialorder %v14499_v51, %v7429_v20 }
 0x3ac   : > { %5465 = vmatprep.subr.msk.bf16.mxu0 %vm7523_vm14, %v13805_v39  ;;  %v7616_v36 = vsel %vm14514_vm9, inf, %v14499_v51  ;;  %vm14517_vm14 = vcmp.eq.f32.partialorder %v6985_v45, %v7429_v20  ;;  %vm14519_vm9 = vcmp.eq.f32.partialorder %v6997_v29, %v7429_v20  ;;  %v7663_v51 = vpop.f32.mrb[18].mxu0 }
 0x3ad   : > { %14515 = vst [vmem:[#allocation59_spill] sm:$0xff] %v7616_v36  ;;  %v2261_v8 = vmin.f32 %v7616_v36, %v7603_v13  ;;  %v7632_v23 = vsel %vm14517_vm14, inf, %v6985_v45  ;;  %v7638_v48 = vsel %vm14519_vm9, inf, %v6997_v29  ;;  %vm13811_vm14 = vcmp.eq.f32.partialorder %v7142_v47, %v7427_v2  ;;  %14525 = vst [vmem:[#allocation29_spill] sm:$0xff] %v7663_v51  ;;  %v14543_v13 = vld [vmem:[#allocation54_spill] sm:$0xff] }
 0x3ae   : > { %14518 = vst [vmem:[#allocation28_spill] sm:$0xff] %v7632_v23  ;;  %14520 = vst [vmem:[#allocation33_spill] sm:$0xff] %v7638_v48  ;;  %v7654_v45 = vsel %vm14521_vm8, inf, %v7016_v49  ;;  %vm14523_vm9 = vcmp.eq.f32.partialorder %v7031_v1, %v7429_v20  ;;  %v7679_v49 = vpop.f32.mrb[19].mxu0  ;;  %v14534_v51 = vmov 1.0|1.0  }
 0x3af   : > { %14522 = vst [vmem:[#allocation34_spill] sm:$0xff] %v7654_v45  ;;  %v7660_v29 = vsel %vm14523_vm9, inf, %v7031_v1  ;;  %5467 = vmatpush1.bf16.msk.msra.mxu0 %vm5466_vm12, %v13805_v39  ;;  %v2262_v46 = vmin.f32 %v7622_v44, %v2261_v8  ;;  %vm5470_vm8 = vmpackc.low %vm13804_vm2, %vm13807_vm0  ;;  %v14528_v1 = vld [vmem:[#allocation15_spill] sm:$0xff]  ;;  %vm13823_vm9 = vcmp.eq.f32.partialorder %v14529_v43, %v7427_v2  ;;  %v7691_v42 = vpop.f32.mrb[20].mxu0  ;;  %vm13836_vm0 = vcmp.eq.f32.partialorder %v7331_v54, %v7427_v2 }
 0x3b0   : > { %14524 = vst [vmem:[#allocation36_spill] sm:$0xff] %v7660_v29  ;;  %5469 = vmatprep.subr.msk.bf16.mxu0 %vm7534_vm4, %v13805_v39  ;;  %14527 = vst [vmem:[#allocation37_spill] sm:$0xff] %v7679_v49  ;;  %vm13824_vm12 = vcmp.eq.f32.partialorder %v14528_v1, %v7427_v2  ;;  %v7704_v49 = vpop.f32.mrb[21].mxu0  ;;  %v14558_v1 = vld [vmem:[#allocation55_spill] sm:$0xff] }
 0x3b1   : > { %vm5472_vm4 = vmpackc.low %vm13808_vm10, %vm1991_vm3  ;;  %14530 = vst [vmem:[#allocation30_spill] sm:$0xff] %v7691_v42  ;;  %v2263_v8 = vmin.f32 %v7632_v23, %v2262_v46  ;;  %v7719_v42 = vpop.f32.mrb[22].mxu0  ;;  %v14538_v23 = vld [vmem:[#allocation17_spill] sm:$0xff] }
 0x3b2   : > { %vm7700_vm2 = vmpackc.low %vm13811_vm14, %vm13812_vm13  ;;  %14533 = vst [vmem:[#allocation39_spill] sm:$0xff] %v7704_v49  ;;  %v14539_v49 = vld [vmem:[#allocation52_spill] sm:$0xff]  ;;  %vm14551_vm14 = vcmp.eq.f32.partialorder %v6938_v38, %v7429_v20 }
 0x3b3   : > { %5471 = vmatpush1.bf16.msk.msra.mxu0 %vm5470_vm8, %v14534_v51  ;;  %vm7715_vm10 = vmpackc.low %vm13819_vm11, %vm13822_vm1  ;;  %14537 = vst [vmem:[#allocation40_spill] sm:$0xff] %v7719_v42  ;;  %vm1999_vm13 = vcmp.eq.f32.partialorder %v14539_v49, %v7429_v20  ;;  %v2264_v44 = vmin.f32 %v7638_v48, %v2263_v8  ;;  %v7737_v42 = vpop.f32.mrb[23].mxu0  ;;  %v14545_v8 = vld [vmem:[#allocation18_spill] sm:$0xff]  ;;  %vm14550_vm11 = vcmp.eq.f32.partialorder %v14495_v56, %v7429_v20  ;;  %v7767_v33 = vsel %vm14551_vm14, inf, %v6938_v38 }
 0x3b4   : > { %5473 = vmatprep.subr.msk.bf16.mxu0 %vm5472_vm4, %v14534_v51  ;;  %vm7733_vm8 = vmpackc.low %vm13823_vm9, %vm13824_vm12  ;;  %14542 = vst [vmem:[#allocation31_spill] sm:$0xff] %v7737_v42  ;;  %vm14546_vm9 = vcmp.eq.f32.partialorder %v7354_v60, %v7429_v20  ;;  %v14547_v42 = vmov 0  ;;  %v1389_v48 = vpop.f32.mrb[24].mxu0  ;;  %v7761_v28 = vsel %vm14550_vm11, inf, %v14495_v56  ;;  %vm14554_vm11 = vcmp.eq.f32.partialorder %v7343_v15, %v7427_v2 }
 0x3b5   : > { %vm7753_vm12 = vmpackc.low %vm14546_vm9, %vm2019_vm7  ;;  %vm14552_vm9 = vcmp.eq.f32.partialorder %v14501_v6, %v7427_v2  ;;  %v14555_v56 = vmov 0  ;;  %v1391_v38 = vpop.f32.mrb[25].mxu0  ;;  %vm13856_vm14 = vcmp.eq.f32.partialorder %v14558_v1, %v7427_v2  ;;  %vm14560_vm1 = vcmp.eq.f32.partialorder %v14496_v55, %v7429_v20 }
 0x3b6   : > { %v14548_v42 = vsel %vm7753_vm12, 4294967295, %v14547_v42  ;;  %v7773_v43 = vsel %vm14552_vm9, inf, %v14501_v6  ;;  %vm7782_vm4 = vmpackc.low %vm14554_vm11, %vm13836_vm0  ;;  %v7794_v6 = vsel %vm14560_vm1, inf, %v14496_v55  ;;  %vm14561_vm11 = vcmp.eq.f32.partialorder %v14502_v41, %v7427_v2 }
 0x3b7   : > { %14549 = vst [vmem:[#allocation42_spill] sm:$0xff] %v14548_v42  ;;  %14553 = vst [vmem:[#allocation43_spill] sm:$0xff] %v7773_v43  ;;  %v2265_v42 = vmin.f32 %v7654_v45, %v2264_v44  ;;  %v14556_v56 = vsel %vm7782_vm4, 4294967295, %v14555_v56  ;;  %v7800_v44 = vsel %vm14561_vm11, inf, %v14502_v41  ;;  %vm14563_vm0 = vcmp.eq.f32.partialorder %v14497_v40, %v7429_v20  ;;  %5475 = vmatpush1.bf16.msk.msra.mxu0 %vm7700_vm2, %v14534_v51 }
 0x3b8   : > { %14557 = vst [vmem:[#allocation32_spill] sm:$0xff] %v14556_v56  ;;  %14562 = vst [vmem:[#allocation35_spill] sm:$0xff] %v7800_v44  ;;  %v7806_v45 = vsel %vm14563_vm0, inf, %v14497_v40  ;;  %vm14564_vm9 = vcmp.eq.f32.partialorder %v14505_v34, %v7427_v2  ;;  %vm14565_vm1 = vcmp.eq.f32.partialorder %v7370_v26, %v7429_v20  ;;  %v14566_v55 = vmov 0  ;;  %v1393_v40 = vpop.f32.mrb[26].mxu0  ;;  %5477 = vmatprep.subr.msk.bf16.mxu0 %vm7715_vm10, %v14534_v51 }
 0x3b9   : > { %v7812_v56 = vsel %vm14564_vm9, inf, %v14505_v34  ;;  %vm7823_vm11 = vmpackc.low %vm2025_vm5, %vm14565_vm1  ;;  %vm14569_vm0 = vcmp.eq.f32.partialorder %v7003_v61, %v7427_v2  ;;  %v2266_v39 = vmin.f32 %v7660_v29, %v2265_v42  ;;  %vm14570_vm2 = vcmp.eq.f32.partialorder %v7109_v19, %v7429_v20 }
 0x3ba   : > { %v14567_v55 = vsel %vm7823_vm11, 4294967295, %v14566_v55  ;;  %v7831_v41 = vsel %vm14569_vm0, inf, %v7003_v61  ;;  %v7838_v34 = vsel %vm14570_vm2, inf, %v7109_v19  ;;  %vm14573_vm9 = vcmp.eq.f32.partialorder %v7361_v30, %v7427_v2  ;;  %v1395_v19 = vpop.f32.mrb[27].mxu0 }
 0x3bb   : > { %14568 = vst [vmem:[#allocation38_spill] sm:$0xff] %v14567_v55  ;;  %14571 = vst [vmem:[#allocation41_spill] sm:$0xff] %v7838_v34  ;;  %v7844_v55 = vsel %vm1991_vm3, inf, %v7115_v11  ;;  %v7863_v11 = vsel %vm2019_vm7, inf, %v7340_v37  ;;  %vm14576_vm3 = vcmp.eq.f32.partialorder %v7343_v15, %v7427_v2  ;;  %vm14577_vm10 = vcmp.eq.f32.partialorder %v7354_v60, %v7429_v20  ;;  %5479 = vmatpush1.bf16.msk.msra.mxu0 %vm7733_vm8, %v14534_v51 }
 0x3bc   : > { %14572 = vst [vmem:[#allocation44_spill] sm:$0xff] %v7844_v55  ;;  %vm7855_vm1 = vmpackc.low %vm2024_vm15, %vm14573_vm9  ;;  %v7869_v42 = vsel %vm14576_vm3, inf, %v7343_v15  ;;  %v7875_v46 = vsel %vm14577_vm10, inf, %v7354_v60  ;;  %vm14580_vm7 = vcmp.eq.f32.partialorder %v7423_v16, %v7429_v20  ;;  %v2267_v15 = vmin.f32 %v7838_v34, %v2266_v39 }
 0x3bd   : > { %14578 = vst [vmem:[#allocation47_spill] sm:$0xff] %v7875_v46  ;;  %vm14579_vm0 = vmmov %vm14573_vm9  ;;  %vm14583_vm9 = vcmp.eq.f32.partialorder %v7370_v26, %v7429_v20  ;;  %v7910_v46 = vsel %vm2025_vm5, inf, %v7390_v31  ;;  %vm14584_vm3 = vcmp.eq.f32.partialorder %v7393_v50, %v7427_v2  ;;  %vm14585_vm10 = vcmp.eq.f32.partialorder %v7418_v63, %v7427_v2 }
 0x3be   : > { %v7881_v29 = vsel %vm14579_vm0, inf, %v7361_v30  ;;  %vm7889_vm2 = vmpackc.low %vm14580_vm7, %vm2027_vm6  ;;  %v7898_v60 = vsel %vm14583_vm9, inf, %v7370_v26  ;;  %v7904_v30 = vsel %vm2024_vm15, inf, %v7375_v12  ;;  %v7932_v31 = vsel %vm2027_vm6, inf, %v7401_v9 }
 0x3bf   : > { %vm7918_vm0 = vmpackc.low %vm14585_vm10, %vm14584_vm3  ;;  %v7944_v34 = vsel %vm14580_vm7, inf, %v7423_v16  ;;  %vm14591_vm6 = vcmp.eq.f32.partialorder %v14544_v3, %v7429_v20  ;;  %v2222_v9 = vmin.f32 %v7578_v57, %v7773_v43  ;;  %vm14592_vm8 = vcmp.eq.f32.partialorder %v7130_v32, %v7429_v20 }
 0x3c0   : > { %vm14588_vm15 = vmmov %vm14584_vm3  ;;  %v7967_v36 = vsel %vm14592_vm8, inf, %v7130_v32  ;;  %v7973_v43 = vpack.c.bf16 %v1395_v19, %v1391_v38  ;;  %vm13855_vm3 = vcmp.eq.f32.partialorder %v7249_v10, %v7429_v20  ;;  %vm13854_vm7 = vcmp.eq.f32.partialorder %v7270_v58, %v7429_v20  ;;  %v14606_v19 = vld [vmem:[#allocation22_spill] sm:$0xff] }
 0x3c1   : > { %v7926_v12 = vsel %vm14588_vm15, inf, %v7393_v50  ;;  %vm14589_vm5 = vmmov %vm14585_vm10  ;;  %v2268_v50 = vmin.f32 %v7844_v55, %v2267_v15  ;;  %14593 = vst [vmem:[#allocation8_spill] sm:$0xff] %v7967_v36  ;;  %v7971_v55 = vpack.c.bf16 %v1393_v40, %v1389_v48  ;;  %vm14596_vm10 = vcmp.eq.f32.partialorder %v14538_v23, %v7427_v2 }
 0x3c2   : > { %v7938_v39 = vsel %vm14589_vm5, inf, %v7418_v63  ;;  %vm5480_vm9 = vmpackc.low %vm14591_vm6, %vm1999_vm13  ;;  %v2223_v63 = vmin.f32 %v7584_v7, %v7800_v44  ;;  %14595 = vst [vmem:[#allocation53_spill] sm:$0xff] %v7973_v43  ;;  %v2224_v44 = vmin.f32 %v2222_v9, %v7812_v56  ;;  %vm14597_vm15 = vcmp.eq.f32.partialorder %v14543_v13, %v7427_v2  ;;  %4756 = vmatprep.mubr.bf16.mxu0 %v7973_v43 }
 0x3c3   : > { %14590 = vst [vmem:[#allocation6_spill] sm:$0xff] %v7938_v39  ;;  %5481 = vmatprep.subr.msk.bf16.mxu0 %vm5480_vm9, %v14534_v51  ;;  %14594 = vst [vmem:[#allocation50_spill] sm:$0xff] %v7971_v55  ;;  %v2269_v16 = vmin.f32 %v7967_v36, %v2268_v50  ;;  %vm14598_vm6 = vcmp.eq.f32.partialorder %v14510_v5, %v7427_v2  ;;  %vm14599_vm9 = vcmp.eq.f32.partialorder %v7047_v18, %v7427_v2 }
 0x3c4   : > { %v2225_v7 = vmin.f32 %v2223_v63, %v7831_v41  ;;  %vm5482_vm5 = vmpackc.low %vm14597_vm15, %vm14596_vm10  ;;  %v7992_v32 = vsel %vm14598_vm6, inf, %v14510_v5  ;;  %v7998_v48 = vsel %vm14599_vm9, inf, %v7047_v18  ;;  %vm14600_vm8 = vcmp.eq.f32.partialorder %v7145_v59, %v7429_v20  ;;  %4809 = vmatprep.mubr.bf16.mxu1 %v7973_v43 }
 0x3c5   : > { %v8004_v38 = vsel %vm14600_vm8, inf, %v7145_v59  ;;  %5483 = vmatpush1.bf16.msk.msra.mxu0 %vm5482_vm5, %v14534_v51  ;;  %vm14601_vm10 = vcmp.eq.f32.partialorder %v14545_v8, %v7429_v20  ;;  %vm14602_vm15 = vcmp.eq.f32.partialorder %v7241_v0, %v7429_v20  ;;  %v2226_v5 = vmin.f32 %v2224_v44, %v7992_v32 }
 0x3c6   : > { %vm5484_vm6 = vmpackc.low %vm14602_vm15, %vm14601_vm10  ;;  %v2270_v18 = vmin.f32 %v8004_v38, %v2269_v16  ;;  %v2227_v40 = vmin.f32 %v2225_v7, %v7998_v48  ;;  %vm2006_vm5 = vcmp.eq.f32.partialorder %v7244_v21, %v7427_v2  ;;  %vm14603_vm9 = vcmp.eq.f32.partialorder %v7059_v14, %v7427_v2 }
 0x3c7   : > { %5485 = vmatprep.subr.msk.bf16.mxu0 %vm5484_vm6, %v14534_v51  ;;  %v8025_v59 = vsel %vm14603_vm9, inf, %v7059_v14  ;;  %vm14604_vm8 = vcmp.eq.f32.partialorder %v7077_v4, %v7427_v2  ;;  %vm14605_vm10 = vcmp.eq.f32.partialorder %v14526_v17, %v7429_v20  ;;  %vm14607_vm6 = vcmp.eq.f32.partialorder %v14559_v62, %v7427_v2 }
 0x3c8   : > { %v8031_v44 = vsel %vm14604_vm8, inf, %v7077_v4  ;;  %v8037_v7 = vsel %vm14605_vm10, inf, %v14526_v17  ;;  %v2228_v14 = vmin.f32 %v2226_v5, %v8025_v59  ;;  %vm5486_vm9 = vmpackc.low %vm14607_vm6, %vm13856_vm14  ;;  %vm13862_vm8 = vcmp.eq.f32.partialorder %v7278_v53, %v7429_v20 }
 0x3c9   : > { %v2271_v50 = vmin.f32 %v8037_v7, %v2270_v18  ;;  %v2229_v9 = vmin.f32 %v2227_v40, %v8031_v44  ;;  %vm14608_vm10 = vcmp.eq.f32.partialorder %v14512_v35, %v7427_v2  ;;  %vm14609_vm15 = vcmp.eq.f32.partialorder %v7101_v24, %v7427_v2  ;;  %5487 = vmatpush1.bf16.msk.msra.mxu0 %vm5486_vm9, %v14534_v51  ;;  %vm5488_vm6 = vmpackc.low %vm13854_vm7, %vm13855_vm3 }
 0x3ca   : > { %v8056_v4 = vsel %vm14608_vm10, inf, %v14512_v35  ;;  %v8062_v17 = vsel %vm14609_vm15, inf, %v7101_v24  ;;  %v8068_v63 = vsel %vm1999_vm13, inf, %v14539_v49  ;;  %vm13861_vm10 = vcmp.eq.f32.partialorder %v7302_v25, %v7429_v20  ;;  %5489 = vmatprep.subr.msk.bf16.mxu0 %vm5488_vm6, %v14534_v51 }
 0x3cb   : > { %v2272_v24 = vmin.f32 %v8068_v63, %v2271_v50  ;;  %v2230_v35 = vmin.f32 %v2228_v14, %v8056_v4  ;;  %v2231_v16 = vmin.f32 %v2229_v9, %v8062_v17  ;;  %vm2010_vm13 = vcmp.eq.f32.partialorder %v7273_v22, %v7427_v2  ;;  %v14617_v9 = vld [vmem:[#allocation16_spill] sm:$0xff] }
 0x3cc   : > { %vm14610_vm15 = vcmp.eq.f32.partialorder %v7120_v27, %v7427_v2  ;;  %vm14611_vm9 = vcmp.eq.f32.partialorder %v7142_v47, %v7427_v2  ;;  %vm14612_vm7 = vcmp.eq.f32.partialorder %v14544_v3, %v7429_v20  ;;  %vm14618_vm14 = vcmp.eq.f32.partialorder %v14617_v9, %v7427_v2 }
 0x3cd   : > { %v8089_v49 = vsel %vm14610_vm15, inf, %v7120_v27  ;;  %v8095_v18 = vsel %vm14611_vm9, inf, %v7142_v47  ;;  %v8101_v5 = vsel %vm14612_vm7, inf, %v14544_v3  ;;  %vm14613_vm15 = vcmp.eq.f32.partialorder %v14606_v19, %v7427_v2  ;;  %v14614_v47 = vld [vmem:[#allocation24_spill] sm:$0xff]  ;;  %v14615_v3 = vld [vmem:[#allocation15_spill] sm:$0xff] }
 0x3ce   : > { %v2273_v40 = vmin.f32 %v8101_v5, %v2272_v24  ;;  %v2232_v27 = vmin.f32 %v2230_v35, %v8089_v49  ;;  %v2233_v50 = vmin.f32 %v2231_v16, %v8095_v18  ;;  %vm5490_vm9 = vmpackc.low %vm14613_vm15, %vm2006_vm5  ;;  %vm2015_vm7 = vcmp.eq.f32.partialorder %v14614_v47, %v7429_v20  ;;  %v14620_v16 = vld [vmem:[#allocation26_spill] sm:$0xff] }
 0x3cf   : > { %vm14616_vm3 = vcmp.eq.f32.partialorder %v14615_v3, %v7427_v2  ;;  %v8126_v24 = vsel %vm14618_vm14, inf, %v14617_v9  ;;  %vm14619_vm6 = vcmp.eq.f32.partialorder %v14545_v8, %v7429_v20  ;;  %5491 = vmatpush1.bf16.msk.msra.mxu0 %vm5490_vm9, %v14534_v51  ;;  %vm2017_vm15 = vcmp.eq.f32.partialorder %v14620_v16, %v7429_v20 }
 0x3d0   : > { %v8120_v14 = vsel %vm14616_vm3, inf, %v14615_v3  ;;  %v8132_v35 = vsel %vm14619_vm6, inf, %v14545_v8  ;;  %vm5492_vm3 = vmpackc.low %vm13861_vm10, %vm13862_vm8  ;;  %v2235_v15 = vmin.f32 %v2233_v50, %v8126_v24  ;;  %vm14621_vm14 = vcmp.eq.f32.partialorder %v14538_v23, %v7427_v2 }
 0x3d1   : > { %v2274_v3 = vmin.f32 %v8132_v35, %v2273_v40  ;;  %v2234_v9 = vmin.f32 %v2232_v27, %v8120_v14  ;;  %5493 = vmatprep.subr.msk.bf16.mxu0 %vm5492_vm3, %v14534_v51  ;;  %v8151_v8 = vsel %vm14621_vm14, inf, %v14538_v23  ;;  %vm14622_vm6 = vcmp.eq.f32.partialorder %v14543_v13, %v7427_v2  ;;  %v14625_v27 = vld [vmem:[#allocation23_spill] sm:$0xff] }
 0x3d2   : > { %v8157_v43 = vsel %vm14622_vm6, inf, %v14543_v13  ;;  %vm14623_vm9 = vcmp.eq.f32.partialorder %v7241_v0, %v7429_v20  ;;  %vm14626_vm14 = vcmp.eq.f32.partialorder %v7283_v52, %v7427_v2  ;;  %v14627_v13 = vld [vmem:[#allocation25_spill] sm:$0xff]  ;;  %vm14628_vm10 = vcmp.eq.f32.partialorder %v14558_v1, %v7427_v2 }
 0x3d3   : > { %v8163_v40 = vsel %vm14623_vm9, inf, %v7241_v0  ;;  %v2236_v23 = vmin.f32 %v2234_v9, %v8151_v8  ;;  %v2237_v36 = vmin.f32 %v2235_v15, %v8157_v43  ;;  %vm5494_vm6 = vmpackc.low %vm14626_vm14, %vm2010_vm13  ;;  %vm2016_vm9 = vcmp.eq.f32.partialorder %v14627_v13, %v7427_v2 }
 0x3d4   : > { %14624 = vst [vmem:[#allocation45_spill] sm:$0xff] %v8163_v40  ;;  %v2275_v50 = vmin.f32 %v8163_v40, %v2274_v3  ;;  %v8182_v0 = vsel %vm14628_vm10, inf, %v14558_v1  ;;  %vm14629_vm8 = vcmp.eq.f32.partialorder %v14559_v62, %v7427_v2  ;;  %vm14630_vm3 = vcmp.eq.f32.partialorder %v7249_v10, %v7429_v20  ;;  %5495 = vmatpush1.bf16.msk.msra.mxu0 %vm5494_vm6, %v14534_v51  ;;  %vm5496_vm10 = vmpackc.low %vm2017_vm15, %vm2015_vm7 }
 0x3d5   : > { %v8188_v15 = vsel %vm14629_vm8, inf, %v14559_v62  ;;  %v8194_v3 = vsel %vm14630_vm3, inf, %v7249_v10  ;;  %v2238_v62 = vmin.f32 %v2236_v23, %v8182_v0  ;;  %5497 = vmatprep.subr.msk.bf16.mxu0 %vm5496_vm10, %v14534_v51  ;;  %v8211_v10 = vsel %vm2006_vm5, inf, %v7244_v21 }
 0x3d6   : > { %14631 = vst [vmem:[#allocation46_spill] sm:$0xff] %v8194_v3  ;;  %v2276_v1 = vmin.f32 %v8194_v3, %v2275_v50  ;;  %v2239_v9 = vmin.f32 %v2237_v36, %v8188_v15  ;;  %vm14632_vm8 = vcmp.eq.f32.partialorder %v14606_v19, %v7427_v2  ;;  %vm14633_vm3 = vcmp.eq.f32.partialorder %v7270_v58, %v7429_v20 }
 0x3d7   : > { %v8217_v40 = vsel %vm14632_vm8, inf, %v14606_v19  ;;  %v8223_v50 = vsel %vm14633_vm3, inf, %v7270_v58  ;;  %v2240_v23 = vmin.f32 %v2238_v62, %v8211_v10  ;;  %vm14634_vm5 = vcmp.eq.f32.partialorder %v14625_v27, %v7427_v2 }
 0x3d8   : > { %v2277_v36 = vmin.f32 %v8223_v50, %v2276_v1  ;;  %v2241_v3 = vmin.f32 %v2239_v9, %v8217_v40  ;;  %vm5498_vm14 = vmpackc.low %vm2016_vm9, %vm14634_vm5  ;;  %v8238_v21 = vsel %vm2010_vm13, inf, %v7273_v22  ;;  %vm14635_vm6 = vcmp.eq.f32.partialorder %v7278_v53, %v7429_v20 }
 0x3d9   : > { %v8244_v58 = vsel %vm14635_vm6, inf, %v7278_v53  ;;  %vm14636_vm10 = vcmp.eq.f32.partialorder %v7283_v52, %v7427_v2  ;;  %5499 = vmatpush1.bf16.msk.msra.mxu0 %vm5498_vm14, %v14534_v51  ;;  %v2242_v62 = vmin.f32 %v2240_v23, %v8238_v21  ;;  %vm14638_vm13 = vcmp.eq.f32.partialorder %v7302_v25, %v7429_v20  ;;  %vm14640_vm8 = vmmov %vm14634_vm5  ;;  %v14644_v20 = vld [vmem:[#allocation47_spill] sm:$0xff] }
 0x3da   : > { %v8250_v19 = vsel %vm14636_vm10, inf, %v7283_v52  ;;  %v2278_v1 = vmin.f32 %v8244_v58, %v2277_v36  ;;  %5501 = vmatprep.subr.msk.bf16.mxu0 %vm7753_vm12, %v14534_v51  ;;  %v8263_v53 = vsel %vm14638_vm13, inf, %v7302_v25  ;;  %v8269_v52 = vsel %vm14640_vm8, inf, %v14625_v27 }
 0x3db   : > { %v2243_v22 = vmin.f32 %v2241_v3, %v8250_v19  ;;  %14639 = vst [vmem:[#allocation9_spill] sm:$0xff] %v8263_v53  ;;  %v8275_v3 = vsel %vm2016_vm9, inf, %v14627_v13  ;;  %v2244_v23 = vmin.f32 %v2242_v62, %v8269_v52  ;;  %v8284_v25 = vsel %vm2015_vm7, inf, %v14614_v47 }
 0x3dc   : > { %v2279_v36 = vmin.f32 %v8263_v53, %v2278_v1  ;;  %vm14641_vm12 = vcmp.eq.f32.partialorder %v7331_v54, %v7427_v2 }
 0x3dd   : > { %v2245_v9 = vmin.f32 %v2243_v22, %v8275_v3  ;;  %v8290_v27 = vsel %vm14641_vm12, inf, %v7331_v54  ;;  %5503 = vmatpush1.bf16.msk.msra.mxu0 %vm7782_vm4, %v14534_v51  ;;  %v8305_v54 = vsel %vm2017_vm15, inf, %v14620_v16 }
 0x3de   : > { %v2280_v1 = vmin.f32 %v8284_v25, %v2279_v36  ;;  %v2246_v62 = vmin.f32 %v2244_v23, %v8290_v27  ;;  %5505 = vmatprep.subr.msk.bf16.mxu0 %vm7823_vm11, %v14534_v51 }
 0x3df   : > { %v2247_v22 = vmin.f32 %v2245_v9, %v7869_v42 }
 0x3e0   : > { %v2281_v2 = vmin.f32 %v8305_v54, %v2280_v1  ;;  %v2248_v47 = vmin.f32 %v2246_v62, %v7881_v29 }
 0x3e1   : > { %v2249_v36 = vmin.f32 %v2247_v22, %v7904_v30  ;;  %5507 = vmatpush1.bf16.msk.msra.mxu0 %vm7855_vm1, %v14534_v51 }
 0x3e2   : > { %v2282_v23 = vmin.f32 %v7863_v11, %v2281_v2  ;;  %v2250_v53 = vmin.f32 %v2248_v47, %v7926_v12  ;;  %5509 = vmatprep.subr.msk.bf16.mxu0 %vm7889_vm2, %v14534_v51 }
 0x3e3   : > { %v2251_v9 = vmin.f32 %v2249_v36, %v7938_v39 }
 0x3e4   : > { %v2283_v16 = vmin.f32 %v14644_v20, %v2282_v23 }
 0x3e5   : > { %v2252_v13 = vmin.f32 %v2250_v53, %v2251_v9  ;;  %5511 = vmatpush1.bf16.msk.msra.mxu0 %vm7918_vm0, %v14534_v51  ;;  %v14645_v53 = vmin.f32 %v7761_v28, %v7794_v6 }
 0x3e6   : > { %v2284_v61 = vmin.f32 %v7898_v60, %v2283_v16  ;;  %v14646_v16 = vmin.f32 %v7767_v33, %v7806_v45 }
 0x3e7   : > { %v2253_v1 = vrot.slane %v2252_v13, 4 }
 0x3e8   : > { %v2285_v62 = vmin.f32 %v7910_v46, %v2284_v61  ;;  %4757 = vmatmul.mubr.bf16.vlgmr.msra.gmra.mrb[32].mxu0 %v7971_v55 }
 0x3e9   : > { %v2254_v22 = vmin.f32 %v2252_v13, %v2253_v1  ;;  %v8336_v13 = vpop.f32.mrb[28].mxu0 }
 0x3ea   : > { %v2286_v2 = vmin.f32 %v7932_v31, %v2285_v62  ;;  %14647 = vst [vmem:[#allocation7_spill] sm:$0xff] %v8336_v13  ;;  %v14648_v62 = vld [vmem:[#allocation57_spill] sm:$0xff] }
 0x3eb   : > { %v2255_v47 = vrot.slane %v2254_v22, 2 }
 0x3ec   : > { %v2287_v37 = vmin.f32 %v7944_v34, %v2286_v2  ;;  %v8344_v2 = vpop.f32.mrb[29].mxu0 }
 0x3ed   : > { %v2256_v36 = vmin.f32 %v2254_v22, %v2255_v47  ;;  %v14649_v22 = vld [vmem:[#allocation43_spill] sm:$0xff]  ;;  %14650 = vst [vmem:[#allocation11_spill] sm:$0xff] %v8344_v2  ;;  %v14664_v2 = vmov 0 }
 0x3ee   : > { %v2288_v26 = vmin.f32 %v14645_v53, %v2287_v37  ;;  %v14651_v47 = vld [vmem:[#allocation35_spill] sm:$0xff]  ;;  %v14726_v37 = vld [vmem:[#allocation46_spill] sm:$0xff] }
 0x3ef   : > { %v2257_v23 = vrot.slane %v2256_v36, 1 }
 0x3f0   : > { %v2289_v61 = vmin.f32 %v14646_v16, %v2288_v26 }
 0x3f1   : > { %v8331_v9 = vmin.f32 %v2256_v36, %v2257_v23  ;;  %v8364_v36 = vpop.f32.mrb[30].mxu0 }
 0x3f2   : > { %v2290_v1 = vrot.slane %v2289_v61, 4  ;;  %14654 = vst [vmem:[#allocation12_spill] sm:$0xff] %v8364_v36  ;;  %v8382_v26 = vpop.f32.mrb[31].mxu0  ;;  %v14672_v36 = vmov 0 }
 0x3f3   : > { %vm13872_vm4 = vcmp.eq.f32.partialorder %v7578_v57, %v8331_v9  ;;  %vm13871_vm11 = vcmp.eq.f32.partialorder %v14648_v62, %v8331_v9  ;;  %vm13870_vm1 = vcmp.eq.f32.partialorder %v14649_v22, %v8331_v9  ;;  %vm13869_vm2 = vcmp.eq.f32.partialorder %v14651_v47, %v8331_v9  ;;  %14657 = vst [vmem:[#allocation10_spill] sm:$0xff] %v8382_v26 }
 0x3f4   : > { %vm13874_vm0 = vcmp.eq.f32.partialorder %v7812_v56, %v8331_v9  ;;  %vm13873_vm7 = vcmp.eq.f32.partialorder %v7831_v41, %v8331_v9  ;;  %vm13878_vm15 = vcmp.eq.f32.partialorder %v7992_v32, %v8331_v9  ;;  %vm8360_vm9 = vmpackc.low %vm13871_vm11, %vm13872_vm4  ;;  %v2291_v23 = vmin.f32 %v2289_v61, %v2290_v1 }
 0x3f5   : > { %vm13875_vm3 = vcmp.eq.f32.partialorder %v7998_v48, %v8331_v9  ;;  %vm13880_vm5 = vcmp.eq.f32.partialorder %v8025_v59, %v8331_v9  ;;  %vm13879_vm14 = vcmp.eq.f32.partialorder %v8031_v44, %v8331_v9  ;;  %vm8378_vm6 = vmpackc.low %vm13869_vm2, %vm13870_vm1  ;;  %vm13882_vm10 = vcmp.eq.f32.partialorder %v8056_v4, %v8331_v9 }
 0x3f6   : > { %vm13881_vm13 = vcmp.eq.f32.partialorder %v8062_v17, %v8331_v9  ;;  %vm13884_vm8 = vcmp.eq.f32.partialorder %v8089_v49, %v8331_v9  ;;  %vm13883_vm12 = vcmp.eq.f32.partialorder %v8095_v18, %v8331_v9  ;;  %vm8398_vm2 = vmpackc.low %vm13873_vm7, %vm13874_vm0  ;;  %v2292_v61 = vrot.slane %v2291_v23, 2 }
 0x3f7   : > { %vm8414_vm7 = vmpackc.low %vm13875_vm3, %vm13878_vm15  ;;  %vm13890_vm0 = vcmp.eq.f32.partialorder %v8157_v43, %v8331_v9  ;;  %vm13889_vm1 = vcmp.eq.f32.partialorder %v8182_v0, %v8331_v9  ;;  %vm14675_vm11 = vcmp.eq.f32.partialorder %v7578_v57, %v8331_v9  ;;  %vm14677_vm4 = vcmp.eq.f32.partialorder %v14648_v62, %v8331_v9 }
 0x3f8   : > { %vm8432_vm3 = vmpackc.low %vm13879_vm14, %vm13880_vm5  ;;  %v2293_v26 = vmin.f32 %v2291_v23, %v2292_v61  ;;  %v14667_v23 = vmov 0  ;;  %vm14670_vm5 = vcmp.eq.f32.partialorder %v8120_v14, %v8331_v9  ;;  %v8498_v13 = vsel %vm14677_vm4, inf, %v14648_v62 }
 0x3f9   : > { %vm8448_vm14 = vmpackc.low %vm13881_vm13, %vm13882_vm10  ;;  %vm14671_vm10 = vcmp.eq.f32.partialorder %v8126_v24, %v8331_v9  ;;  %14678 = vst [vmem:[#allocation51_spill] sm:$0xff] %v8498_v13  ;;  %vm14685_vm4 = vcmp.eq.f32.partialorder %v14651_v47, %v8331_v9  ;;  %vm14699_vm15 = vcmp.eq.f32.partialorder %v8025_v59, %v8331_v9 }
 0x3fa   : > { %v14665_v2 = vsel %vm8448_vm14, 4294967295, %v14664_v2  ;;  %vm8466_vm13 = vmpackc.low %vm13883_vm12, %vm13884_vm8  ;;  %v2294_v61 = vrot.slane %v2293_v26, 1  ;;  %v8522_v62 = vsel %vm14685_vm4, inf, %v14651_v47  ;;  %vm14691_vm8 = vcmp.eq.f32.partialorder %v8188_v15, %v8331_v9 }
 0x3fb   : > { %14666 = vst [vmem:[#allocation48_spill] sm:$0xff] %v14665_v2  ;;  %v14668_v23 = vsel %vm8466_vm13, 4294967295, %v14667_v23  ;;  %vm8482_vm12 = vmpackc.low %vm14671_vm10, %vm14670_vm5  ;;  %vm14679_vm5 = vcmp.eq.f32.partialorder %v14649_v22, %v8331_v9  ;;  %vm14681_vm10 = vcmp.eq.f32.partialorder %v8151_v8, %v8331_v9  ;;  %v14692_v47 = vmov 0 }
 0x3fc   : > { %14669 = vst [vmem:[#allocation13_spill] sm:$0xff] %v14668_v23  ;;  %v14673_v36 = vsel %vm8482_vm12, 4294967295, %v14672_v36  ;;  %v8492_v23 = vsel %vm14675_vm11, inf, %v7578_v57  ;;  %vm8512_vm11 = vmpackc.low %vm13890_vm0, %vm14681_vm10  ;;  %v14682_v57 = vmov 0  ;;  %v8516_v2 = vmin.f32 %v2293_v26, %v2294_v61 }
 0x3fd   : > { %14674 = vst [vmem:[#allocation14_spill] sm:$0xff] %v14673_v36  ;;  %14676 = vst [vmem:[#allocation49_spill] sm:$0xff] %v8492_v23  ;;  %v8504_v36 = vsel %vm14679_vm5, inf, %v14649_v22  ;;  %v14683_v57 = vsel %vm8512_vm11, 4294967295, %v14682_v57  ;;  %vm14687_vm5 = vcmp.eq.f32.partialorder %v7812_v56, %v8331_v9  ;;  %vm14689_vm10 = vcmp.eq.f32.partialorder %v7831_v41, %v8331_v9 }
 0x3fe   : > { %14680 = vst [vmem:[#allocation17_spill] sm:$0xff] %v8504_v36  ;;  %14684 = vst [vmem:[#allocation52_spill] sm:$0xff] %v14683_v57  ;;  %v8528_v22 = vsel %vm14687_vm5, inf, %v7812_v56  ;;  %v8534_v13 = vsel %vm14689_vm10, inf, %v7831_v41  ;;  %vm14695_vm5 = vcmp.eq.f32.partialorder %v7992_v32, %v8331_v9  ;;  %vm14697_vm10 = vcmp.eq.f32.partialorder %v7998_v48, %v8331_v9  ;;  %v14720_v57 = vld [vmem:[#allocation34_spill] sm:$0xff] }
 0x3ff   : > { %14686 = vst [vmem:[#allocation54_spill] sm:$0xff] %v8522_v62  ;;  %14688 = vst [vmem:[#allocation56_spill] sm:$0xff] %v8528_v22  ;;  %v8550_v56 = vsel %vm14695_vm5, inf, %v7992_v32  ;;  %v8556_v41 = vsel %vm14697_vm10, inf, %v7998_v48  ;;  %v8562_v26 = vsel %vm14699_vm15, inf, %v8025_v59  ;;  %vm14703_vm5 = vcmp.eq.f32.partialorder %v8211_v10, %v8331_v9  ;;  %v14713_v59 = vld [vmem:[#allocation58_spill] sm:$0xff] }
 0x400   : > { %14690 = vst [vmem:[#allocation18_spill] sm:$0xff] %v8534_v13  ;;  %vm8542_vm4 = vmpackc.low %vm14691_vm8, %vm13889_vm1  ;;  %vm14701_vm8 = vcmp.eq.f32.partialorder %v8031_v44, %v8331_v9  ;;  %vm14704_vm1 = vcmp.eq.f32.partialorder %v8217_v40, %v8331_v9  ;;  %v14705_v32 = vmov 0  ;;  %vm14708_vm11 = vcmp.eq.f32.partialorder %v8238_v21, %v8331_v9  ;;  %v14727_v13 = vld [vmem:[#allocation9_spill] sm:$0xff] }
 0x401   : > { %v14693_v47 = vsel %vm8542_vm4, 4294967295, %v14692_v47  ;;  %14696 = vst [vmem:[#allocation19_spill] sm:$0xff] %v8550_v56  ;;  %14698 = vst [vmem:[#allocation22_spill] sm:$0xff] %v8556_v41  ;;  %v8568_v61 = vsel %vm14701_vm8, inf, %v8031_v44  ;;  %v14710_v48 = vmov 0  ;;  %v14714_v44 = vld [vmem:[#allocation59_spill] sm:$0xff]  ;;  %vm14715_vm8 = vcmp.eq.f32.partialorder %v7761_v28, %v8516_v2 }
 0x402   : > { %14694 = vst [vmem:[#allocation55_spill] sm:$0xff] %v14693_v47  ;;  %14700 = vst [vmem:[#allocation24_spill] sm:$0xff] %v8562_v26  ;;  %vm14716_vm4 = vcmp.eq.f32.partialorder %v7767_v33, %v8516_v2  ;;  %v14718_v47 = vld [vmem:[#allocation28_spill] sm:$0xff]  ;;  %vm14721_vm0 = vcmp.eq.f32.partialorder %v7794_v6, %v8516_v2  ;;  %v14724_v26 = vld [vmem:[#allocation41_spill] sm:$0xff] }
 0x403   : > { %14702 = vst [vmem:[#allocation15_spill] sm:$0xff] %v8568_v61  ;;  %vm8576_vm10 = vmpackc.low %vm14704_vm1, %vm14703_vm5  ;;  %vm14709_vm1 = vcmp.eq.f32.partialorder %v8250_v19, %v8331_v9  ;;  %v14723_v61 = vld [vmem:[#allocation36_spill] sm:$0xff]  ;;  %v14725_v41 = vld [vmem:[#allocation45_spill] sm:$0xff] }
 0x404   : > { %v14706_v32 = vsel %vm8576_vm10, 4294967295, %v14705_v32  ;;  %vm8594_vm5 = vmpackc.low %vm14709_vm1, %vm14708_vm11  ;;  %vm13906_vm1 = vcmp.eq.f32.partialorder %v8004_v38, %v8516_v2  ;;  %v1409_v56 = vld [vmem:[%s13645_s4 + $0x8] sm:$0xff]  ;;  %vm14728_vm11 = vcmp.eq.f32.partialorder %v14713_v59, %v8516_v2 }
 0x405   : > { %14707 = vst [vmem:[#allocation16_spill] sm:$0xff] %v14706_v32  ;;  %v14711_v48 = vsel %vm8594_vm5, 4294967295, %v14710_v48  ;;  %vm5512_vm10 = vmpackc.low %vm14716_vm4, %vm14715_vm8  ;;  %v14717_v32 = vld [vmem:[#allocation27_spill] sm:$0xff]  ;;  %vm14722_vm4 = vcmp.eq.f32.partialorder %v7806_v45, %v8516_v2  ;;  %1419 = vperm.xlu1 %6015, %v1409_v56  }
 0x406   : > { %14712 = vst [vmem:[#allocation26_spill] sm:$0xff] %v14711_v48  ;;  %v14719_v48 = vld [vmem:[#allocation33_spill] sm:$0xff]  ;;  %5513 = vmatprep.subr.msk.bf16.mxu1 %vm5512_vm10, %v14534_v51  ;;  %vm5516_vm8 = vmpackc.low %vm14722_vm4, %vm14721_vm0  ;;  %vm14729_vm10 = vcmp.eq.f32.partialorder %v14714_v44, %v8516_v2  ;;  %vm14732_vm15 = vcmp.eq.f32.partialorder %v14717_v32, %v8516_v2  ;;  %vm14740_vm4 = vcmp.eq.f32.partialorder %v7761_v28, %v8516_v2 }
 0x407   : > { %5515 = vmatpush1.bf16.msk.msra.mxu1 %vm8360_vm9, %v14534_v51  ;;  %v8707_v23 = vsel %vm14740_vm4, inf, %v7761_v28  ;;  %vm14743_vm9 = vmmov %vm14721_vm0  ;;  %v1410_v28 = vld [vmem:[%s13645_s4 + $0x10] sm:$0xff]  ;;  %vm14746_vm4 = vcmp.eq.f32.partialorder %v8037_v7, %v8516_v2  ;;  %vm14766_vm0 = vcmp.eq.f32.partialorder %v14725_v41, %v8516_v2 }
 0x408   : > { %5517 = vmatprep.subr.msk.bf16.mxu1 %vm5516_vm8, %v14534_v51  ;;  %vm8660_vm8 = vmpackc.low %vm14729_vm10, %vm14728_vm11  ;;  %vm14733_vm11 = vcmp.eq.f32.partialorder %v14718_v47, %v8516_v2  ;;  %v8719_v36 = vsel %vm14743_vm9, inf, %v7794_v6 }
 0x409   : > { %vm8678_vm10 = vmpackc.low %vm14733_vm11, %vm14732_vm15  ;;  %vm14736_vm15 = vcmp.eq.f32.partialorder %v14719_v48, %v8516_v2  ;;  %vm14737_vm11 = vcmp.eq.f32.partialorder %v14720_v57, %v8516_v2  ;;  %1424 = vperm.xlu1 %6015, %v1410_v28  }
 0x40a   : > { %vm8699_vm12 = vmpackc.low %vm14737_vm11, %vm14736_vm15  ;;  %vm14744_vm15 = vcmp.eq.f32.partialorder %v7806_v45, %v8516_v2 }
 0x40b   : > { %5519 = vmatpush1.bf16.msk.msra.mxu1 %vm8378_vm6, %v14534_v51  ;;  %vm14741_vm6 = vcmp.eq.f32.partialorder %v7767_v33, %v8516_v2  ;;  %v8725_v39 = vsel %vm14744_vm15, inf, %v7806_v45  ;;  %vm8739_vm9 = vmpackc.low %vm14746_vm4, %vm13906_vm1  ;;  %v14750_v45 = vld [vmem:[#allocation44_spill] sm:$0xff]  ;;  %vm14755_vm15 = vcmp.eq.f32.partialorder %v8068_v63, %v8516_v2  ;;  %vm14756_vm4 = vcmp.eq.f32.partialorder %v8101_v5, %v8516_v2 }
 0x40c   : > { %v8713_v53 = vsel %vm14741_vm6, inf, %v7767_v33  ;;  %14745 = vst [vmem:[#allocation25_spill] sm:$0xff] %v8725_v39  ;;  %5521 = vmatprep.subr.msk.bf16.mxu1 %vm8660_vm8, %v14534_v51  ;;  %v14747_v33 = vmov 0  ;;  %vm14751_vm6 = vcmp.eq.f32.partialorder %v14713_v59, %v8516_v2  ;;  %vm14753_vm8 = vcmp.eq.f32.partialorder %v14714_v44, %v8516_v2  ;;  %vm8763_vm1 = vmpackc.low %vm14756_vm4, %vm14755_vm15 }
 0x40d   : > { %14742 = vst [vmem:[#allocation23_spill] sm:$0xff] %v8713_v53  ;;  %v14748_v33 = vsel %vm8739_vm9, 4294967295, %v14747_v33  ;;  %v8749_v6 = vsel %vm14751_vm6, inf, %v14713_v59  ;;  %v8755_v22 = vsel %vm14753_vm8, inf, %v14714_v44  ;;  %vm14760_vm6 = vcmp.eq.f32.partialorder %v14717_v32, %v8516_v2 }
 0x40e   : > { %14749 = vst [vmem:[#allocation42_spill] sm:$0xff] %v14748_v33  ;;  %14752 = vst [vmem:[#allocation32_spill] sm:$0xff] %v8749_v6  ;;  %v14757_v33 = vmov 0  ;;  %v2591_v59 = vmin.f32 %v8755_v22, %v8749_v6  ;;  %v8773_v44 = vsel %vm14760_vm6, inf, %v14717_v32  ;;  %vm14762_vm8 = vcmp.eq.f32.partialorder %v14718_v47, %v8516_v2 }
 0x40f   : > { %14754 = vst [vmem:[#allocation38_spill] sm:$0xff] %v8755_v22  ;;  %v14758_v33 = vsel %vm8763_vm1, 4294967295, %v14757_v33  ;;  %14761 = vst [vmem:[#allocation57_spill] sm:$0xff] %v8773_v44  ;;  %v8779_v28 = vsel %vm14762_vm8, inf, %v14718_v47  ;;  %vm14764_vm15 = vcmp.eq.f32.partialorder %v8056_v4, %v8331_v9  ;;  %vm14765_vm4 = vcmp.eq.f32.partialorder %v8132_v35, %v8516_v2  ;;  %5523 = vmatpush1.bf16.msk.msra.mxu1 %vm8398_vm2, %v14534_v51 }
 0x410   : > { %14759 = vst [vmem:[#allocation47_spill] sm:$0xff] %v14758_v33  ;;  %14763 = vst [vmem:[#allocation43_spill] sm:$0xff] %v8779_v28  ;;  %v8785_v33 = vsel %vm14764_vm15, inf, %v8056_v4  ;;  %v14767_v32 = vmov 0  ;;  %vm14770_vm8 = vcmp.eq.f32.partialorder %v14719_v48, %v8516_v2  ;;  %v2592_v16 = vmin.f32 %v8773_v44, %v2591_v59  ;;  %v1411_v59 = vld [vmem:[%s13645_s4 + $0x18] sm:$0xff]  ;;  %5525 = vmatprep.subr.msk.bf16.mxu1 %vm8678_vm10, %v14534_v51 }
 0x411   : > { %vm8793_vm6 = vmpackc.low %vm14766_vm0, %vm14765_vm4  ;;  %v8801_v47 = vsel %vm14770_vm8, inf, %v14719_v48  ;;  %vm14775_vm0 = vcmp.eq.f32.partialorder %v8089_v49, %v8331_v9  ;;  %vm14776_vm4 = vcmp.eq.f32.partialorder %v14723_v61, %v8516_v2  ;;  %vm14777_vm8 = vcmp.eq.f32.partialorder %v14724_v26, %v8516_v2  ;;  %1429 = vperm.xlu1 %6015, %v1411_v59  }
 0x412   : > { %v14768_v32 = vsel %vm8793_vm6, 4294967295, %v14767_v32  ;;  %14771 = vst [vmem:[#allocation58_spill] sm:$0xff] %v8801_v47  ;;  %vm14772_vm15 = vmmov %vm14737_vm11  ;;  %vm14774_vm11 = vcmp.eq.f32.partialorder %v8062_v17, %v8331_v9  ;;  %v8819_v6 = vsel %vm14775_vm0, inf, %v8089_v49  ;;  %vm14781_vm0 = vcmp.eq.f32.partialorder %v8223_v50, %v8516_v2  ;;  %v14785_v49 = vld [vmem:[#allocation8_spill] sm:$0xff] }
 0x413   : > { %14769 = vst [vmem:[#allocation35_spill] sm:$0xff] %v14768_v32  ;;  %v8807_v4 = vsel %vm14772_vm15, inf, %v14720_v57  ;;  %v8813_v22 = vsel %vm14774_vm11, inf, %v8062_v17  ;;  %vm8830_vm15 = vmpackc.low %vm14777_vm8, %vm14776_vm4  ;;  %vm14780_vm11 = vcmp.eq.f32.partialorder %v14726_v37, %v8516_v2  ;;  %v14782_v17 = vmov 0  ;;  %5527 = vmatpush1.bf16.msk.msra.mxu1 %vm8414_vm7, %v14534_v51 }
 0x414   : > { %14773 = vst [vmem:[#allocation59_spill] sm:$0xff] %v8807_v4  ;;  %vm8840_vm5 = vmpackc.low %vm14781_vm0, %vm14780_vm11  ;;  %v8851_v48 = vsel %vm14776_vm4, inf, %v14723_v61  ;;  %v8857_v32 = vsel %vm14777_vm8, inf, %v14724_v26  ;;  %vm14788_vm11 = vcmp.eq.f32.partialorder %v8095_v18, %v8331_v9  ;;  %vm14789_vm0 = vcmp.eq.f32.partialorder %v8244_v58, %v8516_v2  ;;  %5529 = vmatprep.subr.msk.bf16.mxu1 %vm8699_vm12, %v14534_v51 }
 0x415   : > { %v14783_v17 = vsel %vm8840_vm5, 4294967295, %v14782_v17  ;;  %14786 = vst [vmem:[#allocation28_spill] sm:$0xff] %v8851_v48  ;;  %14787 = vst [vmem:[#allocation33_spill] sm:$0xff] %v8857_v32  ;;  %vm14790_vm4 = vcmp.eq.f32.partialorder %v14727_v13, %v8516_v2  ;;  %v14791_v26 = vmov 0  ;;  %vm14796_vm10 = vcmp.eq.f32.partialorder %v8120_v14, %v8331_v9 }
 0x416   : > { %14784 = vst [vmem:[#allocation27_spill] sm:$0xff] %v14783_v17  ;;  %v8863_v17 = vsel %vm14788_vm11, inf, %v8095_v18  ;;  %vm8877_vm8 = vmpackc.low %vm14790_vm4, %vm14789_vm0  ;;  %vm14794_vm11 = vcmp.eq.f32.partialorder %v14750_v45, %v8516_v2  ;;  %v8891_v61 = vsel %vm14796_vm10, inf, %v8120_v14  ;;  %vm14797_vm2 = vcmp.eq.f32.partialorder %v8126_v24, %v8331_v9 }
 0x417   : > { %v14792_v26 = vsel %vm8877_vm8, 4294967295, %v14791_v26  ;;  %v8885_v18 = vsel %vm14794_vm11, inf, %v14750_v45  ;;  %v8897_v56 = vsel %vm14797_vm2, inf, %v8126_v24  ;;  %vm14798_vm0 = vcmp.eq.f32.partialorder %v8037_v7, %v8516_v2  ;;  %5531 = vmatpush1.bf16.msk.msra.mxu1 %vm8432_vm3, %v14534_v51 }
 0x418   : > { %14793 = vst [vmem:[#allocation34_spill] sm:$0xff] %v14792_v26  ;;  %14795 = vst [vmem:[#allocation36_spill] sm:$0xff] %v8885_v18  ;;  %v8903_v44 = vsel %vm14798_vm0, inf, %v8037_v7  ;;  %vm14800_vm4 = vcmp.eq.f32.partialorder %v8284_v25, %v8516_v2  ;;  %vm14801_vm11 = vcmp.eq.f32.partialorder %v8305_v54, %v8516_v2  ;;  %v14802_v14 = vmov 0  ;;  %5533 = vmatprep.subr.msk.bf16.mxu1 %vm8830_vm15, %v14534_v51 }
 0x419   : > { %14799 = vst [vmem:[#allocation41_spill] sm:$0xff] %v8903_v44  ;;  %vm8911_vm10 = vmpackc.low %vm14801_vm11, %vm14800_vm4  ;;  %v2593_v24 = vmin.f32 %v8779_v28, %v2592_v16  ;;  %vm14804_vm2 = vcmp.eq.f32.partialorder %v8151_v8, %v8331_v9  ;;  %vm14805_vm0 = vcmp.eq.f32.partialorder %v8068_v63, %v8516_v2  ;;  %vm14806_vm4 = vcmp.eq.f32.partialorder %v8157_v43, %v8331_v9 }
 0x41a   : > { %v14803_v14 = vsel %vm8911_vm10, 4294967295, %v14802_v14  ;;  %v8920_v26 = vsel %vm14804_vm2, inf, %v8151_v8  ;;  %v8926_v7 = vsel %vm14805_vm0, inf, %v8068_v63  ;;  %v8932_v59 = vsel %vm14806_vm4, inf, %v8157_v43 }
 0x41b   : > { %vm14807_vm11 = vcmp.eq.f32.partialorder %v8269_v52, %v8331_v9  ;;  %vm14808_vm10 = vcmp.eq.f32.partialorder %v8275_v3, %v8331_v9  ;;  %vm14811_vm0 = vcmp.eq.f32.partialorder %v8101_v5, %v8516_v2  ;;  %vm14812_vm4 = vcmp.eq.f32.partialorder %v8182_v0, %v8331_v9  ;;  %5535 = vmatpush1.bf16.msk.msra.mxu1 %vm8448_vm14, %v14534_v51 }
 0x41c   : > { %vm8940_vm2 = vmpackc.low %vm14808_vm10, %vm14807_vm11  ;;  %v8948_v63 = vsel %vm14811_vm0, inf, %v8101_v5  ;;  %v8954_v43 = vsel %vm14812_vm4, inf, %v8182_v0  ;;  %vm14813_vm8 = vcmp.eq.f32.partialorder %v8132_v35, %v8516_v2  ;;  %vm14814_vm10 = vcmp.eq.f32.partialorder %v8188_v15, %v8331_v9 }
 0x41d   : > { %v8960_v16 = vsel %vm14813_vm8, inf, %v8132_v35  ;;  %v8966_v28 = vsel %vm14814_vm10, inf, %v8188_v15  ;;  %vm14815_vm11 = vcmp.eq.f32.partialorder %v7863_v11, %v8516_v2  ;;  %vm14816_vm0 = vcmp.eq.f32.partialorder %v14644_v20, %v8516_v2 }
 0x41e   : > { %vm8977_vm4 = vmpackc.low %vm14816_vm0, %vm14815_vm11  ;;  %v2594_v35 = vmin.f32 %v8801_v47, %v2593_v24  ;;  %vm14819_vm8 = vcmp.eq.f32.partialorder %v14725_v41, %v8516_v2  ;;  %vm14820_vm7 = vcmp.eq.f32.partialorder %v8211_v10, %v8331_v9  ;;  %vm14821_vm10 = vcmp.eq.f32.partialorder %v14726_v37, %v8516_v2 }
 0x41f   : > { %v8986_v0 = vsel %vm14819_vm8, inf, %v14725_v41  ;;  %v8992_v15 = vsel %vm14820_vm7, inf, %v8211_v10  ;;  %v8998_v1 = vsel %vm14821_vm10, inf, %v14726_v37  ;;  %vm14822_vm11 = vcmp.eq.f32.partialorder %v8290_v27, %v8331_v9 }
 0x420   : > { %vm14823_vm0 = vcmp.eq.f32.partialorder %v7869_v42, %v8331_v9  ;;  %v14824_v41 = vmov 0  ;;  %vm14826_vm7 = vcmp.eq.f32.partialorder %v8217_v40, %v8331_v9  ;;  %vm14827_vm12 = vcmp.eq.f32.partialorder %v8223_v50, %v8516_v2 }
 0x421   : > { %vm9009_vm8 = vmpackc.low %vm14823_vm0, %vm14822_vm11  ;;  %v9017_v10 = vsel %vm14826_vm7, inf, %v8217_v40  ;;  %v9023_v62 = vsel %vm14827_vm12, inf, %v8223_v50  ;;  %vm14828_vm10 = vcmp.eq.f32.partialorder %v8238_v21, %v8331_v9  ;;  %vm14829_vm11 = vcmp.eq.f32.partialorder %v8244_v58, %v8516_v2 }
 0x422   : > { %v14825_v41 = vsel %vm9009_vm8, 4294967295, %v14824_v41  ;;  %v9029_v37 = vsel %vm14828_vm10, inf, %v8238_v21  ;;  %v9035_v24 = vsel %vm14829_vm11, inf, %v8244_v58  ;;  %vm14830_vm0 = vcmp.eq.f32.partialorder %v7898_v60, %v8516_v2 }
 0x423   : > { %vm14831_vm7 = vcmp.eq.f32.partialorder %v7910_v46, %v8516_v2  ;;  %v14832_v40 = vmov 0  ;;  %v2595_v50 = vmin.f32 %v8807_v4, %v2594_v35  ;;  %vm14834_vm10 = vcmp.eq.f32.partialorder %v8250_v19, %v8331_v9 }
 0x424   : > { %vm9043_vm12 = vmpackc.low %vm14831_vm7, %vm14830_vm0  ;;  %v9052_v21 = vsel %vm14834_vm10, inf, %v8250_v19  ;;  %vm14835_vm11 = vcmp.eq.f32.partialorder %v14727_v13, %v8516_v2  ;;  %vm14836_vm0 = vcmp.eq.f32.partialorder %v8269_v52, %v8331_v9  ;;  %vm14837_vm7 = vcmp.eq.f32.partialorder %v7881_v29, %v8331_v9 }
 0x425   : > { %v14833_v40 = vsel %vm9043_vm12, 4294967295, %v14832_v40  ;;  %v9058_v58 = vsel %vm14835_vm11, inf, %v14727_v13  ;;  %v9064_v47 = vsel %vm14836_vm0, inf, %v8269_v52  ;;  %vm14838_vm12 = vcmp.eq.f32.partialorder %v7904_v30, %v8331_v9 }
 0x426   : > { %vm9072_vm10 = vmpackc.low %vm14838_vm12, %vm14837_vm7  ;;  %v14839_v19 = vmov 0  ;;  %vm14842_vm11 = vcmp.eq.f32.partialorder %v8284_v25, %v8516_v2  ;;  %vm14843_vm0 = vcmp.eq.f32.partialorder %v8275_v3, %v8331_v9  ;;  %vm14844_vm8 = vcmp.eq.f32.partialorder %v8305_v54, %v8516_v2 }
 0x427   : > { %v14840_v19 = vsel %vm9072_vm10, 4294967295, %v14839_v19  ;;  %v9080_v13 = vsel %vm14842_vm11, inf, %v8284_v25  ;;  %v9086_v52 = vsel %vm14843_vm0, inf, %v8275_v3  ;;  %v9092_v35 = vsel %vm14844_vm8, inf, %v8305_v54 }
 0x428   : > { %14841 = vst [vmem:[#allocation45_spill] sm:$0xff] %v14840_v19  ;;  %vm14845_vm12 = vcmp.eq.f32.partialorder %v8290_v27, %v8331_v9  ;;  %vm14846_vm7 = vcmp.eq.f32.partialorder %v7932_v31, %v8516_v2  ;;  %vm14847_vm11 = vcmp.eq.f32.partialorder %v7944_v34, %v8516_v2  ;;  %v14848_v3 = vmov 0  ;;  %v14876_v19 = vld [vmem:[#allocation51_spill] sm:$0xff] }
 0x429   : > { %v9098_v4 = vsel %vm14845_vm12, inf, %v8290_v27  ;;  %vm9109_vm0 = vmpackc.low %vm14847_vm11, %vm14846_vm7  ;;  %v2596_v25 = vmin.f32 %v8851_v48, %v2595_v50  ;;  %vm14851_vm8 = vcmp.eq.f32.partialorder %v7863_v11, %v8516_v2  ;;  %vm14853_vm3 = vcmp.eq.f32.partialorder %v7869_v42, %v8331_v9 }
 0x42a   : > { %v14849_v3 = vsel %vm9109_vm0, 4294967295, %v14848_v3  ;;  %v9118_v27 = vsel %vm14851_vm8, inf, %v7863_v11  ;;  %v9124_v55 = vsel %vm14853_vm3, inf, %v7869_v42  ;;  %vm14854_vm12 = vcmp.eq.f32.partialorder %v14644_v20, %v8516_v2  ;;  %v14857_v11 = vld [vmem:[#allocation6_spill] sm:$0xff] }
 0x42b   : > { %14850 = vst [vmem:[#allocation46_spill] sm:$0xff] %v14849_v3  ;;  %14852 = vst [vmem:[#allocation9_spill] sm:$0xff] %v9118_v27  ;;  %v9130_v54 = vsel %vm14854_vm12, inf, %v14644_v20  ;;  %vm14856_vm7 = vcmp.eq.f32.partialorder %v7926_v12, %v8331_v9  ;;  %vm14858_vm11 = vcmp.eq.f32.partialorder %v14857_v11, %v8331_v9  ;;  %v14859_v50 = vmov 0  ;;  %v14875_v3 = vld [vmem:[#allocation54_spill] sm:$0xff] }
 0x42c   : > { %14855 = vst [vmem:[#allocation44_spill] sm:$0xff] %v9130_v54  ;;  %vm9141_vm8 = vmpackc.low %vm14858_vm11, %vm14856_vm7  ;;  %vm14862_vm3 = vcmp.eq.f32.partialorder %v7881_v29, %v8331_v9  ;;  %vm14863_vm15 = vcmp.eq.f32.partialorder %v7898_v60, %v8516_v2  ;;  %vm14865_vm12 = vcmp.eq.f32.partialorder %v7904_v30, %v8331_v9  ;;  %vm14866_vm7 = vcmp.eq.f32.partialorder %v7910_v46, %v8516_v2 }
 0x42d   : > { %v14860_v50 = vsel %vm9141_vm8, 4294967295, %v14859_v50  ;;  %v9149_v42 = vsel %vm14862_vm3, inf, %v7881_v29  ;;  %v9155_v20 = vsel %vm14863_vm15, inf, %v7898_v60  ;;  %v9161_v57 = vsel %vm14865_vm12, inf, %v7904_v30 }
 0x42e   : > { %14861 = vst [vmem:[#allocation8_spill] sm:$0xff] %v14860_v50  ;;  %14864 = vst [vmem:[#allocation6_spill] sm:$0xff] %v9155_v20  ;;  %v9167_v48 = vsel %vm14866_vm7, inf, %v7910_v46  ;;  %v2597_v29 = vmin.f32 %v8857_v32, %v2596_v25  ;;  %vm14868_vm11 = vcmp.eq.f32.partialorder %v7926_v12, %v8331_v9  ;;  %vm14869_vm3 = vcmp.eq.f32.partialorder %v7932_v31, %v8516_v2  ;;  %v14874_v32 = vld [vmem:[#allocation49_spill] sm:$0xff] }
 0x42f   : > { %14867 = vst [vmem:[#allocation60_spill] sm:$0xff] %v9167_v48  ;;  %v9174_v60 = vsel %vm14868_vm11, inf, %v7926_v12  ;;  %v9180_v30 = vsel %vm14869_vm3, inf, %v7932_v31  ;;  %vm14871_vm15 = vcmp.eq.f32.partialorder %v14857_v11, %v8331_v9  ;;  %vm14872_vm12 = vcmp.eq.f32.partialorder %v7944_v34, %v8516_v2  ;;  %v14873_v12 = vld [vmem:[#allocation17_spill] sm:$0xff]  ;;  %v14883_v31 = vld [vmem:[#allocation11_spill] sm:$0xff] }
 0x430   : > { %14870 = vst [vmem:[#allocation61_spill] sm:$0xff] %v9180_v30  ;;  %v9186_v46 = vsel %vm14871_vm15, inf, %v14857_v11  ;;  %v9192_v25 = vsel %vm14872_vm12, inf, %v7944_v34  ;;  %v2552_v50 = vmin.f32 %v14874_v32, %v14873_v12  ;;  %v2553_v48 = vmin.f32 %v14876_v19, %v14875_v3  ;;  %v14880_v11 = vld [vmem:[#allocation7_spill] sm:$0xff]  ;;  %v14881_v3 = vld [vmem:[#allocation12_spill] sm:$0xff]  ;;  %v14884_v19 = vld [vmem:[#allocation10_spill] sm:$0xff] }
 0x431   : > { %vm14878_vm7 = vcmp.eq.f32.partialorder %v14750_v45, %v8516_v2  ;;  %vm14879_vm11 = vcmp.eq.f32.partialorder %v14785_v49, %v8516_v2  ;;  %v2598_v34 = vmin.f32 %v8885_v18, %v2597_v29  ;;  %v9214_v12 = vpack.c.bf16 %v14881_v3, %v14880_v11  ;;  %v14888_v29 = vld [vmem:[#allocation56_spill] sm:$0xff]  ;;  %v14889_v32 = vld [vmem:[#allocation18_spill] sm:$0xff]  ;;  %v14891_v3 = vld [vmem:[#allocation19_spill] sm:$0xff] }
 0x432   : > { %vm5536_vm3 = vmpackc.low %vm14879_vm11, %vm14878_vm7  ;;  %v9218_v30 = vpack.c.bf16 %v14884_v19, %v14883_v31  ;;  %v2554_v18 = vmin.f32 %v2552_v50, %v14888_v29  ;;  %v2555_v9 = vmin.f32 %v2553_v48, %v14889_v32  ;;  %vm14890_vm15 = vcmp.eq.f32.partialorder %v8004_v38, %v8516_v2  ;;  %v14892_v11 = vld [vmem:[#allocation22_spill] sm:$0xff] }
 0x433   : > { %14882 = vst [vmem:[#allocation48_spill] sm:$0xff] %v9214_v12  ;;  %5537 = vmatprep.subr.msk.bf16.mxu1 %vm5536_vm3, %v14534_v51  ;;  %vm14886_vm14 = vmmov %vm14879_vm11  ;;  %v9235_v19 = vsel %vm14890_vm15, inf, %v8004_v38  ;;  %v14896_v38 = vld [vmem:[#allocation24_spill] sm:$0xff]  ;;  %vm14913_vm7 = vnez %v14803_v14  ;;  %vm14914_vm11 = vnez %v14825_v41  ;;  %vm14915_vm3 = vnez %v14833_v40  ;;  %v14929_v40 = vld [vmem:[#allocation54_spill] sm:$0xff] }
 0x434   : > { %14885 = vst [vmem:[#allocation7_spill] sm:$0xff] %v9218_v30  ;;  %v9225_v45 = vsel %vm14886_vm14, inf, %v14785_v49  ;;  %4766 = vmatprep.mubr.bf16.mxu0 %v9218_v30  ;;  %v2556_v31 = vmin.f32 %v2554_v18, %v14891_v3  ;;  %v2557_v53 = vmin.f32 %v2555_v9, %v14892_v11  ;;  %5539 = vmatpush1.bf16.msk.msra.mxu1 %vm8466_vm13, %v14534_v51 }
 0x435   : > { %14887 = vst [vmem:[#allocation12_spill] sm:$0xff] %v9225_v45  ;;  %v2599_v39 = vmin.f32 %v9225_v45, %v2598_v34  ;;  %4767 = vmatmul.mubr.bf16.gmra.mrb[36].mxu0 %v9214_v12  ;;  %5541 = vmatprep.subr.msk.bf16.mxu1 %vm8739_vm9, %v14534_v51  ;;  %v14895_v34 = vld [vmem:[#allocation53_spill] sm:$0xff]  ;;  %v14897_v45 = vld [vmem:[#allocation15_spill] sm:$0xff]  ;;  %v14898_v12 = vld [vmem:[#allocation14_spill] sm:$0xff] }
 0x436   : > { %4862 = vmatprep.mubr.bf16.mxu0 %v14895_v34  ;;  %v2558_v2 = vmin.f32 %v2556_v31, %v14896_v38  ;;  %v2559_v18 = vmin.f32 %v2557_v53, %v14897_v45  ;;  %vm14899_vm13 = vnez %v14898_v12 }
 0x437   : > { %v2600_v48 = vmin.f32 %v9235_v19, %v2599_v39 }
 0x438   : > { %v2560_v11 = vmin.f32 %v2558_v2, %v8785_v33  ;;  %v2561_v49 = vmin.f32 %v2559_v18, %v8813_v22  ;;  %5543 = vmatpush1.bf16.msk.msra.mxu1 %vm14899_vm13, %v14534_v51 }
 0x439   : > { %v2601_v9 = vmin.f32 %v8903_v44, %v2600_v48  ;;  %5545 = vmatprep.subr.msk.bf16.mxu1 %vm8763_vm1, %v14534_v51  ;;  %v14901_v44 = vld [vmem:[#allocation52_spill] sm:$0xff] }
 0x43a   : > { %v2562_v31 = vmin.f32 %v2560_v11, %v8819_v6  ;;  %v2563_v53 = vmin.f32 %v2561_v49, %v8863_v17  ;;  %vm14902_vm9 = vnez %v14901_v44 }
 0x43b   : > { %v2602_v39 = vmin.f32 %v8926_v7, %v2601_v9 }
 0x43c   : > { %v2564_v2 = vmin.f32 %v2562_v31, %v8891_v61  ;;  %v2565_v18 = vmin.f32 %v2563_v53, %v8897_v56  ;;  %5547 = vmatpush1.bf16.msk.msra.mxu1 %vm14902_vm9, %v14534_v51  ;;  %v14904_v53 = vld [vmem:[#allocation55_spill] sm:$0xff] }
 0x43d   : > { %v2603_v48 = vmin.f32 %v8948_v63, %v2602_v39  ;;  %5549 = vmatprep.subr.msk.bf16.mxu1 %vm8793_vm6, %v14534_v51  ;;  %vm14905_vm1 = vnez %v14904_v53  ;;  %v14909_v53 = vld [vmem:[#allocation34_spill] sm:$0xff] }
 0x43e   : > { %v2566_v11 = vmin.f32 %v2564_v2, %v8920_v26  ;;  %v2567_v49 = vmin.f32 %v2565_v18, %v8932_v59  ;;  %vm14910_vm12 = vnez %v14909_v53 }
 0x43f   : > { %v2604_v12 = vmin.f32 %v8960_v16, %v2603_v48 }
 0x440   : > { %v2568_v50 = vmin.f32 %v2566_v11, %v8954_v43  ;;  %v2569_v31 = vmin.f32 %v2567_v49, %v8966_v28  ;;  %5551 = vmatpush1.bf16.msk.msra.mxu1 %vm14905_vm1, %v14534_v51  ;;  %v14907_v49 = vld [vmem:[#allocation16_spill] sm:$0xff] }
 0x441   : > { %v2605_v39 = vmin.f32 %v8986_v0, %v2604_v12  ;;  %5553 = vmatprep.subr.msk.bf16.mxu1 %vm8840_vm5, %v14534_v51  ;;  %vm14908_vm6 = vnez %v14907_v49 }
 0x442   : > { %v2570_v2 = vmin.f32 %v2568_v50, %v8992_v15  ;;  %v2571_v18 = vmin.f32 %v2569_v31, %v9017_v10 }
 0x443   : > { %v2606_v44 = vmin.f32 %v8998_v1, %v2605_v39 }
 0x444   : > { %v2572_v9 = vmin.f32 %v2570_v2, %v9029_v37  ;;  %v2573_v11 = vmin.f32 %v2571_v18, %v9052_v21  ;;  %5555 = vmatpush1.bf16.msk.msra.mxu1 %vm14908_vm6, %v14534_v51  ;;  %v14911_v18 = vld [vmem:[#allocation26_spill] sm:$0xff] }
 0x445   : > { %v2607_v12 = vmin.f32 %v9023_v62, %v2606_v44  ;;  %5557 = vmatprep.subr.msk.bf16.mxu1 %vm14910_vm12, %v14534_v51  ;;  %vm14912_vm5 = vnez %v14911_v18 }
 0x446   : > { %v2574_v50 = vmin.f32 %v2572_v9, %v9064_v47  ;;  %v2575_v31 = vmin.f32 %v2573_v11, %v9086_v52 }
 0x447   : > { %v2608_v39 = vmin.f32 %v9035_v24, %v2607_v12 }
 0x448   : > { %v2576_v48 = vmin.f32 %v2574_v50, %v9098_v4  ;;  %v2577_v2 = vmin.f32 %v2575_v31, %v9124_v55  ;;  %5559 = vmatpush1.bf16.msk.msra.mxu1 %vm14912_vm5, %v14534_v51 }
 0x449   : > { %v2609_v44 = vmin.f32 %v9058_v58, %v2608_v39  ;;  %5561 = vmatprep.subr.msk.bf16.mxu1 %vm14913_vm7, %v14534_v51 }
 0x44a   : > { %v2578_v9 = vmin.f32 %v2576_v48, %v9149_v42  ;;  %v2579_v11 = vmin.f32 %v2577_v2, %v9161_v57  ;;  %v14916_v2 = vld [vmem:[#allocation60_spill] sm:$0xff] }
 0x44b   : > { %v2610_v12 = vmin.f32 %v9080_v13, %v2609_v44 }
 0x44c   : > { %v2580_v39 = vmin.f32 %v2578_v9, %v9174_v60  ;;  %v2581_v53 = vmin.f32 %v2579_v11, %v9186_v46  ;;  %5563 = vmatpush1.bf16.msk.msra.mxu1 %vm8940_vm2, %v14534_v51  ;;  %v14918_v9 = vld [vmem:[#allocation61_spill] sm:$0xff] }
 0x44d   : > { %v2611_v49 = vmin.f32 %v9092_v35, %v2610_v12  ;;  %5565 = vmatprep.subr.msk.bf16.mxu1 %vm8977_vm4, %v14534_v51 }
 0x44e   : > { %v2582_v14 = vmin.f32 %v2580_v39, %v2581_v53 }
 0x44f   : > { %v2612_v50 = vmin.f32 %v9118_v27, %v2611_v49  ;;  %v14925_v49 = vld [vmem:[#allocation50_spill] sm:$0xff] }
 0x450   : > { %v2583_v44 = vrot.slane %v2582_v14, 4  ;;  %5567 = vmatpush1.bf16.msk.msra.mxu1 %vm14914_vm11, %v14534_v51 }
 0x451   : > { %v2613_v31 = vmin.f32 %v9130_v54, %v2612_v50  ;;  %5569 = vmatprep.subr.msk.bf16.mxu1 %vm14915_vm3, %v14534_v51  ;;  %v14921_v50 = vmin.f32 %v8707_v23, %v8719_v36 }
 0x452   : > { %v2584_v8 = vmin.f32 %v2582_v14, %v2583_v44  ;;  %v14922_v44 = vld [vmem:[#allocation23_spill] sm:$0xff] }
 0x453   : > { %v2614_v48 = vmin.f32 %v9155_v20, %v2613_v31  ;;  %v14944_v20 = vmov 0 }
 0x454   : > { %v2585_v12 = vrot.slane %v2584_v8, 2  ;;  %5571 = vmatpush1.bf16.msk.msra.mxu1 %vm9072_vm10, %v14534_v51 }
 0x455   : > { %v2615_v18 = vmin.f32 %v14916_v2, %v2614_v48  ;;  %5573 = vmatprep.subr.msk.bf16.mxu1 %vm9109_vm0, %v14534_v51  ;;  %v14923_v48 = vld [vmem:[#allocation25_spill] sm:$0xff] }
 0x456   : > { %v2586_v41 = vmin.f32 %v2584_v8, %v2585_v12  ;;  %v14926_v8 = vld [vmem:[#allocation49_spill] sm:$0xff]  ;;  %v14927_v12 = vld [vmem:[#allocation51_spill] sm:$0xff] }
 0x457   : > { %v2616_v11 = vmin.f32 %v14918_v9, %v2615_v18  ;;  %v14924_v18 = vmin.f32 %v14922_v44, %v14923_v48 }
 0x458   : > { %v2587_v53 = vrot.slane %v2586_v41, 1  ;;  %5575 = vmatpush1.bf16.msk.msra.mxu1 %vm9141_vm8, %v14534_v51 }
 0x459   : > { %v2617_v39 = vmin.f32 %v9192_v25, %v2616_v11  ;;  %v14928_v11 = vld [vmem:[#allocation17_spill] sm:$0xff] }
 0x45a   : > { %v9343_v31 = vmin.f32 %v2586_v41, %v2587_v53  ;;  %v14932_v53 = vld [vmem:[#allocation22_spill] sm:$0xff] }
 0x45b   : > { %v2618_v14 = vmin.f32 %v14921_v50, %v2617_v39  ;;  %4810 = vmatmul.mubr.bf16.vlgmr.msra.gmra.mrb[52].mxu1 %v14925_v49 }
 0x45c   : > { %vm13948_vm2 = vcmp.eq.f32.partialorder %v14926_v8, %v9343_v31  ;;  %vm13947_vm4 = vcmp.eq.f32.partialorder %v14927_v12, %v9343_v31  ;;  %vm13946_vm10 = vcmp.eq.f32.partialorder %v14928_v11, %v9343_v31  ;;  %vm13945_vm0 = vcmp.eq.f32.partialorder %v14929_v40, %v9343_v31  ;;  %4819 = vmatprep.mubr.bf16.mxu1 %v9218_v30 }
 0x45d   : > { %v2619_v5 = vmin.f32 %v14924_v18, %v2618_v14  ;;  %vm13950_vm8 = vcmp.eq.f32.partialorder %v14888_v29, %v9343_v31  ;;  %vm13949_vm14 = vcmp.eq.f32.partialorder %v14889_v32, %v9343_v31  ;;  %vm13954_vm15 = vcmp.eq.f32.partialorder %v14891_v3, %v9343_v31  ;;  %vm9370_vm13 = vmpackc.low %vm13947_vm4, %vm13948_vm2 }
 0x45e   : > { %vm13951_vm9 = vcmp.eq.f32.partialorder %v14932_v53, %v9343_v31  ;;  %vm2642_vm1 = vcmp.eq.f32.partialorder %v14896_v38, %v9343_v31  ;;  %vm13955_vm6 = vcmp.eq.f32.partialorder %v14897_v45, %v9343_v31  ;;  %vm13959_vm12 = vcmp.eq.f32.partialorder %v8785_v33, %v9343_v31  ;;  %vm9388_vm5 = vmpackc.low %vm13945_vm0, %vm13946_vm10 }
 0x45f   : > { %v2620_v41 = vrot.slane %v2619_v5, 4  ;;  %vm13956_vm7 = vcmp.eq.f32.partialorder %v8813_v22, %v9343_v31  ;;  %vm2650_vm11 = vcmp.eq.f32.partialorder %v8819_v6, %v9343_v31  ;;  %vm9404_vm0 = vmpackc.low %vm13949_vm14, %vm13950_vm8  ;;  %vm13965_vm10 = vcmp.eq.f32.partialorder %v8891_v61, %v9343_v31 }
 0x460   : > { %vm13964_vm4 = vcmp.eq.f32.partialorder %v8897_v56, %v9343_v31  ;;  %vm9422_vm14 = vmpackc.low %vm13951_vm9, %vm13954_vm15  ;;  %vm14943_vm15 = vcmp.eq.f32.partialorder %v8863_v17, %v9343_v31  ;;  %vm14951_vm3 = vcmp.eq.f32.partialorder %v14926_v8, %v9343_v31  ;;  %vm14953_vm2 = vcmp.eq.f32.partialorder %v14928_v11, %v9343_v31 }
 0x461   : > { %v2621_v14 = vmin.f32 %v2619_v5, %v2620_v41  ;;  %vm9438_vm9 = vmpackc.low %vm13955_vm6, %vm2642_vm1  ;;  %vm14954_vm8 = vcmp.eq.f32.partialorder %v8920_v26, %v9343_v31 }
 0x462   : > { %vm9456_vm6 = vmpackc.low %vm13956_vm7, %vm13959_vm12  ;;  %vm14952_vm12 = vcmp.eq.f32.partialorder %v14927_v12, %v9343_v31 }
 0x463   : > { %v2622_v41 = vrot.slane %v2621_v14, 2  ;;  %vm9472_vm7 = vmpackc.low %vm14943_vm15, %vm2650_vm11  ;;  %v9506_v54 = vsel %vm14952_vm12, inf, %v14927_v12  ;;  %vm14959_vm12 = vcmp.eq.f32.partialorder %v14929_v40, %v9343_v31 }
 0x464   : > { %v14945_v20 = vsel %vm9472_vm7, 4294967295, %v14944_v20  ;;  %vm9491_vm15 = vmpackc.low %vm13964_vm4, %vm13965_vm10  ;;  %vm14955_vm4 = vcmp.eq.f32.partialorder %v8932_v59, %v9343_v31  ;;  %v9528_v12 = vsel %vm14959_vm12, inf, %v14929_v40  ;;  %vm14963_vm10 = vcmp.eq.f32.partialorder %v14889_v32, %v9343_v31 }
 0x465   : > { %v2623_v2 = vmin.f32 %v2621_v14, %v2622_v41  ;;  %14946 = vst [vmem:[#allocation11_spill] sm:$0xff] %v14945_v20  ;;  %v14947_v14 = vld [vmem:[#allocation48_spill] sm:$0xff]  ;;  %v14948_v41 = vmov 0  ;;  %v9500_v20 = vsel %vm14951_vm3, inf, %v14926_v8  ;;  %vm9520_vm3 = vmpackc.low %vm14955_vm4, %vm14954_vm8  ;;  %v14956_v8 = vmov 0 }
 0x466   : > { %4820 = vmatmul.mubr.bf16.gmra.mrb[56].mxu1 %v14947_v14  ;;  %v14949_v41 = vsel %vm9491_vm15, 4294967295, %v14948_v41  ;;  %v14957_v8 = vsel %vm9520_vm3, 4294967295, %v14956_v8  ;;  %14960 = vst [vmem:[#allocation18_spill] sm:$0xff] %v9528_v12  ;;  %vm14965_vm4 = vcmp.eq.f32.partialorder %v14891_v3, %v9343_v31  ;;  %vm14966_vm8 = vcmp.eq.f32.partialorder %v8954_v43, %v9343_v31 }
 0x467   : > { %14950 = vst [vmem:[#allocation10_spill] sm:$0xff] %v14949_v41  ;;  %4915 = vmatprep.mubr.bf16.mxu1 %v14895_v34  ;;  %v2624_v14 = vrot.slane %v2623_v2, 1  ;;  %v9512_v41 = vsel %vm14953_vm2, inf, %v14928_v11  ;;  %14958 = vst [vmem:[#allocation56_spill] sm:$0xff] %v14957_v8  ;;  %vm14961_vm2 = vcmp.eq.f32.partialorder %v14888_v29, %v9343_v31  ;;  %v9540_v34 = vsel %vm14963_vm10, inf, %v14889_v32 }
 0x468   : > { %v9534_v11 = vsel %vm14961_vm2, inf, %v14888_v29  ;;  %14964 = vst [vmem:[#allocation13_spill] sm:$0xff] %v9540_v34  ;;  %v9546_v8 = vsel %vm14965_vm4, inf, %v14891_v3  ;;  %vm14967_vm12 = vcmp.eq.f32.partialorder %v8966_v28, %v9343_v31  ;;  %v14968_v29 = vmov 0 }
 0x469   : > { %14962 = vst [vmem:[#allocation19_spill] sm:$0xff] %v9534_v11  ;;  %vm9554_vm2 = vmpackc.low %vm14967_vm12, %vm14966_vm8  ;;  %v9558_v40 = vmin.f32 %v2623_v2, %v2624_v14  ;;  %vm14970_vm10 = vcmp.eq.f32.partialorder %v14932_v53, %v9343_v31  ;;  %v9570_v3 = vsel %vm2642_vm1, inf, %v14896_v38  ;;  %vm14972_vm4 = vcmp.eq.f32.partialorder %v14897_v45, %v9343_v31 }
 0x46a   : > { %v14969_v29 = vsel %vm9554_vm2, 4294967295, %v14968_v29  ;;  %v9564_v32 = vsel %vm14970_vm10, inf, %v14932_v53  ;;  %v9576_v27 = vsel %vm14972_vm4, inf, %v14897_v45  ;;  %vm14973_vm8 = vcmp.eq.f32.partialorder %v8992_v15, %v9343_v31 }
 0x46b   : > { %14971 = vst [vmem:[#allocation42_spill] sm:$0xff] %v9564_v32  ;;  %vm14974_vm12 = vcmp.eq.f32.partialorder %v9017_v10, %v9343_v31  ;;  %v14975_v2 = vmov 0  ;;  %vm14978_vm1 = vcmp.eq.f32.partialorder %v8785_v33, %v9343_v31  ;;  %vm14979_vm4 = vcmp.eq.f32.partialorder %v8813_v22, %v9343_v31 }
 0x46c   : > { %vm9584_vm10 = vmpackc.low %vm14974_vm12, %vm14973_vm8  ;;  %v9592_v38 = vsel %vm14978_vm1, inf, %v8785_v33  ;;  %v9598_v45 = vsel %vm14979_vm4, inf, %v8813_v22  ;;  %v9604_v53 = vsel %vm2650_vm11, inf, %v8819_v6  ;;  %vm14981_vm8 = vcmp.eq.f32.partialorder %v8863_v17, %v9343_v31 }
 0x46d   : > { %v14976_v2 = vsel %vm9584_vm10, 4294967295, %v14975_v2  ;;  %14980 = vst [vmem:[#allocation15_spill] sm:$0xff] %v9598_v45  ;;  %v9610_v14 = vsel %vm14981_vm8, inf, %v8863_v17  ;;  %vm14982_vm12 = vcmp.eq.f32.partialorder %v9029_v37, %v9343_v31  ;;  %vm14983_vm1 = vcmp.eq.f32.partialorder %v9052_v21, %v9343_v31 }
 0x46e   : > { %14977 = vst [vmem:[#allocation24_spill] sm:$0xff] %v14976_v2  ;;  %vm9618_vm4 = vmpackc.low %vm14983_vm1, %vm14982_vm12  ;;  %v14984_v33 = vmov 0  ;;  %vm14987_vm10 = vcmp.eq.f32.partialorder %v8891_v61, %v9343_v31  ;;  %vm14988_vm8 = vcmp.eq.f32.partialorder %v8897_v56, %v9343_v31  ;;  %vm14989_vm12 = vcmp.eq.f32.partialorder %v8920_v26, %v9343_v31 }
 0x46f   : > { %v14985_v33 = vsel %vm9618_vm4, 4294967295, %v14984_v33  ;;  %v9628_v6 = vsel %vm14987_vm10, inf, %v8891_v61  ;;  %v9634_v22 = vsel %vm14988_vm8, inf, %v8897_v56  ;;  %v9640_v17 = vsel %vm14989_vm12, inf, %v8920_v26 }
 0x470   : > { %14986 = vst [vmem:[#allocation14_spill] sm:$0xff] %v14985_v33  ;;  %vm14990_vm1 = vcmp.eq.f32.partialorder %v9064_v47, %v9343_v31  ;;  %vm14991_vm11 = vcmp.eq.f32.partialorder %v9086_v52, %v9343_v31  ;;  %v14992_v61 = vmov 0  ;;  %vm14995_vm8 = vcmp.eq.f32.partialorder %v8932_v59, %v9343_v31 }
 0x471   : > { %vm9648_vm10 = vmpackc.low %vm14991_vm11, %vm14990_vm1  ;;  %v9656_v56 = vsel %vm14995_vm8, inf, %v8932_v59  ;;  %vm14996_vm12 = vcmp.eq.f32.partialorder %v8954_v43, %v9343_v31  ;;  %vm14997_vm4 = vcmp.eq.f32.partialorder %v8966_v28, %v9343_v31  ;;  %vm14998_vm11 = vcmp.eq.f32.partialorder %v8992_v15, %v9343_v31 }
 0x472   : > { %v14993_v61 = vsel %vm9648_vm10, 4294967295, %v14992_v61  ;;  %v9662_v26 = vsel %vm14996_vm12, inf, %v8954_v43  ;;  %v9668_v33 = vsel %vm14997_vm4, inf, %v8966_v28  ;;  %vm14999_vm1 = vcmp.eq.f32.partialorder %v9098_v4, %v9343_v31 }
 0x473   : > { %14994 = vst [vmem:[#allocation47_spill] sm:$0xff] %v14993_v61  ;;  %v9674_v61 = vsel %vm14998_vm11, inf, %v8992_v15  ;;  %vm15000_vm8 = vcmp.eq.f32.partialorder %v9124_v55, %v9343_v31  ;;  %v15001_v59 = vmov 0  ;;  %vm15004_vm4 = vcmp.eq.f32.partialorder %v9017_v10, %v9343_v31 }
 0x474   : > { %vm9682_vm12 = vmpackc.low %vm15000_vm8, %vm14999_vm1  ;;  %v9690_v28 = vsel %vm15004_vm4, inf, %v9017_v10  ;;  %vm15005_vm11 = vcmp.eq.f32.partialorder %v9029_v37, %v9343_v31  ;;  %vm15006_vm10 = vcmp.eq.f32.partialorder %v9052_v21, %v9343_v31  ;;  %vm15007_vm1 = vcmp.eq.f32.partialorder %v9064_v47, %v9343_v31 }
 0x475   : > { %v15002_v59 = vsel %vm9682_vm12, 4294967295, %v15001_v59  ;;  %v9696_v43 = vsel %vm15005_vm11, inf, %v9029_v37  ;;  %v9702_v15 = vsel %vm15006_vm10, inf, %v9052_v21  ;;  %vm15008_vm8 = vcmp.eq.f32.partialorder %v9149_v42, %v9343_v31 }
 0x476   : > { %15003 = vst [vmem:[#allocation52_spill] sm:$0xff] %v15002_v59  ;;  %v9708_v59 = vsel %vm15007_vm1, inf, %v9064_v47  ;;  %vm15009_vm4 = vcmp.eq.f32.partialorder %v9161_v57, %v9343_v31  ;;  %v15010_v10 = vmov 0  ;;  %vm15013_vm10 = vcmp.eq.f32.partialorder %v9086_v52, %v9343_v31 }
 0x477   : > { %vm9716_vm11 = vmpackc.low %vm15009_vm4, %vm15008_vm8  ;;  %v9724_v37 = vsel %vm15013_vm10, inf, %v9086_v52  ;;  %vm15014_vm1 = vcmp.eq.f32.partialorder %v9098_v4, %v9343_v31  ;;  %vm15015_vm12 = vcmp.eq.f32.partialorder %v9124_v55, %v9343_v31  ;;  %vm15016_vm4 = vcmp.eq.f32.partialorder %v9174_v60, %v9343_v31 }
 0x478   : > { %v15011_v10 = vsel %vm9716_vm11, 4294967295, %v15010_v10  ;;  %v9730_v47 = vsel %vm15014_vm1, inf, %v9098_v4  ;;  %v9736_v21 = vsel %vm15015_vm12, inf, %v9124_v55  ;;  %vm15017_vm10 = vcmp.eq.f32.partialorder %v9186_v46, %v9343_v31 }
 0x479   : > { %15012 = vst [vmem:[#allocation35_spill] sm:$0xff] %v15011_v10  ;;  %v9742_v10 = vsel %vm15008_vm8, inf, %v9149_v42  ;;  %vm9750_vm1 = vmpackc.low %vm15017_vm10, %vm15016_vm4  ;;  %v15018_v4 = vmov 0  ;;  %vm15021_vm12 = vcmp.eq.f32.partialorder %v9161_v57, %v9343_v31  ;;  %v2883_v2 = vmin.f32 %v9506_v54, %v9528_v12 }
 0x47a   : > { %v15019_v4 = vsel %vm9750_vm1, 4294967295, %v15018_v4  ;;  %v9758_v52 = vsel %vm15021_vm12, inf, %v9161_v57  ;;  %vm15022_vm8 = vmmov %vm15016_vm4  ;;  %vm2629_vm12 = vcmp.eq.f32.partialorder %v14922_v44, %v9558_v40  ;;  %vm2633_vm4 = vcmp.eq.f32.partialorder %v14923_v48, %v9558_v40 }
 0x47b   : > { %15020 = vst [vmem:[#allocation55_spill] sm:$0xff] %v15019_v4  ;;  %v9764_v55 = vsel %vm15022_vm8, inf, %v9174_v60  ;;  %vm15023_vm11 = vmmov %vm15017_vm10  ;;  %v2882_v4 = vmin.f32 %v9500_v20, %v9512_v41  ;;  %vm2627_vm10 = vcmp.eq.f32.partialorder %v8707_v23, %v9558_v40  ;;  %vm2631_vm8 = vcmp.eq.f32.partialorder %v8719_v36, %v9558_v40 }
 0x47c   : > { %v9770_v42 = vsel %vm15023_vm11, inf, %v9186_v46  ;;  %v9784_v60 = vsel %vm2627_vm10, inf, %v8707_v23  ;;  %v9787_v46 = vsel %vm2629_vm12, inf, %v14922_v44  ;;  %vm5576_vm11 = vmpackc.low %vm2629_vm12, %vm2627_vm10  ;;  %v2885_v31 = vmin.f32 %v2883_v2, %v9540_v34  ;;  %v15027_v23 = vld [vmem:[#allocation32_spill] sm:$0xff]  ;;  %v15034_v34 = vld [vmem:[#allocation38_spill] sm:$0xff] }
 0x47d   : > { %v2884_v57 = vmin.f32 %v2882_v4, %v9534_v11  ;;  %15024 = vst [vmem:[#allocation27_spill] sm:$0xff] %v9784_v60  ;;  %15025 = vst [vmem:[#allocation16_spill] sm:$0xff] %v9787_v46  ;;  %5577 = vmatprep.subr.msk.bf16.mxu0 %vm5576_vm11, %v14534_v51  ;;  %v9796_v12 = vsel %vm2631_vm8, inf, %v8719_v36  ;;  %vm15028_vm2 = vcmp.eq.f32.partialorder %v14918_v9, %v9558_v40  ;;  %v15030_v44 = vmov 0 }
 0x47e   : > { %15026 = vst [vmem:[#allocation34_spill] sm:$0xff] %v9796_v12  ;;  %vm15029_vm10 = vcmp.eq.f32.partialorder %v9192_v25, %v9558_v40  ;;  %5579 = vmatpush1.bf16.msk.msra.mxu0 %vm9370_vm13, %v14534_v51  ;;  %v9815_v36 = vsel %vm2633_vm4, inf, %v14923_v48  ;;  %v2919_v4 = vmin.f32 %v9784_v60, %v9796_v12  ;;  %vm5580_vm11 = vmpackc.low %vm2633_vm4, %vm2631_vm8  ;;  %vm2637_vm1 = vcmp.eq.f32.partialorder %v15034_v34, %v9558_v40  ;;  %v15039_v12 = vld [vmem:[#allocation43_spill] sm:$0xff] }
 0x47f   : > { %vm9806_vm12 = vmpackc.low %vm15029_vm10, %vm15028_vm2  ;;  %v2886_v2 = vmin.f32 %v2884_v57, %v9546_v8  ;;  %15033 = vst [vmem:[#allocation45_spill] sm:$0xff] %v9815_v36  ;;  %v2887_v11 = vmin.f32 %v2885_v31, %v9564_v32  ;;  %5581 = vmatprep.subr.msk.bf16.mxu0 %vm5580_vm11, %v14534_v51  ;;  %vm15035_vm13 = vcmp.eq.f32.partialorder %v15027_v23, %v9558_v40  ;;  %v9835_v39 = vsel %vm2637_vm1, inf, %v15034_v34 }
 0x480   : > { %v15031_v44 = vsel %vm9806_vm12, 4294967295, %v15030_v44  ;;  %v9829_v48 = vsel %vm15035_vm13, inf, %v15027_v23  ;;  %15037 = vst [vmem:[#allocation46_spill] sm:$0xff] %v9835_v39  ;;  %vm2641_vm4 = vcmp.eq.f32.partialorder %v15039_v12, %v9558_v40  ;;  %vm15042_vm8 = vmmov %vm15035_vm13 }
 0x481   : > { %15032 = vst [vmem:[#allocation26_spill] sm:$0xff] %v15031_v44  ;;  %v2920_v44 = vmin.f32 %v9787_v46, %v9815_v36  ;;  %15036 = vst [vmem:[#allocation61_spill] sm:$0xff] %v9829_v48  ;;  %v2888_v57 = vmin.f32 %v2886_v2, %v9570_v3  ;;  %v2921_v31 = vmin.f32 %v2919_v4, %v9829_v48  ;;  %v15038_v36 = vld [vmem:[#allocation57_spill] sm:$0xff]  ;;  %v9855_v2 = vsel %vm2641_vm4, inf, %v15039_v12 }
 0x482   : > { %vm2639_vm2 = vcmp.eq.f32.partialorder %v15038_v36, %v9558_v40  ;;  %v2889_v46 = vmin.f32 %v2887_v11, %v9576_v27  ;;  %15041 = vst [vmem:[#allocation23_spill] sm:$0xff] %v9855_v2  ;;  %5583 = vmatpush1.bf16.msk.msra.mxu0 %vm9388_vm5, %v14534_v51  ;;  %vm5584_vm10 = vmpackc.low %vm2637_vm1, %vm15042_vm8 }
 0x483   : > { %v2922_v60 = vmin.f32 %v2920_v44, %v9835_v39  ;;  %v9849_v32 = vsel %vm2639_vm2, inf, %v15038_v36  ;;  %v2890_v4 = vmin.f32 %v2888_v57, %v9592_v38  ;;  %v15043_v44 = vld [vmem:[#allocation58_spill] sm:$0xff]  ;;  %v15044_v39 = vld [vmem:[#allocation59_spill] sm:$0xff]  ;;  %5585 = vmatprep.subr.msk.bf16.mxu0 %vm5584_vm10, %v14534_v51  ;;  %vm5588_vm8 = vmpackc.low %vm2641_vm4, %vm2639_vm2 }
 0x484   : > { %15040 = vst [vmem:[#allocation8_spill] sm:$0xff] %v9849_v32  ;;  %v2923_v11 = vmin.f32 %v2921_v31, %v9849_v32  ;;  %vm2643_vm11 = vcmp.eq.f32.partialorder %v15043_v44, %v9558_v40  ;;  %vm2645_vm13 = vcmp.eq.f32.partialorder %v15044_v39, %v9558_v40  ;;  %v2891_v57 = vmin.f32 %v2889_v46, %v9598_v45  ;;  %v15047_v32 = vld [vmem:[#allocation28_spill] sm:$0xff] }
 0x485   : > { %v2924_v50 = vmin.f32 %v2922_v60, %v9855_v2  ;;  %v9879_v34 = vsel %vm2643_vm11, inf, %v15043_v44  ;;  %v9885_v23 = vsel %vm2645_vm13, inf, %v15044_v39  ;;  %v2892_v31 = vmin.f32 %v2890_v4, %v9604_v53  ;;  %v15048_v60 = vld [vmem:[#allocation33_spill] sm:$0xff]  ;;  %vm5592_vm4 = vmpackc.low %vm2645_vm13, %vm2643_vm11 }
 0x486   : > { %15045 = vst [vmem:[#allocation25_spill] sm:$0xff] %v9879_v34  ;;  %15046 = vst [vmem:[#allocation49_spill] sm:$0xff] %v9885_v23  ;;  %v2925_v46 = vmin.f32 %v2923_v11, %v9879_v34  ;;  %vm2647_vm5 = vcmp.eq.f32.partialorder %v15047_v32, %v9558_v40  ;;  %vm14005_vm1 = vcmp.eq.f32.partialorder %v15048_v60, %v9558_v40  ;;  %5587 = vmatpush1.bf16.msk.msra.mxu0 %vm9404_vm0, %v14534_v51 }
 0x487   : > { %v2893_v2 = vmin.f32 %v2891_v57, %v9610_v14  ;;  %v2926_v48 = vmin.f32 %v2924_v50, %v9885_v23  ;;  %v9899_v45 = vsel %vm2647_vm5, inf, %v15047_v32  ;;  %v9905_v4 = vsel %vm14005_vm1, inf, %v15048_v60  ;;  %v15051_v50 = vld [vmem:[#allocation36_spill] sm:$0xff]  ;;  %5589 = vmatprep.subr.msk.bf16.mxu0 %vm5588_vm8, %v14534_v51 }
 0x488   : > { %15049 = vst [vmem:[#allocation51_spill] sm:$0xff] %v9899_v45  ;;  %15050 = vst [vmem:[#allocation17_spill] sm:$0xff] %v9905_v4  ;;  %v2894_v11 = vmin.f32 %v2892_v31, %v9628_v6  ;;  %v2927_v57 = vmin.f32 %v2925_v46, %v9899_v45  ;;  %vm2651_vm10 = vcmp.eq.f32.partialorder %v15051_v50, %v9558_v40  ;;  %v15052_v23 = vld [vmem:[#allocation12_spill] sm:$0xff] }
 0x489   : > { %vm2653_vm1 = vcmp.eq.f32.partialorder %v15052_v23, %v9558_v40  ;;  %v2895_v31 = vmin.f32 %v2893_v2, %v9634_v22  ;;  %v2928_v18 = vmin.f32 %v2926_v48, %v9905_v4  ;;  %v9929_v12 = vsel %vm2651_vm10, inf, %v15051_v50  ;;  %v15053_v48 = vld [vmem:[#allocation41_spill] sm:$0xff] }
 0x48a   : > { %v9935_v36 = vsel %vm2653_vm1, inf, %v15052_v23  ;;  %v2896_v46 = vmin.f32 %v2894_v11, %v9640_v17  ;;  %v2929_v2 = vmin.f32 %v2927_v57, %v9929_v12  ;;  %vm2655_vm0 = vcmp.eq.f32.partialorder %v9235_v19, %v9558_v40  ;;  %5591 = vmatpush1.bf16.msk.msra.mxu0 %vm9422_vm14, %v14534_v51  ;;  %v15066_v50 = vld [vmem:[#allocation9_spill] sm:$0xff]  ;;  %v15067_v23 = vld [vmem:[#allocation44_spill] sm:$0xff] }
 0x48b   : > { %vm14012_vm2 = vcmp.eq.f32.partialorder %v15053_v48, %v9558_v40  ;;  %v2897_v4 = vmin.f32 %v2895_v31, %v9656_v56  ;;  %v2930_v45 = vmin.f32 %v2928_v18, %v9935_v36  ;;  %v9949_v34 = vsel %vm2655_vm0, inf, %v9235_v19  ;;  %5593 = vmatprep.subr.msk.bf16.mxu0 %vm5592_vm4, %v14534_v51 }
 0x48c   : > { %v9955_v11 = vsel %vm14012_vm2, inf, %v15053_v48  ;;  %v2898_v57 = vmin.f32 %v2896_v46, %v9662_v26  ;;  %v2931_v31 = vmin.f32 %v2929_v2, %v9949_v34  ;;  %vm14026_vm8 = vcmp.eq.f32.partialorder %v8926_v7, %v9558_v40 }
 0x48d   : > { %15054 = vst [vmem:[#allocation54_spill] sm:$0xff] %v9955_v11  ;;  %vm14019_vm2 = vcmp.eq.f32.partialorder %v8948_v63, %v9558_v40  ;;  %v2899_v18 = vmin.f32 %v2897_v4, %v9668_v33  ;;  %v2932_v5 = vmin.f32 %v2930_v45, %v9955_v11  ;;  %v9979_v39 = vsel %vm14026_vm8, inf, %v8926_v7 }
 0x48e   : > { %v9985_v44 = vsel %vm14019_vm2, inf, %v8948_v63  ;;  %v2900_v46 = vmin.f32 %v2898_v57, %v9674_v61  ;;  %v2933_v4 = vmin.f32 %v2931_v31, %v9979_v39  ;;  %vm14015_vm14 = vcmp.eq.f32.partialorder %v8960_v16, %v9558_v40  ;;  %5595 = vmatpush1.bf16.msk.msra.mxu0 %vm9438_vm9, %v14534_v51 }
 0x48f   : > { %vm14016_vm11 = vcmp.eq.f32.partialorder %v8986_v0, %v9558_v40  ;;  %v2901_v45 = vmin.f32 %v2899_v18, %v9690_v28  ;;  %v2934_v2 = vmin.f32 %v2932_v5, %v9985_v44  ;;  %v9999_v11 = vsel %vm14015_vm14, inf, %v8960_v16 }
 0x490   : > { %15055 = vst [vmem:[#allocation22_spill] sm:$0xff] %v9999_v11  ;;  %v10005_v57 = vsel %vm14016_vm11, inf, %v8986_v0  ;;  %v2902_v31 = vmin.f32 %v2900_v46, %v9696_v43  ;;  %vm15057_vm13 = vcmp.eq.f32.partialorder %v15048_v60, %v9558_v40  ;;  %v2935_v18 = vmin.f32 %v2933_v4, %v9999_v11  ;;  %v15090_v46 = vld [vmem:[#allocation19_spill] sm:$0xff] }
 0x491   : > { %15056 = vst [vmem:[#allocation32_spill] sm:$0xff] %v10005_v57  ;;  %vm5596_vm4 = vmpackc.low %vm15057_vm13, %vm2647_vm5  ;;  %vm2667_vm14 = vcmp.eq.f32.partialorder %v8998_v1, %v9558_v40  ;;  %vm2669_vm11 = vcmp.eq.f32.partialorder %v9023_v62, %v9558_v40  ;;  %v2903_v5 = vmin.f32 %v2901_v45, %v9702_v15  ;;  %v2936_v30 = vmin.f32 %v2934_v2, %v10005_v57 }
 0x492   : > { %5597 = vmatprep.subr.msk.bf16.mxu0 %vm5596_vm4, %v14534_v51  ;;  %v10026_v32 = vsel %vm2667_vm14, inf, %v8998_v1  ;;  %v10029_v60 = vsel %vm2669_vm11, inf, %v9023_v62  ;;  %vm10031_vm9 = vmpackc.low %vm2669_vm11, %vm2667_vm14  ;;  %v2904_v4 = vmin.f32 %v2902_v31, %v9708_v59  ;;  %vm2671_vm5 = vcmp.eq.f32.partialorder %v9035_v24, %v9558_v40 }
 0x493   : > { %15058 = vst [vmem:[#allocation38_spill] sm:$0xff] %v10026_v32  ;;  %15059 = vst [vmem:[#allocation57_spill] sm:$0xff] %v10029_v60  ;;  %v2937_v11 = vmin.f32 %v2935_v18, %v10026_v32  ;;  %vm2673_vm13 = vcmp.eq.f32.partialorder %v9058_v58, %v9558_v40  ;;  %v2905_v1 = vmin.f32 %v2903_v5, %v9724_v37  ;;  %v10044_v62 = vsel %vm2671_vm5, inf, %v9035_v24 }
 0x494   : > { %v2938_v45 = vmin.f32 %v2936_v30, %v10029_v60  ;;  %15062 = vst [vmem:[#allocation43_spill] sm:$0xff] %v10044_v62  ;;  %v10047_v2 = vsel %vm2673_vm13, inf, %v9058_v58  ;;  %vm10049_vm14 = vmpackc.low %vm2673_vm13, %vm2671_vm5  ;;  %v2906_v18 = vmin.f32 %v2904_v4, %v9730_v47  ;;  %5599 = vmatpush1.bf16.msk.msra.mxu0 %vm9456_vm6, %v14534_v51  ;;  %vm2675_vm4 = vcmp.eq.f32.partialorder %v9080_v13, %v9558_v40  ;;  %v15070_v30 = vld [vmem:[#allocation6_spill] sm:$0xff]  ;;  %v15071_v4 = vld [vmem:[#allocation60_spill] sm:$0xff] }
 0x495   : > { %15063 = vst [vmem:[#allocation58_spill] sm:$0xff] %v10047_v2  ;;  %vm5600_vm11 = vmpackc.low %vm2653_vm1, %vm2651_vm10  ;;  %v2939_v24 = vmin.f32 %v2937_v11, %v10044_v62  ;;  %vm2677_vm5 = vcmp.eq.f32.partialorder %v9092_v35, %v9558_v40  ;;  %v2907_v58 = vmin.f32 %v2905_v1, %v9736_v21  ;;  %vm2679_vm6 = vcmp.eq.f32.partialorder %v15066_v50, %v9558_v40 }
 0x496   : > { %5601 = vmatprep.subr.msk.bf16.mxu0 %vm5600_vm11, %v14534_v51  ;;  %v2940_v49 = vmin.f32 %v2938_v45, %v10047_v2  ;;  %vm2681_vm1 = vcmp.eq.f32.partialorder %v15067_v23, %v9558_v40  ;;  %vm10075_vm10 = vmpackc.low %vm2677_vm5, %vm2675_vm4  ;;  %v2908_v5 = vmin.f32 %v2906_v18, %v9742_v10  ;;  %vm2683_vm13 = vcmp.eq.f32.partialorder %v15070_v30, %v9558_v40 }
 0x497   : > { %vm2685_vm11 = vcmp.eq.f32.partialorder %v15071_v4, %v9558_v40  ;;  %v10085_v1 = vsel %vm2675_vm4, inf, %v9080_v13  ;;  %vm10087_vm2 = vmpackc.low %vm2681_vm1, %vm2679_vm6  ;;  %v2909_v2 = vmin.f32 %v2907_v58, %v9758_v52  ;;  %v10093_v62 = vsel %vm2677_vm5, inf, %v9092_v35 }
 0x498   : > { %v10096_v18 = vsel %vm2679_vm6, inf, %v15066_v50  ;;  %v10099_v60 = vsel %vm2681_vm1, inf, %v15067_v23  ;;  %vm10101_vm8 = vmpackc.low %vm2685_vm11, %vm2683_vm13  ;;  %v2910_v13 = vmin.f32 %v2908_v5, %v9764_v55  ;;  %5603 = vmatpush1.bf16.msk.msra.mxu0 %vm9472_vm7, %v14534_v51  ;;  %vm15077_vm4 = vcmp.eq.f32.partialorder %v15053_v48, %v9558_v40 }
 0x499   : > { %vm5604_vm5 = vmpackc.low %vm15077_vm4, %vm2655_vm0  ;;  %v10116_v35 = vsel %vm2683_vm13, inf, %v15070_v30  ;;  %v10119_v58 = vsel %vm2685_vm11, inf, %v15071_v4  ;;  %vm15078_vm6 = vcmp.eq.f32.partialorder %v14918_v9, %v9558_v40  ;;  %v2911_v57 = vmin.f32 %v2909_v2, %v9770_v42  ;;  %v15091_v4 = vld [vmem:[#allocation13_spill] sm:$0xff] }
 0x49a   : > { %v10125_v50 = vsel %vm15078_vm6, inf, %v14918_v9  ;;  %5605 = vmatprep.subr.msk.bf16.mxu0 %vm5604_vm5, %v14534_v51  ;;  %vm15079_vm7 = vcmp.eq.f32.partialorder %v9192_v25, %v9558_v40  ;;  %v2941_v48 = vmin.f32 %v2939_v24, %v10085_v1  ;;  %v2942_v23 = vmin.f32 %v2940_v49, %v10093_v62 }
 0x49b   : > { %v10133_v19 = vsel %vm15079_vm7, inf, %v9192_v25  ;;  %v2912_v5 = vmin.f32 %v2910_v13, %v2911_v57  ;;  %vm15081_vm0 = vcmp.eq.f32.partialorder %v8926_v7, %v9558_v40  ;;  %vm15082_vm1 = vcmp.eq.f32.partialorder %v8948_v63, %v9558_v40 }
 0x49c   : > { %v2943_v30 = vmin.f32 %v2941_v48, %v10096_v18  ;;  %v2944_v9 = vmin.f32 %v2942_v23, %v10099_v60  ;;  %5607 = vmatpush1.bf16.msk.msra.mxu0 %vm9491_vm15, %v14534_v51  ;;  %vm5608_vm13 = vmpackc.low %vm15082_vm1, %vm15081_vm0  ;;  %vm15084_vm15 = vcmp.eq.f32.partialorder %v8960_v16, %v9558_v40  ;;  %vm15085_vm11 = vcmp.eq.f32.partialorder %v8986_v0, %v9558_v40  ;;  %v15087_v0 = vld [vmem:[#allocation24_spill] sm:$0xff] }
 0x49d   : > { %v2913_v25 = vrot.slane %v2912_v5, 4  ;;  %5609 = vmatprep.subr.msk.bf16.mxu0 %vm5608_vm13, %v14534_v51  ;;  %vm5612_vm4 = vmpackc.low %vm15085_vm11, %vm15084_vm15  ;;  %vm15086_vm5 = vnez %v14969_v29  ;;  %v15089_v29 = vld [vmem:[#allocation18_spill] sm:$0xff]  ;;  %v15266_v48 = vmov 0 }
 0x49e   : > { %v2945_v2 = vmin.f32 %v2943_v30, %v10116_v35  ;;  %v2946_v24 = vmin.f32 %v2944_v9, %v10119_v58 }
 0x49f   : > { %v2914_v49 = vmin.f32 %v2912_v5, %v2913_v25  ;;  %v15092_v25 = vld [vmem:[#allocation42_spill] sm:$0xff] }
 0x4a0   : > { %v2947_v13 = vmin.f32 %v2945_v2, %v10125_v50  ;;  %v2948_v57 = vmin.f32 %v2946_v24, %v10133_v19  ;;  %5611 = vmatpush1.bf16.msk.msra.mxu0 %vm9520_vm3, %v14534_v51  ;;  %vm15088_vm3 = vnez %v15087_v0  ;;  %v15095_v2 = vld [vmem:[#allocation15_spill] sm:$0xff] }
 0x4a1   : > { %v2915_v7 = vrot.slane %v2914_v49, 2  ;;  %5613 = vmatprep.subr.msk.bf16.mxu0 %vm5612_vm4, %v14534_v51 }
 0x4a2   : > { %v2949_v63 = vmin.f32 %v2947_v13, %v2948_v57 }
 0x4a3   : > { %v2916_v23 = vmin.f32 %v2914_v49, %v2915_v7  ;;  %v15098_v49 = vld [vmem:[#allocation14_spill] sm:$0xff]  ;;  %v15113_v7 = vld [vmem:[#allocation47_spill] sm:$0xff] }
 0x4a4   : > { %v2950_v5 = vrot.slane %v2949_v63, 4  ;;  %5615 = vmatpush1.bf16.msk.msra.mxu0 %vm15086_vm5, %v14534_v51 }
 0x4a5   : > { %v2917_v30 = vrot.slane %v2916_v23, 1  ;;  %5617 = vmatprep.subr.msk.bf16.mxu0 %vm10031_vm9, %v14534_v51 }
 0x4a6   : > { %v10169_v16 = vmin.f32 %v2949_v63, %v2950_v5  ;;  %v15117_v63 = vmov 0 }
 0x4a7   : > { %v10171_v9 = vmin.f32 %v2916_v23, %v2917_v30 }
 0x4a8   : > { %5619 = vmatpush1.bf16.msk.msra.mxu0 %vm15088_vm3, %v14534_v51 }
 0x4a9   : > { %vm14032_vm6 = vcmp.eq.f32.partialorder %v9500_v20, %v10171_v9  ;;  %vm14031_vm7 = vcmp.eq.f32.partialorder %v9506_v54, %v10171_v9  ;;  %vm14034_vm0 = vcmp.eq.f32.partialorder %v9512_v41, %v10171_v9  ;;  %vm14033_vm9 = vcmp.eq.f32.partialorder %v15089_v29, %v10171_v9  ;;  %5621 = vmatprep.subr.msk.bf16.mxu0 %vm10049_vm14, %v14534_v51 }
 0x4aa   : > { %vm14036_vm1 = vcmp.eq.f32.partialorder %v15090_v46, %v10171_v9  ;;  %vm14035_vm13 = vcmp.eq.f32.partialorder %v15091_v4, %v10171_v9  ;;  %vm14037_vm15 = vcmp.eq.f32.partialorder %v9546_v8, %v10171_v9  ;;  %vm10202_vm4 = vmpackc.low %vm14031_vm7, %vm14032_vm6  ;;  %vm15099_vm14 = vnez %v15098_v49 }
 0x4ab   : > { %vm10220_vm7 = vmpackc.low %vm14033_vm9, %vm14034_vm0  ;;  %vm15109_vm5 = vcmp.eq.f32.partialorder %v9592_v38, %v10171_v9  ;;  %vm15114_vm6 = vnez %v15113_v7  ;;  %vm15120_vm11 = vcmp.eq.f32.partialorder %v9500_v20, %v10171_v9 }
 0x4ac   : > { %5623 = vmatpush1.bf16.msk.msra.mxu0 %vm15099_vm14, %v14534_v51  ;;  %vm10241_vm9 = vmpackc.low %vm14035_vm13, %vm14036_vm1  ;;  %vm15102_vm13 = vcmp.eq.f32.partialorder %v15092_v25, %v10171_v9  ;;  %vm15105_vm1 = vcmp.eq.f32.partialorder %v9570_v3, %v10171_v9  ;;  %v10327_v23 = vsel %vm15120_vm11, inf, %v9500_v20  ;;  %vm15125_vm11 = vcmp.eq.f32.partialorder %v9628_v6, %v10171_v9 }
 0x4ad   : > { %5625 = vmatprep.subr.msk.bf16.mxu0 %vm10075_vm10, %v14534_v51  ;;  %vm10262_vm3 = vmpackc.low %vm15102_vm13, %vm14037_vm15  ;;  %vm15106_vm13 = vcmp.eq.f32.partialorder %v9576_v27, %v10171_v9  ;;  %vm15122_vm10 = vcmp.eq.f32.partialorder %v9512_v41, %v10171_v9  ;;  %vm15141_vm14 = vcmp.eq.f32.partialorder %v9592_v38, %v10171_v9 }
 0x4ae   : > { %vm10280_vm15 = vmpackc.low %vm15106_vm13, %vm15105_vm1  ;;  %vm15110_vm1 = vcmp.eq.f32.partialorder %v15095_v2, %v10171_v9  ;;  %v10339_v30 = vsel %vm15122_vm10, inf, %v9512_v41  ;;  %vm15130_vm10 = vcmp.eq.f32.partialorder %v15090_v46, %v10171_v9 }
 0x4af   : > { %vm10298_vm13 = vmpackc.low %vm15110_vm1, %vm15109_vm5  ;;  %vm15115_vm5 = vcmp.eq.f32.partialorder %v9604_v53, %v10171_v9  ;;  %vm15116_vm1 = vcmp.eq.f32.partialorder %v9610_v14, %v10171_v9  ;;  %v10364_v20 = vsel %vm15130_vm10, inf, %v15090_v46  ;;  %vm15135_vm10 = vcmp.eq.f32.partialorder %v9656_v56, %v10171_v9 }
 0x4b0   : > { %5627 = vmatpush1.bf16.msk.msra.mxu0 %vm15114_vm6, %v14534_v51  ;;  %vm10319_vm0 = vmpackc.low %vm15116_vm1, %vm15115_vm5  ;;  %vm15121_vm6 = vcmp.eq.f32.partialorder %v9506_v54, %v10171_v9  ;;  %vm15123_vm5 = vcmp.eq.f32.partialorder %v15089_v29, %v10171_v9  ;;  %vm15126_vm1 = vcmp.eq.f32.partialorder %v9634_v22, %v10171_v9  ;;  %v15136_v46 = vmov 0 }
 0x4b1   : > { %v15118_v63 = vsel %vm10319_vm0, 4294967295, %v15117_v63  ;;  %v10333_v5 = vsel %vm15121_vm6, inf, %v9506_v54  ;;  %v10345_v0 = vsel %vm15123_vm5, inf, %v15089_v29  ;;  %5629 = vmatprep.subr.msk.bf16.mxu0 %vm10087_vm2, %v14534_v51  ;;  %vm10356_vm6 = vmpackc.low %vm15126_vm1, %vm15125_vm11  ;;  %v15127_v54 = vmov 0 }
 0x4b2   : > { %15119 = vst [vmem:[#allocation59_spill] sm:$0xff] %v15118_v63  ;;  %15124 = vst [vmem:[#allocation28_spill] sm:$0xff] %v10345_v0  ;;  %v15128_v54 = vsel %vm10356_vm6, 4294967295, %v15127_v54  ;;  %vm15131_vm2 = vcmp.eq.f32.partialorder %v15091_v4, %v10171_v9  ;;  %vm15132_vm5 = vcmp.eq.f32.partialorder %v9546_v8, %v10171_v9  ;;  %vm15133_vm11 = vcmp.eq.f32.partialorder %v15092_v25, %v10171_v9 }
 0x4b3   : > { %15129 = vst [vmem:[#allocation33_spill] sm:$0xff] %v15128_v54  ;;  %v10370_v41 = vsel %vm15131_vm2, inf, %v15091_v4  ;;  %v10376_v45 = vsel %vm15132_vm5, inf, %v9546_v8  ;;  %v10382_v29 = vsel %vm15133_vm11, inf, %v15092_v25  ;;  %vm15134_vm1 = vcmp.eq.f32.partialorder %v9640_v17, %v10171_v9 }
 0x4b4   : > { %vm10390_vm2 = vmpackc.low %vm15135_vm10, %vm15134_vm1  ;;  %vm15139_vm5 = vcmp.eq.f32.partialorder %v9570_v3, %v10171_v9  ;;  %vm15140_vm11 = vcmp.eq.f32.partialorder %v9576_v27, %v10171_v9  ;;  %v10410_v25 = vsel %vm15141_vm14, inf, %v9592_v38  ;;  %vm15142_vm1 = vcmp.eq.f32.partialorder %v15095_v2, %v10171_v9 }
 0x4b5   : > { %v15137_v46 = vsel %vm10390_vm2, 4294967295, %v15136_v46  ;;  %v10398_v8 = vsel %vm15139_vm5, inf, %v9570_v3  ;;  %v10404_v4 = vsel %vm15140_vm11, inf, %v9576_v27  ;;  %v10416_v49 = vsel %vm15142_vm1, inf, %v15095_v2 }
 0x4b6   : > { %15138 = vst [vmem:[#allocation36_spill] sm:$0xff] %v15137_v46  ;;  %vm15143_vm10 = vcmp.eq.f32.partialorder %v9662_v26, %v10171_v9  ;;  %vm15144_vm5 = vcmp.eq.f32.partialorder %v9668_v33, %v10171_v9  ;;  %v15145_v27 = vmov 0  ;;  %vm15148_vm14 = vcmp.eq.f32.partialorder %v9604_v53, %v10171_v9 }
 0x4b7   : > { %vm10424_vm11 = vmpackc.low %vm15144_vm5, %vm15143_vm10  ;;  %v10432_v3 = vsel %vm15148_vm14, inf, %v9604_v53  ;;  %vm15150_vm1 = vcmp.eq.f32.partialorder %v9610_v14, %v10171_v9  ;;  %vm15152_vm2 = vcmp.eq.f32.partialorder %v9628_v6, %v10171_v9  ;;  %vm15153_vm10 = vcmp.eq.f32.partialorder %v9634_v22, %v10171_v9  ;;  %v15154_v53 = vld [vmem:[#allocation52_spill] sm:$0xff] }
 0x4b8   : > { %v15146_v27 = vsel %vm10424_vm11, 4294967295, %v15145_v27  ;;  %15149 = vst [vmem:[#allocation41_spill] sm:$0xff] %v10432_v3  ;;  %v10438_v38 = vsel %vm15150_vm1, inf, %v9610_v14  ;;  %v10444_v2 = vsel %vm15152_vm2, inf, %v9628_v6  ;;  %v10450_v7 = vsel %vm15153_vm10, inf, %v9634_v22 }
 0x4b9   : > { %15147 = vst [vmem:[#allocation12_spill] sm:$0xff] %v15146_v27  ;;  %15151 = vst [vmem:[#allocation9_spill] sm:$0xff] %v10438_v38  ;;  %vm15155_vm5 = vnez %v15154_v53  ;;  %vm15156_vm14 = vcmp.eq.f32.partialorder %v9674_v61, %v10171_v9  ;;  %vm15157_vm1 = vcmp.eq.f32.partialorder %v9690_v28, %v10171_v9  ;;  %v15158_v14 = vmov 0 }
 0x4ba   : > { %5631 = vmatpush1.bf16.msk.msra.mxu0 %vm15155_vm5, %v14534_v51  ;;  %vm10461_vm11 = vmpackc.low %vm15157_vm1, %vm15156_vm14  ;;  %vm15161_vm2 = vcmp.eq.f32.partialorder %v9640_v17, %v10171_v9  ;;  %vm15163_vm10 = vcmp.eq.f32.partialorder %v9656_v56, %v10171_v9  ;;  %vm15165_vm5 = vcmp.eq.f32.partialorder %v9662_v26, %v10171_v9  ;;  %vm15166_vm14 = vcmp.eq.f32.partialorder %v9668_v33, %v10171_v9 }
 0x4bb   : > { %v15159_v14 = vsel %vm10461_vm11, 4294967295, %v15158_v14  ;;  %v10469_v6 = vsel %vm15161_vm2, inf, %v9640_v17  ;;  %v10475_v22 = vsel %vm15163_vm10, inf, %v9656_v56  ;;  %v10481_v53 = vsel %vm15165_vm5, inf, %v9662_v26  ;;  %5633 = vmatprep.subr.msk.bf16.mxu0 %vm10101_vm8, %v14534_v51 }
 0x4bc   : > { %15160 = vst [vmem:[#allocation44_spill] sm:$0xff] %v15159_v14  ;;  %15162 = vst [vmem:[#allocation6_spill] sm:$0xff] %v10469_v6  ;;  %v10487_v40 = vsel %vm15166_vm14, inf, %v9668_v33  ;;  %vm15167_vm1 = vcmp.eq.f32.partialorder %v9696_v43, %v10171_v9  ;;  %vm15168_vm2 = vcmp.eq.f32.partialorder %v9702_v15, %v10171_v9  ;;  %v15169_v17 = vmov 0 }
 0x4bd   : > { %15164 = vst [vmem:[#allocation60_spill] sm:$0xff] %v10475_v22  ;;  %vm10498_vm10 = vmpackc.low %vm15168_vm2, %vm15167_vm1  ;;  %vm15172_vm5 = vcmp.eq.f32.partialorder %v9674_v61, %v10171_v9  ;;  %vm15173_vm8 = vcmp.eq.f32.partialorder %v9690_v28, %v10171_v9  ;;  %v15204_v14 = vmov 0  ;;  %v3212_v27 = vmin.f32 %v10327_v23, %v10339_v30 }
 0x4be   : > { %v15170_v17 = vsel %vm10498_vm10, 4294967295, %v15169_v17  ;;  %v10506_v33 = vsel %vm15172_vm5, inf, %v9674_v61  ;;  %v10512_v56 = vsel %vm15173_vm8, inf, %v9690_v28  ;;  %vm15174_vm14 = vmmov %vm15167_vm1  ;;  %vm15179_vm5 = vcmp.eq.f32.partialorder %v9724_v37, %v10171_v9 }
 0x4bf   : > { %15171 = vst [vmem:[#allocation11_spill] sm:$0xff] %v15170_v17  ;;  %v10518_v26 = vsel %vm15174_vm14, inf, %v9696_v43  ;;  %vm15176_vm1 = vmmov %vm15168_vm2  ;;  %vm15178_vm2 = vcmp.eq.f32.partialorder %v9708_v59, %v10171_v9  ;;  %v15180_v61 = vmov 0  ;;  %vm15187_vm10 = vcmp.eq.f32.partialorder %v9730_v47, %v10171_v9 }
 0x4c0   : > { %15175 = vst [vmem:[#allocation10_spill] sm:$0xff] %v10518_v26  ;;  %v10524_v32 = vsel %vm15176_vm1, inf, %v9702_v15  ;;  %vm10532_vm8 = vmpackc.low %vm15179_vm5, %vm15178_vm2  ;;  %v10552_v15 = vsel %vm15187_vm10, inf, %v9730_v47  ;;  %v3213_v46 = vmin.f32 %v10333_v5, %v10345_v0  ;;  %v15207_v54 = vrot.slane %v10169_v16, 2 }
 0x4c1   : > { %15177 = vst [vmem:[#allocation56_spill] sm:$0xff] %v10524_v32  ;;  %v15181_v61 = vsel %vm10532_vm8, 4294967295, %v15180_v61  ;;  %vm15183_vm14 = vmmov %vm15178_vm2  ;;  %vm15189_vm2 = vcmp.eq.f32.partialorder %v9736_v21, %v10171_v9  ;;  %vm15200_vm8 = vcmp.eq.f32.partialorder %v9764_v55, %v10171_v9 }
 0x4c2   : > { %15182 = vst [vmem:[#allocation24_spill] sm:$0xff] %v15181_v61  ;;  %v10540_v28 = vsel %vm15183_vm14, inf, %v9708_v59  ;;  %vm15185_vm1 = vmmov %vm15179_vm5  ;;  %v10558_v61 = vsel %vm15189_vm2, inf, %v9736_v21  ;;  %v15193_v59 = vmov 0  ;;  %v10586_v47 = vsel %vm15200_vm8, inf, %v9764_v55 }
 0x4c3   : > { %15184 = vst [vmem:[#allocation18_spill] sm:$0xff] %v10540_v28  ;;  %v10546_v43 = vsel %vm15185_vm1, inf, %v9724_v37  ;;  %15188 = vst [vmem:[#allocation13_spill] sm:$0xff] %v10552_v15 }
 0x4c4   : > { %15186 = vst [vmem:[#allocation19_spill] sm:$0xff] %v10546_v43  ;;  %15190 = vst [vmem:[#allocation42_spill] sm:$0xff] %v10558_v61 }
 0x4c5   : > { %vm15191_vm5 = vmmov %vm15187_vm10  ;;  %vm15196_vm10 = vcmp.eq.f32.partialorder %v9742_v10, %v10171_v9 }
 0x4c6   : > { %vm15192_vm14 = vmmov %vm15189_vm2  ;;  %v10574_v37 = vsel %vm15196_vm10, inf, %v9742_v10  ;;  %vm15198_vm2 = vcmp.eq.f32.partialorder %v9758_v52, %v10171_v9  ;;  %v15209_v10 = vmov 0 }
 0x4c7   : > { %vm10566_vm1 = vmpackc.low %vm15192_vm14, %vm15191_vm5  ;;  %15197 = vst [vmem:[#allocation14_spill] sm:$0xff] %v10574_v37  ;;  %v10580_v17 = vsel %vm15198_vm2, inf, %v9758_v52  ;;  %vm15201_vm5 = vcmp.eq.f32.partialorder %v9770_v42, %v10171_v9  ;;  %v3214_v52 = vmin.f32 %v3212_v27, %v10364_v20  ;;  %v15216_v27 = vld [vmem:[#allocation50_spill] sm:$0xff] }
 0x4c8   : > { %v15194_v59 = vsel %vm10566_vm1, 4294967295, %v15193_v59  ;;  %15199 = vst [vmem:[#allocation47_spill] sm:$0xff] %v10580_v17  ;;  %v10592_v21 = vsel %vm15201_vm5, inf, %v9770_v42  ;;  %vm10603_vm1 = vmpackc.low %vm15198_vm2, %vm15196_vm10 }
 0x4c9   : > { %15195 = vst [vmem:[#allocation15_spill] sm:$0xff] %v15194_v59  ;;  %v15202_v59 = vld [vmem:[#allocation35_spill] sm:$0xff]  ;;  %v15205_v14 = vsel %vm10603_vm1, 4294967295, %v15204_v14  ;;  %v3216_v63 = vmin.f32 %v3214_v52, %v10376_v45 }
 0x4ca   : > { %vm15203_vm14 = vnez %v15202_v59  ;;  %15206 = vst [vmem:[#allocation52_spill] sm:$0xff] %v15205_v14  ;;  %v2953_v59 = vmin.f32 %v10169_v16, %v15207_v54  ;;  %v3215_v14 = vmin.f32 %v3213_v46, %v10370_v41  ;;  %v15212_v16 = vld [vmem:[#allocation55_spill] sm:$0xff]  ;;  %v15215_v46 = vld [vmem:[#allocation16_spill] sm:$0xff] }
 0x4cb   : > { %5635 = vmatpush1.bf16.msk.msra.mxu0 %vm15203_vm14, %v14534_v51  ;;  %vm10623_vm14 = vmpackc.low %vm15201_vm5, %vm15200_vm8  ;;  %vm15213_vm10 = vnez %v15212_v16  ;;  %v3218_v42 = vmin.f32 %v3216_v63, %v10398_v8 }
 0x4cc   : > { %5637 = vmatprep.subr.msk.bf16.mxu0 %vm9806_vm12, %v14534_v51  ;;  %v15210_v10 = vsel %vm10623_vm14, 4294967295, %v15209_v10  ;;  %v2954_v0 = vrot.slane %v2953_v59, 1  ;;  %v3217_v55 = vmin.f32 %v3215_v14, %v10382_v29  ;;  %v15220_v14 = vld [vmem:[#allocation45_spill] sm:$0xff] }
 0x4cd   : > { %15211 = vst [vmem:[#allocation35_spill] sm:$0xff] %v15210_v10  ;;  %v15214_v10 = vld [vmem:[#allocation27_spill] sm:$0xff]  ;;  %v3220_v63 = vmin.f32 %v3218_v42, %v10410_v25 }
 0x4ce   : > { %v10634_v54 = vmin.f32 %v2953_v59, %v2954_v0  ;;  %v3219_v9 = vmin.f32 %v3217_v55, %v10404_v4  ;;  %v15219_v0 = vld [vmem:[#allocation34_spill] sm:$0xff]  ;;  %v15221_v59 = vld [vmem:[#allocation7_spill] sm:$0xff] }
 0x4cf   : > { %5639 = vmatpush1.bf16.msk.msra.mxu0 %vm15213_vm10, %v14534_v51 }
 0x4d0   : > { %vm2957_vm12 = vcmp.eq.f32.partialorder %v15214_v10, %v10634_v54  ;;  %vm2959_vm2 = vcmp.eq.f32.partialorder %v15215_v46, %v10634_v54  ;;  %vm2961_vm5 = vcmp.eq.f32.partialorder %v15219_v0, %v10634_v54  ;;  %vm2963_vm10 = vcmp.eq.f32.partialorder %v15220_v14, %v10634_v54 }
 0x4d1   : > { %v10644_v16 = vsel %vm2957_vm12, inf, %v15214_v10  ;;  %v10647_v52 = vsel %vm2959_vm2, inf, %v15215_v46  ;;  %vm5640_vm8 = vmpackc.low %vm2959_vm2, %vm2957_vm12  ;;  %v3221_v55 = vmin.f32 %v3219_v9, %v10416_v49  ;;  %v10658_v10 = vsel %vm2961_vm5, inf, %v15219_v0  ;;  %v15224_v9 = vld [vmem:[#allocation61_spill] sm:$0xff]  ;;  %v15225_v0 = vld [vmem:[#allocation46_spill] sm:$0xff] }
 0x4d2   : > { %4863 = vmatmul.mubr.bf16.vlgmr.msra.gmra.mrb[40].mxu0 %v15216_v27  ;;  %15217 = vst [vmem:[#allocation26_spill] sm:$0xff] %v10644_v16  ;;  %15218 = vst [vmem:[#allocation55_spill] sm:$0xff] %v10647_v52  ;;  %5641 = vmatprep.subr.msk.bf16.mxu1 %vm5640_vm8, %v14534_v51  ;;  %v10661_v46 = vsel %vm2963_vm10, inf, %v15220_v14  ;;  %vm2965_vm2 = vcmp.eq.f32.partialorder %v15224_v9, %v10634_v54  ;;  %vm2967_vm8 = vcmp.eq.f32.partialorder %v15225_v0, %v10634_v54 }
 0x4d3   : > { %4872 = vmatprep.mubr.bf16.mxu0 %v15221_v59  ;;  %15222 = vst [vmem:[#allocation27_spill] sm:$0xff] %v10658_v10  ;;  %15223 = vst [vmem:[#allocation16_spill] sm:$0xff] %v10661_v46  ;;  %5643 = vmatpush1.bf16.msk.msra.mxu1 %vm10202_vm4, %v14534_v51  ;;  %v3249_v59 = vmin.f32 %v10644_v16, %v10658_v10  ;;  %v3250_v42 = vmin.f32 %v10647_v52, %v10661_v46  ;;  %v10678_v31 = vsel %vm2965_vm2, inf, %v15224_v9  ;;  %v15241_v46 = vld [vmem:[#allocation17_spill] sm:$0xff] }
 0x4d4   : > { %vm5644_vm12 = vmpackc.low %vm2963_vm10, %vm2961_vm5  ;;  %v3222_v14 = vmin.f32 %v3220_v63, %v10432_v3  ;;  %v3223_v27 = vmin.f32 %v3221_v55, %v10438_v38  ;;  %v10681_v10 = vsel %vm2967_vm8, inf, %v15225_v0  ;;  %v15229_v63 = vld [vmem:[#allocation8_spill] sm:$0xff]  ;;  %v15230_v55 = vld [vmem:[#allocation23_spill] sm:$0xff]  ;;  %vm3015_vm1 = vcmp.eq.f32.partialorder %v10119_v58, %v10634_v54 }
 0x4d5   : > { %5645 = vmatprep.subr.msk.bf16.mxu1 %vm5644_vm12, %v14534_v51  ;;  %15226 = vst [vmem:[#allocation34_spill] sm:$0xff] %v10681_v10  ;;  %vm10683_vm4 = vmpackc.low %vm2967_vm8, %vm2965_vm2  ;;  %v3251_v52 = vmin.f32 %v3249_v59, %v10678_v31  ;;  %v3252_v16 = vmin.f32 %v3250_v42, %v10681_v10  ;;  %vm2969_vm5 = vcmp.eq.f32.partialorder %v15229_v63, %v10634_v54 }
 0x4d6   : > { %vm2971_vm10 = vcmp.eq.f32.partialorder %v15230_v55, %v10634_v54  ;;  %v3224_v9 = vmin.f32 %v3222_v14, %v10444_v2  ;;  %v3225_v38 = vmin.f32 %v3223_v27, %v10450_v7  ;;  %v10696_v0 = vsel %vm2969_vm5, inf, %v15229_v63  ;;  %v15235_v27 = vld [vmem:[#allocation25_spill] sm:$0xff] }
 0x4d7   : > { %15231 = vst [vmem:[#allocation45_spill] sm:$0xff] %v10696_v0  ;;  %v10699_v3 = vsel %vm2971_vm10, inf, %v15230_v55  ;;  %vm10701_vm12 = vmpackc.low %vm2971_vm10, %vm2969_vm5  ;;  %5647 = vmatpush1.bf16.msk.msra.mxu1 %vm10220_vm7, %v14534_v51  ;;  %v3253_v42 = vmin.f32 %v3251_v52, %v10696_v0  ;;  %vm2973_vm2 = vcmp.eq.f32.partialorder %v15235_v27, %v10634_v54  ;;  %v15236_v63 = vld [vmem:[#allocation49_spill] sm:$0xff] }
 0x4d8   : > { %15232 = vst [vmem:[#allocation61_spill] sm:$0xff] %v10699_v3  ;;  %v3254_v14 = vmin.f32 %v3252_v16, %v10699_v3  ;;  %vm2975_vm8 = vcmp.eq.f32.partialorder %v15236_v63, %v10634_v54  ;;  %v3226_v55 = vmin.f32 %v3224_v9, %v10469_v6  ;;  %v3227_v10 = vmin.f32 %v3225_v38, %v10475_v22  ;;  %v15239_v3 = vld [vmem:[#allocation48_spill] sm:$0xff]  ;;  %v15240_v22 = vld [vmem:[#allocation51_spill] sm:$0xff] }
 0x4d9   : > { %5649 = vmatprep.subr.msk.bf16.mxu1 %vm10683_vm4, %v14534_v51  ;;  %v10720_v24 = vsel %vm2973_vm2, inf, %v15235_v27  ;;  %v10723_v52 = vsel %vm2975_vm8, inf, %v15236_v63  ;;  %vm10725_vm7 = vmpackc.low %vm2975_vm8, %vm2973_vm2  ;;  %vm2977_vm5 = vcmp.eq.f32.partialorder %v15240_v22, %v10634_v54  ;;  %vm2979_vm4 = vcmp.eq.f32.partialorder %v15241_v46, %v10634_v54  ;;  %v15242_v27 = vld [vmem:[#allocation53_spill] sm:$0xff]  ;;  %v15253_v16 = vld [vmem:[#allocation32_spill] sm:$0xff] }
 0x4da   : > { %4873 = vmatmul.mubr.bf16.gmra.mrb[44].mxu0 %v15239_v3  ;;  %v3255_v9 = vmin.f32 %v3253_v42, %v10720_v24  ;;  %v3256_v38 = vmin.f32 %v3254_v14, %v10723_v52  ;;  %v3228_v63 = vmin.f32 %v3226_v55, %v10481_v53  ;;  %v3229_v6 = vmin.f32 %v3227_v10, %v10487_v40  ;;  %vm10745_vm10 = vmpackc.low %vm2979_vm4, %vm2977_vm5  ;;  %v15261_v42 = vld [vmem:[#allocation58_spill] sm:$0xff] }
 0x4db   : > { %4968 = vmatprep.mubr.bf16.mxu0 %v15242_v27  ;;  %v10740_v0 = vsel %vm2977_vm5, inf, %v15240_v22  ;;  %v10743_v3 = vsel %vm2979_vm4, inf, %v15241_v46  ;;  %5651 = vmatpush1.bf16.msk.msra.mxu1 %vm10241_vm9, %v14534_v51  ;;  %vm2981_vm2 = vcmp.eq.f32.partialorder %v9929_v12, %v10634_v54  ;;  %vm2983_vm8 = vcmp.eq.f32.partialorder %v9935_v36, %v10634_v54 }
 0x4dc   : > { %v3257_v14 = vmin.f32 %v3255_v9, %v10740_v0  ;;  %v3258_v55 = vmin.f32 %v3256_v38, %v10743_v3  ;;  %v3230_v22 = vmin.f32 %v3228_v63, %v10506_v33  ;;  %v3231_v10 = vmin.f32 %v3229_v6, %v10512_v56  ;;  %5653 = vmatprep.subr.msk.bf16.mxu1 %vm10701_vm12, %v14534_v51  ;;  %vm10769_vm9 = vmpackc.low %vm2983_vm8, %vm2981_vm2  ;;  %v15247_v6 = vld [vmem:[#allocation54_spill] sm:$0xff] }
 0x4dd   : > { %v10764_v13 = vsel %vm2981_vm2, inf, %v9929_v12  ;;  %v10767_v9 = vsel %vm2983_vm8, inf, %v9935_v36  ;;  %vm2985_vm5 = vcmp.eq.f32.partialorder %v9949_v34, %v10634_v54  ;;  %vm2987_vm12 = vcmp.eq.f32.partialorder %v15247_v6, %v10634_v54 }
 0x4de   : > { %v3259_v46 = vmin.f32 %v3257_v14, %v10764_v13  ;;  %v3260_v63 = vmin.f32 %v3258_v55, %v10767_v9  ;;  %v3232_v12 = vmin.f32 %v3230_v22, %v10518_v26  ;;  %v3233_v59 = vmin.f32 %v3231_v10, %v10524_v32  ;;  %vm10787_vm4 = vmpackc.low %vm2987_vm12, %vm2985_vm5 }
 0x4df   : > { %v10782_v36 = vsel %vm2985_vm5, inf, %v9949_v34  ;;  %v10785_v27 = vsel %vm2987_vm12, inf, %v15247_v6  ;;  %5655 = vmatpush1.bf16.msk.msra.mxu1 %vm10262_vm3, %v14534_v51  ;;  %vm2989_vm2 = vcmp.eq.f32.partialorder %v9979_v39, %v10634_v54  ;;  %vm2991_vm8 = vcmp.eq.f32.partialorder %v9985_v44, %v10634_v54 }
 0x4e0   : > { %v3261_v55 = vmin.f32 %v3259_v46, %v10782_v36  ;;  %v3262_v22 = vmin.f32 %v3260_v63, %v10785_v27  ;;  %v3234_v34 = vmin.f32 %v3232_v12, %v10540_v28  ;;  %v3235_v10 = vmin.f32 %v3233_v59, %v10546_v43  ;;  %5657 = vmatprep.subr.msk.bf16.mxu1 %vm10725_vm7, %v14534_v51  ;;  %vm10811_vm3 = vmpackc.low %vm2991_vm8, %vm2989_vm2  ;;  %v15252_v59 = vld [vmem:[#allocation22_spill] sm:$0xff]  ;;  %v10973_v63 = vpop.f32.mrb[32].mxu0 }
 0x4e1   : > { %v10806_v57 = vsel %vm2989_vm2, inf, %v9979_v39  ;;  %v10809_v46 = vsel %vm2991_vm8, inf, %v9985_v44  ;;  %vm2993_vm5 = vcmp.eq.f32.partialorder %v15252_v59, %v10634_v54  ;;  %vm2995_vm7 = vcmp.eq.f32.partialorder %v15253_v16, %v10634_v54 }
 0x4e2   : > { %v3263_v6 = vmin.f32 %v3261_v55, %v10806_v57  ;;  %v3264_v12 = vmin.f32 %v3262_v22, %v10809_v46  ;;  %v3236_v39 = vmin.f32 %v3234_v34, %v10552_v15  ;;  %v3237_v43 = vmin.f32 %v3235_v10, %v10558_v61  ;;  %vm10829_vm12 = vmpackc.low %vm2995_vm7, %vm2993_vm5  ;;  %v15256_v10 = vld [vmem:[#allocation38_spill] sm:$0xff] }
 0x4e3   : > { %v10824_v44 = vsel %vm2993_vm5, inf, %v15252_v59  ;;  %v10827_v28 = vsel %vm2995_vm7, inf, %v15253_v16  ;;  %5659 = vmatpush1.bf16.msk.msra.mxu1 %vm10280_vm15, %v14534_v51  ;;  %vm2997_vm2 = vcmp.eq.f32.partialorder %v15256_v10, %v10634_v54  ;;  %v15257_v59 = vld [vmem:[#allocation57_spill] sm:$0xff] }
 0x4e4   : > { %v3265_v22 = vmin.f32 %v3263_v6, %v10824_v44  ;;  %v3266_v34 = vmin.f32 %v3264_v12, %v10827_v28  ;;  %vm2999_vm8 = vcmp.eq.f32.partialorder %v15257_v59, %v10634_v54  ;;  %v3238_v16 = vmin.f32 %v3236_v39, %v10574_v37  ;;  %5661 = vmatprep.subr.msk.bf16.mxu1 %vm10745_vm10, %v14534_v51 }
 0x4e5   : > { %v3239_v61 = vmin.f32 %v3237_v43, %v10580_v17  ;;  %v10848_v11 = vsel %vm2997_vm2, inf, %v15256_v10  ;;  %v10851_v6 = vsel %vm2999_vm8, inf, %v15257_v59  ;;  %vm10853_vm15 = vmpackc.low %vm2999_vm8, %vm2997_vm2  ;;  %v15260_v43 = vld [vmem:[#allocation43_spill] sm:$0xff]  ;;  %vm3003_vm10 = vcmp.eq.f32.partialorder %v15261_v42, %v10634_v54 }
 0x4e6   : > { %v3267_v15 = vmin.f32 %v3265_v22, %v10848_v11  ;;  %v3268_v39 = vmin.f32 %v3266_v34, %v10851_v6  ;;  %vm3001_vm5 = vcmp.eq.f32.partialorder %v15260_v43, %v10634_v54  ;;  %v3240_v10 = vmin.f32 %v3238_v16, %v10586_v47 }
 0x4e7   : > { %v3241_v17 = vmin.f32 %v3239_v61, %v10592_v21  ;;  %v10866_v59 = vsel %vm3001_vm5, inf, %v15260_v43  ;;  %v10869_v37 = vsel %vm3003_vm10, inf, %v15261_v42  ;;  %vm10871_vm7 = vmpackc.low %vm3003_vm10, %vm3001_vm5  ;;  %v15264_v22 = vmov 0  ;;  %5663 = vmatpush1.bf16.msk.msra.mxu1 %vm10298_vm13, %v14534_v51 }
 0x4e8   : > { %15262 = vst [vmem:[#allocation46_spill] sm:$0xff] %v10866_v59  ;;  %15263 = vst [vmem:[#allocation8_spill] sm:$0xff] %v10869_v37  ;;  %v15265_v22 = vsel %vm10871_vm7, 4294967295, %v15264_v22  ;;  %v3269_v34 = vmin.f32 %v3267_v15, %v10866_v59  ;;  %v3270_v16 = vmin.f32 %v3268_v39, %v10869_v37  ;;  %vm3005_vm2 = vcmp.eq.f32.partialorder %v10085_v1, %v10634_v54 }
 0x4e9   : > { %vm3007_vm8 = vcmp.eq.f32.partialorder %v10093_v62, %v10634_v54  ;;  %v3242_v61 = vmin.f32 %v3240_v10, %v3241_v17  ;;  %5665 = vmatprep.subr.msk.bf16.mxu1 %vm10769_vm9, %v14534_v51  ;;  %vm3009_vm5 = vcmp.eq.f32.partialorder %v10096_v18, %v10634_v54  ;;  %vm3011_vm13 = vcmp.eq.f32.partialorder %v10099_v60, %v10634_v54 }
 0x4ea   : > { %vm3013_vm10 = vcmp.eq.f32.partialorder %v10116_v35, %v10634_v54  ;;  %vm10893_vm14 = vmpackc.low %vm3007_vm8, %vm3005_vm2  ;;  %vm3017_vm7 = vcmp.eq.f32.partialorder %v10125_v50, %v10634_v54  ;;  %vm3019_vm9 = vcmp.eq.f32.partialorder %v10133_v19, %v10634_v54  ;;  %v10904_v17 = vsel %vm3005_vm2, inf, %v10085_v1 }
 0x4eb   : > { %v15267_v48 = vsel %vm10893_vm14, 4294967295, %v15266_v48  ;;  %vm10906_vm11 = vmpackc.low %vm3011_vm13, %vm3009_vm5  ;;  %v3243_v38 = vrot.slane %v3242_v61, 4  ;;  %v10911_v39 = vsel %vm3007_vm8, inf, %v10093_v62  ;;  %v10914_v43 = vsel %vm3009_vm5, inf, %v10096_v18  ;;  %5667 = vmatpush1.bf16.msk.msra.mxu1 %vm10319_vm0, %v14534_v51 }
 0x4ec   : > { %v10917_v42 = vsel %vm3011_vm13, inf, %v10099_v60  ;;  %vm10919_vm14 = vmpackc.low %vm3015_vm1, %vm3013_vm10  ;;  %v10927_v54 = vsel %vm3013_vm10, inf, %v10116_v35  ;;  %v10930_v62 = vsel %vm3015_vm1, inf, %v10119_v58  ;;  %v10933_v18 = vsel %vm3017_vm7, inf, %v10125_v50  ;;  %5669 = vmatprep.subr.msk.bf16.mxu1 %vm10787_vm4, %v14534_v51 }
 0x4ed   : > { %v10936_v60 = vsel %vm3019_vm9, inf, %v10133_v19  ;;  %vm10938_vm2 = vmpackc.low %vm3019_vm9, %vm3017_vm7  ;;  %v3244_v26 = vmin.f32 %v3242_v61, %v3243_v38  ;;  %v3271_v35 = vmin.f32 %v3269_v34, %v10904_v17  ;;  %v3272_v58 = vmin.f32 %v3270_v16, %v10911_v39 }
 0x4ef   : > { %v3245_v1 = vrot.slane %v3244_v26, 2  ;;  %v3273_v50 = vmin.f32 %v3271_v35, %v10914_v43  ;;  %v3274_v37 = vmin.f32 %v3272_v58, %v10917_v42  ;;  %5671 = vmatpush1.bf16.msk.msra.mxu1 %vm10356_vm6, %v14534_v51  ;;  %v15276_v35 = vld [vmem:[#allocation36_spill] sm:$0xff] }
 0x4f0   : > { %5673 = vmatprep.subr.msk.bf16.mxu1 %vm10811_vm3, %v14534_v51  ;;  %vm15277_vm0 = vnez %v15276_v35 }
 0x4f1   : > { %v3246_v59 = vmin.f32 %v3244_v26, %v3245_v1  ;;  %v3275_v14 = vmin.f32 %v3273_v50, %v10927_v54  ;;  %v3276_v34 = vmin.f32 %v3274_v37, %v10930_v62  ;;  %v15280_v1 = vld [vmem:[#allocation28_spill] sm:$0xff]  ;;  %v15281_v50 = vmov 0 }
 0x4f3   : > { %v3247_v61 = vrot.slane %v3246_v59, 1  ;;  %v3277_v16 = vmin.f32 %v3275_v14, %v10933_v18  ;;  %v3278_v38 = vmin.f32 %v3276_v34, %v10936_v60  ;;  %5675 = vmatpush1.bf16.msk.msra.mxu1 %vm15277_vm0, %v14534_v51 }
 0x4f4   : > { %5677 = vmatprep.subr.msk.bf16.mxu1 %vm10829_vm12, %v14534_v51 }
 0x4f5   : > { %v10962_v58 = vmin.f32 %v3246_v59, %v3247_v61  ;;  %v3279_v26 = vmin.f32 %v3277_v16, %v3278_v38  ;;  %v15278_v59 = vld [vmem:[#allocation12_spill] sm:$0xff] }
 0x4f6   : > { %vm15279_vm3 = vnez %v15278_v59  ;;  %v15346_v38 = vld [vmem:[#allocation52_spill] sm:$0xff] }
 0x4f7   : > { %vm14093_vm6 = vcmp.eq.f32.partialorder %v10592_v21, %v10962_v58  ;;  %vm14100_vm1 = vcmp.eq.f32.partialorder %v10586_v47, %v10962_v58  ;;  %v3280_v37 = vrot.slane %v3279_v26, 4  ;;  %vm3286_vm4 = vcmp.eq.f32.partialorder %v10327_v23, %v10962_v58  ;;  %5679 = vmatpush1.bf16.msk.msra.mxu1 %vm15279_vm3, %v14534_v51 }
 0x4f8   : > { %vm3288_vm12 = vcmp.eq.f32.partialorder %v10333_v5, %v10962_v58  ;;  %v10981_v55 = vsel %vm3286_vm4, inf, %v10327_v23  ;;  %vm3290_vm7 = vcmp.eq.f32.partialorder %v10339_v30, %v10962_v58  ;;  %vm3292_vm8 = vcmp.eq.f32.partialorder %v15280_v1, %v10962_v58  ;;  %vm10993_vm5 = vmpackc.low %vm14093_vm6, %vm14100_vm1  ;;  %5681 = vmatprep.subr.msk.bf16.mxu1 %vm10853_vm15, %v14534_v51 }
 0x4f9   : > { %v15282_v50 = vsel %vm10993_vm5, 4294967295, %v15281_v50  ;;  %v3281_v23 = vmin.f32 %v3279_v26, %v3280_v37  ;;  %v11001_v19 = vsel %vm3288_vm12, inf, %v10333_v5  ;;  %vm11003_vm13 = vmpackc.low %vm3288_vm12, %vm3286_vm4  ;;  %v11008_v34 = vsel %vm3290_vm7, inf, %v10339_v30  ;;  %v15294_v37 = vld [vmem:[#allocation44_spill] sm:$0xff]  ;;  %v15356_v26 = vld [vmem:[#allocation35_spill] sm:$0xff] }
 0x4fa   : > { %15283 = vst [vmem:[#allocation23_spill] sm:$0xff] %v15282_v50  ;;  %15286 = vst [vmem:[#allocation25_spill] sm:$0xff] %v11008_v34  ;;  %v11011_v61 = vsel %vm3292_vm8, inf, %v15280_v1  ;;  %v3542_v16 = vmin.f32 %v10981_v55, %v11008_v34  ;;  %vm3294_vm10 = vcmp.eq.f32.partialorder %v10364_v20, %v10962_v58  ;;  %vm3296_vm9 = vcmp.eq.f32.partialorder %v10370_v41, %v10962_v58  ;;  %v15338_v34 = vld [vmem:[#allocation15_spill] sm:$0xff] }
 0x4fb   : > { %15287 = vst [vmem:[#allocation49_spill] sm:$0xff] %v11011_v61  ;;  %v3543_v12 = vmin.f32 %v11001_v19, %v11011_v61  ;;  %vm11017_vm15 = vmpackc.low %vm3292_vm8, %vm3290_vm7  ;;  %v3282_v5 = vrot.slane %v3281_v23, 2  ;;  %v11026_v30 = vsel %vm3294_vm10, inf, %v10364_v20  ;;  %v11029_v35 = vsel %vm3296_vm9, inf, %v10370_v41 }
 0x4fc   : > { %15290 = vst [vmem:[#allocation51_spill] sm:$0xff] %v11026_v30  ;;  %15291 = vst [vmem:[#allocation17_spill] sm:$0xff] %v11029_v35  ;;  %vm3298_vm4 = vcmp.eq.f32.partialorder %v10376_v45, %v10962_v58  ;;  %vm15295_vm3 = vnez %v15294_v37  ;;  %v3544_v59 = vmin.f32 %v3542_v16, %v11026_v30  ;;  %vm3300_vm12 = vcmp.eq.f32.partialorder %v10382_v29, %v10962_v58  ;;  %v15326_v30 = vld [vmem:[#allocation24_spill] sm:$0xff] }
 0x4fd   : > { %vm11031_vm0 = vmpackc.low %vm3296_vm9, %vm3294_vm10  ;;  %5683 = vmatpush1.bf16.msk.msra.mxu1 %vm15295_vm3, %v14534_v51  ;;  %v3545_v1 = vmin.f32 %v3543_v12, %v11029_v35  ;;  %v11045_v20 = vsel %vm3298_vm4, inf, %v10376_v45  ;;  %vm15297_vm7 = vnez %v15265_v22  ;;  %v3283_v41 = vmin.f32 %v3281_v23, %v3282_v5  ;;  %v15305_v5 = vld [vmem:[#allocation41_spill] sm:$0xff] }
 0x4fe   : > { %15296 = vst [vmem:[#allocation54_spill] sm:$0xff] %v11045_v20  ;;  %5685 = vmatprep.subr.msk.bf16.mxu1 %vm15297_vm7, %v14534_v51  ;;  %v11051_v50 = vsel %vm3300_vm12, inf, %v10382_v29  ;;  %vm11053_vm8 = vmpackc.low %vm3300_vm12, %vm3298_vm4  ;;  %vm3302_vm10 = vcmp.eq.f32.partialorder %v10398_v8, %v10962_v58  ;;  %vm3304_vm9 = vcmp.eq.f32.partialorder %v10404_v4, %v10962_v58  ;;  %v3546_v45 = vmin.f32 %v3544_v59, %v11045_v20 }
 0x4ff   : > { %15298 = vst [vmem:[#allocation22_spill] sm:$0xff] %v11051_v50  ;;  %v3547_v16 = vmin.f32 %v3545_v1, %v11051_v50  ;;  %v11064_v22 = vsel %vm3302_vm10, inf, %v10398_v8  ;;  %v11067_v29 = vsel %vm3304_vm9, inf, %v10404_v4  ;;  %vm11069_vm4 = vmpackc.low %vm3304_vm9, %vm3302_vm10  ;;  %v15303_v23 = vmov 0  ;;  %v15306_v8 = vld [vmem:[#allocation11_spill] sm:$0xff] }
 0x500   : > { %15301 = vst [vmem:[#allocation32_spill] sm:$0xff] %v11064_v22  ;;  %15302 = vst [vmem:[#allocation38_spill] sm:$0xff] %v11067_v29  ;;  %v15304_v23 = vsel %vm11069_vm4, 4294967295, %v15303_v23  ;;  %v3284_v12 = vrot.slane %v3283_v41, 1  ;;  %vm3306_vm3 = vcmp.eq.f32.partialorder %v10410_v25, %v10962_v58  ;;  %vm3308_vm12 = vcmp.eq.f32.partialorder %v10416_v49, %v10962_v58 }
 0x501   : > { %vm3310_vm7 = vcmp.eq.f32.partialorder %v15305_v5, %v10962_v58  ;;  %vm15307_vm6 = vnez %v15306_v8  ;;  %v11083_v4 = vmin.f32 %v3546_v45, %v11064_v22  ;;  %v11086_v59 = vmin.f32 %v3547_v16, %v11067_v29  ;;  %vm11094_vm10 = vmpackc.low %vm3308_vm12, %vm3306_vm3  ;;  %v15312_v45 = vld [vmem:[#allocation9_spill] sm:$0xff]  ;;  %v15316_v8 = vld [vmem:[#allocation55_spill] sm:$0xff] }
 0x502   : > { %5687 = vmatpush1.bf16.msk.msra.mxu1 %vm15307_vm6, %v14534_v51  ;;  %v11089_v1 = vsel %vm3306_vm3, inf, %v10410_v25  ;;  %v11092_v50 = vsel %vm3308_vm12, inf, %v10416_v49  ;;  %v15309_v20 = vmov 0  ;;  %v11098_v35 = vmin.f32 %v3283_v41, %v3284_v12  ;;  %v15315_v12 = vld [vmem:[#allocation26_spill] sm:$0xff] }
 0x503   : > { %15308 = vst [vmem:[#allocation57_spill] sm:$0xff] %v11089_v1  ;;  %v15310_v20 = vsel %vm11094_vm10, 4294967295, %v15309_v20  ;;  %vm15311_vm6 = vnez %v15267_v48  ;;  %vm3312_vm9 = vcmp.eq.f32.partialorder %v15312_v45, %v10962_v58  ;;  %v11109_v25 = vsel %vm3310_vm7, inf, %v15305_v5 }
 0x504   : > { %5689 = vmatprep.subr.msk.bf16.mxu1 %vm15311_vm6, %v14534_v51  ;;  %v3550_v49 = vmin.f32 %v11083_v4, %v11089_v1  ;;  %v11118_v48 = vsel %vm3312_vm9, inf, %v15312_v45  ;;  %vm11123_vm12 = vmpackc.low %vm3312_vm9, %vm3310_vm7  ;;  %v15313_v16 = vmov 0  ;;  %vm3316_vm6 = vcmp.eq.f32.partialorder %v10450_v7, %v10962_v58  ;;  %v15317_v4 = vld [vmem:[#allocation27_spill] sm:$0xff]  ;;  %v15318_v45 = vld [vmem:[#allocation16_spill] sm:$0xff] }
 0x505   : > { %v15314_v16 = vsel %vm11123_vm12, 4294967295, %v15313_v16  ;;  %vm3287_vm1 = vcmp.eq.f32.partialorder %v15315_v12, %v11098_v35  ;;  %vm3289_vm3 = vcmp.eq.f32.partialorder %v15316_v8, %v11098_v35  ;;  %vm3291_vm5 = vcmp.eq.f32.partialorder %v15317_v4, %v11098_v35 }
 0x506   : > { %vm3293_vm10 = vcmp.eq.f32.partialorder %v15318_v45, %v11098_v35  ;;  %vm15319_vm7 = vcmp.eq.f32.partialorder %v10444_v2, %v10962_v58  ;;  %v11148_v41 = vsel %vm3287_vm1, inf, %v15315_v12  ;;  %v11151_v1 = vsel %vm3289_vm3, inf, %v15316_v8  ;;  %vm5704_vm12 = vmpackc.low %vm3289_vm3, %vm3287_vm1 }
 0x507   : > { %vm11143_vm9 = vmpackc.low %vm3316_vm6, %vm15319_vm7  ;;  %15322 = vst [vmem:[#allocation43_spill] sm:$0xff] %v11148_v41  ;;  %v11154_v29 = vsel %vm3291_vm5, inf, %v15317_v4  ;;  %v11157_v22 = vsel %vm3293_vm10, inf, %v15318_v45  ;;  %vm15327_vm4 = vnez %v15326_v30  ;;  %5705 = vmatprep.subr.msk.bf16.mxu0 %vm5704_vm12, %v14534_v51  ;;  %vm3295_vm1 = vcmp.eq.f32.partialorder %v10678_v31, %v11098_v35  ;;  %v11178_v4 = vpop.f32.mrb[33].mxu0  ;;  %v15330_v45 = vld [vmem:[#allocation34_spill] sm:$0xff] }
 0x508   : > { %15323 = vst [vmem:[#allocation58_spill] sm:$0xff] %v11151_v1  ;;  %15324 = vst [vmem:[#allocation59_spill] sm:$0xff] %v11154_v29  ;;  %5691 = vmatpush1.bf16.msk.msra.mxu1 %vm15327_vm4, %v14534_v51  ;;  %v3579_v12 = vmin.f32 %v11148_v41, %v11154_v29  ;;  %v3580_v8 = vmin.f32 %v11151_v1, %v11157_v22  ;;  %vm15328_vm4 = vcmp.eq.f32.partialorder %v10444_v2, %v10962_v58  ;;  %v15332_v29 = vld [vmem:[#allocation61_spill] sm:$0xff] }
 0x509   : > { %15325 = vst [vmem:[#allocation33_spill] sm:$0xff] %v11157_v22  ;;  %vm5708_vm7 = vmpackc.low %vm3293_vm10, %vm3291_vm5  ;;  %5693 = vmatprep.subr.msk.bf16.mxu1 %vm10906_vm11, %v14534_v51  ;;  %v11176_v30 = vsel %vm15328_vm4, inf, %v10444_v2  ;;  %5707 = vmatpush1.bf16.msk.msra.mxu0 %vm11003_vm13, %v14534_v51  ;;  %vm3297_vm5 = vcmp.eq.f32.partialorder %v15330_v45, %v11098_v35  ;;  %v11186_v15 = vsel %vm3295_vm1, inf, %v10678_v31  ;;  %v15331_v22 = vld [vmem:[#allocation45_spill] sm:$0xff]  ;;  %vm3301_vm10 = vcmp.eq.f32.partialorder %v15332_v29, %v11098_v35 }
 0x50a   : > { %15329 = vst [vmem:[#allocation36_spill] sm:$0xff] %v11176_v30  ;;  %vm3299_vm11 = vcmp.eq.f32.partialorder %v15331_v22, %v11098_v35  ;;  %5709 = vmatprep.subr.msk.bf16.mxu0 %vm5708_vm7, %v14534_v51  ;;  %v11194_v2 = vsel %vm3297_vm5, inf, %v15330_v45  ;;  %v3581_v14 = vmin.f32 %v3579_v12, %v11186_v15  ;;  %vm11197_vm13 = vmpackc.low %vm3297_vm5, %vm3295_vm1  ;;  %v11205_v41 = vsel %vm3301_vm10, inf, %v15332_v29  ;;  %v15401_v1 = vld [vmem:[#allocation53_spill] sm:$0xff] }
 0x50b   : > { %15333 = vst [vmem:[#allocation12_spill] sm:$0xff] %v11194_v2  ;;  %v11202_v31 = vsel %vm3299_vm11, inf, %v15331_v22  ;;  %15337 = vst [vmem:[#allocation44_spill] sm:$0xff] %v11205_v41  ;;  %v3582_v61 = vmin.f32 %v3580_v8, %v11194_v2  ;;  %vm15339_vm3 = vnez %v15338_v34  ;;  %vm3303_vm7 = vcmp.eq.f32.partialorder %v10720_v24, %v11098_v35  ;;  %v11237_v8 = vpop.f32.mrb[34].mxu0 }
 0x50c   : > { %15336 = vst [vmem:[#allocation28_spill] sm:$0xff] %v11202_v31  ;;  %5695 = vmatpush1.bf16.msk.msra.mxu1 %vm15339_vm3, %v14534_v51  ;;  %vm11211_vm12 = vmpackc.low %vm3301_vm10, %vm3299_vm11  ;;  %vm3305_vm1 = vcmp.eq.f32.partialorder %v10723_v52, %v11098_v35  ;;  %vm3307_vm4 = vcmp.eq.f32.partialorder %v10740_v0, %v11098_v35  ;;  %v3583_v34 = vmin.f32 %v3581_v14, %v11202_v31  ;;  %v11226_v22 = vsel %vm3303_vm7, inf, %v10720_v24  ;;  %v11255_v31 = vpop.f32.mrb[35].mxu0 }
 0x50d   : > { %5697 = vmatprep.subr.msk.bf16.mxu1 %vm10919_vm14, %v14534_v51  ;;  %v11229_v29 = vsel %vm3305_vm1, inf, %v10723_v52  ;;  %vm11231_vm5 = vmpackc.low %vm3305_vm1, %vm3303_vm7  ;;  %vm3309_vm11 = vcmp.eq.f32.partialorder %v10743_v3, %v11098_v35  ;;  %5711 = vmatpush1.bf16.msk.msra.mxu0 %vm11017_vm15, %v14534_v51  ;;  %v3584_v10 = vmin.f32 %v3582_v61, %v11205_v41  ;;  %v11244_v24 = vsel %vm3307_vm4, inf, %v10740_v0 }
 0x50e   : > { %v11247_v52 = vsel %vm3309_vm11, inf, %v10743_v3  ;;  %vm11249_vm14 = vmpackc.low %vm3309_vm11, %vm3307_vm4  ;;  %vm3311_vm10 = vcmp.eq.f32.partialorder %v10764_v13, %v11098_v35  ;;  %5713 = vmatprep.subr.msk.bf16.mxu0 %vm11197_vm13, %v14534_v51  ;;  %v3585_v61 = vmin.f32 %v3583_v34, %v11226_v22  ;;  %vm3313_vm15 = vcmp.eq.f32.partialorder %v10767_v9, %v11098_v35 }
 0x50f   : > { %v11264_v3 = vsel %vm3311_vm10, inf, %v10764_v13  ;;  %v3552_v0 = vmin.f32 %v3550_v49, %v11109_v25  ;;  %vm15347_vm3 = vnez %v15346_v38  ;;  %v3586_v41 = vmin.f32 %v3584_v10, %v11229_v29  ;;  %vm11274_vm13 = vmpackc.low %vm3313_vm15, %vm3311_vm10 }
 0x510   : > { %5699 = vmatpush1.bf16.msk.msra.mxu1 %vm15347_vm3, %v14534_v51  ;;  %v11272_v2 = vsel %vm3313_vm15, inf, %v10767_v9  ;;  %v15350_v13 = vmin.f32 %v11086_v59, %v11092_v50  ;;  %vm3315_vm7 = vcmp.eq.f32.partialorder %v10782_v36, %v11098_v35  ;;  %v3587_v49 = vmin.f32 %v3585_v61, %v11244_v24 }
 0x511   : > { %5701 = vmatprep.subr.msk.bf16.mxu1 %vm10938_vm2, %v14534_v51  ;;  %vm3317_vm1 = vcmp.eq.f32.partialorder %v10785_v27, %v11098_v35  ;;  %v11291_v9 = vsel %vm3315_vm7, inf, %v10782_v36  ;;  %v11297_v59 = vsel %vm3316_vm6, inf, %v10450_v7  ;;  %5715 = vmatpush1.bf16.msk.msra.mxu0 %vm11031_vm0, %v14534_v51  ;;  %v3588_v32 = vmin.f32 %v3586_v41, %v11247_v52 }
 0x512   : > { %v3553_v34 = vmin.f32 %v15350_v13, %v11118_v48  ;;  %15351 = vst [vmem:[#allocation41_spill] sm:$0xff] %v11297_v59  ;;  %v11304_v10 = vsel %vm3317_vm1, inf, %v10785_v27  ;;  %vm11306_vm2 = vmpackc.low %vm3317_vm1, %vm3315_vm7  ;;  %v3554_v36 = vmin.f32 %v3552_v0, %v11176_v30  ;;  %5717 = vmatprep.subr.msk.bf16.mxu0 %vm11211_vm12, %v14534_v51  ;;  %v3589_v7 = vmin.f32 %v3587_v49, %v11264_v3  ;;  %v15355_v27 = vld [vmem:[#allocation6_spill] sm:$0xff]  ;;  %v15450_v5 = vld [vmem:[#allocation12_spill] sm:$0xff] }
 0x513   : > { %15352 = vst [vmem:[#allocation11_spill] sm:$0xff] %v11304_v10  ;;  %vm3319_vm0 = vcmp.eq.f32.partialorder %v10806_v57, %v11098_v35  ;;  %vm3321_vm6 = vcmp.eq.f32.partialorder %v10809_v46, %v11098_v35  ;;  %vm3318_vm4 = vcmp.eq.f32.partialorder %v15355_v27, %v10962_v58  ;;  %vm15357_vm11 = vnez %v15356_v26 }
 0x514   : > { %v3555_v38 = vmin.f32 %v3553_v34, %v11297_v59  ;;  %5703 = vmatpush1.bf16.msk.msra.mxu1 %vm15357_vm11, %v14534_v51  ;;  %v3590_v41 = vmin.f32 %v3588_v32, %v11272_v2  ;;  %v11327_v45 = vsel %vm3319_vm0, inf, %v10806_v57  ;;  %v11330_v0 = vsel %vm3321_vm6, inf, %v10809_v46  ;;  %vm11332_vm12 = vmpackc.low %vm3321_vm6, %vm3319_vm0  ;;  %v15362_v34 = vld [vmem:[#allocation60_spill] sm:$0xff] }
 0x515   : > { %15358 = vst [vmem:[#allocation9_spill] sm:$0xff] %v11327_v45  ;;  %15359 = vst [vmem:[#allocation26_spill] sm:$0xff] %v11330_v0  ;;  %vm3320_vm10 = vcmp.eq.f32.partialorder %v15362_v34, %v10962_v58  ;;  %v3591_v49 = vmin.f32 %v3589_v7, %v11291_v9  ;;  %v11340_v26 = vsel %vm3318_vm4, inf, %v15355_v27  ;;  %vm3323_vm3 = vcmp.eq.f32.partialorder %v10824_v44, %v11098_v35 }
 0x516   : > { %15363 = vst [vmem:[#allocation55_spill] sm:$0xff] %v11340_v26  ;;  %v11343_v32 = vsel %vm3320_vm10, inf, %v15362_v34  ;;  %vm11345_vm15 = vmpackc.low %vm3320_vm10, %vm3318_vm4  ;;  %5719 = vmatpush1.bf16.msk.msra.mxu0 %vm11053_vm8, %v14534_v51  ;;  %v3592_v46 = vmin.f32 %v3590_v41, %v11304_v10  ;;  %v3556_v7 = vmin.f32 %v3554_v36, %v11340_v26  ;;  %vm3325_vm7 = vcmp.eq.f32.partialorder %v10827_v28, %v11098_v35  ;;  %v15367_v34 = vld [vmem:[#allocation50_spill] sm:$0xff] }
 0x517   : > { %15364 = vst [vmem:[#allocation27_spill] sm:$0xff] %v11343_v32  ;;  %v3557_v27 = vmin.f32 %v3555_v38, %v11343_v32  ;;  %5721 = vmatprep.subr.msk.bf16.mxu0 %vm11231_vm5, %v14534_v51  ;;  %4916 = vmatmul.mubr.bf16.vlgmr.msra.gmra.mrb[60].mxu1 %v15367_v34  ;;  %v3593_v59 = vmin.f32 %v3591_v49, %v11327_v45  ;;  %v11365_v37 = vsel %vm3323_vm3, inf, %v10824_v44  ;;  %v11368_v41 = vsel %vm3325_vm7, inf, %v10827_v28  ;;  %vm11370_vm8 = vmpackc.low %vm3325_vm7, %vm3323_vm3  ;;  %v15372_v38 = vld [vmem:[#allocation7_spill] sm:$0xff] }
 0x518   : > { %15368 = vst [vmem:[#allocation16_spill] sm:$0xff] %v11365_v37  ;;  %15369 = vst [vmem:[#allocation24_spill] sm:$0xff] %v11368_v41  ;;  %vm3322_vm1 = vcmp.eq.f32.partialorder %v10481_v53, %v10962_v58  ;;  %4925 = vmatprep.mubr.bf16.mxu1 %v15372_v38  ;;  %v3594_v12 = vmin.f32 %v3592_v46, %v11330_v0  ;;  %vm3324_vm5 = vcmp.eq.f32.partialorder %v10487_v40, %v10962_v58  ;;  %v15408_v10 = vmov 0 }
 0x519   : > { %v11381_v44 = vsel %vm3322_vm1, inf, %v10481_v53  ;;  %vm3327_vm0 = vcmp.eq.f32.partialorder %v10848_v11, %v11098_v35  ;;  %v3595_v28 = vmin.f32 %v3593_v59, %v11365_v37  ;;  %v11387_v49 = vsel %vm3324_vm5, inf, %v10487_v40  ;;  %vm11390_vm6 = vmpackc.low %vm3324_vm5, %vm3322_vm1 }
 0x51a   : > { %15373 = vst [vmem:[#allocation34_spill] sm:$0xff] %v11381_v44  ;;  %15374 = vst [vmem:[#allocation45_spill] sm:$0xff] %v11387_v49  ;;  %v3558_v32 = vmin.f32 %v3556_v7, %v11381_v44  ;;  %vm3329_vm4 = vcmp.eq.f32.partialorder %v10851_v6, %v11098_v35  ;;  %vm15377_vm11 = vnez %v15304_v23  ;;  %v3596_v53 = vmin.f32 %v3594_v12, %v11368_v41  ;;  %v15404_v44 = vld [vmem:[#allocation47_spill] sm:$0xff] }
 0x51b   : > { %5723 = vmatpush1.bf16.msk.msra.mxu0 %vm15377_vm11, %v14534_v51  ;;  %v3559_v59 = vmin.f32 %v3557_v27, %v11387_v49  ;;  %v11402_v40 = vsel %vm3327_vm0, inf, %v10848_v11  ;;  %v11405_v46 = vsel %vm3329_vm4, inf, %v10851_v6  ;;  %vm11407_vm10 = vmpackc.low %vm3329_vm4, %vm3327_vm0  ;;  %v15380_v7 = vmov 0  ;;  %v15382_v11 = vld [vmem:[#allocation46_spill] sm:$0xff] }
 0x51c   : > { %15378 = vst [vmem:[#allocation61_spill] sm:$0xff] %v11402_v40  ;;  %15379 = vst [vmem:[#allocation15_spill] sm:$0xff] %v11405_v46  ;;  %v15381_v7 = vsel %vm11407_vm10, 4294967295, %v15380_v7  ;;  %5725 = vmatprep.subr.msk.bf16.mxu0 %vm11249_vm14, %v14534_v51  ;;  %v11415_v23 = vmin.f32 %v3595_v28, %v11402_v40  ;;  %vm3326_vm3 = vcmp.eq.f32.partialorder %v10506_v33, %v10962_v58  ;;  %v15385_v12 = vmov 0  ;;  %v15387_v28 = vld [vmem:[#allocation8_spill] sm:$0xff] }
 0x51d   : > { %vm3328_vm7 = vcmp.eq.f32.partialorder %v10512_v56, %v10962_v58  ;;  %vm3331_vm1 = vcmp.eq.f32.partialorder %v15382_v11, %v11098_v35  ;;  %v11424_v6 = vmin.f32 %v3596_v53, %v11405_v46  ;;  %v11427_v27 = vsel %vm3326_vm3, inf, %v10506_v33 }
 0x51e   : > { %15383 = vst [vmem:[#allocation52_spill] sm:$0xff] %v11427_v27  ;;  %v11430_v14 = vsel %vm3328_vm7, inf, %v10512_v56  ;;  %vm11432_vm14 = vmpackc.low %vm3328_vm7, %vm3326_vm3  ;;  %vm3333_vm5 = vcmp.eq.f32.partialorder %v15387_v28, %v11098_v35  ;;  %v3560_v40 = vmin.f32 %v3558_v32, %v11427_v27  ;;  %v11441_v53 = vsel %vm3331_vm1, inf, %v15382_v11  ;;  %v15394_v11 = vld [vmem:[#allocation56_spill] sm:$0xff]  ;;  %v15403_v27 = vld [vmem:[#allocation14_spill] sm:$0xff] }
 0x51f   : > { %15384 = vst [vmem:[#allocation6_spill] sm:$0xff] %v11430_v14  ;;  %v15386_v12 = vsel %vm11432_vm14, 4294967295, %v15385_v12  ;;  %v3561_v49 = vmin.f32 %v3559_v59, %v11430_v14  ;;  %15388 = vst [vmem:[#allocation35_spill] sm:$0xff] %v11441_v53  ;;  %v11444_v33 = vsel %vm3333_vm5, inf, %v15387_v28  ;;  %v15390_v56 = vmov 0  ;;  %v15393_v59 = vld [vmem:[#allocation10_spill] sm:$0xff] }
 0x520   : > { %15389 = vst [vmem:[#allocation60_spill] sm:$0xff] %v11444_v33  ;;  %vm11446_vm0 = vmpackc.low %vm3333_vm5, %vm3331_vm1  ;;  %vm15392_vm4 = vnez %v15310_v20  ;;  %v3599_v46 = vmin.f32 %v11415_v23, %v11441_v53  ;;  %v3600_v32 = vmin.f32 %v11424_v6, %v11444_v33  ;;  %vm3330_vm11 = vcmp.eq.f32.partialorder %v15393_v59, %v10962_v58  ;;  %v15395_v28 = vld [vmem:[#allocation48_spill] sm:$0xff]  ;;  %v15396_v20 = vld [vmem:[#allocation18_spill] sm:$0xff] }
 0x521   : > { %v15391_v56 = vsel %vm11446_vm0, 4294967295, %v15390_v56  ;;  %5727 = vmatpush1.bf16.msk.msra.mxu0 %vm15392_vm4, %v14534_v51  ;;  %vm3332_vm3 = vcmp.eq.f32.partialorder %v15394_v11, %v10962_v58  ;;  %4926 = vmatmul.mubr.bf16.gmra.mrb[64].mxu1 %v15395_v28  ;;  %vm3334_vm7 = vcmp.eq.f32.partialorder %v15396_v20, %v10962_v58  ;;  %v15397_v23 = vld [vmem:[#allocation19_spill] sm:$0xff]  ;;  %v15398_v6 = vld [vmem:[#allocation13_spill] sm:$0xff]  ;;  %v11472_v33 = vsel %vm3330_vm11, inf, %v15393_v59  ;;  %v15402_v14 = vld [vmem:[#allocation42_spill] sm:$0xff] }
 0x522   : > { %5729 = vmatprep.subr.msk.bf16.mxu0 %vm11274_vm13, %v14534_v51  ;;  %vm3336_vm1 = vcmp.eq.f32.partialorder %v15397_v23, %v10962_v58  ;;  %vm3338_vm5 = vcmp.eq.f32.partialorder %v15398_v6, %v10962_v58  ;;  %vm11474_vm4 = vmpackc.low %vm3332_vm3, %vm3330_vm11  ;;  %5021 = vmatprep.mubr.bf16.mxu1 %v15401_v1  ;;  %vm3340_vm13 = vcmp.eq.f32.partialorder %v15402_v14, %v10962_v58  ;;  %v11486_v41 = vsel %vm3332_vm3, inf, %v15394_v11 }
 0x523   : > { %vm3342_vm0 = vcmp.eq.f32.partialorder %v15403_v27, %v10962_v58  ;;  %vm3344_vm14 = vcmp.eq.f32.partialorder %v15404_v44, %v10962_v58  ;;  %vm11488_vm10 = vmpackc.low %vm3336_vm1, %vm3334_vm7  ;;  %v15405_v59 = vmov 0  ;;  %v11493_v37 = vsel %vm3334_vm7, inf, %v15396_v20 }
 0x524   : > { %v15406_v59 = vsel %vm11488_vm10, 4294967295, %v15405_v59  ;;  %v11496_v0 = vsel %vm3336_vm1, inf, %v15397_v23  ;;  %v11499_v45 = vsel %vm3338_vm5, inf, %v15398_v6  ;;  %v11502_v30 = vsel %vm3340_vm13, inf, %v15402_v14  ;;  %vm11504_vm11 = vmpackc.low %vm3340_vm13, %vm3338_vm5 }
 0x525   : > { %15407 = vst [vmem:[#allocation50_spill] sm:$0xff] %v11502_v30  ;;  %v15409_v10 = vsel %vm11504_vm11, 4294967295, %v15408_v10  ;;  %vm15410_vm3 = vnez %v15314_v16  ;;  %v11512_v11 = vsel %vm3342_vm0, inf, %v15403_v27  ;;  %v11515_v20 = vsel %vm3344_vm14, inf, %v15404_v44  ;;  %vm11529_vm5 = vmpackc.low %vm3344_vm14, %vm3342_vm0 }
 0x526   : > { %5731 = vmatpush1.bf16.msk.msra.mxu0 %vm15410_vm3, %v14534_v51  ;;  %vm15411_vm7 = vcmp.eq.f32.partialorder %v10586_v47, %v10962_v58  ;;  %vm15412_vm1 = vcmp.eq.f32.partialorder %v10592_v21, %v10962_v58  ;;  %v15413_v16 = vmov 0  ;;  %v3562_v44 = vmin.f32 %v3560_v40, %v11472_v33 }
 0x527   : > { %v11521_v14 = vsel %vm15411_vm7, inf, %v10586_v47  ;;  %v11527_v23 = vsel %vm15412_vm1, inf, %v10592_v21  ;;  %v15414_v16 = vsel %vm11529_vm5, 4294967295, %v15413_v16  ;;  %5733 = vmatprep.subr.msk.bf16.mxu0 %vm11306_vm2, %v14534_v51  ;;  %v3563_v27 = vmin.f32 %v3561_v49, %v11486_v41 }
 0x528   : > { %vm3335_vm13 = vcmp.eq.f32.partialorder %v10904_v17, %v11098_v35  ;;  %vm3337_vm3 = vcmp.eq.f32.partialorder %v10911_v39, %v11098_v35  ;;  %vm3339_vm14 = vcmp.eq.f32.partialorder %v10914_v43, %v11098_v35  ;;  %vm3341_vm0 = vcmp.eq.f32.partialorder %v10917_v42, %v11098_v35 }
 0x529   : > { %vm3343_vm7 = vcmp.eq.f32.partialorder %v10927_v54, %v11098_v35  ;;  %vm3345_vm2 = vcmp.eq.f32.partialorder %v10930_v62, %v11098_v35  ;;  %vm11550_vm1 = vmpackc.low %vm3337_vm3, %vm3335_vm13  ;;  %v3564_v21 = vmin.f32 %v3562_v44, %v11493_v37  ;;  %v3565_v58 = vmin.f32 %v3563_v27, %v11496_v0 }
 0x52a   : > { %vm3347_vm5 = vcmp.eq.f32.partialorder %v10933_v18, %v11098_v35  ;;  %vm3349_vm11 = vcmp.eq.f32.partialorder %v10936_v60, %v11098_v35  ;;  %vm11560_vm10 = vmpackc.low %vm3341_vm0, %vm3339_vm14  ;;  %v15417_v61 = vmov 0  ;;  %5735 = vmatpush1.bf16.msk.msra.mxu0 %vm11143_vm9, %v14534_v51  ;;  %v11568_v49 = vsel %vm3335_vm13, inf, %v10904_v17 }
 0x52b   : > { %v15418_v61 = vsel %vm11560_vm10, 4294967295, %v15417_v61  ;;  %v11571_v40 = vsel %vm3337_vm3, inf, %v10911_v39  ;;  %v11574_v6 = vsel %vm3339_vm14, inf, %v10914_v43  ;;  %v11577_v44 = vsel %vm3341_vm0, inf, %v10917_v42  ;;  %vm11585_vm10 = vmpackc.low %vm3345_vm2, %vm3343_vm7  ;;  %5737 = vmatprep.subr.msk.bf16.mxu0 %vm11332_vm12, %v14534_v51 }
 0x52c   : > { %15419 = vst [vmem:[#allocation46_spill] sm:$0xff] %v11571_v40  ;;  %v3566_v17 = vmin.f32 %v3564_v21, %v11499_v45  ;;  %v3567_v39 = vmin.f32 %v3565_v58, %v11502_v30  ;;  %v11598_v43 = vsel %vm3343_vm7, inf, %v10927_v54  ;;  %v11604_v42 = vsel %vm3345_vm2, inf, %v10930_v62  ;;  %vm11606_vm9 = vmpackc.low %vm3349_vm11, %vm3347_vm5 }
 0x52d   : > { %15422 = vst [vmem:[#allocation8_spill] sm:$0xff] %v11598_v43  ;;  %15423 = vst [vmem:[#allocation10_spill] sm:$0xff] %v11604_v42  ;;  %v11611_v13 = vsel %vm3347_vm5, inf, %v10933_v18  ;;  %v11614_v21 = vsel %vm3349_vm11, inf, %v10936_v60  ;;  %v3601_v58 = vmin.f32 %v3599_v46, %v11568_v49  ;;  %v3602_v54 = vmin.f32 %v3600_v32, %v11571_v40 }
 0x52e   : > { %15426 = vst [vmem:[#allocation56_spill] sm:$0xff] %v11611_v13  ;;  %15427 = vst [vmem:[#allocation18_spill] sm:$0xff] %v11614_v21  ;;  %v3568_v30 = vmin.f32 %v3566_v17, %v11512_v11  ;;  %v3569_v35 = vmin.f32 %v3567_v39, %v11515_v20  ;;  %5739 = vmatpush1.bf16.msk.msra.mxu0 %vm11345_vm15, %v14534_v51  ;;  %v4768_v39 = vpop.f32.mrb[36].mxu0  ;;  %vm15428_vm12 = vnez %v15381_v7  ;;  %vm15429_vm15 = vnez %v15386_v12 }
 0x52f   : > { %v3603_v62 = vmin.f32 %v3601_v58, %v11574_v6  ;;  %v3604_v18 = vmin.f32 %v3602_v54, %v11577_v44  ;;  %5741 = vmatprep.subr.msk.bf16.mxu0 %vm11370_vm8, %v14534_v51  ;;  %v4770_v57 = vpop.f32.mrb[37].mxu0  ;;  %vm15430_vm8 = vnez %v15391_v56  ;;  %v5149_v7 = vunpack.c.l.bf16 %v15401_v1 }
 0x530   : > { %v3570_v60 = vmin.f32 %v3568_v30, %v11521_v14  ;;  %v3571_v46 = vmin.f32 %v3569_v35, %v11527_v23  ;;  %v4772_v54 = vpop.f32.mrb[38].mxu0  ;;  %v5155_v56 = vunpack.c.h.bf16 %v15372_v38  ;;  %vm15432_vm5 = vnez %v15418_v61 }
 0x531   : > { %v3605_v32 = vmin.f32 %v3603_v62, %v11598_v43  ;;  %v3606_v17 = vmin.f32 %v3604_v18, %v11604_v42  ;;  %v4774_v35 = vpop.f32.mrb[39].mxu0 }
 0x532   : > { %v3572_v40 = vmin.f32 %v3570_v60, %v3571_v46  ;;  %5743 = vmatpush1.bf16.msk.msra.mxu0 %vm11390_vm6, %v14534_v51  ;;  %vm15431_vm6 = vnez %v15406_v59 }
 0x533   : > { %v3607_v58 = vmin.f32 %v3605_v32, %v11611_v13  ;;  %v3608_v36 = vmin.f32 %v3606_v17, %v11614_v21  ;;  %5745 = vmatprep.subr.msk.bf16.mxu0 %vm15428_vm12, %v14534_v51  ;;  %v5148_v17 = vunpack.c.l.bf16 %v15367_v34  ;;  %v5152_v21 = vunpack.c.l.bf16 %v15395_v28 }
 0x534   : > { %v3573_v30 = vrot.slane %v3572_v40, 4 }
 0x535   : > { %v3609_v62 = vmin.f32 %v3607_v58, %v3608_v36  ;;  %v5154_v58 = vunpack.c.h.bf16 %v15395_v28  ;;  %v11661_v53 = vmax.f32 %v5148_v17, %v10973_v63  ;;  %v11674_v47 = vmax.f32 %v5152_v21, %v4768_v39  ;;  %v15442_v17 = vld [vmem:[#allocation58_spill] sm:$0xff] }
 0x536   : > { %v3574_v18 = vmin.f32 %v3572_v40, %v3573_v30  ;;  %5747 = vmatpush1.bf16.msk.msra.mxu0 %vm15429_vm15, %v14534_v51  ;;  %v5153_v40 = vunpack.c.l.bf16 %v15372_v38  ;;  %v5150_v30 = vunpack.c.h.bf16 %v15367_v34 }
 0x537   : > { %v3610_v60 = vrot.slane %v3609_v62, 4  ;;  %5749 = vmatprep.subr.msk.bf16.mxu0 %vm15430_vm8, %v14534_v51 }
 0x538   : > { %v3575_v26 = vrot.slane %v3574_v18, 2  ;;  %v11669_v13 = vmax.f32 %v5150_v30, %v11237_v8  ;;  %v11679_v63 = vmax.f32 %v5153_v40, %v4770_v57  ;;  %v15434_v8 = vld [vmem:[#allocation49_spill] sm:$0xff] }
 0x539   : > { %v3611_v46 = vmin.f32 %v3609_v62, %v3610_v60  ;;  %v5151_v62 = vunpack.c.h.bf16 %v15401_v1  ;;  %v11664_v60 = vmax.f32 %v5149_v7, %v11178_v4  ;;  %v11683_v4 = vmax.f32 %v5155_v56, %v4774_v35  ;;  %v15443_v7 = vld [vmem:[#allocation59_spill] sm:$0xff] }
 0x53a   : > { %v3576_v32 = vmin.f32 %v3574_v18, %v3575_v26  ;;  %5751 = vmatpush1.bf16.msk.msra.mxu0 %vm11474_vm4, %v14534_v51  ;;  %v15465_v35 = vld [vmem:[#allocation23_spill] sm:$0xff] }
 0x53b   : > { %v3612_v12 = vrot.slane %v3611_v46, 2  ;;  %5753 = vmatprep.subr.msk.bf16.mxu0 %vm11550_vm1, %v14534_v51  ;;  %v11672_v42 = vmax.f32 %v5151_v62, %v11255_v31  ;;  %v15433_v31 = vld [vmem:[#allocation25_spill] sm:$0xff] }
 0x53c   : > { %v3577_v36 = vrot.slane %v3576_v32, 1 }
 0x53d   : > { %v3613_v18 = vmin.f32 %v3611_v46, %v3612_v12  ;;  %v11681_v46 = vmax.f32 %v5154_v58, %v4772_v54  ;;  %v15444_v12 = vld [vmem:[#allocation33_spill] sm:$0xff] }
 0x53e   : > { %v11666_v26 = vmin.f32 %v3576_v32, %v3577_v36  ;;  %5755 = vmatpush1.bf16.msk.msra.mxu0 %vm15431_vm6, %v14534_v51  ;;  %v15441_v32 = vld [vmem:[#allocation43_spill] sm:$0xff]  ;;  %vm15445_vm6 = vnez %v15409_v10 }
 0x53f   : > { %v3614_v43 = vrot.slane %v3613_v18, 1  ;;  %5757 = vmatprep.subr.msk.bf16.mxu0 %vm15432_vm5, %v14534_v51 }
 0x540   : > { %vm3616_vm4 = vcmp.eq.f32.partialorder %v10981_v55, %v11666_v26  ;;  %vm3618_vm11 = vcmp.eq.f32.partialorder %v11001_v19, %v11666_v26  ;;  %vm3620_vm13 = vcmp.eq.f32.partialorder %v15433_v31, %v11666_v26  ;;  %vm3622_vm3 = vcmp.eq.f32.partialorder %v15434_v8, %v11666_v26 }
 0x541   : > { %v11696_v59 = vmin.f32 %v3613_v18, %v3614_v43  ;;  %v11699_v21 = vsel %vm3616_vm4, inf, %v10981_v55  ;;  %v11702_v39 = vsel %vm3618_vm11, inf, %v11001_v19  ;;  %vm11704_vm14 = vmpackc.low %vm3618_vm11, %vm3616_vm4  ;;  %v11709_v61 = vsel %vm3620_vm13, inf, %v15433_v31  ;;  %v15439_v55 = vld [vmem:[#allocation51_spill] sm:$0xff]  ;;  %v15440_v19 = vld [vmem:[#allocation17_spill] sm:$0xff] }
 0x542   : > { %v11712_v54 = vsel %vm3622_vm3, inf, %v15434_v8  ;;  %v3872_v43 = vmin.f32 %v11699_v21, %v11709_v61  ;;  %vm11716_vm0 = vmpackc.low %vm3622_vm3, %vm3620_vm13  ;;  %vm3624_vm7 = vcmp.eq.f32.partialorder %v15439_v55, %v11666_v26  ;;  %vm3626_vm2 = vcmp.eq.f32.partialorder %v15440_v19, %v11666_v26  ;;  %5759 = vmatpush1.bf16.msk.msra.mxu0 %vm15445_vm6, %v14534_v51 }
 0x543   : > { %vm3617_vm1 = vcmp.eq.f32.partialorder %v15441_v32, %v11696_v59  ;;  %vm3619_vm12 = vcmp.eq.f32.partialorder %v15442_v17, %v11696_v59  ;;  %vm3621_vm15 = vcmp.eq.f32.partialorder %v15443_v7, %v11696_v59  ;;  %vm3623_vm8 = vcmp.eq.f32.partialorder %v15444_v12, %v11696_v59  ;;  %5761 = vmatprep.subr.msk.bf16.mxu0 %vm11585_vm10, %v14534_v51 }
 0x544   : > { %v11736_v40 = vsel %vm3617_vm1, inf, %v15441_v32  ;;  %v11739_v58 = vsel %vm3619_vm12, inf, %v15442_v17  ;;  %vm5768_vm4 = vmpackc.low %vm3619_vm12, %vm3617_vm1  ;;  %v11742_v56 = vsel %vm3621_vm15, inf, %v15443_v7  ;;  %v11745_v36 = vsel %vm3623_vm8, inf, %v15444_v12 }
 0x545   : > { %15446 = vst [vmem:[#allocation19_spill] sm:$0xff] %v11736_v40  ;;  %15447 = vst [vmem:[#allocation13_spill] sm:$0xff] %v11739_v58  ;;  %5769 = vmatprep.subr.msk.bf16.mxu1 %vm5768_vm4, %v14534_v51  ;;  %v3909_v10 = vmin.f32 %v11736_v40, %v11742_v56  ;;  %v3910_v30 = vmin.f32 %v11739_v58, %v11745_v36  ;;  %v3873_v62 = vmin.f32 %v11702_v39, %v11712_v54 }
 0x546   : > { %15448 = vst [vmem:[#allocation42_spill] sm:$0xff] %v11742_v56  ;;  %15449 = vst [vmem:[#allocation14_spill] sm:$0xff] %v11745_v36  ;;  %vm3625_vm5 = vcmp.eq.f32.partialorder %v11186_v15, %v11696_v59  ;;  %5771 = vmatpush1.bf16.msk.msra.mxu1 %vm11704_vm14, %v14534_v51  ;;  %vm3627_vm10 = vcmp.eq.f32.partialorder %v15450_v5, %v11696_v59  ;;  %v11771_v31 = vsel %vm3624_vm7, inf, %v15439_v55  ;;  %v11777_v8 = vsel %vm3626_vm2, inf, %v15440_v19  ;;  %v15456_v36 = vld [vmem:[#allocation28_spill] sm:$0xff] }
 0x547   : > { %vm5772_vm11 = vmpackc.low %vm3623_vm8, %vm3621_vm15  ;;  %v11765_v18 = vsel %vm3625_vm5, inf, %v11186_v15  ;;  %v11781_v57 = vsel %vm3627_vm10, inf, %v15450_v5  ;;  %v3874_v17 = vmin.f32 %v3872_v43, %v11771_v31  ;;  %v3875_v7 = vmin.f32 %v3873_v62, %v11777_v8  ;;  %v15457_v5 = vld [vmem:[#allocation44_spill] sm:$0xff]  ;;  %v15458_v43 = vld [vmem:[#allocation54_spill] sm:$0xff] }
 0x548   : > { %15451 = vst [vmem:[#allocation47_spill] sm:$0xff] %v11765_v18  ;;  %5773 = vmatprep.subr.msk.bf16.mxu1 %vm5772_vm11, %v14534_v51  ;;  %15452 = vst [vmem:[#allocation25_spill] sm:$0xff] %v11781_v57  ;;  %v3911_v15 = vmin.f32 %v3909_v10, %v11765_v18  ;;  %vm15455_vm3 = vnez %v15414_v16  ;;  %v3912_v12 = vmin.f32 %v3910_v30, %v11781_v57  ;;  %v15463_v62 = vld [vmem:[#allocation22_spill] sm:$0xff]  ;;  %vm15466_vm6 = vnez %v15465_v35 }
 0x549   : > { %vm11784_vm13 = vmpackc.low %vm3627_vm10, %vm3625_vm5  ;;  %5763 = vmatpush1.bf16.msk.msra.mxu0 %vm15455_vm3, %v14534_v51  ;;  %vm3629_vm14 = vcmp.eq.f32.partialorder %v15456_v36, %v11696_v59  ;;  %vm3631_vm1 = vcmp.eq.f32.partialorder %v15457_v5, %v11696_v59  ;;  %vm3628_vm12 = vcmp.eq.f32.partialorder %v15458_v43, %v11666_v26  ;;  %vm3630_vm8 = vcmp.eq.f32.partialorder %v15463_v62, %v11666_v26 }
 0x54a   : > { %5765 = vmatprep.subr.msk.bf16.mxu0 %vm11606_vm9, %v14534_v51  ;;  %v11804_v10 = vsel %vm3629_vm14, inf, %v15456_v36  ;;  %v11807_v16 = vsel %vm3631_vm1, inf, %v15457_v5  ;;  %vm11809_vm15 = vmpackc.low %vm3631_vm1, %vm3629_vm14  ;;  %v11819_v27 = vsel %vm3628_vm12, inf, %v15458_v43  ;;  %5775 = vmatpush1.bf16.msk.msra.mxu1 %vm11716_vm0, %v14534_v51  ;;  %v11830_v57 = vsel %vm3630_vm8, inf, %v15463_v62 }
 0x54b   : > { %15459 = vst [vmem:[#allocation49_spill] sm:$0xff] %v11804_v10  ;;  %15460 = vst [vmem:[#allocation51_spill] sm:$0xff] %v11807_v16  ;;  %v3913_v36 = vmin.f32 %v3911_v15, %v11804_v10  ;;  %v3914_v5 = vmin.f32 %v3912_v12, %v11807_v16  ;;  %v3876_v18 = vmin.f32 %v3874_v17, %v11819_v27  ;;  %5777 = vmatprep.subr.msk.bf16.mxu1 %vm11784_vm13, %v14534_v51  ;;  %v15472_v12 = vld [vmem:[#allocation38_spill] sm:$0xff] }
 0x54c   : > { %15464 = vst [vmem:[#allocation17_spill] sm:$0xff] %v11830_v57  ;;  %v3877_v56 = vmin.f32 %v3875_v7, %v11830_v57  ;;  %vm3633_vm9 = vcmp.eq.f32.partialorder %v11226_v22, %v11696_v59  ;;  %vm3635_vm0 = vcmp.eq.f32.partialorder %v11229_v29, %v11696_v59  ;;  %v15471_v7 = vld [vmem:[#allocation32_spill] sm:$0xff]  ;;  %vm3634_vm5 = vcmp.eq.f32.partialorder %v15472_v12, %v11666_v26  ;;  %vm5778_vm10 = vmpackc.low %vm3626_vm2, %vm3624_vm7 }
 0x54d   : > { %5767 = vmatpush1.bf16.msk.msra.mxu0 %vm15466_vm6, %v14534_v51  ;;  %v11845_v15 = vsel %vm3633_vm9, inf, %v11226_v22  ;;  %v11848_v17 = vsel %vm3635_vm0, inf, %v11229_v29  ;;  %vm11850_vm4 = vmpackc.low %vm3635_vm0, %vm3633_vm9  ;;  %vm3632_vm11 = vcmp.eq.f32.partialorder %v15471_v7, %v11666_v26  ;;  %v11876_v57 = vsel %vm3634_vm5, inf, %v15472_v12 }
 0x54e   : > { %15467 = vst [vmem:[#allocation43_spill] sm:$0xff] %v11845_v15  ;;  %15468 = vst [vmem:[#allocation58_spill] sm:$0xff] %v11848_v17  ;;  %v3915_v22 = vmin.f32 %v3913_v36, %v11845_v15  ;;  %v3916_v29 = vmin.f32 %v3914_v5, %v11848_v17  ;;  %v11870_v35 = vsel %vm3632_vm11, inf, %v15471_v7  ;;  %5779 = vmatpush1.bf16.msk.msra.mxu1 %vm5778_vm10, %v14534_v51  ;;  %v15501_v5 = vld [vmem:[#allocation9_spill] sm:$0xff] }
 0x54f   : > { %15473 = vst [vmem:[#allocation59_spill] sm:$0xff] %v11870_v35  ;;  %15474 = vst [vmem:[#allocation33_spill] sm:$0xff] %v11876_v57  ;;  %v3878_v55 = vmin.f32 %v3876_v18, %v11870_v35  ;;  %v3879_v19 = vmin.f32 %v3877_v56, %v11876_v57  ;;  %vm3637_vm7 = vcmp.eq.f32.partialorder %v11244_v24, %v11696_v59  ;;  %5781 = vmatprep.subr.msk.bf16.mxu1 %vm11809_vm15, %v14534_v51  ;;  %v15476_v18 = vld [vmem:[#allocation57_spill] sm:$0xff] }
 0x550   : > { %4969 = vmatmul.mubr.bf16.vlgmr.msra.gmra.mrb[48].mxu0 %v15367_v34  ;;  %vm3639_vm2 = vcmp.eq.f32.partialorder %v11247_v52, %v11696_v59  ;;  %v11890_v36 = vsel %vm3637_vm7, inf, %v11244_v24  ;;  %vm3636_vm13 = vcmp.eq.f32.partialorder %v15476_v18, %v11666_v26  ;;  %vm3638_vm3 = vcmp.eq.f32.partialorder %v11092_v50, %v11666_v26  ;;  %vm5782_vm1 = vmpackc.low %vm3630_vm8, %vm3628_vm12 }
 0x551   : > { %15475 = vst [vmem:[#allocation12_spill] sm:$0xff] %v11890_v36  ;;  %4978 = vmatprep.mubr.bf16.mxu0 %v15372_v38  ;;  %v11898_v56 = vsel %vm3639_vm2, inf, %v11247_v52  ;;  %v3917_v30 = vmin.f32 %v3915_v22, %v11890_v36  ;;  %vm11901_vm14 = vmpackc.low %vm3639_vm2, %vm3637_vm7  ;;  %v11909_v24 = vsel %vm3636_vm13, inf, %v15476_v18  ;;  %v11915_v57 = vsel %vm3638_vm3, inf, %v11092_v50 }
 0x552   : > { %15477 = vst [vmem:[#allocation28_spill] sm:$0xff] %v11898_v56  ;;  %15480 = vst [vmem:[#allocation44_spill] sm:$0xff] %v11909_v24  ;;  %v3918_v52 = vmin.f32 %v3916_v29, %v11898_v56  ;;  %v3880_v22 = vmin.f32 %v3878_v55, %v11909_v24  ;;  %v3881_v35 = vmin.f32 %v3879_v19, %v11915_v57  ;;  %5783 = vmatpush1.bf16.msk.msra.mxu1 %vm5782_vm1, %v14534_v51 }
 0x553   : > { %15481 = vst [vmem:[#allocation54_spill] sm:$0xff] %v11915_v57  ;;  %vm3641_vm15 = vcmp.eq.f32.partialorder %v11264_v3, %v11696_v59  ;;  %vm3643_vm9 = vcmp.eq.f32.partialorder %v11272_v2, %v11696_v59  ;;  %vm3640_vm12 = vcmp.eq.f32.partialorder %v11109_v25, %v11666_v26  ;;  %vm3642_vm8 = vcmp.eq.f32.partialorder %v11118_v48, %v11666_v26  ;;  %vm5786_vm10 = vmpackc.low %vm3634_vm5, %vm3632_vm11 }
 0x554   : > { %v11932_v43 = vsel %vm3641_vm15, inf, %v11264_v3  ;;  %5785 = vmatprep.subr.msk.bf16.mxu1 %vm11850_vm4, %v14534_v51  ;;  %v11942_v62 = vsel %vm3643_vm9, inf, %v11272_v2  ;;  %vm11945_vm0 = vmpackc.low %vm3643_vm9, %vm3641_vm15  ;;  %v11950_v3 = vsel %vm3640_vm12, inf, %v11109_v25  ;;  %v11953_v19 = vsel %vm3642_vm8, inf, %v11118_v48  ;;  %v15490_v25 = vld [vmem:[#allocation11_spill] sm:$0xff] }
 0x555   : > { %15482 = vst [vmem:[#allocation22_spill] sm:$0xff] %v11932_v43  ;;  %15483 = vst [vmem:[#allocation23_spill] sm:$0xff] %v11942_v62  ;;  %v3919_v29 = vmin.f32 %v3917_v30, %v11932_v43  ;;  %v3920_v57 = vmin.f32 %v3918_v52, %v11942_v62  ;;  %v3882_v32 = vmin.f32 %v3880_v22, %v11950_v3  ;;  %v15493_v30 = vld [vmem:[#allocation41_spill] sm:$0xff]  ;;  %v15557_v43 = vmov 0 }
 0x556   : > { %15486 = vst [vmem:[#allocation32_spill] sm:$0xff] %v11950_v3  ;;  %15487 = vst [vmem:[#allocation38_spill] sm:$0xff] %v11953_v19  ;;  %v3883_v24 = vmin.f32 %v3881_v35, %v11953_v19  ;;  %vm3645_vm4 = vcmp.eq.f32.partialorder %v11291_v9, %v11696_v59  ;;  %vm3647_vm7 = vcmp.eq.f32.partialorder %v15490_v25, %v11696_v59  ;;  %v15492_v35 = vld [vmem:[#allocation36_spill] sm:$0xff]  ;;  %5787 = vmatpush1.bf16.msk.msra.mxu1 %vm5786_vm10, %v14534_v51 }
 0x557   : > { %vm11958_vm6 = vmpackc.low %vm3642_vm8, %vm3640_vm12  ;;  %v11973_v48 = vsel %vm3645_vm4, inf, %v11291_v9  ;;  %vm3644_vm2 = vcmp.eq.f32.partialorder %v15492_v35, %v11666_v26  ;;  %vm3646_vm1 = vcmp.eq.f32.partialorder %v15493_v30, %v11666_v26  ;;  %v11982_v7 = vsel %vm3647_vm7, inf, %v15490_v25  ;;  %5789 = vmatprep.subr.msk.bf16.mxu1 %vm11901_vm14, %v14534_v51 }
 0x558   : > { %15491 = vst [vmem:[#allocation57_spill] sm:$0xff] %v11973_v48  ;;  %4979 = vmatmul.mubr.bf16.gmra.mrb[52].mxu0 %v15395_v28  ;;  %15494 = vst [vmem:[#allocation11_spill] sm:$0xff] %v11982_v7  ;;  %v3921_v12 = vmin.f32 %v3919_v29, %v11973_v48  ;;  %v11990_v9 = vsel %vm3644_vm2, inf, %v15492_v35  ;;  %v11993_v22 = vsel %vm3646_vm1, inf, %v15493_v30  ;;  %v3922_v19 = vmin.f32 %v3920_v57, %v11982_v7  ;;  %v15502_v57 = vld [vmem:[#allocation26_spill] sm:$0xff]  ;;  %v12020_v35 = vpop.f32.mrb[52].mxu1 }
 0x559   : > { %vm11985_vm11 = vmpackc.low %vm3647_vm7, %vm3645_vm4  ;;  %15497 = vst [vmem:[#allocation36_spill] sm:$0xff] %v11990_v9  ;;  %5074 = vmatprep.mubr.bf16.mxu0 %v15401_v1  ;;  %v3884_v29 = vmin.f32 %v3882_v32, %v11990_v9  ;;  %v3885_v25 = vmin.f32 %v3883_v24, %v11993_v22  ;;  %vm3649_vm14 = vcmp.eq.f32.partialorder %v15501_v5, %v11696_v59  ;;  %v15503_v32 = vld [vmem:[#allocation55_spill] sm:$0xff]  ;;  %v12038_v7 = vpop.f32.mrb[53].mxu1  ;;  %v15563_v1 = vld [vmem:[#allocation46_spill] sm:$0xff] }
 0x55a   : > { %15498 = vst [vmem:[#allocation41_spill] sm:$0xff] %v11993_v22  ;;  %vm12002_vm5 = vmpackc.low %vm3646_vm1, %vm3644_vm2  ;;  %vm3651_vm9 = vcmp.eq.f32.partialorder %v15502_v57, %v11696_v59  ;;  %vm3648_vm12 = vcmp.eq.f32.partialorder %v15503_v32, %v11666_v26  ;;  %v15504_v24 = vld [vmem:[#allocation27_spill] sm:$0xff]  ;;  %v12023_v18 = vsel %vm3649_vm14, inf, %v15501_v5 }
 0x55b   : > { %vm5790_vm15 = vmpackc.low %vm3638_vm3, %vm3636_vm13  ;;  %vm3650_vm8 = vcmp.eq.f32.partialorder %v15504_v24, %v11666_v26  ;;  %15505 = vst [vmem:[#allocation9_spill] sm:$0xff] %v12023_v18  ;;  %v12026_v50 = vsel %vm3651_vm9, inf, %v15502_v57  ;;  %v12033_v22 = vsel %vm3648_vm12, inf, %v15503_v32  ;;  %v3923_v5 = vmin.f32 %v3921_v12, %v12023_v18  ;;  %v12049_v32 = vpop.f32.mrb[54].mxu1  ;;  %v15514_v12 = vld [vmem:[#allocation24_spill] sm:$0xff] }
 0x55c   : > { %15506 = vst [vmem:[#allocation26_spill] sm:$0xff] %v12026_v50  ;;  %vm12028_vm13 = vmpackc.low %vm3651_vm9, %vm3649_vm14  ;;  %v12036_v9 = vsel %vm3650_vm8, inf, %v15504_v24  ;;  %5791 = vmatpush1.bf16.msk.msra.mxu1 %vm5790_vm15, %v14534_v51  ;;  %v3924_v3 = vmin.f32 %v3922_v19, %v12026_v50  ;;  %v3886_v57 = vmin.f32 %v3884_v29, %v12033_v22  ;;  %v15513_v24 = vld [vmem:[#allocation16_spill] sm:$0xff]  ;;  %vm3655_vm10 = vcmp.eq.f32.partialorder %v15514_v12, %v11696_v59  ;;  %v15515_v19 = vld [vmem:[#allocation34_spill] sm:$0xff] }
 0x55d   : > { %15509 = vst [vmem:[#allocation55_spill] sm:$0xff] %v12033_v22  ;;  %15510 = vst [vmem:[#allocation27_spill] sm:$0xff] %v12036_v9  ;;  %v3887_v62 = vmin.f32 %v3885_v25, %v12036_v9  ;;  %5793 = vmatprep.subr.msk.bf16.mxu1 %vm11945_vm0, %v14534_v51  ;;  %vm3653_vm4 = vcmp.eq.f32.partialorder %v15513_v24, %v11696_v59  ;;  %vm3652_vm7 = vcmp.eq.f32.partialorder %v15515_v19, %v11666_v26  ;;  %v15516_v29 = vld [vmem:[#allocation45_spill] sm:$0xff]  ;;  %v12062_v25 = vpop.f32.mrb[55].mxu1  ;;  %v15561_v22 = vmov 0 }
 0x55e   : > { %vm12045_vm3 = vmpackc.low %vm3650_vm8, %vm3648_vm12  ;;  %vm3654_vm2 = vcmp.eq.f32.partialorder %v15516_v29, %v11666_v26  ;;  %v12065_v9 = vsel %vm3653_vm4, inf, %v15513_v24  ;;  %v12068_v55 = vsel %vm3655_vm10, inf, %v15514_v12  ;;  %v12075_v50 = vsel %vm3652_vm7, inf, %v15515_v19  ;;  %v15525_v19 = vld [vmem:[#allocation61_spill] sm:$0xff]  ;;  %v12130_v15 = vpop.f32.mrb[56].mxu1 }
 0x55f   : > { %15517 = vst [vmem:[#allocation16_spill] sm:$0xff] %v12065_v9  ;;  %15518 = vst [vmem:[#allocation24_spill] sm:$0xff] %v12068_v55  ;;  %v12078_v18 = vsel %vm3654_vm2, inf, %v15516_v29  ;;  %v3925_v56 = vmin.f32 %v3923_v5, %v12065_v9  ;;  %v3926_v36 = vmin.f32 %v3924_v3, %v12068_v55  ;;  %v3888_v24 = vmin.f32 %v3886_v57, %v12075_v50  ;;  %v15526_v29 = vld [vmem:[#allocation15_spill] sm:$0xff]  ;;  %v15527_v3 = vld [vmem:[#allocation52_spill] sm:$0xff] }
 0x560   : > { %vm12070_vm0 = vmpackc.low %vm3655_vm10, %vm3653_vm4  ;;  %15521 = vst [vmem:[#allocation34_spill] sm:$0xff] %v12075_v50  ;;  %v3889_v17 = vmin.f32 %v3887_v62, %v12078_v18  ;;  %5795 = vmatpush1.bf16.msk.msra.mxu1 %vm11958_vm6, %v14534_v51  ;;  %vm3657_vm15 = vcmp.eq.f32.partialorder %v15525_v19, %v11696_v59  ;;  %vm3659_vm14 = vcmp.eq.f32.partialorder %v15526_v29, %v11696_v59  ;;  %v15528_v5 = vld [vmem:[#allocation6_spill] sm:$0xff] }
 0x561   : > { %15522 = vst [vmem:[#allocation45_spill] sm:$0xff] %v12078_v18  ;;  %vm12084_vm1 = vmpackc.low %vm3654_vm2, %vm3652_vm7  ;;  %vm3656_vm9 = vcmp.eq.f32.partialorder %v15527_v3, %v11666_v26  ;;  %vm3658_vm12 = vcmp.eq.f32.partialorder %v15528_v5, %v11666_v26  ;;  %5797 = vmatprep.subr.msk.bf16.mxu1 %vm11985_vm11, %v14534_v51  ;;  %v12103_v62 = vsel %vm3657_vm15, inf, %v15525_v19  ;;  %v12106_v2 = vsel %vm3659_vm14, inf, %v15526_v29 }
 0x562   : > { %15529 = vst [vmem:[#allocation61_spill] sm:$0xff] %v12103_v62  ;;  %15530 = vst [vmem:[#allocation15_spill] sm:$0xff] %v12106_v2  ;;  %v12113_v18 = vsel %vm3656_vm9, inf, %v15527_v3  ;;  %v12116_v50 = vsel %vm3658_vm12, inf, %v15528_v5  ;;  %v12119_v55 = vmin.f32 %v3925_v56, %v12103_v62  ;;  %v12122_v52 = vmin.f32 %v3926_v36, %v12106_v2  ;;  %v15537_v3 = vld [vmem:[#allocation35_spill] sm:$0xff]  ;;  %v15538_v5 = vld [vmem:[#allocation60_spill] sm:$0xff] }
 0x563   : > { %vm12108_vm6 = vmpackc.low %vm3659_vm14, %vm3657_vm15  ;;  %15533 = vst [vmem:[#allocation52_spill] sm:$0xff] %v12113_v18  ;;  %v3890_v19 = vmin.f32 %v3888_v24, %v12113_v18  ;;  %v3891_v29 = vmin.f32 %v3889_v17, %v12116_v50  ;;  %vm3661_vm8 = vcmp.eq.f32.partialorder %v15537_v3, %v11696_v59  ;;  %vm3663_vm4 = vcmp.eq.f32.partialorder %v15538_v5, %v11696_v59  ;;  %v12140_v36 = vpop.f32.mrb[57].mxu1 }
 0x564   : > { %15534 = vst [vmem:[#allocation6_spill] sm:$0xff] %v12116_v50  ;;  %vm12126_vm11 = vmpackc.low %vm3658_vm12, %vm3656_vm9  ;;  %vm14234_vm10 = vcmp.eq.f32.partialorder %v11472_v33, %v11666_v26  ;;  %vm14233_vm7 = vcmp.eq.f32.partialorder %v11486_v41, %v11666_v26  ;;  %5799 = vmatpush1.bf16.msk.msra.mxu1 %vm12002_vm5, %v14534_v51  ;;  %v12146_v17 = vsel %vm3661_vm8, inf, %v15537_v3  ;;  %v12149_v56 = vsel %vm3663_vm4, inf, %v15538_v5  ;;  %v12159_v50 = vpop.f32.mrb[58].mxu1  ;;  %v15543_v5 = vld [vmem:[#allocation50_spill] sm:$0xff] }
 0x565   : > { %15539 = vst [vmem:[#allocation35_spill] sm:$0xff] %v12146_v17  ;;  %15540 = vst [vmem:[#allocation60_spill] sm:$0xff] %v12149_v56  ;;  %vm3664_vm15 = vcmp.eq.f32.partialorder %v11493_v37, %v11666_v26  ;;  %5801 = vmatprep.subr.msk.bf16.mxu1 %vm12028_vm13, %v14534_v51  ;;  %v3929_v48 = vmin.f32 %v12119_v55, %v12146_v17  ;;  %v3930_v3 = vmin.f32 %v12122_v52, %v12149_v56  ;;  %v12182_v55 = vpop.f32.mrb[59].mxu1 }
 0x566   : > { %vm12151_vm2 = vmpackc.low %vm3663_vm4, %vm3661_vm8  ;;  %vm3668_vm5 = vcmp.eq.f32.partialorder %v11499_v45, %v11666_v26  ;;  %vm3670_vm9 = vcmp.eq.f32.partialorder %v15543_v5, %v11666_v26  ;;  %vm3674_vm8 = vcmp.eq.f32.partialorder %v11515_v20, %v11666_v26  ;;  %vm3676_vm4 = vcmp.eq.f32.partialorder %v11521_v14, %v11666_v26 }
 0x567   : > { %vm12178_vm12 = vmpackc.low %vm14233_vm7, %vm14234_vm10  ;;  %vm15546_vm7 = vcmp.eq.f32.partialorder %v11496_v0, %v11666_v26  ;;  %vm15549_vm13 = vcmp.eq.f32.partialorder %v11472_v33, %v11666_v26  ;;  %vm15551_vm14 = vcmp.eq.f32.partialorder %v11486_v41, %v11666_v26  ;;  %v12218_v18 = vsel %vm3664_vm15, inf, %v11493_v37 }
 0x568   : > { %vm12198_vm10 = vmpackc.low %vm15546_vm7, %vm3664_vm15  ;;  %v12206_v56 = vsel %vm15549_vm13, inf, %v11472_v33  ;;  %v12212_v17 = vsel %vm15551_vm14, inf, %v11486_v41  ;;  %v12224_v2 = vsel %vm15546_vm7, inf, %v11496_v0  ;;  %v15553_v33 = vmov 0  ;;  %5803 = vmatpush1.bf16.msk.msra.mxu1 %vm12045_vm3, %v14534_v51 }
 0x569   : > { %15550 = vst [vmem:[#allocation50_spill] sm:$0xff] %v12206_v56  ;;  %15552 = vst [vmem:[#allocation62_spill] sm:$0xff] %v12212_v17  ;;  %v12234_v41 = vsel %vm3668_vm5, inf, %v11499_v45  ;;  %v12237_v37 = vsel %vm3670_vm9, inf, %v15543_v5  ;;  %vm15555_vm15 = vcmp.eq.f32.partialorder %v11512_v11, %v11666_v26  ;;  %v12246_v62 = vsel %vm3674_vm8, inf, %v11515_v20  ;;  %5805 = vmatprep.subr.msk.bf16.mxu1 %vm12070_vm0, %v14534_v51 }
 0x56a   : > { %vm12226_vm13 = vmpackc.low %vm3670_vm9, %vm3668_vm5  ;;  %v12243_v0 = vsel %vm15555_vm15, inf, %v11512_v11  ;;  %v12262_v45 = vsel %vm3676_vm4, inf, %v11521_v14  ;;  %vm15559_vm3 = vcmp.eq.f32.partialorder %v11527_v23, %v11666_v26  ;;  %v3892_v11 = vmin.f32 %v3890_v19, %v12206_v56  ;;  %v15564_v26 = vld [vmem:[#allocation8_spill] sm:$0xff]  ;;  %v15565_v19 = vld [vmem:[#allocation10_spill] sm:$0xff] }
 0x56b   : > { %v15554_v33 = vsel %vm12226_vm13, 4294967295, %v15553_v33  ;;  %vm15556_vm14 = vmmov %vm15555_vm15  ;;  %v12268_v20 = vsel %vm15559_vm3, inf, %v11527_v23  ;;  %v3893_v5 = vmin.f32 %v3891_v29, %v12212_v17  ;;  %vm3665_vm9 = vcmp.eq.f32.partialorder %v11568_v49, %v11696_v59  ;;  %v15568_v17 = vld [vmem:[#allocation56_spill] sm:$0xff] }
 0x56c   : > { %vm12251_vm7 = vmpackc.low %vm3674_vm8, %vm15556_vm14  ;;  %vm3667_vm8 = vcmp.eq.f32.partialorder %v15563_v1, %v11696_v59  ;;  %v3894_v14 = vmin.f32 %v3892_v11, %v12218_v18  ;;  %5807 = vmatpush1.bf16.msk.msra.mxu1 %vm12084_vm1, %v14534_v51  ;;  %vm3677_vm14 = vcmp.eq.f32.partialorder %v15568_v17, %v11696_v59  ;;  %v15569_v11 = vld [vmem:[#allocation18_spill] sm:$0xff] }
 0x56d   : > { %v15558_v43 = vsel %vm12251_vm7, 4294967295, %v15557_v43  ;;  %vm15560_vm0 = vmmov %vm15559_vm3  ;;  %v3895_v23 = vmin.f32 %v3893_v5, %v12224_v2  ;;  %vm3675_vm3 = vcmp.eq.f32.partialorder %v15565_v19, %v11696_v59  ;;  %vm3679_vm15 = vcmp.eq.f32.partialorder %v15569_v11, %v11696_v59  ;;  %5809 = vmatprep.subr.msk.bf16.mxu1 %vm12108_vm6, %v14534_v51 }
 0x56e   : > { %vm12278_vm5 = vmpackc.low %vm15560_vm0, %vm3676_vm4  ;;  %vm3673_vm4 = vcmp.eq.f32.partialorder %v15564_v26, %v11696_v59  ;;  %v12308_v5 = vsel %vm3665_vm9, inf, %v11568_v49  ;;  %v12311_v56 = vsel %vm3667_vm8, inf, %v15563_v1  ;;  %vm15571_vm7 = vcmp.eq.f32.partialorder %v11577_v44, %v11696_v59 }
 0x56f   : > { %v15562_v22 = vsel %vm12278_vm5, 4294967295, %v15561_v22  ;;  %vm12296_vm0 = vmpackc.low %vm3667_vm8, %vm3665_vm9  ;;  %vm15570_vm5 = vcmp.eq.f32.partialorder %v11574_v6, %v11696_v59  ;;  %v3896_v49 = vmin.f32 %v3894_v14, %v12234_v41  ;;  %v3897_v28 = vmin.f32 %v3895_v23, %v12237_v37 }
 0x570   : > { %vm12319_vm13 = vmpackc.low %vm15571_vm7, %vm15570_vm5  ;;  %v12338_v16 = vsel %vm15571_vm7, inf, %v11577_v44  ;;  %v12345_v57 = vsel %vm3673_vm4, inf, %v15564_v26  ;;  %v12348_v14 = vsel %vm3675_vm3, inf, %v15565_v19  ;;  %v12357_v23 = vsel %vm3679_vm15, inf, %v15569_v11  ;;  %5811 = vmatpush1.bf16.msk.msra.mxu1 %vm12126_vm11, %v14534_v51 }
 0x571   : > { %vm15574_vm1 = vmmov %vm15570_vm5  ;;  %v3898_v26 = vmin.f32 %v3896_v49, %v12243_v0  ;;  %v3899_v19 = vmin.f32 %v3897_v28, %v12246_v62  ;;  %v3931_v58 = vmin.f32 %v3929_v48, %v12308_v5  ;;  %v3932_v40 = vmin.f32 %v3930_v3, %v12311_v56  ;;  %5813 = vmatprep.subr.msk.bf16.mxu1 %vm12151_vm2, %v14534_v51 }
 0x572   : > { %v12332_v1 = vsel %vm15574_vm1, inf, %v11574_v6  ;;  %vm12340_vm5 = vmpackc.low %vm3675_vm3, %vm3673_vm4  ;;  %v12354_v6 = vsel %vm3677_vm14, inf, %v15568_v17  ;;  %vm15579_vm11 = vnez %v15554_v33  ;;  %vm15592_vm1 = vnez %v15562_v22 }
 0x573   : > { %vm12362_vm6 = vmpackc.low %vm3679_vm15, %vm3677_vm14  ;;  %v3900_v48 = vmin.f32 %v3898_v26, %v12262_v45  ;;  %v3901_v9 = vmin.f32 %v3899_v19, %v12268_v20  ;;  %v3933_v3 = vmin.f32 %v3931_v58, %v12332_v1  ;;  %v3934_v49 = vmin.f32 %v3932_v40, %v12338_v16 }
 0x574   : > { %5815 = vmatpush1.bf16.msk.msra.mxu1 %vm12178_vm12, %v14534_v51 }
 0x575   : > { %v3902_v11 = vmin.f32 %v3900_v48, %v3901_v9  ;;  %v3935_v26 = vmin.f32 %v3933_v3, %v12345_v57  ;;  %v3936_v19 = vmin.f32 %v3934_v49, %v12348_v14  ;;  %5817 = vmatprep.subr.msk.bf16.mxu1 %vm12296_vm0, %v14534_v51 }
 0x577   : > { %v3903_v40 = vrot.slane %v3902_v11, 4  ;;  %v3937_v58 = vmin.f32 %v3935_v26, %v12354_v6  ;;  %v3938_v17 = vmin.f32 %v3936_v19, %v12357_v23  ;;  %v15664_v19 = vld [vmem:[#allocation38_spill] sm:$0xff] }
 0x578   : > { %5819 = vmatpush1.bf16.msk.msra.mxu1 %vm12198_vm10, %v14534_v51  ;;  %vm15580_vm10 = vnez %v15558_v43 }
 0x579   : > { %v3904_v28 = vmin.f32 %v3902_v11, %v3903_v40  ;;  %v3939_v24 = vmin.f32 %v3937_v58, %v3938_v17  ;;  %5821 = vmatprep.subr.msk.bf16.mxu1 %vm12319_vm13, %v14534_v51 }
 0x57b   : > { %v3905_v48 = vrot.slane %v3904_v28, 2  ;;  %v3940_v9 = vrot.slane %v3939_v24, 4 }
 0x57c   : > { %5823 = vmatpush1.bf16.msk.msra.mxu1 %vm15579_vm11, %v14534_v51 }
 0x57d   : > { %v3906_v30 = vmin.f32 %v3904_v28, %v3905_v48  ;;  %v3941_v3 = vmin.f32 %v3939_v24, %v3940_v9  ;;  %5825 = vmatprep.subr.msk.bf16.mxu1 %vm12340_vm5, %v14534_v51 }
 0x57f   : > { %v3907_v29 = vrot.slane %v3906_v30, 1  ;;  %v3942_v49 = vrot.slane %v3941_v3, 2 }
 0x580   : > { %5827 = vmatpush1.bf16.msk.msra.mxu1 %vm15580_vm10, %v14534_v51 }
 0x581   : > { %v12418_v52 = vmin.f32 %v3906_v30, %v3907_v29  ;;  %v3943_v11 = vmin.f32 %v3941_v3, %v3942_v49  ;;  %5829 = vmatprep.subr.msk.bf16.mxu1 %vm12362_vm6, %v14534_v51 }
 0x583   : > { %vm3994_vm2 = vcmp.eq.f32.partialorder %v12218_v18, %v12418_v52  ;;  %vm3996_vm12 = vcmp.eq.f32.partialorder %v12224_v2, %v12418_v52  ;;  %vm3998_vm13 = vcmp.eq.f32.partialorder %v12234_v41, %v12418_v52  ;;  %vm4000_vm9 = vcmp.eq.f32.partialorder %v12237_v37, %v12418_v52 }
 0x584   : > { %vm4002_vm8 = vcmp.eq.f32.partialorder %v12243_v0, %v12418_v52  ;;  %vm4004_vm15 = vcmp.eq.f32.partialorder %v12246_v62, %v12418_v52  ;;  %vm4006_vm14 = vcmp.eq.f32.partialorder %v12262_v45, %v12418_v52  ;;  %vm4008_vm4 = vcmp.eq.f32.partialorder %v12268_v20, %v12418_v52  ;;  %vm12442_vm3 = vmpackc.low %vm3996_vm12, %vm3994_vm2  ;;  %5831 = vmatpush1.bf16.msk.msra.mxu1 %vm15592_vm1, %v14534_v51 }
 0x585   : > { %v12447_v33 = vsel %vm3994_vm2, inf, %v12218_v18  ;;  %v12450_v43 = vsel %vm3996_vm12, inf, %v12224_v2  ;;  %v12453_v12 = vsel %vm3998_vm13, inf, %v12234_v41  ;;  %v12456_v44 = vsel %vm4000_vm9, inf, %v12237_v37  ;;  %vm12458_vm0 = vmpackc.low %vm4000_vm9, %vm3998_vm13 }
 0x586   : > { %15583 = vst [vmem:[#allocation46_spill] sm:$0xff] %v12447_v33  ;;  %15584 = vst [vmem:[#allocation8_spill] sm:$0xff] %v12450_v43  ;;  %v4202_v28 = vmin.f32 %v12450_v43, %v12447_v33  ;;  %v12468_v18 = vsel %vm4002_vm8, inf, %v12243_v0  ;;  %v12471_v2 = vsel %vm4004_vm15, inf, %v12246_v62  ;;  %v12477_v41 = vsel %vm4006_vm14, inf, %v12262_v45 }
 0x587   : > { %15585 = vst [vmem:[#allocation10_spill] sm:$0xff] %v12453_v12  ;;  %15586 = vst [vmem:[#allocation56_spill] sm:$0xff] %v12456_v44  ;;  %v12493_v62 = vsel %vm4008_vm4, inf, %v12268_v20  ;;  %v3944_v24 = vrot.slane %v3943_v11, 1  ;;  %vm14260_vm5 = vcmp.eq.f32.partialorder %v11699_v21, %v12418_v52  ;;  %vm14259_vm6 = vcmp.eq.f32.partialorder %v11702_v39, %v12418_v52  ;;  %5022 = vmatmul.mubr.bf16.vlgmr.msra.gmra.mrb[68].mxu1 %v15367_v34 }
 0x588   : > { %15589 = vst [vmem:[#allocation18_spill] sm:$0xff] %v12468_v18  ;;  %15590 = vst [vmem:[#allocation63_spill] sm:$0xff] %v12471_v2  ;;  %v15596_v0 = vmov 0  ;;  %v4203_v22 = vmin.f32 %v12453_v12, %v4202_v28  ;;  %vm3950_vm10 = vcmp.eq.f32.partialorder %v11709_v61, %v12418_v52  ;;  %vm3952_vm2 = vcmp.eq.f32.partialorder %v11712_v54, %v12418_v52  ;;  %5031 = vmatprep.mubr.bf16.mxu1 %v15372_v38 }
 0x589   : > { %15591 = vst [vmem:[#allocation64_spill] sm:$0xff] %v12477_v41  ;;  %vm12485_vm7 = vmpackc.low %vm4004_vm15, %vm4002_vm8  ;;  %vm3954_vm12 = vcmp.eq.f32.partialorder %v11771_v31, %v12418_v52  ;;  %v12516_v26 = vmin.f32 %v3943_v11, %v3944_v24  ;;  %v12519_v45 = vsel %vm3950_vm10, inf, %v11709_v61  ;;  %v12522_v20 = vsel %vm3952_vm2, inf, %v11712_v54  ;;  %v15619_v24 = vld [vmem:[#allocation14_spill] sm:$0xff] }
 0x58a   : > { %15595 = vst [vmem:[#allocation65_spill] sm:$0xff] %v12493_v62  ;;  %vm12505_vm11 = vmpackc.low %vm4008_vm4, %vm4006_vm14  ;;  %vm3956_vm9 = vcmp.eq.f32.partialorder %v11777_v8, %v12418_v52  ;;  %v4204_v40 = vmin.f32 %v12456_v44, %v4203_v22  ;;  %v12533_v58 = vsel %vm3954_vm12, inf, %v11771_v31  ;;  %v15620_v22 = vld [vmem:[#allocation47_spill] sm:$0xff]  ;;  %v15769_v37 = vmov 0  }
 0x58b   : > { %v15597_v0 = vsel %vm12505_vm11, 4294967295, %v15596_v0  ;;  %vm12524_vm13 = vmpackc.low %vm3952_vm2, %vm3950_vm10  ;;  %v12536_v61 = vsel %vm3956_vm9, inf, %v11777_v8  ;;  %vm3999_vm14 = vcmp.eq.f32.partialorder %v12332_v1, %v12516_v26  ;;  %vm4001_vm4 = vcmp.eq.f32.partialorder %v12338_v16, %v12516_v26 }
 0x58c   : > { %vm12538_vm8 = vmpackc.low %vm3956_vm9, %vm3954_vm12  ;;  %vm4003_vm1 = vcmp.eq.f32.partialorder %v12345_v57, %v12516_v26  ;;  %vm4005_vm10 = vcmp.eq.f32.partialorder %v12348_v14, %v12516_v26  ;;  %v4205_v31 = vmin.f32 %v12468_v18, %v4204_v40  ;;  %vm4007_vm2 = vcmp.eq.f32.partialorder %v12354_v6, %v12516_v26 }
 0x58d   : > { %vm4009_vm12 = vcmp.eq.f32.partialorder %v12357_v23, %v12516_v26  ;;  %v12559_v8 = vsel %vm3999_vm14, inf, %v12332_v1  ;;  %vm12561_vm9 = vmpackc.low %vm4001_vm4, %vm3999_vm14  ;;  %v12566_v9 = vsel %vm4001_vm4, inf, %v12338_v16  ;;  %v12569_v30 = vsel %vm4003_vm1, inf, %v12345_v57  ;;  %v15612_v57 = vld [vmem:[#allocation19_spill] sm:$0xff] }
 0x58e   : > { %15602 = vst [vmem:[#allocation66_spill] sm:$0xff] %v12559_v8  ;;  %15605 = vst [vmem:[#allocation67_spill] sm:$0xff] %v12566_v9  ;;  %v12572_v3 = vsel %vm4005_vm10, inf, %v12348_v14  ;;  %v12575_v29 = vsel %vm4007_vm2, inf, %v12354_v6  ;;  %v4206_v1 = vmin.f32 %v12471_v2, %v4205_v31  ;;  %v4239_v11 = vmin.f32 %v12566_v9, %v12559_v8  ;;  %v15615_v6 = vld [vmem:[#allocation13_spill] sm:$0xff] }
 0x58f   : > { %15606 = vst [vmem:[#allocation68_spill] sm:$0xff] %v12569_v30  ;;  %15607 = vst [vmem:[#allocation69_spill] sm:$0xff] %v12572_v3  ;;  %v12585_v16 = vsel %vm4009_vm12, inf, %v12357_v23  ;;  %v15613_v14 = vmov 0  ;;  %v15618_v23 = vld [vmem:[#allocation42_spill] sm:$0xff] }
 0x590   : > { %15608 = vst [vmem:[#allocation70_spill] sm:$0xff] %v12575_v29  ;;  %vm12577_vm15 = vmpackc.low %vm4005_vm10, %vm4003_vm1  ;;  %vm3951_vm14 = vcmp.eq.f32.partialorder %v15618_v23, %v12516_v26  ;;  %v4207_v40 = vmin.f32 %v12477_v41, %v4206_v1  ;;  %v4240_v31 = vmin.f32 %v12569_v30, %v4239_v11  ;;  %vm15621_vm1 = vcmp.eq.f32.partialorder %v15612_v57, %v12516_v26  ;;  %v15625_v1 = vld [vmem:[#allocation25_spill] sm:$0xff] }
 0x591   : > { %15611 = vst [vmem:[#allocation71_spill] sm:$0xff] %v12585_v16  ;;  %vm12589_vm4 = vmpackc.low %vm4009_vm12, %vm4007_vm2  ;;  %vm3953_vm2 = vcmp.eq.f32.partialorder %v15619_v24, %v12516_v26  ;;  %v12620_v59 = vsel %vm3951_vm14, inf, %v15618_v23  ;;  %vm3957_vm11 = vcmp.eq.f32.partialorder %v15625_v1, %v12516_v26  ;;  %v15628_v41 = vld [vmem:[#allocation49_spill] sm:$0xff]  ;;  %v15629_v23 = vld [vmem:[#allocation51_spill] sm:$0xff] }
 0x592   : > { %v15614_v14 = vsel %vm12589_vm4, 4294967295, %v15613_v14  ;;  %vm12601_vm10 = vmpackc.low %vm14259_vm6, %vm14260_vm5  ;;  %vm15622_vm6 = vcmp.eq.f32.partialorder %v15615_v6, %v12516_v26  ;;  %15623 = vst [vmem:[#allocation19_spill] sm:$0xff] %v12620_v59  ;;  %v12623_v2 = vsel %vm3953_vm2, inf, %v15619_v24  ;;  %vm15626_vm4 = vcmp.eq.f32.partialorder %v15620_v22, %v12516_v26  ;;  %v15630_v24 = vld [vmem:[#allocation48_spill] sm:$0xff] }
 0x593   : > { %vm5832_vm5 = vmpackc.low %vm15622_vm6, %vm15621_vm1  ;;  %15624 = vst [vmem:[#allocation13_spill] sm:$0xff] %v12623_v2  ;;  %v12632_v11 = vsel %vm15626_vm4, inf, %v15620_v22  ;;  %vm3959_vm6 = vcmp.eq.f32.partialorder %v15628_v41, %v12516_v26  ;;  %vm3961_vm1 = vcmp.eq.f32.partialorder %v15629_v23, %v12516_v26  ;;  %5032 = vmatmul.mubr.bf16.gmra.mrb[72].mxu1 %v15630_v24  ;;  %v4208_v18 = vmin.f32 %v12493_v62, %v4207_v40  ;;  %v15636_v40 = vld [vmem:[#allocation53_spill] sm:$0xff] }
 0x594   : > { %5833 = vmatprep.subr.msk.bf16.mxu0 %vm5832_vm5, %v14534_v51  ;;  %vm5836_vm12 = vmpackc.low %vm3953_vm2, %vm3951_vm14  ;;  %15627 = vst [vmem:[#allocation42_spill] sm:$0xff] %v12632_v11  ;;  %v4241_v30 = vmin.f32 %v12572_v3, %v4240_v31  ;;  %v12645_v44 = vsel %vm3957_vm11, inf, %v15625_v1  ;;  %v12655_v9 = vsel %vm3959_vm6, inf, %v15628_v41  ;;  %5127 = vmatprep.mubr.bf16.mxu1 %v15636_v40  ;;  %v12660_v28 = vsel %vm3961_vm1, inf, %v15629_v23  ;;  %v15640_v22 = vld [vmem:[#allocation17_spill] sm:$0xff]  ;;  %v15642_v1 = vld [vmem:[#allocation43_spill] sm:$0xff] }
 0x595   : > { %5835 = vmatpush1.bf16.msk.msra.mxu0 %vm12601_vm10, %v14534_v51  ;;  %15631 = vst [vmem:[#allocation14_spill] sm:$0xff] %v12645_v44  ;;  %vm15632_vm5 = vmmov %vm15626_vm4  ;;  %vm15641_vm10 = vcmp.eq.f32.partialorder %v11819_v27, %v12418_v52  ;;  %vm3963_vm2 = vcmp.eq.f32.partialorder %v15642_v1, %v12516_v26  ;;  %v4209_v23 = vmin.f32 %v12519_v45, %v4208_v18  ;;  %v15646_v3 = vld [vmem:[#allocation58_spill] sm:$0xff]  ;;  %v15657_v31 = vld [vmem:[#allocation33_spill] sm:$0xff] }
 0x596   : > { %vm12650_vm14 = vmpackc.low %vm3957_vm11, %vm15632_vm5  ;;  %15635 = vst [vmem:[#allocation47_spill] sm:$0xff] %v12655_v9  ;;  %5837 = vmatprep.subr.msk.bf16.mxu0 %vm5836_vm12, %v14534_v51  ;;  %vm3960_vm11 = vcmp.eq.f32.partialorder %v15640_v22, %v12418_v52  ;;  %v12672_v41 = vsel %vm15641_vm10, inf, %v11819_v27  ;;  %v4242_v40 = vmin.f32 %v12575_v29, %v4241_v30  ;;  %v12691_v8 = vsel %vm3963_vm2, inf, %v15642_v1  ;;  %v15651_v1 = vld [vmem:[#allocation12_spill] sm:$0xff]  ;;  %v15659_v18 = vld [vmem:[#allocation54_spill] sm:$0xff] }
 0x597   : > { %15637 = vst [vmem:[#allocation25_spill] sm:$0xff] %v12660_v28  ;;  %vm12662_vm4 = vmpackc.low %vm3961_vm1, %vm3959_vm6  ;;  %vm3965_vm1 = vcmp.eq.f32.partialorder %v15646_v3, %v12516_v26  ;;  %v4210_v29 = vmin.f32 %v12522_v20, %v4209_v23 }
 0x598   : > { %vm15643_vm12 = vmmov %vm15641_vm10  ;;  %15647 = vst [vmem:[#allocation49_spill] sm:$0xff] %v12691_v8  ;;  %v12694_v30 = vsel %vm3965_vm1, inf, %v15646_v3  ;;  %v4243_v27 = vmin.f32 %v12585_v16, %v4242_v40  ;;  %vm3967_vm10 = vcmp.eq.f32.partialorder %v15651_v1, %v12516_v26  ;;  %v15652_v3 = vld [vmem:[#allocation28_spill] sm:$0xff] }
 0x599   : > { %vm12684_vm6 = vmpackc.low %vm3960_vm11, %vm15643_vm12  ;;  %15648 = vst [vmem:[#allocation51_spill] sm:$0xff] %v12694_v30  ;;  %5839 = vmatpush1.bf16.msk.msra.mxu0 %vm12524_vm13, %v14534_v51  ;;  %v4211_v40 = vmin.f32 %v12533_v58, %v4210_v29  ;;  %v12715_v23 = vsel %vm3967_vm10, inf, %v15651_v1  ;;  %v15656_v1 = vld [vmem:[#allocation59_spill] sm:$0xff]  ;;  %vm3968_vm12 = vcmp.eq.f32.partialorder %v15659_v18, %v12418_v52 }
 0x59a   : > { %vm12696_vm5 = vmpackc.low %vm3965_vm1, %vm3963_vm2  ;;  %5841 = vmatprep.subr.msk.bf16.mxu0 %vm12650_vm14, %v14534_v51  ;;  %vm3969_vm2 = vcmp.eq.f32.partialorder %v15652_v3, %v12516_v26  ;;  %v4244_v43 = vmin.f32 %v12620_v59, %v4243_v27  ;;  %15653 = vst [vmem:[#allocation53_spill] sm:$0xff] %v12715_v23  ;;  %vm3962_vm14 = vcmp.eq.f32.partialorder %v15656_v1, %v12418_v52  ;;  %v12787_v24 = vsel %vm3968_vm12, inf, %v15659_v18 }
 0x59b   : > { %vm12720_vm13 = vmpackc.low %vm3969_vm2, %vm3967_vm10  ;;  %v4212_v16 = vmin.f32 %v12536_v61, %v4211_v40  ;;  %vm3972_vm10 = vcmp.eq.f32.partialorder %v15664_v19, %v12418_v52  ;;  %15665 = vst [vmem:[#allocation43_spill] sm:$0xff] %v12787_v24 }
 0x59c   : > { %v4245_v12 = vmin.f32 %v12623_v2, %v4244_v43  ;;  %v12740_v43 = vsel %vm3960_vm11, inf, %v15640_v22 }
 0x59d   : > { %5843 = vmatpush1.bf16.msk.msra.mxu0 %vm12538_vm8, %v14534_v51  ;;  %v4213_v27 = vmin.f32 %v12672_v41, %v4212_v16  ;;  %vm3964_vm8 = vcmp.eq.f32.partialorder %v15657_v31, %v12418_v52  ;;  %v12753_v16 = vsel %vm3962_vm14, inf, %v15656_v1 }
 0x59e   : > { %5845 = vmatprep.subr.msk.bf16.mxu0 %vm12662_vm4, %v14534_v51  ;;  %v4246_v29 = vmin.f32 %v12632_v11, %v4245_v12  ;;  %v12760_v62 = vsel %vm3964_vm8, inf, %v15657_v31  ;;  %vm5850_vm11 = vmpackc.low %vm3964_vm8, %vm3962_vm14 }
 0x59f   : > { %v4214_v40 = vmin.f32 %v12740_v43, %v4213_v27 }
 0x5a0   : > { %v4247_v54 = vmin.f32 %v12645_v44, %v4246_v29  ;;  %v15658_v29 = vld [vmem:[#allocation44_spill] sm:$0xff] }
 0x5a1   : > { %5847 = vmatpush1.bf16.msk.msra.mxu0 %vm12684_vm6, %v14534_v51  ;;  %v4215_v12 = vmin.f32 %v12753_v16, %v4214_v40  ;;  %vm3966_vm4 = vcmp.eq.f32.partialorder %v15658_v29, %v12418_v52  ;;  %v15662_v40 = vld [vmem:[#allocation23_spill] sm:$0xff] }
 0x5a2   : > { %5849 = vmatprep.subr.msk.bf16.mxu0 %vm12696_vm5, %v14534_v51  ;;  %v4248_v22 = vmin.f32 %v12655_v9, %v4247_v54  ;;  %v12774_v1 = vsel %vm3966_vm4, inf, %v15658_v29  ;;  %v15661_v54 = vld [vmem:[#allocation22_spill] sm:$0xff]  ;;  %vm14284_vm1 = vcmp.eq.f32.partialorder %v15662_v40, %v12516_v26 }
 0x5a3   : > { %v4216_v33 = vmin.f32 %v12760_v62, %v4215_v12  ;;  %15660 = vst [vmem:[#allocation17_spill] sm:$0xff] %v12774_v1  ;;  %vm3971_vm6 = vcmp.eq.f32.partialorder %v15661_v54, %v12516_v26  ;;  %v15663_v12 = vld [vmem:[#allocation32_spill] sm:$0xff] }
 0x5a4   : > { %v4249_v27 = vmin.f32 %v12660_v28, %v4248_v22  ;;  %vm3970_vm5 = vcmp.eq.f32.partialorder %v15663_v12, %v12418_v52  ;;  %v15666_v28 = vld [vmem:[#allocation57_spill] sm:$0xff]  ;;  %v12865_v59 = vsel %vm3971_vm6, inf, %v15661_v54  ;;  %v15683_v54 = vld [vmem:[#allocation55_spill] sm:$0xff] }
 0x5a5   : > { %5851 = vmatpush1.bf16.msk.msra.mxu0 %vm5850_vm11, %v14534_v51  ;;  %v4217_v22 = vmin.f32 %v12774_v1, %v4216_v33  ;;  %vm3975_vm14 = vcmp.eq.f32.partialorder %v15666_v28, %v12516_v26  ;;  %v12813_v29 = vsel %vm3970_vm5, inf, %v15663_v12  ;;  %v15673_v12 = vld [vmem:[#allocation36_spill] sm:$0xff]  ;;  %15679 = vst [vmem:[#allocation59_spill] sm:$0xff] %v12865_v59 }
 0x5a6   : > { %5853 = vmatprep.subr.msk.bf16.mxu0 %vm12720_vm13, %v14534_v51  ;;  %v4250_v31 = vmin.f32 %v12691_v8, %v4249_v27  ;;  %vm5854_vm13 = vmpackc.low %vm3968_vm12, %vm3966_vm4  ;;  %v15667_v27 = vld [vmem:[#allocation11_spill] sm:$0xff]  ;;  %v12801_v8 = vsel %vm3969_vm2, inf, %v15652_v3  ;;  %15669 = vst [vmem:[#allocation12_spill] sm:$0xff] %v12813_v29  ;;  %v15671_v3 = vld [vmem:[#allocation50_spill] sm:$0xff] }
 0x5a7   : > { %vm14285_vm8 = vcmp.eq.f32.partialorder %v15667_v27, %v12516_v26  ;;  %15668 = vst [vmem:[#allocation58_spill] sm:$0xff] %v12801_v8  ;;  %v4218_v18 = vmin.f32 %v12787_v24, %v4217_v22  ;;  %vm5856_vm4 = vmpackc.low %vm14284_vm1, %vm3971_vm6  ;;  %vm3990_vm11 = vcmp.eq.f32.partialorder %v15671_v3, %v12418_v52  ;;  %v15672_v22 = vld [vmem:[#allocation62_spill] sm:$0xff]  ;;  %vm3995_vm1 = vcmp.eq.f32.partialorder %v12308_v5, %v12516_v26 }
 0x5a8   : > { %v4251_v33 = vmin.f32 %v12694_v30, %v4250_v31  ;;  %v12816_v31 = vsel %vm3972_vm10, inf, %v15664_v19  ;;  %vm5858_vm2 = vmpackc.low %vm3972_vm10, %vm3970_vm5  ;;  %vm3992_vm12 = vcmp.eq.f32.partialorder %v15672_v22, %v12418_v52  ;;  %vm3974_vm5 = vcmp.eq.f32.partialorder %v15673_v12, %v12418_v52  ;;  %v15674_v19 = vld [vmem:[#allocation41_spill] sm:$0xff] }
 0x5a9   : > { %5855 = vmatpush1.bf16.msk.msra.mxu0 %vm5854_vm13, %v14534_v51  ;;  %15670 = vst [vmem:[#allocation28_spill] sm:$0xff] %v12816_v31  ;;  %v4219_v9 = vmin.f32 %v12813_v29, %v4218_v18  ;;  %vm5860_vm13 = vmpackc.low %vm14285_vm8, %vm3975_vm14  ;;  %vm3976_vm10 = vcmp.eq.f32.partialorder %v15674_v19, %v12418_v52  ;;  %v12835_v44 = vsel %vm3990_vm11, inf, %v15671_v3  ;;  %vm3997_vm8 = vcmp.eq.f32.partialorder %v12311_v56, %v12516_v26 }
 0x5aa   : > { %5857 = vmatprep.subr.msk.bf16.mxu0 %vm5856_vm4, %v14534_v51  ;;  %v4252_v30 = vmin.f32 %v12715_v23, %v4251_v33  ;;  %v12838_v33 = vsel %vm3992_vm12, inf, %v15672_v22  ;;  %vm12840_vm4 = vmpackc.low %vm3992_vm12, %vm3990_vm11  ;;  %v12852_v3 = vsel %vm3995_vm1, inf, %v12308_v5  ;;  %v12855_v22 = vsel %vm3997_vm8, inf, %v12311_v56  ;;  %v15681_v56 = vld [vmem:[#allocation9_spill] sm:$0xff] }
 0x5ab   : > { %v4220_v11 = vmin.f32 %v12816_v31, %v4219_v9  ;;  %vm12857_vm11 = vmpackc.low %vm3997_vm8, %vm3995_vm1  ;;  %v12872_v5 = vsel %vm3974_vm5, inf, %v15673_v12  ;;  %vm3979_vm1 = vcmp.eq.f32.partialorder %v15681_v56, %v12516_v26  ;;  %v15682_v9 = vld [vmem:[#allocation26_spill] sm:$0xff]  ;;  %vm3978_vm6 = vcmp.eq.f32.partialorder %v15683_v54, %v12418_v52 }
 0x5ac   : > { %v4253_v23 = vmin.f32 %v12801_v8, %v4252_v30  ;;  %15680 = vst [vmem:[#allocation33_spill] sm:$0xff] %v12872_v5  ;;  %vm14305_vm8 = vcmp.eq.f32.partialorder %v15682_v9, %v12516_v26  ;;  %v12892_v29 = vsel %vm3976_vm10, inf, %v15674_v19  ;;  %vm5862_vm12 = vmpackc.low %vm3976_vm10, %vm3974_vm5  ;;  %v12915_v12 = vsel %vm3975_vm14, inf, %v15666_v28  ;;  %v15690_v19 = vld [vmem:[#allocation16_spill] sm:$0xff]  ;;  %v15692_v28 = vld [vmem:[#allocation34_spill] sm:$0xff] }
 0x5ad   : > { %5859 = vmatpush1.bf16.msk.msra.mxu0 %vm5858_vm2, %v14534_v51  ;;  %v4221_v8 = vmin.f32 %v12872_v5, %v4220_v11  ;;  %vm15684_vm2 = vcmp.eq.f32.partialorder %v15662_v40, %v12516_v26  ;;  %15686 = vst [vmem:[#allocation54_spill] sm:$0xff] %v12892_v29  ;;  %15688 = vst [vmem:[#allocation22_spill] sm:$0xff] %v12915_v12  ;;  %vm3983_vm5 = vcmp.eq.f32.partialorder %v15690_v19, %v12516_v26 }
 0x5ae   : > { %5861 = vmatprep.subr.msk.bf16.mxu0 %vm5860_vm13, %v14534_v51  ;;  %v4254_v30 = vmin.f32 %v12865_v59, %v4253_v23  ;;  %v12886_v31 = vsel %vm15684_vm2, inf, %v15662_v40  ;;  %vm5864_vm13 = vmpackc.low %vm14305_vm8, %vm3979_vm1  ;;  %v15687_v40 = vld [vmem:[#allocation27_spill] sm:$0xff]  ;;  %vm3982_vm14 = vcmp.eq.f32.partialorder %v15692_v28, %v12418_v52  ;;  %v15703_v24 = vmax.f32 %v11669_v13, %v12049_v32 }
 0x5af   : > { %15685 = vst [vmem:[#allocation44_spill] sm:$0xff] %v12886_v31  ;;  %v4222_v23 = vmin.f32 %v12892_v29, %v4221_v8  ;;  %vm3980_vm2 = vcmp.eq.f32.partialorder %v15687_v40, %v12418_v52  ;;  %v12922_v8 = vsel %vm3978_vm6, inf, %v15683_v54  ;;  %v15705_v13 = vmax.f32 %v11672_v42, %v12062_v25  ;;  %v15707_v25 = vld [vmem:[#allocation35_spill] sm:$0xff] }
 0x5b0   : > { %v4255_v11 = vmin.f32 %v12886_v31, %v4254_v30  ;;  %15689 = vst [vmem:[#allocation23_spill] sm:$0xff] %v12922_v8  ;;  %v15691_v30 = vld [vmem:[#allocation24_spill] sm:$0xff]  ;;  %v12939_v5 = vsel %vm3980_vm2, inf, %v15687_v40 }
 0x5b1   : > { %5863 = vmatpush1.bf16.msk.msra.mxu0 %vm5862_vm12, %v14534_v51  ;;  %vm3985_vm10 = vcmp.eq.f32.partialorder %v15691_v30, %v12516_v26  ;;  %v4223_v59 = vmin.f32 %v12922_v8, %v4222_v23  ;;  %vm15693_vm12 = vcmp.eq.f32.partialorder %v15667_v27, %v12516_v26  ;;  %15695 = vst [vmem:[#allocation38_spill] sm:$0xff] %v12939_v5  ;;  %v4864_v23 = vpop.f32.mrb[40].mxu0 }
 0x5b2   : > { %5865 = vmatprep.subr.msk.bf16.mxu0 %vm5864_vm13, %v14534_v51  ;;  %v4256_v31 = vmin.f32 %v12915_v12, %v4255_v11  ;;  %v12936_v29 = vsel %vm15693_vm12, inf, %v15667_v27  ;;  %vm5866_vm13 = vmpackc.low %vm3980_vm2, %vm3978_vm6  ;;  %v15696_v11 = vld [vmem:[#allocation45_spill] sm:$0xff]  ;;  %v5243_v12 = vld [vmem:[%s13647_s6 + $0x8] sm:$0xff]  ;;  %v12954_v27 = vsel %vm3979_vm1, inf, %v15681_v56 }
 0x5b3   : > { %15694 = vst [vmem:[#allocation32_spill] sm:$0xff] %v12936_v29  ;;  %vm3984_vm8 = vcmp.eq.f32.partialorder %v15696_v11, %v12418_v52  ;;  %v4224_v40 = vmin.f32 %v12939_v5, %v4223_v59  ;;  %vm5868_vm6 = vmpackc.low %vm3985_vm10, %vm3983_vm5  ;;  %5251 = vperm.xlu1 %6015, %v5243_v12   ;;  %v12974_v59 = vsel %vm3982_vm14, inf, %v15692_v28  ;;  %v15699_v56 = vld [vmem:[#allocation61_spill] sm:$0xff]  ;;  %v15700_v5 = vld [vmem:[#allocation15_spill] sm:$0xff] }
 0x5b4   : > { %v4257_v8 = vmin.f32 %v12936_v29, %v4256_v31  ;;  %v15697_v31 = vmax.f32 %v11661_v53, %v12020_v35  ;;  %v4866_v29 = vpop.f32.mrb[41].mxu0  ;;  %vm3987_vm1 = vcmp.eq.f32.partialorder %v15699_v56, %v12516_v26  ;;  %vm3989_vm2 = vcmp.eq.f32.partialorder %v15700_v5, %v12516_v26 }
 0x5b5   : > { %5867 = vmatpush1.bf16.msk.msra.mxu0 %vm5866_vm13, %v14534_v51  ;;  %v15701_v53 = vmax.f32 %v11664_v60, %v12038_v7  ;;  %v4868_v12 = vpop.f32.mrb[42].mxu0  ;;  %vm15704_vm13 = vcmp.eq.f32.partialorder %v15682_v9, %v12516_v26  ;;  %v13004_v7 = vsel %vm3984_vm8, inf, %v15696_v11 }
 0x5b6   : > { %v12967_v54 = vmax.f32 %v15697_v31, %v4864_v23  ;;  %5869 = vmatprep.subr.msk.bf16.mxu0 %vm5868_vm6, %v14534_v51  ;;  %v4258_v23 = vmin.f32 %v12954_v27, %v4257_v8  ;;  %v4225_v31 = vmin.f32 %v12974_v59, %v4224_v40  ;;  %v12992_v1 = vmax.f32 %v15703_v24, %v4868_v12  ;;  %v4870_v38 = vpop.f32.mrb[43].mxu0  ;;  %vm5870_vm6 = vmpackc.low %vm3984_vm8, %vm3982_vm14  ;;  %v15708_v8 = vld [vmem:[#allocation60_spill] sm:$0xff] }
 0x5b7   : > { %v12983_v35 = vmax.f32 %v15701_v53, %v4866_v29  ;;  %v12998_v60 = vsel %vm15704_vm13, inf, %v15682_v9  ;;  %v13015_v32 = vmax.f32 %v15705_v13, %v4870_v38  ;;  %vm5872_vm13 = vmpackc.low %vm3989_vm2, %vm3987_vm1  ;;  %v15706_v9 = vld [vmem:[#allocation6_spill] sm:$0xff]  ;;  %v13032_v38 = vsel %vm3983_vm5, inf, %v15690_v19  ;;  %v4874_v53 = vpop.f32.mrb[44].mxu0 }
 0x5b8   : > { %15698 = vst [vmem:[#allocation57_spill] sm:$0xff] %v12967_v54  ;;  %v15702_v54 = vld [vmem:[#allocation52_spill] sm:$0xff]  ;;  %v4259_v24 = vmin.f32 %v12998_v60, %v4258_v23  ;;  %v4226_v29 = vmin.f32 %v13004_v7, %v4225_v31  ;;  %vm3988_vm8 = vcmp.eq.f32.partialorder %v15706_v9, %v12418_v52  ;;  %vm3991_vm14 = vcmp.eq.f32.partialorder %v15707_v25, %v12516_v26 }
 0x5b9   : > { %vm3986_vm12 = vcmp.eq.f32.partialorder %v15702_v54, %v12418_v52  ;;  %5871 = vmatpush1.bf16.msk.msra.mxu0 %vm5870_vm6, %v14534_v51  ;;  %vm3993_vm6 = vcmp.eq.f32.partialorder %v15708_v8, %v12516_v26  ;;  %v13051_v19 = vsel %vm3985_vm10, inf, %v15691_v30  ;;  %v13054_v40 = vsel %vm3988_vm8, inf, %v15706_v9 }
 0x5ba   : > { %5873 = vmatprep.subr.msk.bf16.mxu0 %vm5872_vm13, %v14534_v51  ;;  %v13039_v42 = vsel %vm3986_vm12, inf, %v15702_v54  ;;  %v4260_v28 = vmin.f32 %v13032_v38, %v4259_v24  ;;  %vm5874_vm5 = vmpackc.low %vm3988_vm8, %vm3986_vm12  ;;  %v15709_v30 = vmax.f32 %v11674_v47, %v12130_v15  ;;  %v4876_v54 = vpop.f32.mrb[45].mxu0  ;;  %v13077_v13 = vsel %vm3987_vm1, inf, %v15699_v56 }
 0x5bb   : > { %v4227_v11 = vmin.f32 %v13039_v42, %v4226_v29  ;;  %vm5876_vm10 = vmpackc.low %vm3993_vm6, %vm3991_vm14  ;;  %v15710_v24 = vmax.f32 %v11679_v63, %v12140_v36  ;;  %v4878_v9 = vpop.f32.mrb[46].mxu0  ;;  %v15711_v15 = vmax.f32 %v11681_v46, %v12159_v50  ;;  %v13096_v56 = vsel %vm3989_vm2, inf, %v15700_v5 }
 0x5bc   : > { %v4261_v12 = vmin.f32 %v13051_v19, %v4260_v28  ;;  %v13071_v31 = vmax.f32 %v15709_v30, %v4874_v53  ;;  %v4880_v53 = vpop.f32.mrb[47].mxu0  ;;  %v15712_v63 = vmax.f32 %v11683_v4, %v12182_v55  ;;  %v13112_v46 = vsel %vm3991_vm14, inf, %v15707_v25 }
 0x5bd   : > { %v4228_v23 = vmin.f32 %v13054_v40, %v4227_v11  ;;  %5875 = vmatpush1.bf16.msk.msra.mxu0 %vm5874_vm5, %v14534_v51  ;;  %v13083_v29 = vmax.f32 %v15710_v24, %v4876_v54  ;;  %v13090_v11 = vmax.f32 %v15711_v15, %v4878_v9  ;;  %vm15713_vm1 = vcmp.eq.f32.partialorder %v11699_v21, %v12418_v52  ;;  %v15734_v15 = vld [vmem:[#allocation23_spill] sm:$0xff] }
 0x5be   : > { %5877 = vmatprep.subr.msk.bf16.mxu0 %vm5876_vm10, %v14534_v51  ;;  %v4262_v28 = vmin.f32 %v13077_v13, %v4261_v12  ;;  %v13101_v36 = vmax.f32 %v15712_v63, %v4880_v53  ;;  %v4138_v4 = vsel %vm15713_vm1, inf, %v11699_v21  ;;  %v13126_v18 = vsel %vm3993_vm6, inf, %v15708_v8  ;;  %v15737_v63 = vld [vmem:[#allocation38_spill] sm:$0xff] }
 0x5bf   : > { %v4229_v47 = vmin.f32 %v12835_v44, %v4228_v23  ;;  %v15735_v53 = vmov 0 }
 0x5c0   : > { %v4263_v12 = vmin.f32 %v13096_v56, %v4262_v28 }
 0x5c1   : > { %v4230_v23 = vmin.f32 %v12838_v33, %v4229_v47  ;;  %5879 = vmatpush1.bf16.msk.msra.mxu0 %vm12840_vm4, %v14534_v51  ;;  %vm15714_vm4 = vcmp.eq.f32.partialorder %v11702_v39, %v12418_v52  ;;  %v15733_v47 = vld [vmem:[#allocation54_spill] sm:$0xff] }
 0x5c2   : > { %5881 = vmatprep.subr.msk.bf16.mxu0 %vm12857_vm11, %v14534_v51  ;;  %v4264_v50 = vmin.f32 %v13112_v46, %v4263_v12  ;;  %v4140_v2 = vsel %vm15714_vm4, inf, %v11702_v39  ;;  %vm15715_vm11 = vcmp.eq.f32.partialorder %v15612_v57, %v12516_v26 }
 0x5c3   : > { %v4231_v55 = vmin.f32 %v4138_v4, %v4230_v23  ;;  %v4139_v39 = vsel %vm15715_vm11, inf, %v15612_v57  ;;  %v15738_v23 = vmov 0 }
 0x5c4   : > { %v4265_v5 = vmin.f32 %v13126_v18, %v4264_v50  ;;  %v15743_v50 = vld [vmem:[#allocation19_spill] sm:$0xff] }
 0x5c5   : > { %v4232_v25 = vmin.f32 %v4140_v2, %v4231_v55  ;;  %5883 = vmatpush1.bf16.msk.msra.mxu0 %vm12442_vm3, %v14534_v51  ;;  %vm15716_vm3 = vcmp.eq.f32.partialorder %v15615_v6, %v12516_v26  ;;  %v15744_v55 = vld [vmem:[#allocation13_spill] sm:$0xff] }
 0x5c6   : > { %5885 = vmatprep.subr.msk.bf16.mxu0 %vm12561_vm9, %v14534_v51  ;;  %v4266_v21 = vmin.f32 %v12852_v3, %v4265_v5  ;;  %v4141_v48 = vsel %vm15716_vm3, inf, %v15615_v6  ;;  %v15728_v6 = vld [vmem:[#allocation12_spill] sm:$0xff]  ;;  %v15748_v5 = vld [vmem:[#allocation42_spill] sm:$0xff] }
 0x5c7   : > { %v4233_v8 = vrot.slane %v4232_v25, 4 }
 0x5c8   : > { %v4267_v30 = vmin.f32 %v12855_v22, %v4266_v21  ;;  %v15750_v21 = vld [vmem:[#allocation47_spill] sm:$0xff] }
 0x5c9   : > { %v4234_v54 = vmin.f32 %v4232_v25, %v4233_v8  ;;  %5887 = vmatpush1.bf16.msk.msra.mxu0 %vm12458_vm0, %v14534_v51  ;;  %vm15717_vm0 = vnez %v15614_v14  ;;  %v15727_v14 = vld [vmem:[#allocation43_spill] sm:$0xff]  ;;  %v15749_v25 = vld [vmem:[#allocation14_spill] sm:$0xff]  ;;  %v15751_v8 = vld [vmem:[#allocation25_spill] sm:$0xff] }
 0x5ca   : > { %5889 = vmatprep.subr.msk.bf16.mxu0 %vm12577_vm15, %v14534_v51  ;;  %v4268_v52 = vmin.f32 %v4139_v39, %v4267_v30  ;;  %vm15718_vm15 = vnez %v15597_v0  ;;  %v15752_v30 = vld [vmem:[#allocation48_spill] sm:$0xff] }
 0x5cb   : > { %v4235_v10 = vrot.slane %v4234_v54, 2 }
 0x5cc   : > { %v4269_v24 = vmin.f32 %v4141_v48, %v4268_v52  ;;  %v15755_v52 = vld [vmem:[#allocation53_spill] sm:$0xff] }
 0x5cd   : > { %v4236_v9 = vmin.f32 %v4234_v54, %v4235_v10  ;;  %5891 = vmatpush1.bf16.msk.msra.mxu0 %vm12485_vm7, %v14534_v51  ;;  %v15753_v54 = vld [vmem:[#allocation49_spill] sm:$0xff]  ;;  %v15756_v10 = vld [vmem:[#allocation58_spill] sm:$0xff] }
 0x5ce   : > { %5893 = vmatprep.subr.msk.bf16.mxu0 %vm15717_vm0, %v14534_v51  ;;  %v4270_v17 = vrot.slane %v4269_v24, 4 }
 0x5cf   : > { %v4237_v49 = vrot.slane %v4236_v9, 1 }
 0x5d0   : > { %v4271_v57 = vmin.f32 %v4269_v24, %v4270_v17  ;;  %v15759_v24 = vld [vmem:[#allocation59_spill] sm:$0xff]  ;;  %v15761_v17 = vld [vmem:[#allocation22_spill] sm:$0xff] }
 0x5d1   : > { %v13161_v28 = vmin.f32 %v4236_v9, %v4237_v49  ;;  %5895 = vmatpush1.bf16.msk.msra.mxu0 %vm15718_vm15, %v14534_v51  ;;  %v15760_v9 = vld [vmem:[#allocation44_spill] sm:$0xff] }
 0x5d2   : > { %v4272_v26 = vrot.slane %v4271_v57, 2  ;;  %v15762_v49 = vld [vmem:[#allocation32_spill] sm:$0xff] }
 0x5d3   : > { %vm4276_vm9 = vcmp.eq.f32.partialorder %v4138_v4, %v13161_v28  ;;  %vm4278_vm2 = vcmp.eq.f32.partialorder %v4140_v2, %v13161_v28  ;;  %vm4280_vm7 = vcmp.eq.f32.partialorder %v12519_v45, %v13161_v28  ;;  %vm4282_vm13 = vcmp.eq.f32.partialorder %v12522_v20, %v13161_v28  ;;  %v15723_v20 = vld [vmem:[#allocation7_spill] sm:$0xff]  ;;  %v15832_v2 = vld [vmem:[#allocation64_spill] sm:$0xff] }
 0x5d4   : > { %vm13170_vm12 = vmpackc.low %vm4278_vm2, %vm4276_vm9  ;;  %vm4284_vm8 = vcmp.eq.f32.partialorder %v12533_v58, %v13161_v28  ;;  %vm4286_vm14 = vcmp.eq.f32.partialorder %v12536_v61, %v13161_v28  ;;  %vm4288_vm6 = vcmp.eq.f32.partialorder %v12672_v41, %v13161_v28  ;;  %5075 = vmatmul.mubr.bf16.vlgmr.msra.gmra.mrb[56].mxu0 %v15367_v34  ;;  %v4273_v0 = vmin.f32 %v4271_v57, %v4272_v26  ;;  %v15726_v61 = vld [vmem:[#allocation17_spill] sm:$0xff]  ;;  %v15729_v41 = vld [vmem:[#allocation28_spill] sm:$0xff] }
 0x5d5   : > { %vm13183_vm5 = vmpackc.low %vm4282_vm13, %vm4280_vm7  ;;  %vm4290_vm10 = vcmp.eq.f32.partialorder %v12740_v43, %v13161_v28  ;;  %vm4292_vm1 = vcmp.eq.f32.partialorder %v12753_v16, %v13161_v28  ;;  %vm4294_vm4 = vcmp.eq.f32.partialorder %v12760_v62, %v13161_v28  ;;  %5084 = vmatprep.mubr.bf16.mxu0 %v15723_v20  ;;  %vm4296_vm3 = vcmp.eq.f32.partialorder %v15726_v61, %v13161_v28  ;;  %v15732_v62 = vld [vmem:[#allocation33_spill] sm:$0xff] }
 0x5d6   : > { %vm13194_vm11 = vmpackc.low %vm4286_vm14, %vm4284_vm8  ;;  %vm4298_vm0 = vcmp.eq.f32.partialorder %v15727_v14, %v13161_v28  ;;  %vm4300_vm15 = vcmp.eq.f32.partialorder %v15728_v6, %v13161_v28  ;;  %v4274_v43 = vrot.slane %v4273_v0, 1  ;;  %vm4306_vm13 = vcmp.eq.f32.partialorder %v15733_v47, %v13161_v28  ;;  %v15824_v47 = vld [vmem:[#allocation10_spill] sm:$0xff] }
 0x5d7   : > { %vm13206_vm2 = vmpackc.low %vm4290_vm10, %vm4288_vm6  ;;  %vm15740_vm7 = vcmp.eq.f32.partialorder %v15729_v41, %v13161_v28  ;;  %v15741_v4 = vmov 0 }
 0x5d8   : > { %vm13216_vm14 = vmpackc.low %vm4294_vm4, %vm4292_vm1  ;;  %v13228_v12 = vmin.f32 %v4273_v0, %v4274_v43  ;;  %vm15745_vm4 = vcmp.eq.f32.partialorder %v15732_v62, %v13161_v28 }
 0x5d9   : > { %v15736_v53 = vsel %vm13216_vm14, 4294967295, %v15735_v53  ;;  %vm13233_vm1 = vmpackc.low %vm4298_vm0, %vm4296_vm3 }
 0x5da   : > { %v15739_v23 = vsel %vm13233_vm1, 4294967295, %v15738_v23  ;;  %vm13249_vm9 = vmpackc.low %vm15740_vm7, %vm4300_vm15  ;;  %vm4277_vm3 = vcmp.eq.f32.partialorder %v4139_v39, %v13228_v12  ;;  %vm4279_vm0 = vcmp.eq.f32.partialorder %v4141_v48, %v13228_v12  ;;  %vm4281_vm6 = vcmp.eq.f32.partialorder %v15743_v50, %v13228_v12  ;;  %v15754_v39 = vld [vmem:[#allocation51_spill] sm:$0xff]  ;;  %v15830_v50 = vld [vmem:[#allocation70_spill] sm:$0xff] }
 0x5db   : > { %v15742_v4 = vsel %vm13249_vm9, 4294967295, %v15741_v4  ;;  %vm4283_vm10 = vcmp.eq.f32.partialorder %v15744_v55, %v13228_v12  ;;  %vm13265_vm15 = vmpackc.low %vm4306_vm13, %vm15745_vm4  ;;  %vm4285_vm8 = vcmp.eq.f32.partialorder %v15748_v5, %v13228_v12  ;;  %vm4287_vm9 = vcmp.eq.f32.partialorder %v15749_v25, %v13228_v12  ;;  %v15831_v55 = vld [vmem:[#allocation71_spill] sm:$0xff]  ;;  %v15833_v5 = vld [vmem:[#allocation65_spill] sm:$0xff] }
 0x5dc   : > { %vm5896_vm7 = vmpackc.low %vm4279_vm0, %vm4277_vm3  ;;  %5085 = vmatmul.mubr.bf16.gmra.mrb[60].mxu0 %v15752_v30  ;;  %vm4293_vm4 = vcmp.eq.f32.partialorder %v15753_v54, %v13228_v12  ;;  %vm4295_vm3 = vcmp.eq.f32.partialorder %v15754_v39, %v13228_v12  ;;  %vm4297_vm0 = vcmp.eq.f32.partialorder %v15755_v52, %v13228_v12 }
 0x5dd   : > { %5897 = vmatprep.subr.msk.bf16.mxu1 %vm5896_vm7, %v14534_v51  ;;  %vm5900_vm13 = vmpackc.low %vm4283_vm10, %vm4281_vm6  ;;  %vm4301_vm6 = vcmp.eq.f32.partialorder %v15759_v24, %v13228_v12  ;;  %vm4309_vm10 = vcmp.eq.f32.partialorder %v12954_v27, %v13228_v12  ;;  %5295 = vmatprep.mubr.bf16.mxu0 %v15769_v37  ;;  %vm15784_vm7 = vcmp.eq.f32.partialorder %v15737_v63, %v13161_v28  ;;  %v15789_v27 = vmov 0  ;;  %v15827_v63 = vld [vmem:[#allocation69_spill] sm:$0xff] }
 0x5de   : > { %5899 = vmatpush1.bf16.msk.msra.mxu1 %vm13170_vm12, %v14534_v51  ;;  %vm13290_vm14 = vmpackc.low %vm4287_vm9, %vm4285_vm8  ;;  %vm15763_vm12 = vcmp.eq.f32.partialorder %v15750_v21, %v13228_v12  ;;  %vm15764_vm9 = vcmp.eq.f32.partialorder %v15751_v8, %v13228_v12 }
 0x5df   : > { %5901 = vmatprep.subr.msk.bf16.mxu1 %vm5900_vm13, %v14534_v51  ;;  %vm13309_vm8 = vmpackc.low %vm15764_vm9, %vm15763_vm12  ;;  %vm4317_vm9 = vcmp.eq.f32.partialorder %v13077_v13, %v13228_v12  ;;  %vm15773_vm13 = vcmp.eq.f32.partialorder %v15760_v9, %v13228_v12 }
 0x5e0   : > { %vm13327_vm12 = vmpackc.low %vm4295_vm3, %vm4293_vm4  ;;  %vm15770_vm4 = vcmp.eq.f32.partialorder %v15756_v10, %v13228_v12 }
 0x5e1   : > { %vm13346_vm3 = vmpackc.low %vm15770_vm4, %vm4297_vm0  ;;  %vm15776_vm4 = vcmp.eq.f32.partialorder %v15761_v17, %v13228_v12 }
 0x5e2   : > { %5903 = vmatpush1.bf16.msk.msra.mxu1 %vm13183_vm5, %v14534_v51  ;;  %vm13363_vm0 = vmpackc.low %vm15773_vm13, %vm4301_vm6  ;;  %vm15777_vm5 = vcmp.eq.f32.partialorder %v15762_v49, %v13228_v12  ;;  %vm15780_vm6 = vcmp.eq.f32.partialorder %v12998_v60, %v13228_v12 }
 0x5e3   : > { %5905 = vmatprep.subr.msk.bf16.mxu1 %vm13290_vm14, %v14534_v51  ;;  %vm13376_vm1 = vmpackc.low %vm15777_vm5, %vm15776_vm4  ;;  %vm15783_vm14 = vcmp.eq.f32.partialorder %v15734_v15, %v13161_v28  ;;  %vm15788_vm5 = vcmp.eq.f32.partialorder %v13051_v19, %v13228_v12  ;;  %v15825_v15 = vld [vmem:[#allocation56_spill] sm:$0xff] }
 0x5e4   : > { %vm13386_vm13 = vmpackc.low %vm15780_vm6, %vm4309_vm10  ;;  %vm15787_vm10 = vcmp.eq.f32.partialorder %v13032_v38, %v13228_v12 }
 0x5e5   : > { %vm13396_vm4 = vmpackc.low %vm15784_vm7, %vm15783_vm14  ;;  %vm15791_vm7 = vcmp.eq.f32.partialorder %v12974_v59, %v13161_v28 }
 0x5e6   : > { %5907 = vmatpush1.bf16.msk.msra.mxu1 %vm13194_vm11, %v14534_v51  ;;  %vm13409_vm6 = vmpackc.low %vm15788_vm5, %vm15787_vm10  ;;  %vm15792_vm11 = vcmp.eq.f32.partialorder %v13004_v7, %v13161_v28  ;;  %vm15795_vm10 = vcmp.eq.f32.partialorder %v13096_v56, %v13228_v12  ;;  %v15804_v7 = vmov 0 }
 0x5e7   : > { %v15790_v27 = vsel %vm13409_vm6, 4294967295, %v15789_v27  ;;  %5909 = vmatprep.subr.msk.bf16.mxu1 %vm13309_vm8, %v14534_v51  ;;  %vm13422_vm14 = vmpackc.low %vm15792_vm11, %vm15791_vm7  ;;  %vm15798_vm8 = vcmp.eq.f32.partialorder %v13039_v42, %v13161_v28  ;;  %vm15799_vm6 = vcmp.eq.f32.partialorder %v13054_v40, %v13161_v28  ;;  %vm15803_vm11 = vcmp.eq.f32.partialorder %v13126_v18, %v13228_v12 }
 0x5e8   : > { %vm13432_vm5 = vmpackc.low %vm15795_vm10, %vm4317_vm9  ;;  %vm15802_vm9 = vcmp.eq.f32.partialorder %v13112_v46, %v13228_v12 }
 0x5e9   : > { %vm13442_vm7 = vmpackc.low %vm15799_vm6, %vm15798_vm8  ;;  %vm15806_vm6 = vcmp.eq.f32.partialorder %v12835_v44, %v13161_v28 }
 0x5ea   : > { %5911 = vmatpush1.bf16.msk.msra.mxu1 %vm13206_vm2, %v14534_v51  ;;  %vm13455_vm10 = vmpackc.low %vm15803_vm11, %vm15802_vm9  ;;  %vm15807_vm2 = vcmp.eq.f32.partialorder %v12838_v33, %v13161_v28  ;;  %vm15810_vm9 = vcmp.eq.f32.partialorder %v12852_v3, %v13228_v12  ;;  %vm15811_vm11 = vcmp.eq.f32.partialorder %v12855_v22, %v13228_v12  ;;  %v4917_v44 = vpop.f32.mrb[60].mxu1  ;;  %v15817_v33 = vld [vmem:[#allocation57_spill] sm:$0xff] }
 0x5eb   : > { %v15805_v7 = vsel %vm13455_vm10, 4294967295, %v15804_v7  ;;  %5913 = vmatprep.subr.msk.bf16.mxu1 %vm13327_vm12, %v14534_v51  ;;  %vm13468_vm8 = vmpackc.low %vm15807_vm2, %vm15806_vm6  ;;  %vm15814_vm12 = vnez %v15736_v53  ;;  %vm15815_vm6 = vnez %v15739_v23  ;;  %vm15816_vm2 = vnez %v15742_v4  ;;  %v4919_v22 = vpop.f32.mrb[61].mxu1  ;;  %v15826_v53 = vld [vmem:[#allocation68_spill] sm:$0xff]  ;;  %v15828_v23 = vld [vmem:[#allocation18_spill] sm:$0xff] }
 0x5ec   : > { %vm13478_vm10 = vmpackc.low %vm15811_vm11, %vm15810_vm9  ;;  %v5180_v3 = vmax.f32 %v15817_v33, %v4917_v44  ;;  %v5181_v40 = vmax.f32 %v12983_v35, %v4919_v22  ;;  %v4921_v13 = vpop.f32.mrb[62].mxu1  ;;  %vm4335_vm9 = vcmp.eq.f32.partialorder %v15827_v63, %v13228_v12  ;;  %v15829_v4 = vld [vmem:[#allocation63_spill] sm:$0xff] }
 0x5ed   : > { %v5182_v56 = vmax.f32 %v12992_v1, %v4921_v13  ;;  %v4923_v46 = vpop.f32.mrb[63].mxu1 }
 0x5ee   : > { %5915 = vmatpush1.bf16.msk.msra.mxu1 %vm15814_vm12, %v14534_v51  ;;  %v5183_v18 = vmax.f32 %v13015_v32, %v4923_v46 }
 0x5ef   : > { %5917 = vmatprep.subr.msk.bf16.mxu1 %vm13346_vm3, %v14534_v51 }
 0x5f2   : > { %5919 = vmatpush1.bf16.msk.msra.mxu1 %vm15815_vm6, %v14534_v51  ;;  %vm4332_vm6 = vcmp.eq.f32.partialorder %v15828_v23, %v13161_v28 }
 0x5f3   : > { %5921 = vmatprep.subr.msk.bf16.mxu1 %vm13363_vm0, %v14534_v51 }
 0x5f4   : > { %v4927_v58 = vpop.f32.mrb[64].mxu1 }
 0x5f5   : > { %v5184_v1 = vmax.f32 %v13071_v31, %v4927_v58  ;;  %v4929_v35 = vpop.f32.mrb[65].mxu1  ;;  %v15820_v31 = vld [vmem:[#allocation46_spill] sm:$0xff] }
 0x5f6   : > { %5923 = vmatpush1.bf16.msk.msra.mxu1 %vm15816_vm2, %v14534_v51  ;;  %v5185_v41 = vmax.f32 %v13083_v29, %v4929_v35  ;;  %v4931_v43 = vpop.f32.mrb[66].mxu1  ;;  %vm4324_vm3 = vcmp.eq.f32.partialorder %v15820_v31, %v13161_v28  ;;  %v15821_v29 = vld [vmem:[#allocation8_spill] sm:$0xff]  ;;  %vm4334_vm2 = vcmp.eq.f32.partialorder %v15829_v4, %v13161_v28 }
 0x5f7   : > { %5925 = vmatprep.subr.msk.bf16.mxu1 %vm13376_vm1, %v14534_v51  ;;  %vm15818_vm1 = vnez %v15790_v27  ;;  %v5186_v32 = vmax.f32 %v13090_v11, %v4931_v43  ;;  %v4933_v16 = vpop.f32.mrb[67].mxu1  ;;  %vm4326_vm0 = vcmp.eq.f32.partialorder %v15821_v29, %v13161_v28  ;;  %v15822_v11 = vld [vmem:[#allocation66_spill] sm:$0xff]  ;;  %v15834_v29 = vld [vmem:[#allocation20_spill] sm:$0xff] }
 0x5f8   : > { %v5187_v62 = vmax.f32 %v13101_v36, %v4933_v16  ;;  %v15823_v36 = vld [vmem:[#allocation67_spill] sm:$0xff]  ;;  %v1420_v16 = vpop.permute.xlu1 %1419 }
 0x5fa   : > { %5927 = vmatpush1.bf16.msk.msra.mxu1 %vm13265_vm15, %v14534_v51  ;;  %vm15819_vm15 = vnez %v15805_v7 }
 0x5fb   : > { %5929 = vmatprep.subr.msk.bf16.mxu1 %vm13386_vm13, %v14534_v51  ;;  %vm4329_vm13 = vcmp.eq.f32.partialorder %v15822_v11, %v13228_v12 }
 0x5fc   : > { %v1425_v63 = vpop.permute.xlu1 %1424 }
 0x5fe   : > { %5931 = vmatpush1.bf16.msk.msra.mxu1 %vm13396_vm4, %v14534_v51  ;;  %vm4331_vm4 = vcmp.eq.f32.partialorder %v15823_v36, %v13228_v12 }
 0x5ff   : > { %5933 = vmatprep.subr.msk.bf16.mxu1 %vm15818_vm1, %v14534_v51  ;;  %vm4337_vm1 = vcmp.eq.f32.partialorder %v15830_v50, %v13228_v12  ;;  %v15836_v50 = vld [vmem:[#allocation29_spill] sm:$0xff] }
 0x602   : > { %5935 = vmatpush1.bf16.msk.msra.mxu1 %vm13422_vm14, %v14534_v51  ;;  %vm5946_vm14 = vmpackc.low %vm4326_vm0, %vm4324_vm3 }
 0x603   : > { %5937 = vmatprep.subr.msk.bf16.mxu1 %vm13432_vm5, %v14534_v51  ;;  %vm5948_vm5 = vmpackc.low %vm4331_vm4, %vm4329_vm13  ;;  %vm4336_vm13 = vcmp.eq.f32.partialorder %v15832_v2, %v13161_v28  ;;  %vm4338_vm4 = vcmp.eq.f32.partialorder %v15833_v5, %v13161_v28 }
 0x604   : > { %vm5954_vm3 = vmpackc.low %vm4334_vm2, %vm4332_vm6 }
 0x606   : > { %5939 = vmatpush1.bf16.msk.msra.mxu1 %vm13442_vm7, %v14534_v51  ;;  %vm4328_vm7 = vcmp.eq.f32.partialorder %v15824_v47, %v13161_v28 }
 0x607   : > { %5941 = vmatprep.subr.msk.bf16.mxu1 %vm15819_vm15, %v14534_v51  ;;  %vm4339_vm15 = vcmp.eq.f32.partialorder %v15831_v55, %v13228_v12  ;;  %v1434_v55 = vadd.f32 %v1420_v16, %v15836_v50 }
 0x608   : > { %vm5956_vm0 = vmpackc.low %vm4339_vm15, %vm4337_vm1 }
 0x60a   : > { %5943 = vmatpush1.bf16.msk.msra.mxu1 %vm13468_vm8, %v14534_v51  ;;  %vm4330_vm8 = vcmp.eq.f32.partialorder %v15825_v15, %v13161_v28  ;;  %v15835_v15 = vld [vmem:[#allocation21_spill] sm:$0xff] }
 0x60b   : > { %5945 = vmatprep.subr.msk.bf16.mxu1 %vm13478_vm10, %v14534_v51  ;;  %vm4333_vm10 = vcmp.eq.f32.partialorder %v15826_v53, %v13228_v12  ;;  %vm5950_vm11 = vmpackc.low %vm4330_vm8, %vm4328_vm7 }
 0x60c   : > { %vm5952_vm12 = vmpackc.low %vm4335_vm9, %vm4333_vm10 }
 0x60e   : > { %5947 = vmatpush1.bf16.msk.msra.mxu1 %vm5946_vm14, %v14534_v51  ;;  %vm5958_vm14 = vmpackc.low %vm4338_vm4, %vm4336_vm13 }
 0x60f   : > { %5949 = vmatprep.subr.msk.bf16.mxu1 %vm5948_vm5, %v14534_v51  ;;  %vm5259_vm5 = vcmask 261120  }
 0x612   : > { %5951 = vmatpush1.bf16.msk.msra.mxu1 %vm5950_vm11, %v14534_v51 }
 0x613   : > { %5953 = vmatprep.subr.msk.bf16.mxu1 %vm5952_vm12, %v14534_v51 }
 0x616   : > { %5955 = vmatpush1.bf16.msk.msra.mxu1 %vm5954_vm3, %v14534_v51 }
 0x617   : > { %5957 = vmatprep.subr.msk.bf16.mxu1 %vm5956_vm0, %v14534_v51 }
 0x61a   : > { %5959 = vmatpush1.bf16.msk.msra.mxu1 %vm5958_vm14, %v14534_v51 }
 0x61d   : > { %5128 = vmatmul.mubr.bf16.vlgmr.msra.gmra.mrb[76].mxu1 %v15367_v34 }
 0x61e   : > { %5137 = vmatprep.mubr.bf16.mxu1 %v15723_v20 }
 0x623   : > { %v4970_v12 = vpop.f32.mrb[48].mxu0 }
 0x624   : > { %v5188_v25 = vmax.f32 %v5180_v3, %v4970_v12  ;;  %v4972_v21 = vpop.f32.mrb[49].mxu0 }
 0x625   : > { %5138 = vmatmul.mubr.bf16.gmra.mrb[80].mxu1 %v15752_v30  ;;  %v5189_v8 = vmax.f32 %v5181_v40, %v4972_v21  ;;  %v4974_v54 = vpop.f32.mrb[50].mxu0 }
 0x626   : > { %v5190_v39 = vmax.f32 %v5182_v56, %v4974_v54  ;;  %v4976_v52 = vpop.f32.mrb[51].mxu0 }
 0x627   : > { %v5191_v10 = vmax.f32 %v5183_v18, %v4976_v52 }
 0x62b   : > { %v4980_v28 = vpop.f32.mrb[52].mxu0 }
 0x62c   : > { %v5192_v48 = vmax.f32 %v5184_v1, %v4980_v28  ;;  %v4982_v24 = vpop.f32.mrb[53].mxu0 }
 0x62d   : > { %v5193_v9 = vmax.f32 %v5185_v41, %v4982_v24  ;;  %v4984_v17 = vpop.f32.mrb[54].mxu0 }
 0x62e   : > { %v5194_v51 = vmax.f32 %v5186_v32, %v4984_v17  ;;  %v4986_v49 = vpop.f32.mrb[55].mxu0 }
 0x62f   : > { %v5195_v34 = vmax.f32 %v5187_v62, %v4986_v49  ;;  %v1415_v62 = vpop.permute.xlu0 %1414 }
 0x630   : > { %v1432_v11 = vadd.f32 %v1415_v62, %v15834_v29  ;;  %v1433_v53 = vadd.f32 %v1415_v62, %v15835_v15  ;;  %v6027_v15 = vld [vmem:[%s6201_s21 + $0x10] sm:$0xff] }
 0x65a   : > { %v5023_v57 = vpop.f32.mrb[68].mxu1 }
 0x65b   : > { %v5196_v20 = vmax.f32 %v5188_v25, %v5023_v57  ;;  %v5025_v26 = vpop.f32.mrb[69].mxu1  ;;  %v15837_v25 = vld [vmem:[#allocation37_spill] sm:$0xff] }
 0x65c   : > { %v5197_v30 = vmax.f32 %v5189_v8, %v5025_v26  ;;  %v5027_v37 = vpop.f32.mrb[70].mxu1  ;;  %v1435_v21 = vadd.f32 %v1420_v16, %v15837_v25  ;;  %v15839_v26 = vld [vmem:[#allocation39_spill] sm:$0xff]  ;;  %v6025_v16 = vld [vmem:[%s6201_s21] sm:$0xff] }
 0x65d   : > { %v5198_v0 = vmax.f32 %v5190_v39, %v5027_v37  ;;  %v5029_v61 = vpop.f32.mrb[71].mxu1 }
 0x65e   : > { %v5199_v45 = vmax.f32 %v5191_v10, %v5029_v61 }
 0x666   : > { %v5033_v14 = vpop.f32.mrb[72].mxu1 }
 0x667   : > { %v5200_v6 = vmax.f32 %v5192_v48, %v5033_v14  ;;  %v5035_v27 = vpop.f32.mrb[73].mxu1  ;;  %v1430_v48 = vpop.permute.xlu1 %1429 }
 0x668   : > { %v5201_v60 = vmax.f32 %v5193_v9, %v5035_v27  ;;  %v5037_v38 = vpop.f32.mrb[74].mxu1 }
 0x669   : > { %v5202_v59 = vmax.f32 %v5194_v51, %v5037_v38  ;;  %v5039_v7 = vpop.f32.mrb[75].mxu1  ;;  %v15838_v51 = vld [vmem:[#allocation30_spill] sm:$0xff]  ;;  %v15841_v38 = vld [vmem:[#allocation31_spill] sm:$0xff] }
 0x66a   : > { %v5203_v42 = vmax.f32 %v5195_v34, %v5039_v7  ;;  %v1436_v49 = vadd.f32 %v1425_v63, %v15838_v51 }
 0x6a7   : > { %v5076_v19 = vpop.f32.mrb[56].mxu0 }
 0x6a8   : > { %v5204_v44 = vmax.f32 %v5196_v20, %v5076_v19  ;;  %v5078_v33 = vpop.f32.mrb[57].mxu0 }
 0x6a9   : > { %v5205_v3 = vmax.f32 %v5197_v30, %v5078_v33  ;;  %v5080_v22 = vpop.f32.mrb[58].mxu0  ;;  %v1437_v30 = vadd.f32 %v1425_v63, %v15839_v26  ;;  %v6028_v63 = vld [vmem:[%s6201_s21 + $0x18] sm:$0xff] }
 0x6aa   : > { %v5206_v40 = vmax.f32 %v5198_v0, %v5080_v22  ;;  %v5082_v13 = vpop.f32.mrb[59].mxu0 }
 0x6ab   : > { %v5207_v56 = vmax.f32 %v5199_v45, %v5082_v13  ;;  %v15840_v45 = vld [vmem:[#allocation40_spill] sm:$0xff] }
 0x6ac   : > { %v1438_v14 = vadd.f32 %v1430_v48, %v15840_v45 }
 0x6af   : > { %v5086_v46 = vpop.f32.mrb[60].mxu0 }
 0x6b0   : > { %v5208_v18 = vmax.f32 %v5200_v6, %v5086_v46  ;;  %v5088_v58 = vpop.f32.mrb[61].mxu0  ;;  %v6020_v46 = vld [vmem:[%s13646_s5] sm:$0xff]  }
 0x6b1   : > { %v5209_v1 = vmax.f32 %v5201_v60, %v5088_v58  ;;  %v5090_v35 = vpop.f32.mrb[62].mxu0 }
 0x6b2   : > { %v5210_v41 = vmax.f32 %v5202_v59, %v5090_v35  ;;  %v5092_v43 = vpop.f32.mrb[63].mxu0  ;;  %v1439_v59 = vadd.f32 %v1430_v48, %v15841_v38 }
 0x6b3   : > { %v5211_v32 = vmax.f32 %v5203_v42, %v5092_v43 }
 0x6f0   : > { %v5129_v31 = vpop.f32.mrb[76].mxu1 }
 0x6f1   : > { %v5212_v36 = vmax.f32 %v5204_v44, %v5129_v31  ;;  %v5131_v47 = vpop.f32.mrb[77].mxu1 }
 0x6f2   : > { %v5213_v23 = vmax.f32 %v5205_v3, %v5131_v47  ;;  %v5133_v4 = vpop.f32.mrb[78].mxu1 }
 0x6f3   : > { %v5220_v2 = vadd.f32 %v5212_v36, %v1432_v11  ;;  %v5214_v5 = vmax.f32 %v5206_v40, %v5133_v4  ;;  %v5135_v12 = vpop.f32.mrb[79].mxu1  ;;  %v6026_v11 = vld [vmem:[%s6201_s21 + $0x8] sm:$0xff] }
 0x6f4   : > { %v5221_v8 = vadd.f32 %v5213_v23, %v1433_v53  ;;  %v5215_v54 = vmax.f32 %v5207_v56, %v5135_v12 }
 0x6f5   : > { %v5222_v39 = vadd.f32 %v5214_v5, %v1434_v55  ;;  %v5228_v10 = vmax.f32 %v5220_v2, 0.0 }
 0x6f6   : > { %v5223_v52 = vadd.f32 %v5215_v54, %v1435_v21  ;;  %v5229_v24 = vmax.f32 %v5221_v8, 0.0 }
 0x6f7   : > { %v5230_v28 = vmax.f32 %v5222_v39, 0.0 }
 0x6f8   : > { %v5231_v9 = vmax.f32 %v5223_v52, 0.0  ;;  %v5139_v17 = vpop.f32.mrb[80].mxu1 }
 0x6f9   : > { %v5236_v34 = vpack.c.bf16 %v5230_v28, %v5228_v10  ;;  %v5216_v57 = vmax.f32 %v5208_v18, %v5139_v17  ;;  %v5141_v20 = vpop.f32.mrb[81].mxu1  ;;  %v5247_v18 = vpop.permute.xlu0 %5246 }
 0x6fa   : > { %v5217_v37 = vmax.f32 %v5209_v1, %v5141_v20  ;;  %v5143_v0 = vpop.f32.mrb[82].mxu1  ;;  %v5237_v61 = vpack.c.bf16 %v5231_v9, %v5229_v24 }
 0x6fb   : > { %v5224_v6 = vadd.f32 %v5216_v57, %v1436_v49  ;;  %v5218_v27 = vmax.f32 %v5210_v41, %v5143_v0  ;;  %v5145_v60 = vpop.f32.mrb[83].mxu1  ;;  %v5252_v41 = vpop.permute.xlu1 %5251 }
 0x6fc   : > { %v5225_v7 = vadd.f32 %v5217_v37, %v1437_v30  ;;  %v5219_v42 = vmax.f32 %v5211_v32, %v5145_v60  ;;  %5263 = vmatprep.subr.bf16.mxu0 %v5237_v61 }
 0x6fd   : > { %v5226_v19 = vadd.f32 %v5218_v27, %v1438_v14  ;;  %5264 = vmatpush1.bf16.msra.mxu0 %v5236_v34  ;;  %v5232_v33 = vmax.f32 %v5224_v6, 0.0 }
 0x6fe   : > { %v5227_v44 = vadd.f32 %v5219_v42, %v1439_v59  ;;  %v5233_v22 = vmax.f32 %v5225_v7, 0.0 }
 0x6ff   : > { %v5234_v3 = vmax.f32 %v5226_v19, 0.0 }
 0x700   : > { %v5235_v40 = vmax.f32 %v5227_v44, 0.0 }
 0x701   : > { %v5238_v13 = vpack.c.bf16 %v5234_v3, %v5232_v33 }
 0x702   : > { %v5239_v56 = vpack.c.bf16 %v5235_v40, %v5233_v22 }
 0x704   : > { %5265 = vmatprep.subr.bf16.mxu0 %v5239_v56 }
 0x705   : > { %5266 = vmatpush1.bf16.msra.mxu0 %v5238_v13 }
 0x708   : > { %5440 = vmatmul.mubr.msk.bf16.vlgmr.msra.gmra.mrb[64].mxu0 %vm5259_vm5, %v6020_v46 }
 0x7db   : > { %v5297_v58 = vpop.f32.mrb[64].mxu0 }
 0x7dc   : > { %v5298_v1 = vadd.f32 %v5297_v58, %v5247_v18  ;;  %v5299_v35 = vpop.f32.mrb[65].mxu0 }
 0x7dd   : > { %v5300_v43 = vadd.f32 %v5299_v35, %v5247_v18  ;;  %v5301_v32 = vpop.f32.mrb[66].mxu0 }
 0x7de   : > { %v5306_v62 = vadd.f32 %v6025_v16, %v5298_v1  ;;  %v5302_v31 = vadd.f32 %v5301_v32, %v5252_v41  ;;  %v5303_v29 = vpop.f32.mrb[67].mxu0 }
 0x7df   : > { %v5307_v36 = vadd.f32 %v6026_v11, %v5300_v43  ;;  %v5304_v47 = vadd.f32 %v5303_v29, %v5252_v41 }
 0x7e0   : > { %5310 = vst [vmem:[%s271_s29] sm:$0xff] %v5306_v62  ;;  %v5308_v53 = vadd.f32 %v6027_v15, %v5302_v31 }
 0x7e1   : > { %5311 = vst [vmem:[%s271_s29 + $0x8] sm:$0xff] %v5307_v36  ;;  %v5309_v23 = vadd.f32 %v6028_v63, %v5304_v47 }
 0x7e2   : > { %5312 = vst [vmem:[%s271_s29 + $0x10] sm:$0xff] %v5308_v53 }
 0x7e3   : > { %5313 = vst [vmem:[%s271_s29 + $0x18] sm:$0xff] %v5309_v23 }
 0x7e4   : > { %6042 = shalt.err (!%p6039_p3)
}
 0x7e5   : > { %s6043_s21 = scalar_lea.hbm %s13598_s15, 512  ;;  %s6047_s23 = scalar_lea.hbm %s13648_s7, 1024 }
 0x7e6   : > { %p6044_p4 = scmp.ne.s32.totalorder %s13598_s15, %s6043_s21  ;;  %p6048_p9 = scmp.lt.u32.totalorder %s13598_s15, %s13648_s7 }
 0x7e7   : > { %p6049_p10 = scmp.lt.u32.totalorder %s6047_s23, %s6043_s21  ;;  %p6051_p12 = scmp.lt.u32.totalorder %s6043_s21, %s13598_s15 }
 0x7e8   : > { %p6045_p7 = pnand %p6044_p4, %p6177_p5 }
 0x7e9   : > { %p6050_p11 = por %p6049_p10, %p6048_p9 }
 0x7ea   : > { %p6046_p8 = pneg %p6045_p7 }
 0x7eb   : > { %p6052_p13 = por %p6051_p12, %p6050_p11 }
 0x7ed   : > { %p6053_p0 = pnand %p6052_p13, %p6046_p8 }
 0x7ef   : > { %6056 = shalt.err (!%p6053_p0)
}
 0x7f0   : > { %s6097_s13 = smov 256   ;;  %s6098_s14 = smov 16  }
 0x7f1   : > { %5970 = dma.vmem_to_hbm [thread:$0]  (%p6177_p5), %s13591_s8, 512, %s13598_s15, %s13600_s28, %s6097_s13, %s6097_s13, %s6098_s14  }
 0x7f2 PF: > { %p5976_p1 = scmp.ge.s32.totalorder %s6091_s27, 2  ;;  %s5343_s16 = sand.u32 1, %s6079_s24  }
 0x7f3   : > { %s5344_s17 = scalar_lea.sflag [#allocation4], %s5343_s16 }
 0x7f4   : > { %p5973_p2 = pnand %p5976_p1, %p6181_p6 }
 0x7f6   : > { %6074 = dma.done.wait (!%p5973_p2), %s5344_s17, 512  }
 0x7f7   : > { %6076 = vsyncadd (!%p5973_p2), %s5344_s17, 4294966784  ;;  %p17_p3 = scmp.ge.s32.totalorder %s6164_s30, 4   ;;  %s15842_s24 = smov %s6083_s25 }
 0x7f8   : > { %s15843_s25 = smov %s6087_s26  ;;  %s15844_s26 = smov %s6175_s10 }
 0x7f9   : > { %s15845_s27 = smov %s6164_s30  ;;  %19 = sbr.rel (!%p17_p3) target bundleno = 3 (0x3), region = 83 }
 0x800   :  { %5349 = vsyncpa [#allocation4], 1 }
 0x801   :  { %5351 = vsyncpa [#allocation4 + $0x1], 1 }

</bundles_post_ra>
